<compile_context>
chip_gen: v7x
topology: tpu7x:2x2x1
jax: 0.10.0
libtpu: 0.0.40
codegen_flags: <defaults>
</compile_context>

<pallas_src>
import functools
import math

import jax
import jax.numpy as jnp
from jax.experimental import pallas as pl
from jax.experimental.pallas import tpu as pltpu

DIM = 256             # hard-coded in TSM (Block(dim=256, num_heads=8))
NUM_HEADS = 8
HEAD_DIM = DIM // NUM_HEADS
MLP_HIDDEN = DIM * 4  # mlp_ratio = 4.0
NUM_BLOCKS = 8
EPS = 1e-5            # PyTorch nn.LayerNorm default


def _layernorm(x, w, b):
    mu = jnp.mean(x, axis=-1, keepdims=True)
    xc = x - mu
    var = jnp.mean(xc * xc, axis=-1, keepdims=True)
    return xc * jax.lax.rsqrt(var + EPS) * w + b


def _gelu_tanh(x):
    # tanh-approx GELU (|abs err| < ~1e-3 vs. exact-erf nn.GELU); single EUP
    # tanh per element instead of the previous ~10-VALU-op erf polynomial.
    c = 0.7978845608028654  # sqrt(2/pi)
    return 0.5 * x * (1.0 + jnp.tanh(c * (x + 0.044715 * (x * x * x))))


def _bdot(a, b, contract_a, contract_b):
    """Head-batched matmul: batch dim 0 on both operands, f32 accumulation."""
    return jax.lax.dot_general(
        a, b, (((contract_a,), (contract_b,)), ((0,), (0,))),
        preferred_element_type=jnp.float32)


def tsm_block_kernel(x_ref, n1w_ref, n1b_ref, qw_ref, kw_ref, vw_ref,
                     projw_ref, projb_ref, n2w_ref, n2b_ref,
                     fc1w_ref, fc1b_ref, fc2w_ref, fc2b_ref,
                     out_ref, *, t_len, num_heads, head_dim):
    """One transformer Block for one batch element; grid = (batch, block).

    The output block (same index for every block step) acts as the resident
    activation accumulator across the block axis.
    """
    l = pl.program_id(1)

    @pl.when(l == 0)
    def _():
        out_ref[...] = x_ref[...]          # load initial activations once per b

    x = out_ref[0]                         # (N, C) f32, running activations
    N, C = x.shape
    scale = float(head_dim) ** -0.5

    # ---------------- attention branch ----------------
    y = _layernorm(x, n1w_ref[0], n1b_ref[0])                       # (N, C) f32
    yb = jnp.broadcast_to(y.astype(jnp.bfloat16)[None], (num_heads, N, C))

    q = _bdot(yb, qw_ref[0], 2, 1)                                  # (H, N, hd)
    k = _bdot(yb, kw_ref[0], 2, 1)                                  # (H, N, hd)
    v = _bdot(yb, vw_ref[0], 2, 1)                                  # (H, N, hd)

    # Full (H, N, N) scores; template rows must not attend to search columns.
    # TODO(synk): for large H*W (N >~ 1200) switch to flash-style tiling over
    # query rows so the (H, N, N) scores stay within VMEM.
    scores = _bdot(q.astype(jnp.bfloat16), k.astype(jnp.bfloat16), 2, 2) * scale
    row = jax.lax.broadcasted_iota(jnp.int32, (N, N), 0)
    col = jax.lax.broadcasted_iota(jnp.int32, (N, N), 1)
    mask = jnp.where((row < t_len) & (col >= t_len), -1e30, 0.0).astype(jnp.float32)
    scores = scores + mask[None]

    m = jnp.max(scores, axis=-1, keepdims=True)
    e = jnp.exp(scores - m)
    s = jnp.sum(e, axis=-1, keepdims=True)
    probs = e * pl.reciprocal(s, approx=True)                       # (H, N, N)

    o = _bdot(probs.astype(jnp.bfloat16), v.astype(jnp.bfloat16), 2, 1)  # (H, N, hd)
    proj_h = _bdot(o.astype(jnp.bfloat16), projw_ref[0], 2, 1)           # (H, N, C)
    x1 = x + jnp.sum(proj_h, axis=0) + projb_ref[0]                 # residual 1

    # ---------------- MLP branch ----------------
    y2 = _layernorm(x1, n2w_ref[0], n2b_ref[0])
    h1 = jnp.dot(y2.astype(jnp.bfloat16), fc1w_ref[0],
                 preferred_element_type=jnp.float32) + fc1b_ref[0]
    h1 = _gelu_tanh(h1)
    h2 = jnp.dot(h1.astype(jnp.bfloat16), fc2w_ref[0],
                 preferred_element_type=jnp.float32) + fc2b_ref[0]

    out_ref[0] = (x1 + h2).astype(out_ref.dtype)                    # residual 2


_WEIGHT_NAMES = ["n1w", "n1b", "qw", "kw", "vw", "projw", "projb",
                 "n2w", "n2b", "fc1w", "fc1b", "fc2w", "fc2b"]


def run_tsm(x, params, t_len):
    """x: (B, N, C) f32 -> (B, N, C) f32, applying all stacked blocks."""
    B, N, C = x.shape
    L = params["n1w"].shape[0]
    kernel = functools.partial(tsm_block_kernel, t_len=t_len,
                               num_heads=NUM_HEADS, head_dim=HEAD_DIM)
    weights = [params[n] for n in _WEIGHT_NAMES]

    def wspec(arr):
        zeros = (0,) * (arr.ndim - 1)
        return pl.BlockSpec((1,) + arr.shape[1:], lambda b, l, z=zeros: (l,) + z)

    in_specs = [pl.BlockSpec((1, N, C), lambda b, l: (b, 0, 0))]
    in_specs += [wspec(w) for w in weights]

    return pl.pallas_call(
        kernel,
        out_shape=jax.ShapeDtypeStruct((B, N, C), jnp.float32),
        grid_spec=pltpu.PrefetchScalarGridSpec(
            num_scalar_prefetch=0,
            grid=(B, L),                               # block axis innermost
            in_specs=in_specs,
            out_specs=pl.BlockSpec((1, N, C), lambda b, l: (b, 0, 0)),
        ),
        compiler_params=pltpu.CompilerParams(
            dimension_semantics=("parallel", "arbitrary"),
            # well under v7x's 64 MiB physical VMEM; leaves compiler headroom
            vmem_limit_bytes=48 * 1024 * 1024),
    )(x, *weights)


@jax.jit
def tsm_forward(params, rgb_features, hsi_features):
    """Mirrors TSM.forward: NCHW in, NCHW out (search/HSI branch)."""
    b, c, h, w = rgb_features.shape
    rgb_f = rgb_features.reshape(b, c, h * w)
    hsi_f = hsi_features.reshape(b, c, h * w)
    f = jnp.concatenate([rgb_f, hsi_f], axis=2).transpose(0, 2, 1)  # (b, 2hw, c)
    f = run_tsm(f, params, t_len=h * w)
    f = f[:, h * w:, :].transpose(0, 2, 1).reshape(b, c, h, w)
    return f


# ------------- deterministic parameter init (matches _init_weights_xavier) -------------
def _xavier_uniform(key, out_f, in_f):
    bound = math.sqrt(6.0 / (in_f + out_f))
    return jax.random.uniform(key, (out_f, in_f), jnp.float32, -bound, bound)


def init_params(key):
    """All 8 blocks' weights stacked on a leading axis; matmul weights in bf16."""
    qws, kws, vws, projws, fc1ws, fc2ws = [], [], [], [], [], []
    for _ in range(NUM_BLOCKS):
        key, k1, k2, k3, k4 = jax.random.split(key, 5)
        # torch Linear weight (out, in); kernel layout is head-leading (in, out)
        qkv_w = _xavier_uniform(k1, 3 * DIM, DIM)                    # (3C, C)
        wt = qkv_w.T.reshape(DIM, 3, NUM_HEADS, HEAD_DIM)            # (C, 3, H, hd)
        wt = wt.transpose(2, 0, 1, 3)                                # (H, C, 3, hd)
        qws.append(wt[:, :, 0, :])
        kws.append(wt[:, :, 1, :])
        vws.append(wt[:, :, 2, :])
        proj_w = _xavier_uniform(k2, DIM, DIM)                       # (C, C)
        projws.append(proj_w.T.reshape(NUM_HEADS, HEAD_DIM, DIM))    # (H, hd, C)
        fc1ws.append(_xavier_uniform(k3, MLP_HIDDEN, DIM).T)         # (C, 4C)
        fc2ws.append(_xavier_uniform(k4, DIM, MLP_HIDDEN).T)         # (4C, C)

    L = NUM_BLOCKS
    bf16 = jnp.bfloat16
    return dict(
        n1w=jnp.ones((L, 1, DIM), jnp.float32),
        n1b=jnp.zeros((L, 1, DIM), jnp.float32),
        qw=jnp.stack(qws).astype(bf16),           # (L, H, C, hd)
        kw=jnp.stack(kws).astype(bf16),           # (L, H, C, hd)
        vw=jnp.stack(vws).astype(bf16),           # (L, H, C, hd)
        projw=jnp.stack(projws).astype(bf16),     # (L, H, hd, C)
        projb=jnp.zeros((L, 1, DIM), jnp.float32),
        n2w=jnp.ones((L, 1, DIM), jnp.float32),
        n2b=jnp.zeros((L, 1, DIM), jnp.float32),
        fc1w=jnp.stack(fc1ws).astype(bf16),       # (L, C, 4C)
        fc1b=jnp.zeros((L, 1, MLP_HIDDEN), jnp.float32),
        fc2w=jnp.stack(fc2ws).astype(bf16),       # (L, 4C, C)
        fc2b=jnp.zeros((L, 1, DIM), jnp.float32),
    )


if __name__ == "__main__":
    key = jax.random.PRNGKey(0)
    kp, kr, kh = jax.random.split(key, 3)
    params = init_params(kp)

    # Small spatial size; channel dim must be 256 (hard-coded Block dim in TSM).
    b, c, h, w = 2, DIM, 4, 4
    rgb = jax.random.normal(kr, (b, c, h, w), jnp.float32)
    hsi = jax.random.normal(kh, (b, c, h, w), jnp.float32)

    out = tsm_forward(params, rgb, hsi)
    jax.block_until_ready(out)
    assert out.shape == (b, c, h, w) and out.dtype == jnp.float32
    assert bool(jnp.all(jnp.isfinite(out)))
    print("KERNEL_OK")
</pallas_src>

<mosaic_0001>
module attributes {stable_mosaic.version = 11 : i64} {
  func.func @tsm_block_kernel(%arg0: i32, %arg1: i32, %arg2: memref<1x32x256xf32, #tpu.memory_space<vmem>>, %arg3: memref<1x1x256xf32, #tpu.memory_space<vmem>>, %arg4: memref<1x1x256xf32, #tpu.memory_space<vmem>>, %arg5: memref<1x8x256x32xbf16, #tpu.memory_space<vmem>>, %arg6: memref<1x8x256x32xbf16, #tpu.memory_space<vmem>>, %arg7: memref<1x8x256x32xbf16, #tpu.memory_space<vmem>>, %arg8: memref<1x8x32x256xbf16, #tpu.memory_space<vmem>>, %arg9: memref<1x1x256xf32, #tpu.memory_space<vmem>>, %arg10: memref<1x1x256xf32, #tpu.memory_space<vmem>>, %arg11: memref<1x1x256xf32, #tpu.memory_space<vmem>>, %arg12: memref<1x256x1024xbf16, #tpu.memory_space<vmem>>, %arg13: memref<1x1x1024xf32, #tpu.memory_space<vmem>>, %arg14: memref<1x1024x256xbf16, #tpu.memory_space<vmem>>, %arg15: memref<1x1x256xf32, #tpu.memory_space<vmem>>, %arg16: memref<1x32x256xf32, #tpu.memory_space<vmem>>) attributes {dimension_semantics = [#tpu.dimension_semantics<parallel>, #tpu.dimension_semantics<arbitrary>], iteration_bounds = array<i64: 2, 8>, scalar_prefetch = 0 : i64, scratch_operands = 0 : i64, tpu.core_type = #tpu.core_type<tc>, window_params = [{transform_indices = @transform_0, window_bounds = array<i64: 1, 32, 256>}, {transform_indices = @transform_1, window_bounds = array<i64: 1, 1, 256>}, {transform_indices = @transform_2, window_bounds = array<i64: 1, 1, 256>}, {transform_indices = @transform_3, window_bounds = array<i64: 1, 8, 256, 32>}, {transform_indices = @transform_4, window_bounds = array<i64: 1, 8, 256, 32>}, {transform_indices = @transform_5, window_bounds = array<i64: 1, 8, 256, 32>}, {transform_indices = @transform_6, window_bounds = array<i64: 1, 8, 32, 256>}, {transform_indices = @transform_7, window_bounds = array<i64: 1, 1, 256>}, {transform_indices = @transform_8, window_bounds = array<i64: 1, 1, 256>}, {transform_indices = @transform_9, window_bounds = array<i64: 1, 1, 256>}, {transform_indices = @transform_10, window_bounds = array<i64: 1, 256, 1024>}, {transform_indices = @transform_11, window_bounds = array<i64: 1, 1, 1024>}, {transform_indices = @transform_12, window_bounds = array<i64: 1, 1024, 256>}, {transform_indices = @transform_13, window_bounds = array<i64: 1, 1, 256>}, {transform_indices = @transform_14, window_bounds = array<i64: 1, 32, 256>}]} {
    %c0_i32 = arith.constant 0 : i32
    %0 = arith.cmpi eq, %arg1, %c0_i32 : i32
    %1 = arith.extui %0 : i1 to i32
    %c0_i32_0 = arith.constant 0 : i32
    %2 = arith.cmpi ne, %1, %c0_i32_0 : i32
    scf.if %2 {
      %c0_77 = arith.constant 0 : index
      %c0_78 = arith.constant 0 : index
      %c0_79 = arith.constant 0 : index
      %140 = vector.load %arg2[%c0_77, %c0_78, %c0_79] : memref<1x32x256xf32, #tpu.memory_space<vmem>>, vector<1x32x256xf32>
      %c0_80 = arith.constant 0 : index
      %c0_81 = arith.constant 0 : index
      %c0_82 = arith.constant 0 : index
      %141 = vector.load %arg16[%c0_80, %c0_81, %c0_82] : memref<1x32x256xf32, #tpu.memory_space<vmem>>, vector<1x32x256xf32>
      tpu.vector_store %arg16[%c0_80, %c0_81, %c0_82], %140 {strides = array<i32>} : memref<1x32x256xf32, #tpu.memory_space<vmem>>, vector<1x32x256xf32>,
    } else {
    }
    %c0 = arith.constant 0 : index
    %c0_1 = arith.constant 0 : index
    %c0_2 = arith.constant 0 : index
    %3 = vector.load %arg16[%c0, %c0_1, %c0_2] : memref<1x32x256xf32, #tpu.memory_space<vmem>>, vector<1x32x256xf32>
    %4 = vector.shape_cast %3 : vector<1x32x256xf32> to vector<32x256xf32>
    %c0_3 = arith.constant 0 : index
    %c0_4 = arith.constant 0 : index
    %c0_5 = arith.constant 0 : index
    %5 = vector.load %arg3[%c0_3, %c0_4, %c0_5] : memref<1x1x256xf32, #tpu.memory_space<vmem>>, vector<1x1x256xf32>
    %6 = vector.shape_cast %5 : vector<1x1x256xf32> to vector<1x256xf32>
    %c0_6 = arith.constant 0 : index
    %c0_7 = arith.constant 0 : index
    %c0_8 = arith.constant 0 : index
    %7 = vector.load %arg4[%c0_6, %c0_7, %c0_8] : memref<1x1x256xf32, #tpu.memory_space<vmem>>, vector<1x1x256xf32>
    %8 = vector.shape_cast %7 : vector<1x1x256xf32> to vector<1x256xf32>
    %cst = arith.constant dense<0.000000e+00> : vector<32xf32>
    %9 = vector.multi_reduction <add>, %4, %cst [1] : vector<32x256xf32> to vector<32xf32>
    %10 = vector.shape_cast %9 : vector<32xf32> to vector<32x1xf32>
    %cst_9 = arith.constant 2.560000e+02 : f32
    %11 = vector.broadcast %cst_9 : f32 to vector<32x1xf32>
    %12 = arith.divf %10, %11 : vector<32x1xf32>
    %13 = vector.broadcast %12 : vector<32x1xf32> to vector<32x256xf32>
    %14 = arith.subf %4, %13 : vector<32x256xf32>
    %15 = arith.mulf %14, %14 : vector<32x256xf32>
    %cst_10 = arith.constant dense<0.000000e+00> : vector<32xf32>
    %16 = vector.multi_reduction <add>, %15, %cst_10 [1] : vector<32x256xf32> to vector<32xf32>
    %17 = vector.shape_cast %16 : vector<32xf32> to vector<32x1xf32>
    %cst_11 = arith.constant 2.560000e+02 : f32
    %18 = vector.broadcast %cst_11 : f32 to vector<32x1xf32>
    %19 = arith.divf %17, %18 : vector<32x1xf32>
    %cst_12 = arith.constant 9.99999974E-6 : f32
    %20 = vector.broadcast %cst_12 : f32 to vector<32x1xf32>
    %21 = arith.addf %19, %20 : vector<32x1xf32>
    %22 = math.rsqrt %21 : vector<32x1xf32>
    %23 = vector.broadcast %22 : vector<32x1xf32> to vector<32x256xf32>
    %24 = arith.mulf %14, %23 : vector<32x256xf32>
    %25 = vector.broadcast %6 : vector<1x256xf32> to vector<32x256xf32>
    %26 = arith.mulf %24, %25 : vector<32x256xf32>
    %27 = vector.broadcast %8 : vector<1x256xf32> to vector<32x256xf32>
    %28 = arith.addf %26, %27 : vector<32x256xf32>
    %29 = arith.truncf %28 : vector<32x256xf32> to vector<32x256xbf16>
    %30 = vector.shape_cast %29 : vector<32x256xbf16> to vector<1x32x256xbf16>
    %31 = vector.shape_cast %30 : vector<1x32x256xbf16> to vector<1x32x256xbf16>
    %32 = vector.broadcast %31 : vector<1x32x256xbf16> to vector<8x32x256xbf16>
    %c0_13 = arith.constant 0 : index
    %c0_14 = arith.constant 0 : index
    %c0_15 = arith.constant 0 : index
    %c0_16 = arith.constant 0 : index
    %33 = vector.load %arg5[%c0_13, %c0_14, %c0_15, %c0_16] : memref<1x8x256x32xbf16, #tpu.memory_space<vmem>>, vector<1x8x256x32xbf16>
    %34 = vector.shape_cast %33 : vector<1x8x256x32xbf16> to vector<8x256x32xbf16>
    %cst_17 = arith.constant dense<0.000000e+00> : vector<8x32x32xf32>
    %35 = tpu.matmul %32, %34, %cst_17 {dimension_numbers = #tpu.dot_dimension_numbers<[2], [1], [1], [2], [0, 0, 0, 1, 1, 2], [0], [0]>} : vector<8x32x256xbf16>, vector<8x256x32xbf16>, vector<8x32x32xf32> -> vector<8x32x32xf32>
    %c0_18 = arith.constant 0 : index
    %c0_19 = arith.constant 0 : index
    %c0_20 = arith.constant 0 : index
    %c0_21 = arith.constant 0 : index
    %36 = vector.load %arg6[%c0_18, %c0_19, %c0_20, %c0_21] : memref<1x8x256x32xbf16, #tpu.memory_space<vmem>>, vector<1x8x256x32xbf16>
    %37 = vector.shape_cast %36 : vector<1x8x256x32xbf16> to vector<8x256x32xbf16>
    %cst_22 = arith.constant dense<0.000000e+00> : vector<8x32x32xf32>
    %38 = tpu.matmul %32, %37, %cst_22 {dimension_numbers = #tpu.dot_dimension_numbers<[2], [1], [1], [2], [0, 0, 0, 1, 1, 2], [0], [0]>} : vector<8x32x256xbf16>, vector<8x256x32xbf16>, vector<8x32x32xf32> -> vector<8x32x32xf32>
    %c0_23 = arith.constant 0 : index
    %c0_24 = arith.constant 0 : index
    %c0_25 = arith.constant 0 : index
    %c0_26 = arith.constant 0 : index
    %39 = vector.load %arg7[%c0_23, %c0_24, %c0_25, %c0_26] : memref<1x8x256x32xbf16, #tpu.memory_space<vmem>>, vector<1x8x256x32xbf16>
    %40 = vector.shape_cast %39 : vector<1x8x256x32xbf16> to vector<8x256x32xbf16>
    %cst_27 = arith.constant dense<0.000000e+00> : vector<8x32x32xf32>
    %41 = tpu.matmul %32, %40, %cst_27 {dimension_numbers = #tpu.dot_dimension_numbers<[2], [1], [1], [2], [0, 0, 0, 1, 1, 2], [0], [0]>} : vector<8x32x256xbf16>, vector<8x256x32xbf16>, vector<8x32x32xf32> -> vector<8x32x32xf32>
    %42 = arith.truncf %35 : vector<8x32x32xf32> to vector<8x32x32xbf16>
    %43 = arith.truncf %38 : vector<8x32x32xf32> to vector<8x32x32xbf16>
    %cst_28 = arith.constant dense<0.000000e+00> : vector<8x32x32xf32>
    %44 = tpu.matmul %42, %43, %cst_28 {dimension_numbers = #tpu.dot_dimension_numbers<[2], [2], [1], [1], [0, 0, 0, 1, 1, 1], [0], [0]>} : vector<8x32x32xbf16>, vector<8x32x32xbf16>, vector<8x32x32xf32> -> vector<8x32x32xf32>
    %cst_29 = arith.constant 0.176776692 : f32
    %45 = vector.broadcast %cst_29 : f32 to vector<8x32x32xf32>
    %46 = arith.mulf %44, %45 : vector<8x32x32xf32>
    %47 = tpu.iota {dimensions = array<i32: 0>} : vector<32x32xi32>
    %48 = tpu.iota {dimensions = array<i32: 1>} : vector<32x32xi32>
    %c16_i32 = arith.constant 16 : i32
    %49 = vector.broadcast %c16_i32 : i32 to vector<32x32xi32>
    %50 = arith.cmpi slt, %47, %49 : vector<32x32xi32>
    %c16_i32_30 = arith.constant 16 : i32
    %51 = vector.broadcast %c16_i32_30 : i32 to vector<32x32xi32>
    %52 = arith.cmpi sge, %48, %51 : vector<32x32xi32>
    %53 = arith.andi %50, %52 : vector<32x32xi1>
    %cst_31 = arith.constant -1.000000e+30 : f32
    %cst_32 = arith.constant 0.000000e+00 : f32
    %54 = vector.broadcast %cst_31 : f32 to vector<32x32xf32>
    %55 = vector.broadcast %cst_32 : f32 to vector<32x32xf32>
    %56 = arith.select %53, %54, %55 : vector<32x32xi1>, vector<32x32xf32>
    %57 = vector.shape_cast %56 : vector<32x32xf32> to vector<1x32x32xf32>
    %58 = vector.broadcast %57 : vector<1x32x32xf32> to vector<8x32x32xf32>
    %59 = arith.addf %46, %58 : vector<8x32x32xf32>
    %cst_33 = arith.constant dense<0xFF800000> : vector<8x32xf32>
    %60 = vector.multi_reduction <maximumf>, %59, %cst_33 [2] : vector<8x32x32xf32> to vector<8x32xf32>
    %61 = vector.shape_cast %60 : vector<8x32xf32> to vector<8x32x1xf32>
    %62 = vector.broadcast %61 : vector<8x32x1xf32> to vector<8x32x32xf32>
    %63 = arith.subf %59, %62 : vector<8x32x32xf32>
    %64 = math.exp %63 : vector<8x32x32xf32>
    %cst_34 = arith.constant dense<0.000000e+00> : vector<8x32xf32>
    %65 = vector.multi_reduction <add>, %64, %cst_34 [2] : vector<8x32x32xf32> to vector<8x32xf32>
    %66 = vector.shape_cast %65 : vector<8x32xf32> to vector<8x32x1xf32>
    %67 = tpu.reciprocal %66 {approx = true} : vector<8x32x1xf32> -> vector<8x32x1xf32>
    %68 = vector.broadcast %67 : vector<8x32x1xf32> to vector<8x32x32xf32>
    %69 = arith.mulf %64, %68 : vector<8x32x32xf32>
    %70 = arith.truncf %69 : vector<8x32x32xf32> to vector<8x32x32xbf16>
    %71 = arith.truncf %41 : vector<8x32x32xf32> to vector<8x32x32xbf16>
    %cst_35 = arith.constant dense<0.000000e+00> : vector<8x32x32xf32>
    %72 = tpu.matmul %70, %71, %cst_35 {dimension_numbers = #tpu.dot_dimension_numbers<[2], [1], [1], [2], [0, 0, 0, 1, 1, 2], [0], [0]>} : vector<8x32x32xbf16>, vector<8x32x32xbf16>, vector<8x32x32xf32> -> vector<8x32x32xf32>
    %73 = arith.truncf %72 : vector<8x32x32xf32> to vector<8x32x32xbf16>
    %c0_36 = arith.constant 0 : index
    %c0_37 = arith.constant 0 : index
    %c0_38 = arith.constant 0 : index
    %c0_39 = arith.constant 0 : index
    %74 = vector.load %arg8[%c0_36, %c0_37, %c0_38, %c0_39] : memref<1x8x32x256xbf16, #tpu.memory_space<vmem>>, vector<1x8x32x256xbf16>
    %75 = vector.shape_cast %74 : vector<1x8x32x256xbf16> to vector<8x32x256xbf16>
    %cst_40 = arith.constant dense<0.000000e+00> : vector<8x32x256xf32>
    %76 = tpu.matmul %73, %75, %cst_40 {dimension_numbers = #tpu.dot_dimension_numbers<[2], [1], [1], [2], [0, 0, 0, 1, 1, 2], [0], [0]>} : vector<8x32x32xbf16>, vector<8x32x256xbf16>, vector<8x32x256xf32> -> vector<8x32x256xf32>
    %cst_41 = arith.constant dense<0.000000e+00> : vector<32x256xf32>
    %77 = vector.multi_reduction <add>, %76, %cst_41 [0] : vector<8x32x256xf32> to vector<32x256xf32>
    %78 = arith.addf %4, %77 : vector<32x256xf32>
    %c0_42 = arith.constant 0 : index
    %c0_43 = arith.constant 0 : index
    %c0_44 = arith.constant 0 : index
    %79 = vector.load %arg9[%c0_42, %c0_43, %c0_44] : memref<1x1x256xf32, #tpu.memory_space<vmem>>, vector<1x1x256xf32>
    %80 = vector.shape_cast %79 : vector<1x1x256xf32> to vector<1x256xf32>
    %81 = vector.broadcast %80 : vector<1x256xf32> to vector<32x256xf32>
    %82 = arith.addf %78, %81 : vector<32x256xf32>
    %c0_45 = arith.constant 0 : index
    %c0_46 = arith.constant 0 : index
    %c0_47 = arith.constant 0 : index
    %83 = vector.load %arg10[%c0_45, %c0_46, %c0_47] : memref<1x1x256xf32, #tpu.memory_space<vmem>>, vector<1x1x256xf32>
    %84 = vector.shape_cast %83 : vector<1x1x256xf32> to vector<1x256xf32>
    %c0_48 = arith.constant 0 : index
    %c0_49 = arith.constant 0 : index
    %c0_50 = arith.constant 0 : index
    %85 = vector.load %arg11[%c0_48, %c0_49, %c0_50] : memref<1x1x256xf32, #tpu.memory_space<vmem>>, vector<1x1x256xf32>
    %86 = vector.shape_cast %85 : vector<1x1x256xf32> to vector<1x256xf32>
    %cst_51 = arith.constant dense<0.000000e+00> : vector<32xf32>
    %87 = vector.multi_reduction <add>, %82, %cst_51 [1] : vector<32x256xf32> to vector<32xf32>
    %88 = vector.shape_cast %87 : vector<32xf32> to vector<32x1xf32>
    %cst_52 = arith.constant 2.560000e+02 : f32
    %89 = vector.broadcast %cst_52 : f32 to vector<32x1xf32>
    %90 = arith.divf %88, %89 : vector<32x1xf32>
    %91 = vector.broadcast %90 : vector<32x1xf32> to vector<32x256xf32>
    %92 = arith.subf %82, %91 : vector<32x256xf32>
    %93 = arith.mulf %92, %92 : vector<32x256xf32>
    %cst_53 = arith.constant dense<0.000000e+00> : vector<32xf32>
    %94 = vector.multi_reduction <add>, %93, %cst_53 [1] : vector<32x256xf32> to vector<32xf32>
    %95 = vector.shape_cast %94 : vector<32xf32> to vector<32x1xf32>
    %cst_54 = arith.constant 2.560000e+02 : f32
    %96 = vector.broadcast %cst_54 : f32 to vector<32x1xf32>
    %97 = arith.divf %95, %96 : vector<32x1xf32>
    %cst_55 = arith.constant 9.99999974E-6 : f32
    %98 = vector.broadcast %cst_55 : f32 to vector<32x1xf32>
    %99 = arith.addf %97, %98 : vector<32x1xf32>
    %100 = math.rsqrt %99 : vector<32x1xf32>
    %101 = vector.broadcast %100 : vector<32x1xf32> to vector<32x256xf32>
    %102 = arith.mulf %92, %101 : vector<32x256xf32>
    %103 = vector.broadcast %84 : vector<1x256xf32> to vector<32x256xf32>
    %104 = arith.mulf %102, %103 : vector<32x256xf32>
    %105 = vector.broadcast %86 : vector<1x256xf32> to vector<32x256xf32>
    %106 = arith.addf %104, %105 : vector<32x256xf32>
    %107 = arith.truncf %106 : vector<32x256xf32> to vector<32x256xbf16>
    %c0_56 = arith.constant 0 : index
    %c0_57 = arith.constant 0 : index
    %c0_58 = arith.constant 0 : index
    %108 = vector.load %arg12[%c0_56, %c0_57, %c0_58] : memref<1x256x1024xbf16, #tpu.memory_space<vmem>>, vector<1x256x1024xbf16>
    %109 = vector.shape_cast %108 : vector<1x256x1024xbf16> to vector<256x1024xbf16>
    %cst_59 = arith.constant dense<0.000000e+00> : vector<32x1024xf32>
    %110 = tpu.matmul %107, %109, %cst_59 {dimension_numbers = #tpu.dot_dimension_numbers<[1], [0], [0], [1], [0, 0, 1, 1], [], []>} : vector<32x256xbf16>, vector<256x1024xbf16>, vector<32x1024xf32> -> vector<32x1024xf32>
    %c0_60 = arith.constant 0 : index
    %c0_61 = arith.constant 0 : index
    %c0_62 = arith.constant 0 : index
    %111 = vector.load %arg13[%c0_60, %c0_61, %c0_62] : memref<1x1x1024xf32, #tpu.memory_space<vmem>>, vector<1x1x1024xf32>
    %112 = vector.shape_cast %111 : vector<1x1x1024xf32> to vector<1x1024xf32>
    %113 = vector.broadcast %112 : vector<1x1024xf32> to vector<32x1024xf32>
    %114 = arith.addf %110, %113 : vector<32x1024xf32>
    %cst_63 = arith.constant 5.000000e-01 : f32
    %115 = vector.broadcast %cst_63 : f32 to vector<32x1024xf32>
    %116 = arith.mulf %115, %114 : vector<32x1024xf32>
    %117 = arith.mulf %114, %114 : vector<32x1024xf32>
    %118 = arith.mulf %117, %114 : vector<32x1024xf32>
    %cst_64 = arith.constant 4.471500e-02 : f32
    %119 = vector.broadcast %cst_64 : f32 to vector<32x1024xf32>
    %120 = arith.mulf %119, %118 : vector<32x1024xf32>
    %121 = arith.addf %114, %120 : vector<32x1024xf32>
    %cst_65 = arith.constant 0.797884583 : f32
    %122 = vector.broadcast %cst_65 : f32 to vector<32x1024xf32>
    %123 = arith.mulf %122, %121 : vector<32x1024xf32>
    %124 = math.tanh %123 : vector<32x1024xf32>
    %cst_66 = arith.constant 1.000000e+00 : f32
    %125 = vector.broadcast %cst_66 : f32 to vector<32x1024xf32>
    %126 = arith.addf %125, %124 : vector<32x1024xf32>
    %127 = arith.mulf %116, %126 : vector<32x1024xf32>
    %128 = arith.truncf %127 : vector<32x1024xf32> to vector<32x1024xbf16>
    %c0_67 = arith.constant 0 : index
    %c0_68 = arith.constant 0 : index
    %c0_69 = arith.constant 0 : index
    %129 = vector.load %arg14[%c0_67, %c0_68, %c0_69] : memref<1x1024x256xbf16, #tpu.memory_space<vmem>>, vector<1x1024x256xbf16>
    %130 = vector.shape_cast %129 : vector<1x1024x256xbf16> to vector<1024x256xbf16>
    %cst_70 = arith.constant dense<0.000000e+00> : vector<32x256xf32>
    %131 = tpu.matmul %128, %130, %cst_70 {dimension_numbers = #tpu.dot_dimension_numbers<[1], [0], [0], [1], [0, 0, 1, 1], [], []>} : vector<32x1024xbf16>, vector<1024x256xbf16>, vector<32x256xf32> -> vector<32x256xf32>
    %c0_71 = arith.constant 0 : index
    %c0_72 = arith.constant 0 : index
    %c0_73 = arith.constant 0 : index
    %132 = vector.load %arg15[%c0_71, %c0_72, %c0_73] : memref<1x1x256xf32, #tpu.memory_space<vmem>>, vector<1x1x256xf32>
    %133 = vector.shape_cast %132 : vector<1x1x256xf32> to vector<1x256xf32>
    %134 = vector.broadcast %133 : vector<1x256xf32> to vector<32x256xf32>
    %135 = arith.addf %131, %134 : vector<32x256xf32>
    %136 = arith.addf %82, %135 : vector<32x256xf32>
    %c0_74 = arith.constant 0 : index
    %c0_75 = arith.constant 0 : index
    %c0_76 = arith.constant 0 : index
    %137 = vector.load %arg16[%c0_74, %c0_75, %c0_76] : memref<1x32x256xf32, #tpu.memory_space<vmem>>, vector<1x32x256xf32>
    %138 = vector.shape_cast %137 : vector<1x32x256xf32> to vector<32x256xf32>
    %139 = vector.shape_cast %136 : vector<32x256xf32> to vector<1x32x256xf32>
    tpu.vector_store %arg16[%c0_74, %c0_75, %c0_76], %139 {strides = array<i32>} : memref<1x32x256xf32, #tpu.memory_space<vmem>>, vector<1x32x256xf32>,
    return
  }
  func.func @transform_0(%arg0: i32, %arg1: i32) -> (i32, i32, i32) {
    %c0_i32 = arith.constant 0 : i32
    %c0_i32_0 = arith.constant 0 : i32
    %c0_i32_1 = arith.constant 0 : i32
    return %arg0, %c0_i32, %c0_i32_0 : i32, i32, i32
  }
  func.func @transform_1(%arg0: i32, %arg1: i32) -> (i32, i32, i32) {
    %c0_i32 = arith.constant 0 : i32
    %c0_i32_0 = arith.constant 0 : i32
    %c0_i32_1 = arith.constant 0 : i32
    return %arg1, %c0_i32, %c0_i32_0 : i32, i32, i32
  }
  func.func @transform_2(%arg0: i32, %arg1: i32) -> (i32, i32, i32) {
    %c0_i32 = arith.constant 0 : i32
    %c0_i32_0 = arith.constant 0 : i32
    %c0_i32_1 = arith.constant 0 : i32
    return %arg1, %c0_i32, %c0_i32_0 : i32, i32, i32
  }
  func.func @transform_3(%arg0: i32, %arg1: i32) -> (i32, i32, i32, i32) {
    %c0_i32 = arith.constant 0 : i32
    %c0_i32_0 = arith.constant 0 : i32
    %c0_i32_1 = arith.constant 0 : i32
    %c0_i32_2 = arith.constant 0 : i32
    return %arg1, %c0_i32, %c0_i32_0, %c0_i32_1 : i32, i32, i32, i32
  }
  func.func @transform_4(%arg0: i32, %arg1: i32) -> (i32, i32, i32, i32) {
    %c0_i32 = arith.constant 0 : i32
    %c0_i32_0 = arith.constant 0 : i32
    %c0_i32_1 = arith.constant 0 : i32
    %c0_i32_2 = arith.constant 0 : i32
    return %arg1, %c0_i32, %c0_i32_0, %c0_i32_1 : i32, i32, i32, i32
  }
  func.func @transform_5(%arg0: i32, %arg1: i32) -> (i32, i32, i32, i32) {
    %c0_i32 = arith.constant 0 : i32
    %c0_i32_0 = arith.constant 0 : i32
    %c0_i32_1 = arith.constant 0 : i32
    %c0_i32_2 = arith.constant 0 : i32
    return %arg1, %c0_i32, %c0_i32_0, %c0_i32_1 : i32, i32, i32, i32
  }
  func.func @transform_6(%arg0: i32, %arg1: i32) -> (i32, i32, i32, i32) {
    %c0_i32 = arith.constant 0 : i32
    %c0_i32_0 = arith.constant 0 : i32
    %c0_i32_1 = arith.constant 0 : i32
    %c0_i32_2 = arith.constant 0 : i32
    return %arg1, %c0_i32, %c0_i32_0, %c0_i32_1 : i32, i32, i32, i32
  }
  func.func @transform_7(%arg0: i32, %arg1: i32) -> (i32, i32, i32) {
    %c0_i32 = arith.constant 0 : i32
    %c0_i32_0 = arith.constant 0 : i32
    %c0_i32_1 = arith.constant 0 : i32
    return %arg1, %c0_i32, %c0_i32_0 : i32, i32, i32
  }
  func.func @transform_8(%arg0: i32, %arg1: i32) -> (i32, i32, i32) {
    %c0_i32 = arith.constant 0 : i32
    %c0_i32_0 = arith.constant 0 : i32
    %c0_i32_1 = arith.constant 0 : i32
    return %arg1, %c0_i32, %c0_i32_0 : i32, i32, i32
  }
  func.func @transform_9(%arg0: i32, %arg1: i32) -> (i32, i32, i32) {
    %c0_i32 = arith.constant 0 : i32
    %c0_i32_0 = arith.constant 0 : i32
    %c0_i32_1 = arith.constant 0 : i32
    return %arg1, %c0_i32, %c0_i32_0 : i32, i32, i32
  }
  func.func @transform_10(%arg0: i32, %arg1: i32) -> (i32, i32, i32) {
    %c0_i32 = arith.constant 0 : i32
    %c0_i32_0 = arith.constant 0 : i32
    %c0_i32_1 = arith.constant 0 : i32
    return %arg1, %c0_i32, %c0_i32_0 : i32, i32, i32
  }
  func.func @transform_11(%arg0: i32, %arg1: i32) -> (i32, i32, i32) {
    %c0_i32 = arith.constant 0 : i32
    %c0_i32_0 = arith.constant 0 : i32
    %c0_i32_1 = arith.constant 0 : i32
    return %arg1, %c0_i32, %c0_i32_0 : i32, i32, i32
  }
  func.func @transform_12(%arg0: i32, %arg1: i32) -> (i32, i32, i32) {
    %c0_i32 = arith.constant 0 : i32
    %c0_i32_0 = arith.constant 0 : i32
    %c0_i32_1 = arith.constant 0 : i32
    return %arg1, %c0_i32, %c0_i32_0 : i32, i32, i32
  }
  func.func @transform_13(%arg0: i32, %arg1: i32) -> (i32, i32, i32) {
    %c0_i32 = arith.constant 0 : i32
    %c0_i32_0 = arith.constant 0 : i32
    %c0_i32_1 = arith.constant 0 : i32
    return %arg1, %c0_i32, %c0_i32_0 : i32, i32, i32
  }
  func.func @transform_14(%arg0: i32, %arg1: i32) -> (i32, i32, i32) {
    %c0_i32 = arith.constant 0 : i32
    %c0_i32_0 = arith.constant 0 : i32
    %c0_i32_1 = arith.constant 0 : i32
    return %arg0, %c0_i32, %c0_i32_0 : i32, i32, i32
  }
}

</mosaic_0001>

<bundles_post_ra>
// kernel: tsm_forward.1
= control target key start
LH: loop header
LB: loop body
LE: loop exit
PB: predicated region body
PF: predicated region fallthrough
CT: control target
= control target key end

     0   :  { %s16055_s0 = inlined_call_operand.hbm [shape: f32[2,32,256], index: 0, kind: input, shape index: {}]   ;;  %s16056_s1 = inlined_call_operand.hbm [shape: f32[8,1,256], index: 1, kind: input, shape index: {}]   ;;  %s16057_s2 = inlined_call_operand.hbm [shape: f32[8,1,256], index: 2, kind: input, shape index: {}]   ;;  %s16058_s3 = inlined_call_operand.vmem [shape: bf16[8,8,256,32], index: 3, kind: input, shape index: {}]   ;;  %s16059_s4 = inlined_call_operand.vmem [shape: bf16[8,8,256,32], index: 4, kind: input, shape index: {}]   ;;  %s16060_s5 = inlined_call_operand.vmem [shape: bf16[8,8,256,32], index: 5, kind: input, shape index: {}]   ;;  %s16061_s6 = inlined_call_operand.hbm [shape: bf16[8,8,32,256], index: 6, kind: input, shape index: {}]   ;;  %s16062_s7 = inlined_call_operand.hbm [shape: f32[8,1,256], index: 7, kind: input, shape index: {}]   ;;  %s16063_s8 = inlined_call_operand.hbm [shape: f32[8,1,256], index: 8, kind: input, shape index: {}]   ;;  %s16064_s9 = inlined_call_operand.hbm [shape: f32[8,1,256], index: 9, kind: input, shape index: {}]   ;;  %s16065_s10 = inlined_call_operand.vmem [shape: bf16[8,256,1024], index: 10, kind: input, shape index: {}]   ;;  %s16066_s11 = inlined_call_operand.hbm [shape: f32[8,1,1024], index: 11, kind: input, shape index: {}]   ;;  %s16067_s12 = inlined_call_operand.hbm [shape: bf16[8,1024,256], index: 12, kind: input, shape index: {}]   ;;  %s16068_s13 = inlined_call_operand.hbm [shape: f32[8,1,256], index: 13, kind: input, shape index: {}]   ;;  %s16069_s14 = inlined_call_operand.hbm [shape: f32[2,32,256], index: 14, kind: output, shape index: {}]  }
   0x1   :  { %16105 = sst [smem:[#allocation39_spill]] %s16055_s0 }
   0x2   :  { %16106 = sst [smem:[#allocation40_spill]] %s16056_s1 }
   0x3   :  { %16107 = sst [smem:[#allocation41_spill]] %s16057_s2 }
   0x4   :  { %16108 = sst [smem:[#allocation42_spill]] %s16058_s3 }
   0x5   :  { %16109 = sst [smem:[#allocation43_spill]] %s16059_s4 }
   0x6   :  { %16110 = sst [smem:[#allocation44_spill]] %s16060_s5 }
   0x7   :  { %16111 = sst [smem:[#allocation45_spill]] %s16061_s6 }
   0x8   :  { %16112 = sst [smem:[#allocation46_spill]] %s16062_s7 }
   0x9   :  { %16113 = sst [smem:[#allocation47_spill]] %s16063_s8 }
   0xa   :  { %16114 = sst [smem:[#allocation48_spill]] %s16064_s9 }
   0xb   :  { %16115 = sst [smem:[#allocation49_spill]] %s16065_s10 }
   0xc   :  { %16116 = sst [smem:[#allocation50_spill]] %s16066_s11 }
   0xd   :  { %16117 = sst [smem:[#allocation51_spill]] %s16067_s12 }
   0xe   :  { %16118 = sst [smem:[#allocation52_spill]] %s16068_s13 }
   0xf   :  { %16119 = sst [smem:[#allocation53_spill]] %s16069_s14 }
  0x10   :  { %19 = vsyncpa [#allocation3], 0 }
  0x11   :  { %21 = vsyncpa [#allocation3 + $0x1], 0 }
  0x12   :  { %22 = vsyncpa [#allocation6], 0 }
  0x13   :  { %24 = vsyncpa [#allocation6 + $0x1], 0 }
  0x14   :  { %25 = vsyncpa [#allocation9], 0 }
  0x15   :  { %27 = vsyncpa [#allocation9 + $0x1], 0 }
  0x16   :  { %28 = vsyncpa [#allocation12], 0 }
  0x17   :  { %30 = vsyncpa [#allocation12 + $0x1], 0 }
  0x18   :  { %31 = vsyncpa [#allocation15], 0 }
  0x19   :  { %33 = vsyncpa [#allocation15 + $0x1], 0 }
  0x1a   :  { %34 = vsyncpa [#allocation18], 0 }
  0x1b   :  { %36 = vsyncpa [#allocation18 + $0x1], 0 }
  0x1c   :  { %37 = vsyncpa [#allocation4], 0 }
  0x1d   :  { %39 = vsyncpa [#allocation4 + $0x1], 0  ;;  %s13570_s29 = smov 0   ;;  %s13572_s30 = smov 0  }
  0x1e   :  { %s13574_s15 = smov 0   ;;  %s13576_s16 = smov 0  }
  0x1f   :  { %s13578_s17 = smov 0   ;;  %s13580_s18 = smov 0  }
  0x20   :  { %s13582_s19 = smov 0   ;;  %s13584_s20 = smov 0  }
  0x21   :  { %s13586_s21 = smov 0   ;;  %s13588_s22 = smov 0  }
  0x22   :  { %s13590_s23 = smov 0  }
  0x23 LB: > { %16120 = sst [smem:[#allocation27_spill]] %s13442_s15  ;;  %p16076_p0 = scmp.eq.s32.totalorder %s13474_s23, 0  ;;  %s13474_s23 = sphi %s13590_s23, %s45_s23   ;;  %s13470_s22 = sphi %s13588_s22, %s16212_s22   ;;  %s13466_s21 = sphi %s13586_s21, %s16211_s21   ;;  %s13462_s20 = sphi %s13584_s20, %s16210_s20   ;;  %s13458_s19 = sphi %s13582_s19, %s16209_s19   ;;  %s13454_s18 = sphi %s13580_s18, %s16208_s18   ;;  %s13450_s17 = sphi %s13578_s17, %s16207_s17   ;;  %s13446_s16 = sphi %s13576_s16, %s16206_s16   ;;  %s13442_s15 = sphi %s13574_s15, %s16205_s15   ;;  %s13438_s30 = sphi %s13572_s30, %s16214_s30   ;;  %s13434_s29 = sphi %s13570_s29, %s16213_s29  }
  0x24   : > { %16121 = sst [smem:[#allocation28_spill]] %s13450_s17  ;;  %p97_p1 = scmp.ne.s32.totalorder %s13442_s15, %s13438_s30 }
  0x25   : > { %16122 = sst [smem:[#allocation29_spill]] %s13454_s18  ;;  %p16075_p2 = scmp.lt.s32.totalorder %s13474_s23, 16 }
  0x26   : > { %16123 = sst [smem:[#allocation30_spill]] %s13458_s19  ;;  %s13631_s25 = sand.u32 1, %s13474_s23  }
  0x27   : > { %16124 = sst [smem:[#allocation31_spill]] %s13462_s20  ;;  %p99_p3 = por %p97_p1, %p16076_p0 }
  0x28   : > { %16125 = sst [smem:[#allocation32_spill]] %s13466_s21  ;;  %s13636_s26 = sand.u32 1, %s13442_s15  }
  0x29   : > { %16126 = sst [smem:[#allocation33_spill]] %s13470_s22  ;;  %s13639_s27 = sshll.u32 %s13466_s21, 5 }
  0x2a   : > { %s13642_s28 = sshll.u32 %s13636_s26, 1  ;;  %s16127_s1 = sld [smem:[#allocation40_spill]] }
  0x2b   : > { %p13652_p4 = pnand %p16075_p2, %p99_p3  ;;  %s490_s5 = scalar_lea.vmem [#allocation5], %s13642_s28 }
  0x2c   : > { %s498_s4 = sshll.u32 %s490_s5, 4  ;;  %s13658_s4 = int_to_ptr.vmem [resolvable:$true] %s498_s4 }
  0x2d   : > { %s16128_s10 = scalar_select %p13652_p4, 1, 0 }
  0x2e   : > { %p13665_p7 = pneg %p13652_p4 }
  0x30   : > { %s13648_s24 = scalar_lea.hbm %s16127_s1, %s13639_s27  ;;  %s13037_s12 = scalar_lea.hbm %s16127_s1, 256 }
  0x31   : > { %s13032_s14 = scalar_lea.hbm %s13648_s24, 32  ;;  %p13038_p10 = scmp.lt.u32.totalorder %s13648_s24, %s16127_s1 }
  0x32   : > { %p13033_p6 = scmp.ne.s32.totalorder %s13648_s24, %s13032_s14  ;;  %p13039_p11 = scmp.lt.u32.totalorder %s13037_s12, %s13032_s14 }
  0x33   : > { %p13041_p13 = scmp.lt.u32.totalorder %s13032_s14, %s13648_s24 }
  0x34   : > { %p13035_p8 = pnand %p13665_p7, %p13033_p6  ;;  %p13040_p12 = por %p13039_p11, %p13038_p10 }
  0x36   : > { %p13036_p9 = pneg %p13035_p8  ;;  %p13042_p1 = por %p13041_p13, %p13040_p12 }
  0x38   : > { %p13043_p3 = pnand %p13042_p1, %p13036_p9 }
  0x3a   : > { %13046 = shalt.err (!%p13043_p3)
}
  0x3b   : > { %s13047_s3 = scalar_lea.vmem %s13658_s4, 32  ;;  %s13476_s13 = smov [#allocation5]  }
  0x3c   : > { %p13048_p6 = scmp.ne.s32.totalorder %s13658_s4, %s13047_s3  ;;  %s13052_s19 = sshll.u32 %s13476_s13, 4  ;;  %s13053_s19 = int_to_ptr.vmem [resolvable:$false] %s13052_s19 }
  0x3d   : > { %s13054_s9 = scalar_lea.vmem %s13053_s19, 64  ;;  %p13055_p0 = scmp.lt.s32.totalorder %s13658_s4, %s13053_s19 }
  0x3e   : > { %p13050_p8 = pnand %p13048_p6, %p13665_p7  ;;  %p13056_p5 = scmp.lt.s32.totalorder %s13054_s9, %s13047_s3 }
  0x40   : > { %p13051_p2 = pneg %p13050_p8  ;;  %p13057_p10 = por %p13056_p5, %p13055_p0 }
  0x42   : > { %p13058_p11 = pnand %p13057_p10, %p13051_p2 }
  0x44   : > { %13061 = shalt.err (!%p13058_p11)
}
  0x45   : > { %s16130_s12 = scalar_lea.sflag [#allocation6], %s13631_s25  ;;  %p691_p9 = scmp.lt.s32.totalorder %s13474_s23, 17 }
  0x46   : > { %12065 = dma.hbm_to_vmem [thread:$0]  (!%p13652_p4), %s13648_s24, 32, %s13658_s4, %s16130_s12  }
  0x47   : > { %s10287_s14 = sshll.u32 %s13636_s26, 8  ;;  %s11057_s5 = sshll.u32 %s13466_s21, 12 }
  0x48   : > { %p16131_p12 = scmp.ge.s32.totalorder %s13474_s23, 1  ;;  %s16134_s6 = sld [smem:[#allocation45_spill]] }
  0x49   : > { %s552_s1 = scalar_lea.vmem [#allocation8], %s10287_s14  ;;  %s16086_s4 = scalar_lea.sflag [#allocation9], %s13631_s25 }
  0x4a   : > { %p13695_p0 = pnand %p16131_p12, %p691_p9  ;;  %s559_s7 = sshll.u32 %s552_s1, 4  ;;  %s13704_s7 = int_to_ptr.vmem [resolvable:$true] %s559_s7 }
  0x4c   : > { %s16132_s3 = scalar_select %p13695_p0, 1, 0 }
  0x4e   : > { %16133 = sst [smem:[#allocation34_spill]] %s16132_s3  ;;  %s13702_s9 = scalar_lea.hbm %s16134_s6, %s11057_s5 }
  0x4f   : > { %s13062_s24 = scalar_lea.hbm %s13702_s9, 4096  ;;  %s13067_s13 = scalar_lea.hbm %s16134_s6, 32768 }
  0x50   : > { %p13063_p2 = scmp.ne.s32.totalorder %s13702_s9, %s13062_s24  ;;  %p13068_p1 = scmp.lt.u32.totalorder %s13702_s9, %s16134_s6 }
  0x51   : > { %p13069_p3 = scmp.lt.u32.totalorder %s13067_s13, %s13062_s24  ;;  %p13071_p8 = scmp.lt.u32.totalorder %s13062_s24, %s13702_s9 }
  0x52   : > { %p13065_p5 = pnand %p13063_p2, %p13665_p7 }
  0x53   : > { %p13070_p6 = por %p13069_p3, %p13068_p1 }
  0x54   : > { %p13066_p13 = pneg %p13065_p5 }
  0x55   : > { %p13072_p10 = por %p13071_p8, %p13070_p6 }
  0x57   : > { %p13073_p11 = pnand %p13072_p10, %p13066_p13 }
  0x59   : > { %13076 = shalt.err (!%p13073_p11)
}
  0x5a   : > { %s13077_s1 = scalar_lea.vmem %s13704_s7, 4096  ;;  %s13477_s14 = smov [#allocation8]  }
  0x5b   : > { %p13078_p9 = scmp.ne.s32.totalorder %s13704_s7, %s13077_s1  ;;  %s13082_s3 = sshll.u32 %s13477_s14, 4  ;;  %s13083_s3 = int_to_ptr.vmem [resolvable:$false] %s13082_s3 }
  0x5c   : > { %s13084_s12 = scalar_lea.vmem %s13083_s3, 8192  ;;  %p13085_p5 = scmp.lt.s32.totalorder %s13704_s7, %s13083_s3 }
  0x5d   : > { %p13080_p12 = pnand %p13078_p9, %p13665_p7  ;;  %p13086_p0 = scmp.lt.s32.totalorder %s13084_s12, %s13077_s1 }
  0x5f   : > { %p13081_p2 = pneg %p13080_p12  ;;  %p13087_p1 = por %p13086_p0, %p13085_p5 }
  0x61   : > { %p13088_p3 = pnand %p13087_p1, %p13081_p2 }
  0x63   : > { %13091 = shalt.err (!%p13088_p3)
}
  0x64   : > { %s16080_s24 = smov 128   ;;  %s16081_s13 = smov 8  }
  0x65   : > { %12071 = dma.hbm_to_vmem [thread:$0]  (!%p13652_p4), %s13702_s9, 4096, %s13704_s7, %s16086_s4, %s16080_s24, %s16080_s24, %s16081_s13  }
  0x66   : > { %s16135_s8 = sld [smem:[#allocation47_spill]]  ;;  %s592_s14 = scalar_lea.vmem [#allocation11], %s13642_s28 }
  0x67   : > { %s600_s3 = sshll.u32 %s592_s14, 4  ;;  %s10299_s12 = sshll.u32 %s13636_s26, 3  ;;  %s13740_s3 = int_to_ptr.vmem [resolvable:$true] %s600_s3 }
  0x68   : > { %s16082_s6 = scalar_lea.sflag [#allocation12], %s13631_s25 }
  0x6c   : > { %s13737_s1 = scalar_lea.hbm %s16135_s8, %s13639_s27  ;;  %s13097_s5 = scalar_lea.hbm %s16135_s8, 256 }
  0x6d   : > { %s13092_s2 = scalar_lea.hbm %s13737_s1, 32  ;;  %p13098_p8 = scmp.lt.u32.totalorder %s13737_s1, %s16135_s8 }
  0x6e   : > { %p13093_p0 = scmp.ne.s32.totalorder %s13737_s1, %s13092_s2  ;;  %p13099_p10 = scmp.lt.u32.totalorder %s13097_s5, %s13092_s2 }
  0x6f   : > { %p13101_p9 = scmp.lt.u32.totalorder %s13092_s2, %s13737_s1 }
  0x70   : > { %p13095_p13 = pnand %p13093_p0, %p13665_p7  ;;  %p13100_p11 = por %p13099_p10, %p13098_p8 }
  0x72   : > { %p13096_p6 = pneg %p13095_p13  ;;  %p13102_p12 = por %p13101_p9, %p13100_p11 }
  0x74   : > { %p13103_p2 = pnand %p13102_p12, %p13096_p6 }
  0x76   : > { %13106 = shalt.err (!%p13103_p2)
}
  0x77   : > { %s13107_s14 = scalar_lea.vmem %s13740_s3, 32  ;;  %s13480_s7 = smov [#allocation11]  }
  0x78   : > { %p13108_p5 = scmp.ne.s32.totalorder %s13740_s3, %s13107_s14  ;;  %s13112_s9 = sshll.u32 %s13480_s7, 4  ;;  %s13113_s9 = int_to_ptr.vmem [resolvable:$false] %s13112_s9 }
  0x79   : > { %s13114_s24 = scalar_lea.vmem %s13113_s9, 64  ;;  %p13115_p0 = scmp.lt.s32.totalorder %s13740_s3, %s13113_s9 }
  0x7a   : > { %p13110_p1 = pnand %p13108_p5, %p13665_p7  ;;  %p13116_p13 = scmp.lt.s32.totalorder %s13114_s24, %s13107_s14 }
  0x7c   : > { %p13111_p3 = pneg %p13110_p1  ;;  %p13117_p8 = por %p13116_p13, %p13115_p0 }
  0x7e   : > { %p13118_p10 = pnand %p13117_p8, %p13111_p3 }
  0x80   : > { %13121 = shalt.err (!%p13118_p10)
}
  0x81   : > { %12077 = dma.hbm_to_vmem [thread:$0]  (!%p13652_p4), %s13737_s1, 32, %s13740_s3, %s16082_s6  }
  0x82   : > { %s11061_s2 = sshll.u32 %s13466_s21, 7  ;;  %s16136_s11 = sld [smem:[#allocation50_spill]] }
  0x83   : > { %s638_s14 = scalar_lea.vmem [#allocation14], %s10299_s12  ;;  %s16085_s24 = scalar_lea.sflag [#allocation15], %s13631_s25 }
  0x84   : > { %s646_s9 = sshll.u32 %s638_s14, 4  ;;  %s647_s9 = int_to_ptr.vmem [resolvable:$true] %s646_s9 }
  0x88   : > { %s13771_s7 = scalar_lea.hbm %s16136_s11, %s11061_s2  ;;  %s13127_s5 = scalar_lea.hbm %s16136_s11, 1024 }
  0x89   : > { %s13122_s13 = scalar_lea.hbm %s13771_s7, 128  ;;  %p13128_p12 = scmp.lt.u32.totalorder %s13771_s7, %s16136_s11 }
  0x8a   : > { %p13123_p6 = scmp.ne.s32.totalorder %s13771_s7, %s13122_s13  ;;  %p13129_p2 = scmp.lt.u32.totalorder %s13127_s5, %s13122_s13 }
  0x8b   : > { %p13131_p1 = scmp.lt.u32.totalorder %s13122_s13, %s13771_s7 }
  0x8c   : > { %p13125_p11 = pnand %p13123_p6, %p13665_p7  ;;  %p13130_p5 = por %p13129_p2, %p13128_p12 }
  0x8e   : > { %p13126_p9 = pneg %p13125_p11  ;;  %p13132_p3 = por %p13131_p1, %p13130_p5 }
  0x90   : > { %p13133_p0 = pnand %p13132_p3, %p13126_p9 }
  0x92   : > { %13136 = shalt.err (!%p13133_p0)
}
  0x93   : > { %s13137_s12 = scalar_lea.vmem %s647_s9, 128  ;;  %s13481_s14 = smov [#allocation14]  }
  0x94   : > { %p13138_p13 = scmp.ne.s32.totalorder %s647_s9, %s13137_s12  ;;  %s13142_s6 = sshll.u32 %s13481_s14, 4  ;;  %s13143_s6 = int_to_ptr.vmem [resolvable:$false] %s13142_s6 }
  0x95   : > { %s13144_s1 = scalar_lea.vmem %s13143_s6, 256  ;;  %p13145_p6 = scmp.lt.s32.totalorder %s647_s9, %s13143_s6 }
  0x96   : > { %p13140_p8 = pnand %p13138_p13, %p13665_p7  ;;  %p13146_p11 = scmp.lt.s32.totalorder %s13144_s1, %s13137_s12 }
  0x98   : > { %p13141_p10 = pneg %p13140_p8  ;;  %p13147_p4 = por %p13146_p11, %p13145_p6 }
  0x9a   : > { %p13148_p2 = pnand %p13147_p4, %p13141_p10 }
  0x9c   : > { %13151 = shalt.err (!%p13148_p2)
}
  0x9d   : > { %p16137_p12 = scmp.ne.s32.totalorder %s16128_s10, 0  ;;  %s13796_s6 = sadd.s32 4294967295, %s13474_s23  }
  0x9e   : > { %s10275_s13 = sadd.s32 4294967294, %s13474_s23   ;;  %s54_s3 = sadd.s32 1, %s13466_s21 }
  0x9f   : > { %12083 = dma.hbm_to_vmem [thread:$0]  (!%p16137_p12), %s13771_s7, 128, %s647_s9, %s16085_s24  }
  0xa0   : > { %p55_p4 = scmp.ge.s32.totalorder %s54_s3, 8  ;;  %s57_s5 = sadd.s32 1, %s13470_s22 }
  0xa1   : > { %s64_s2 = sadd.s32 1, %s13454_s18  ;;  %p71_p9 = scmp.ne.s32.totalorder %s13454_s18, %s13450_s17 }
  0xa2   : > { %s16216_s3 = smov (%p55_p4, %s54_s3), 0  ;;  %s16218_s5 = smov (!%p55_p4, %s57_s5), %s13470_s22 }
  0xa3   : > { %16138 = sst [smem:[#allocation35_spill]] %s16216_s3  ;;  %p16139_p5 = scmp.eq.s32.totalorder %s13474_s23, 0 }
  0xa4   : > { %p77_p3 = scmp.ne.s32.totalorder %s13450_s17, %s13446_s16  ;;  %p59_p0 = scmp.ge.s32.totalorder %s16218_s5, 2 }
  0xa5   : > { %p13812_p1 = por %p16139_p5, %p71_p9  ;;  %p78_p13 = scmp.eq.s32.totalorder %s13796_s6, 0 }
  0xa6   : > { %s87_s9 = ssub.s32 %s13466_s21, %s16216_s3  ;;  %p103_p8 = scmp.ne.s32.totalorder %s13438_s30, %s13434_s29 }
  0xa7   : > { %s16220_s5 = smov (%p59_p0, %s16218_s5), 0  ;;  %p13828_p10 = por %p78_p13, %p77_p3 }
  0xa8   : > { %16141 = sst [smem:[#allocation36_spill]] %s16220_s5  ;;  %p88_p6 = scmp.eq.s32.totalorder %s87_s9, 0 }
  0xa9   : > { %s16142_s19 = scalar_select %p13828_p10, 1, 0 }
  0xaa   : > { %s61_s12 = ssub.s32 %s13470_s22, %s16220_s5  ;;  %p13834_p11 = por %p103_p8, %p78_p13 }
  0xab   : > { %p62_p2 = scmp.eq.s32.totalorder %s61_s12, 0  ;;  %p439_p4 = scmp.eq.s32.totalorder %s13796_s6, 15 }
  0xac   : > { %s16143_s14 = scalar_select %p13834_p11, 1, 0 }
  0xad   : > { %s16144_s1 = sadd.s32 1, %s13442_s15  ;;  %p13850_p5 = por %p439_p4, %p71_p9 }
  0xae   : > { %s13842_s29 = scalar_select %p88_p6, %s13442_s15, %s16144_s1  }
  0xaf   : > { %s13845_s24 = scalar_select %p62_p2, %s13454_s18, %s64_s2  }
  0xb0   : > { %16145 = sst [smem:[#allocation37_spill]] %s13842_s29  ;;  %p445_p0 = scmp.eq.s32.totalorder %s10275_s13, 15 }
  0xb1   : > { %16146 = sst [smem:[#allocation38_spill]] %s13845_s24  ;;  %s465_s8 = sand.u32 1, %s13454_s18  }
  0xb2   : > { %s16147_s4 = scalar_select %p13850_p5, 1, 0 }
  0xb3   : > { %s11054_s9 = sshll.u32 %s13470_s22, 10  ;;  %p13859_p13 = por %p445_p0, %p77_p3 }
  0xb4   : > { %s10278_s12 = sshll.u32 %s465_s8, 6  ;;  %s16149_s0 = sld [smem:[#allocation39_spill]] }
  0xb5   : > { %s16148_s11 = scalar_select %p13859_p13, 1, 0 }
  0xb6   : > { %p16150_p8 = scmp.lt.s32.totalorder %s13474_s23, 16  ;;  %s469_s2 = scalar_lea.vmem [#allocation2], %s10278_s12 }
  0xb7   : > { %s476_s22 = sshll.u32 %s469_s2, 4  ;;  %s13878_s24 = scalar_lea.sflag [#allocation3], %s465_s8  ;;  %s13876_s22 = int_to_ptr.vmem [resolvable:$true] %s476_s22 }
  0xb8   : > { %p13872_p9 = pnand %p16150_p8, %p13812_p1 }
  0xba   : > { %s13866_s1 = scalar_lea.hbm %s16149_s0, %s11054_s9  ;;  %p13154_p6 = pneg %p13872_p9 }
  0xbb   : > { %s13152_s3 = scalar_lea.hbm %s13866_s1, 1024  ;;  %s13157_s9 = scalar_lea.hbm %s16149_s0, 2048 }
  0xbc   : > { %p13153_p3 = scmp.ne.s32.totalorder %s13866_s1, %s13152_s3  ;;  %p13158_p1 = scmp.lt.u32.totalorder %s13866_s1, %s16149_s0 }
  0xbd   : > { %p13159_p0 = scmp.lt.u32.totalorder %s13157_s9, %s13152_s3  ;;  %p13161_p13 = scmp.lt.u32.totalorder %s13152_s3, %s13866_s1 }
  0xbe   : > { %p13155_p2 = pnand %p13154_p6, %p13153_p3 }
  0xbf   : > { %p13160_p8 = por %p13159_p0, %p13158_p1 }
  0xc0   : > { %p13156_p4 = pneg %p13155_p2 }
  0xc1   : > { %p13162_p5 = por %p13161_p13, %p13160_p8 }
  0xc3   : > { %p13163_p11 = pnand %p13162_p5, %p13156_p4 }
  0xc5   : > { %13166 = shalt.err (!%p13163_p11)
}
  0xc6   : > { %s13167_s8 = scalar_lea.vmem %s13876_s22, 1024  ;;  %s13482_s12 = smov [#allocation2]  }
  0xc7   : > { %p13168_p3 = scmp.ne.s32.totalorder %s13876_s22, %s13167_s8  ;;  %s13172_s2 = sshll.u32 %s13482_s12, 4  ;;  %s13173_s2 = int_to_ptr.vmem [resolvable:$false] %s13172_s2 }
  0xc8   : > { %s13174_s18 = scalar_lea.vmem %s13173_s2, 2048  ;;  %p13175_p12 = scmp.lt.s32.totalorder %s13876_s22, %s13173_s2 }
  0xc9   : > { %p13170_p2 = pnand %p13168_p3, %p13154_p6  ;;  %p13176_p1 = scmp.lt.s32.totalorder %s13174_s18, %s13167_s8 }
  0xcb   : > { %p13171_p10 = pneg %p13170_p2  ;;  %p13177_p0 = por %p13176_p1, %p13175_p12 }
  0xcd   : > { %p13178_p13 = pnand %p13177_p0, %p13171_p10 }
  0xcf   : > { %13181 = shalt.err (!%p13178_p13)
}
  0xd0   : > { %s13483_s29 = smov 256   ;;  %s13484_s3 = smov 16  }
  0xd1   : > { %12062 = dma.hbm_to_vmem [thread:$0]  (!%p13872_p9), %s13866_s1, 1024, %s13876_s22, %s13878_s24, %s13483_s29, %s13483_s29, %s13484_s3  }
  0xd2   : > { %s16152_s9 = sld [smem:[#allocation41_spill]]  ;;  %s509_s8 = scalar_lea.vmem [#allocation7], %s13642_s28 }
  0xd3   : > { %s517_s2 = sshll.u32 %s509_s8, 4  ;;  %s518_s2 = int_to_ptr.vmem [resolvable:$true] %s517_s2 }
  0xd8   : > { %s13910_s12 = scalar_lea.hbm %s16152_s9, %s13639_s27  ;;  %s13187_s22 = scalar_lea.hbm %s16152_s9, 256 }
  0xd9   : > { %s13182_s18 = scalar_lea.hbm %s13910_s12, 32  ;;  %p13188_p5 = scmp.lt.u32.totalorder %s13910_s12, %s16152_s9 }
  0xda   : > { %p13183_p12 = scmp.ne.s32.totalorder %s13910_s12, %s13182_s18  ;;  %p13189_p9 = scmp.lt.u32.totalorder %s13187_s22, %s13182_s18 }
  0xdb   : > { %p13191_p4 = scmp.lt.u32.totalorder %s13182_s18, %s13910_s12 }
  0xdc   : > { %p13185_p10 = pnand %p13183_p12, %p13665_p7  ;;  %p13190_p6 = por %p13189_p9, %p13188_p5 }
  0xde   : > { %p13186_p11 = pneg %p13185_p10  ;;  %p13192_p8 = por %p13191_p4, %p13190_p6 }
  0xe0   : > { %p13193_p3 = pnand %p13192_p8, %p13186_p11 }
  0xe2   : > { %13196 = shalt.err (!%p13193_p3)
}
  0xe3   : > { %s13197_s29 = scalar_lea.vmem %s518_s2, 32  ;;  %s13485_s3 = smov [#allocation7]  }
  0xe4   : > { %p13198_p2 = scmp.ne.s32.totalorder %s518_s2, %s13197_s29  ;;  %s13202_s5 = sshll.u32 %s13485_s3, 4  ;;  %s13203_s5 = int_to_ptr.vmem [resolvable:$false] %s13202_s5 }
  0xe5   : > { %s13204_s0 = scalar_lea.vmem %s13203_s5, 64  ;;  %p13205_p13 = scmp.lt.s32.totalorder %s518_s2, %s13203_s5 }
  0xe6   : > { %p13200_p1 = pnand %p13198_p2, %p13665_p7  ;;  %p13206_p12 = scmp.lt.s32.totalorder %s13204_s0, %s13197_s29 }
  0xe8   : > { %p13201_p0 = pneg %p13200_p1  ;;  %p13207_p10 = por %p13206_p12, %p13205_p13 }
  0xea   : > { %p13208_p5 = pnand %p13207_p10, %p13201_p0 }
  0xec   : > { %13211 = shalt.err (!%p13208_p5)
}
  0xed   : > { %p16153_p9 = scmp.ne.s32.totalorder %s16128_s10, 0  ;;  %s16154_s7 = scalar_lea.sflag [#allocation6], %s13631_s25 }
  0xee   : > { %s16155_s13 = sld [smem:[#allocation46_spill]]  ;;  %s573_s24 = scalar_lea.vmem [#allocation10], %s13642_s28 }
  0xef   : > { %12068 = dma.hbm_to_vmem [thread:$0]  (!%p16153_p9), %s13910_s12, 32, %s518_s2, %s16154_s7  }
  0xf0   : > { %s581_s1 = sshll.u32 %s573_s24, 4  ;;  %s582_s1 = int_to_ptr.vmem [resolvable:$true] %s581_s1 }
  0xf4   : > { %s13936_s22 = scalar_lea.hbm %s16155_s13, %s13639_s27  ;;  %s13217_s12 = scalar_lea.hbm %s16155_s13, 256 }
  0xf5   : > { %s13212_s29 = scalar_lea.hbm %s13936_s22, 32  ;;  %p13218_p8 = scmp.lt.u32.totalorder %s13936_s22, %s16155_s13 }
  0xf6   : > { %p13213_p11 = scmp.ne.s32.totalorder %s13936_s22, %s13212_s29  ;;  %p13219_p3 = scmp.lt.u32.totalorder %s13217_s12, %s13212_s29 }
  0xf7   : > { %p13221_p1 = scmp.lt.u32.totalorder %s13212_s29, %s13936_s22 }
  0xf8   : > { %p13215_p6 = pnand %p13213_p11, %p13665_p7  ;;  %p13220_p2 = por %p13219_p3, %p13218_p8 }
  0xfa   : > { %p13216_p4 = pneg %p13215_p6  ;;  %p13222_p0 = por %p13221_p1, %p13220_p2 }
  0xfc   : > { %p13223_p13 = pnand %p13222_p0, %p13216_p4 }
  0xfe   : > { %13226 = shalt.err (!%p13223_p13)
}
  0xff   : > { %s13227_s7 = scalar_lea.vmem %s582_s1, 32  ;;  %s13486_s8 = smov [#allocation10]  }
 0x100   : > { %p13228_p12 = scmp.ne.s32.totalorder %s582_s1, %s13227_s7  ;;  %s13232_s18 = sshll.u32 %s13486_s8, 4  ;;  %s13233_s18 = int_to_ptr.vmem [resolvable:$false] %s13232_s18 }
 0x101   : > { %s13234_s24 = scalar_lea.vmem %s13233_s18, 64  ;;  %p13235_p11 = scmp.lt.s32.totalorder %s582_s1, %s13233_s18 }
 0x102   : > { %p13230_p10 = pnand %p13228_p12, %p13665_p7  ;;  %p13236_p6 = scmp.lt.s32.totalorder %s13234_s24, %s13227_s7 }
 0x104   : > { %p13231_p5 = pneg %p13230_p10  ;;  %p13237_p9 = por %p13236_p6, %p13235_p11 }
 0x106   : > { %p13238_p3 = pnand %p13237_p9, %p13231_p5 }
 0x108   : > { %13241 = shalt.err (!%p13238_p3)
}
 0x109   : > { %p16156_p8 = scmp.ne.s32.totalorder %s16128_s10, 0  ;;  %s16157_s29 = scalar_lea.sflag [#allocation9], %s13631_s25 }
 0x10a   : > { %s16158_s12 = sld [smem:[#allocation48_spill]]  ;;  %s611_s0 = scalar_lea.vmem [#allocation13], %s13642_s28 }
 0x10b   : > { %12074 = dma.hbm_to_vmem [thread:$0]  (!%p16156_p8), %s13936_s22, 32, %s582_s1, %s16157_s29  }
 0x10c   : > { %s619_s7 = sshll.u32 %s611_s0, 4  ;;  %s620_s7 = int_to_ptr.vmem [resolvable:$true] %s619_s7 }
 0x110   : > { %s13962_s2 = scalar_lea.hbm %s16158_s12, %s13639_s27  ;;  %s13247_s1 = scalar_lea.hbm %s16158_s12, 256 }
 0x111   : > { %s13242_s18 = scalar_lea.hbm %s13962_s2, 32  ;;  %p13248_p1 = scmp.lt.u32.totalorder %s13962_s2, %s16158_s12 }
 0x112   : > { %p13243_p9 = scmp.ne.s32.totalorder %s13962_s2, %s13242_s18  ;;  %p13249_p0 = scmp.lt.u32.totalorder %s13247_s1, %s13242_s18 }
 0x113   : > { %p13251_p12 = scmp.lt.u32.totalorder %s13242_s18, %s13962_s2 }
 0x114   : > { %p13245_p4 = pnand %p13243_p9, %p13665_p7  ;;  %p13250_p13 = por %p13249_p0, %p13248_p1 }
 0x116   : > { %p13246_p2 = pneg %p13245_p4  ;;  %p13252_p10 = por %p13251_p12, %p13250_p13 }
 0x118   : > { %p13253_p5 = pnand %p13252_p10, %p13246_p2 }
 0x11a   : > { %13256 = shalt.err (!%p13253_p5)
}
 0x11b   : > { %s13257_s5 = scalar_lea.vmem %s620_s7, 32  ;;  %s13487_s0 = smov [#allocation13]  }
 0x11c   : > { %p13258_p11 = scmp.ne.s32.totalorder %s620_s7, %s13257_s5  ;;  %s13262_s8 = sshll.u32 %s13487_s0, 4  ;;  %s13263_s8 = int_to_ptr.vmem [resolvable:$false] %s13262_s8 }
 0x11d   : > { %s13264_s24 = scalar_lea.vmem %s13263_s8, 64  ;;  %p13265_p9 = scmp.lt.s32.totalorder %s620_s7, %s13263_s8 }
 0x11e   : > { %p13260_p6 = pnand %p13258_p11, %p13665_p7  ;;  %p13266_p4 = scmp.lt.s32.totalorder %s13264_s24, %s13257_s5 }
 0x120   : > { %p13261_p3 = pneg %p13260_p6  ;;  %p13267_p8 = por %p13266_p4, %p13265_p9 }
 0x122   : > { %p13268_p0 = pnand %p13267_p8, %p13261_p3 }
 0x124   : > { %13271 = shalt.err (!%p13268_p0)
}
 0x125   : > { %p16159_p1 = scmp.ne.s32.totalorder %s16128_s10, 0  ;;  %s16160_s18 = scalar_lea.sflag [#allocation12], %s13631_s25 }
 0x126   : > { %s11062_s22 = sshll.u32 %s13466_s21, 14  ;;  %s16161_s3 = sld [smem:[#allocation51_spill]] }
 0x127   : > { %12080 = dma.hbm_to_vmem [thread:$0]  (!%p16159_p1), %s13962_s2, 32, %s620_s7, %s16160_s18  }
 0x128   : > { %s16162_s8 = sshll.u32 %s13636_s26, 10 }
 0x129   : > { %s657_s5 = scalar_lea.vmem [#allocation16], %s16162_s8 }
 0x12a   : > { %s664_s24 = sshll.u32 %s657_s5, 4  ;;  %s13993_s24 = int_to_ptr.vmem [resolvable:$true] %s664_s24 }
 0x12c   : > { %s13989_s0 = scalar_lea.hbm %s16161_s3, %s11062_s22  ;;  %s13277_s18 = scalar_lea.hbm %s16161_s3, 131072 }
 0x12d   : > { %s13272_s9 = scalar_lea.hbm %s13989_s0, 16384  ;;  %p13278_p12 = scmp.lt.u32.totalorder %s13989_s0, %s16161_s3 }
 0x12e   : > { %p13273_p8 = scmp.ne.s32.totalorder %s13989_s0, %s13272_s9  ;;  %p13279_p10 = scmp.lt.u32.totalorder %s13277_s18, %s13272_s9 }
 0x12f   : > { %p13281_p11 = scmp.lt.u32.totalorder %s13272_s9, %s13989_s0 }
 0x130   : > { %p13275_p2 = pnand %p13273_p8, %p13665_p7  ;;  %p13280_p5 = por %p13279_p10, %p13278_p12 }
 0x132   : > { %p13276_p13 = pneg %p13275_p2  ;;  %p13282_p6 = por %p13281_p11, %p13280_p5 }
 0x134   : > { %p13283_p3 = pnand %p13282_p6, %p13276_p13 }
 0x136   : > { %13286 = shalt.err (!%p13283_p3)
}
 0x137   : > { %s13287_s29 = scalar_lea.vmem %s13993_s24, 16384  ;;  %s13488_s8 = smov [#allocation16]  }
 0x138   : > { %p13288_p9 = scmp.ne.s32.totalorder %s13993_s24, %s13287_s29  ;;  %s13292_s5 = sshll.u32 %s13488_s8, 4  ;;  %s13293_s5 = int_to_ptr.vmem [resolvable:$false] %s13292_s5 }
 0x139   : > { %s13294_s2 = scalar_lea.vmem %s13293_s5, 32768  ;;  %p13295_p8 = scmp.lt.s32.totalorder %s13993_s24, %s13293_s5 }
 0x13a   : > { %p13290_p4 = pnand %p13288_p9, %p13665_p7  ;;  %p13296_p2 = scmp.lt.s32.totalorder %s13294_s2, %s13287_s29 }
 0x13c   : > { %p13291_p0 = pneg %p13290_p4  ;;  %p13297_p12 = por %p13296_p2, %p13295_p8 }
 0x13e   : > { %p13298_p10 = pnand %p13297_p12, %p13291_p0 }
 0x140   : > { %13301 = shalt.err (!%p13298_p10)
}
 0x141   : > { %s16163_s9 = smov 8   ;;  %s16164_s7 = smov 128  }
 0x142   : > { %s16165_s18 = scalar_lea.sflag [#allocation15], %s13631_s25  ;;  %s16166_s29 = sld [smem:[#allocation52_spill]] }
 0x143   : > { %12086 = dma.hbm_to_vmem [thread:$0]  (!%p16159_p1), %s13989_s0, 16384, %s13993_s24, %s16165_s18, %s16164_s7, %s16164_s7, %s16163_s9  }
 0x144   : > { %s678_s2 = scalar_lea.vmem [#allocation17], %s13642_s28  ;;  %s675_s25 = scalar_lea.sflag [#allocation18], %s13636_s26 }
 0x145   : > { %s686_s3 = sshll.u32 %s678_s2, 4  ;;  %s687_s3 = int_to_ptr.vmem [resolvable:$true] %s686_s3 }
 0x148   : > { %s16167_s8 = smov %s16166_s29  ;;  %s14025_s5 = scalar_lea.hbm %s16166_s29, %s13639_s27 }
 0x149   : > { %s13302_s12 = scalar_lea.hbm %s14025_s5, 32  ;;  %s13307_s24 = scalar_lea.hbm %s16167_s8, 256 }
 0x14a   : > { %p13303_p13 = scmp.ne.s32.totalorder %s14025_s5, %s13302_s12  ;;  %p13308_p6 = scmp.lt.u32.totalorder %s14025_s5, %s16167_s8 }
 0x14b   : > { %p13309_p3 = scmp.lt.u32.totalorder %s13307_s24, %s13302_s12  ;;  %p13311_p4 = scmp.lt.u32.totalorder %s13302_s12, %s14025_s5 }
 0x14c   : > { %p13305_p5 = pnand %p13303_p13, %p13665_p7 }
 0x14d   : > { %p13310_p9 = por %p13309_p3, %p13308_p6 }
 0x14e   : > { %p13306_p11 = pneg %p13305_p5 }
 0x14f   : > { %p13312_p0 = por %p13311_p4, %p13310_p9 }
 0x151   : > { %p13313_p8 = pnand %p13312_p0, %p13306_p11 }
 0x153   : > { %13316 = shalt.err (!%p13313_p8)
}
 0x154   : > { %s13317_s26 = scalar_lea.vmem %s687_s3, 32  ;;  %s13489_s28 = smov [#allocation17]  }
 0x155   : > { %p13318_p2 = scmp.ne.s32.totalorder %s687_s3, %s13317_s26  ;;  %s13322_s7 = sshll.u32 %s13489_s28, 4  ;;  %s13323_s7 = int_to_ptr.vmem [resolvable:$false] %s13322_s7 }
 0x156   : > { %s13324_s13 = scalar_lea.vmem %s13323_s7, 64  ;;  %p13325_p13 = scmp.lt.s32.totalorder %s687_s3, %s13323_s7 }
 0x157   : > { %p13320_p12 = pnand %p13318_p2, %p13665_p7  ;;  %p13326_p5 = scmp.lt.s32.totalorder %s13324_s13, %s13317_s26 }
 0x159   : > { %p13321_p10 = pneg %p13320_p12  ;;  %p13327_p1 = por %p13326_p5, %p13325_p13 }
 0x15b   : > { %p13328_p3 = pnand %p13327_p1, %p13321_p10 }
 0x15d   : > { %13331 = shalt.err (!%p13328_p3)
}
 0x15e   : > { %p16168_p6 = scmp.ne.s32.totalorder %s16128_s10, 0  ;;  %s16169_s12 = sld [smem:[#allocation34_spill]] }
 0x160   : > { %12089 = dma.hbm_to_vmem [thread:$0]  (!%p16168_p6), %s14025_s5, 32, %s687_s3, %s675_s25  }
 0x164   : > { %p16170_p11 = scmp.ne.s32.totalorder %s16169_s12, 0 }
 0x165   : > { %s14049_s20 = sand.u32 (!%p16170_p11), 1, %s13450_s17   ;;  %p16171_p7 = scmp.ne.s32.totalorder (!%p16170_p11), %s16142_s19, 0 }
 0x166   : > { %695 = sbr.rel (%p16170_p11) target bundleno = 3266 (0xcc2), region = 76  ;;  %s16099_s18 = sshll.u32 (!%p16170_p11), %s14049_s20, 6 }
 0x167   : > { %s698_s22 = scalar_lea.sflag (!%p16170_p11), [#allocation3], %s14049_s20  ;;  %s14055_s1 = scalar_lea.vmem (!%p16170_p11), [#allocation2], %s16099_s18 }
 0x16d   : > { %13405 = dma.done.wait (%p16171_p7), %s698_s22, 1024  }
 0x16e   : > { %13407 = vsyncadd (%p16171_p7), %s698_s22, 4294966272  ;;  %s706_s10 = sand.u32 1, %s13796_s6   ;;  %s708_s3 = sand.u32 1, %s13438_s30  }
 0x16f   : > { %s14063_s29 = sshll.u32 %s708_s3, 1  ;;  %s707_s5 = scalar_lea.sflag [#allocation6], %s706_s10 }
 0x170   : > { %p16172_p1 = scmp.ne.s32.totalorder %s16143_s14, 0 }
 0x172   : > { %13409 = dma.done.wait (%p16172_p1), %s707_s5, 64  }
 0x173   : > { %13411 = vsyncadd (%p16172_p1), %s707_s5, 4294967232  ;;  %s10312_s25 = sshll.u32 %s708_s3, 8  ;;  %s725_s0 = scalar_lea.sflag [#allocation9], %s706_s10 }
 0x174   : > { %s14071_s24 = scalar_lea.vmem [#allocation8], %s10312_s25 }
 0x175   : > { %13413 = dma.done.wait (%p16172_p1), %s725_s0, 4128  }
 0x176   : > { %13415 = vsyncadd (%p16172_p1), %s725_s0, 4294963168  ;;  %s743_s9 = scalar_lea.sflag [#allocation12], %s706_s10 }
 0x177   : > { %13417 = dma.done.wait (%p16172_p1), %s743_s9, 64  }
 0x178   : > { %13419 = vsyncadd (%p16172_p1), %s743_s9, 4294967232  ;;  %s10316_s26 = sshll.u32 %s708_s3, 3  ;;  %s761_s7 = scalar_lea.sflag [#allocation15], %s706_s10 }
 0x179   : > { %s14084_s13 = scalar_lea.vmem [#allocation14], %s10316_s26 }
 0x17a   : > { %13421 = dma.done.wait (%p16172_p1), %s761_s7, 16512  }
 0x17b   : > { %13423 = vsyncadd (%p16172_p1), %s761_s7, 4294950784  ;;  %s10317_s12 = sshll.u32 %s708_s3, 10  ;;  %s779_s5 = scalar_lea.sflag [#allocation18], %s708_s3 }
 0x17c   : > { %s14090_s22 = scalar_lea.vmem [#allocation16], %s10317_s12 }
 0x17d   : > { %13425 = dma.done.wait (%p16172_p1), %s779_s5, 32  }
 0x17e   : > { %13427 = vsyncadd (%p16172_p1), %s779_s5, 4294967264  ;;  %s16173_s10 = sld [smem:[#allocation30_spill]]  ;;  %s16174_s28 = sld [smem:[#allocation42_spill]] }
 0x17f   : > { %s16175_s3 = sld [smem:[#allocation43_spill]]  ;;  %s16176_s14 = sld [smem:[#allocation44_spill]] }
 0x180   : > { %s16177_s21 = sld [smem:[#allocation49_spill]] }
 0x184   : > { %p892_p9 = scmp.lt.s32.totalorder %s16173_s10, 7  ;;  %p10328_p4 = scmp.ne.s32.totalorder %s16173_s10, 0 }
 0x185   : > { %v917_v0 = vld [vmem:[%s14055_s1] sm:$0xff] (!%p10328_p4)  ;;  %v918_v1 = vld [vmem:[%s14055_s1 + $0x8] sm:$0xff] (!%p10328_p4)  ;;  %v919_v2 = vld [vmem:[%s14055_s1 + $0x10] sm:$0xff] (!%p10328_p4) }
 0x186   : > { %s893_s0 = scalar_select %p892_p9, %s16173_s10, 7 }
 0x187   : > { %916 = sbr.rel (%p10328_p4) target bundleno = 400 (0x190), region = 120  ;;  %v920_v3 = vld [vmem:[%s14055_s1 + $0x18] sm:$0xff] (!%p10328_p4)  ;;  %v921_v4 = vld [vmem:[%s14055_s1 + $0x20] sm:$0xff] (!%p10328_p4)  ;;  %v922_v5 = vld [vmem:[%s14055_s1 + $0x28] sm:$0xff] (!%p10328_p4) }
 0x188   : > { %s11064_s9 = sshll.u32 %s893_s0, 10  ;;  %s16178_s0 = sshll.u32 %s14049_s20, 6  ;;  %v923_v6 = vld [vmem:[%s14055_s1 + $0x30] sm:$0xff] (!%p10328_p4)  ;;  %v924_v7 = vld [vmem:[%s14055_s1 + $0x38] sm:$0xff] (!%p10328_p4) }
 0x189   : > { %s14102_s27 = scalar_lea.vmem %s16174_s28, %s11064_s9  ;;  %s14107_s25 = scalar_lea.vmem %s16175_s3, %s11064_s9 }
 0x18a   : > { %s14112_s5 = scalar_lea.vmem %s16176_s14, %s11064_s9  ;;  %s14117_s17 = scalar_lea.vmem %s16177_s21, %s11064_s9 }
 0x18b   : > { %s14121_s15 = scalar_lea.vmem [#allocation19], %s16178_s0 }
 0x18c   : > { %925 = vst [vmem:[%s14121_s15] sm:$0xff] (!%p10328_p4), %v917_v0  ;;  %926 = vst [vmem:[%s14121_s15 + $0x8] sm:$0xff] (!%p10328_p4), %v918_v1 }
 0x18d   : > { %927 = vst [vmem:[%s14121_s15 + $0x10] sm:$0xff] (!%p10328_p4), %v919_v2  ;;  %928 = vst [vmem:[%s14121_s15 + $0x18] sm:$0xff] (!%p10328_p4), %v920_v3 }
 0x18e   : > { %929 = vst [vmem:[%s14121_s15 + $0x20] sm:$0xff] %v921_v4  ;;  %930 = vst [vmem:[%s14121_s15 + $0x28] sm:$0xff] %v922_v5 }
 0x18f   : > { %931 = vst [vmem:[%s14121_s15 + $0x30] sm:$0xff] %v923_v6  ;;  %932 = vst [vmem:[%s14121_s15 + $0x38] sm:$0xff] %v924_v7 }
 0x190 PF: > { %v12192_v20 = vld [vmem:[%s14102_s27 + $0x40] sm:$0xff]   ;;  %v12196_v24 = vld [vmem:[%s14102_s27 + $0x48] sm:$0xff]   ;;  %v12200_v56 = vld [vmem:[%s14102_s27 + $0x50] sm:$0xff]   ;;  %s16179_s21 = scalar_lea.vmem [#allocation5], %s14063_s29  ;;  %s16180_s8 = scalar_lea.vmem [#allocation7], %s14063_s29  ;;  %vm5330_vm0 = vcmask 261120  }
 0x191   : > { %v12193_v21 = vld [vmem:[%s14102_s27 + $0xc0] sm:$0xff]   ;;  %v12197_v25 = vld [vmem:[%s14102_s27 + $0xc8] sm:$0xff]   ;;  %11069 = vmatprep.subr.bf16.mxu0 %v12192_v20  ;;  %v12201_v57 = vld [vmem:[%s14102_s27 + $0xd0] sm:$0xff]   ;;  %v16104_v20 = vlaneseq  ;;  %s16196_s18 = scalar_lea.vmem [#allocation10], %s14063_s29  ;;  %s16197_s1 = scalar_lea.vmem [#allocation11], %s14063_s29 }
 0x192   : > { %v12194_v22 = vld [vmem:[%s14102_s27] sm:$0xff]   ;;  %11097 = vmatprep.subr.bf16.mxu1 %v12193_v21  ;;  %v12198_v54 = vld [vmem:[%s14102_s27 + $0x8] sm:$0xff]   ;;  %v12202_v58 = vld [vmem:[%s14102_s27 + $0x10] sm:$0xff]   ;;  %s16198_s2 = scalar_lea.vmem [#allocation13], %s14063_s29  ;;  %s16201_s28 = sld [smem:[#allocation53_spill]] }
 0x193   : > { %v12195_v23 = vld [vmem:[%s14102_s27 + $0x80] sm:$0xff]   ;;  %11070 = vmatpush3.bf16.msra.mxu0 %v12194_v22  ;;  %v12199_v55 = vld [vmem:[%s14102_s27 + $0x88] sm:$0xff]   ;;  %v12203_v59 = vld [vmem:[%s14102_s27 + $0x90] sm:$0xff]   ;;  %p16202_p8 = scmp.ne.s32.totalorder %s16147_s4, 0  ;;  %s13492_s10 = smov [#allocation19]  }
 0x194   : > { %11098 = vmatpush3.bf16.msra.mxu1 %v12195_v23  ;;  %11071 = vmatprep.subr.bf16.mxu0 %v12196_v24  ;;  %v12204_v60 = vld [vmem:[%s14102_s27 + $0x58] sm:$0xff]   ;;  %v12208_v0 = vld [vmem:[%s14102_s27 + $0x60] sm:$0xff]   ;;  %v12212_v4 = vld [vmem:[%s14102_s27 + $0x68] sm:$0xff]   ;;  %s13336_s9 = sshll.u32 %s13492_s10, 4  ;;  %s13337_s9 = int_to_ptr.vmem [resolvable:$false] %s13336_s9 }
 0x195   : > { %v933_v8 = vld [vmem:[%s14121_s15] sm:$0xff]  ;;  %v934_v9 = vld [vmem:[%s14121_s15 + $0x8] sm:$0xff]  ;;  %11099 = vmatprep.subr.bf16.mxu1 %v12197_v25  ;;  %v12205_v61 = vld [vmem:[%s14102_s27 + $0xd8] sm:$0xff]   ;;  %s13338_s26 = scalar_lea.vmem %s13337_s9, 2048 }
 0x196   : > { %v943_v11 = vadd.f32 %v934_v9, %v933_v8  ;;  %v935_v13 = vld [vmem:[%s14121_s15 + $0x10] sm:$0xff]  ;;  %v936_v14 = vld [vmem:[%s14121_s15 + $0x18] sm:$0xff]  ;;  %v12213_v5 = vld [vmem:[%s14102_s27 + $0xe8] sm:$0xff]  }
 0x197   : > { %v937_v10 = vld [vmem:[%s14121_s15 + $0x20] sm:$0xff]  ;;  %v938_v12 = vld [vmem:[%s14121_s15 + $0x28] sm:$0xff]  ;;  %v939_v16 = vld [vmem:[%s14121_s15 + $0x30] sm:$0xff]  ;;  %v946_v18 = vadd.f32 %v936_v14, %v935_v13  ;;  %11072 = vmatpush3.bf16.msra.mxu0 %v12198_v54 }
 0x198   : > { %v949_v15 = vadd.f32 %v938_v12, %v937_v10  ;;  %v940_v17 = vld [vmem:[%s14121_s15 + $0x38] sm:$0xff]  ;;  %944 = vadd.xlane.f32.xlu0 %v943_v11  ;;  %11100 = vmatpush3.bf16.msra.mxu1 %v12199_v55  ;;  %v12206_v62 = vld [vmem:[%s14102_s27 + $0x18] sm:$0xff]   ;;  %v12214_v6 = vld [vmem:[%s14102_s27 + $0x28] sm:$0xff]  }
 0x199   : > { %v952_v19 = vadd.f32 %v940_v17, %v939_v16  ;;  %11073 = vmatprep.subr.bf16.mxu0 %v12200_v56  ;;  %11101 = vmatprep.subr.bf16.mxu1 %v12201_v57  ;;  %v12207_v63 = vld [vmem:[%s14102_s27 + $0x98] sm:$0xff]   ;;  %v12209_v1 = vld [vmem:[%s14102_s27 + $0xe0] sm:$0xff]   ;;  %v12215_v7 = vld [vmem:[%s14102_s27 + $0xa8] sm:$0xff]  }
 0x19a   : > { %950 = vadd.xlane.f32.xlu1 %v949_v15  ;;  %v12210_v2 = vld [vmem:[%s14102_s27 + $0x20] sm:$0xff]   ;;  %v12219_v11 = vld [vmem:[%s14102_s27 + $0xb0] sm:$0xff]   ;;  %v12223_v15 = vld [vmem:[%s14102_s27 + $0xb8] sm:$0xff]  }
 0x19b   : > { %11074 = vmatpush3.bf16.msra.mxu0 %v12202_v58  ;;  %v12211_v3 = vld [vmem:[%s14102_s27 + $0xa0] sm:$0xff]  }
 0x19c   : > { %947 = vadd.xlane.f32.xlu0 %v946_v18  ;;  %11102 = vmatpush3.bf16.msra.mxu1 %v12203_v59 }
 0x19d   : > { %11075 = vmatprep.subr.bf16.mxu0 %v12204_v60  ;;  %11103 = vmatprep.subr.bf16.mxu1 %v12205_v61 }
 0x19e   : > { %953 = vadd.xlane.f32.xlu1 %v952_v19 }
 0x19f   : > { %11076 = vmatpush3.bf16.msra.mxu0 %v12206_v62 }
 0x1a0   : > { %11104 = vmatpush3.bf16.msra.mxu1 %v12207_v63  ;;  %11077 = vmatprep.subr.bf16.mxu0 %v12208_v0 }
 0x1a1   : > { %11105 = vmatprep.subr.bf16.mxu1 %v12209_v1  ;;  %v12226_v1 = vld [vmem:[%s14102_s27 + $0x100] sm:$0xff]  }
 0x1a3   : > { %11078 = vmatpush3.bf16.msra.mxu0 %v12210_v2 }
 0x1a4   : > { %11106 = vmatpush3.bf16.msra.mxu1 %v12211_v3  ;;  %11079 = vmatprep.subr.bf16.mxu0 %v12212_v4  ;;  %v12227_v4 = vld [vmem:[%s14102_s27 + $0x180] sm:$0xff]  }
 0x1a5   : > { %11107 = vmatprep.subr.bf16.mxu1 %v12213_v5  ;;  %v12228_v5 = vld [vmem:[%s14102_s27 + $0x148] sm:$0xff]  }
 0x1a7   : > { %11080 = vmatpush3.bf16.msra.mxu0 %v12214_v6 }
 0x1a8   : > { %11108 = vmatpush3.bf16.msra.mxu1 %v12215_v7  ;;  %v12229_v7 = vld [vmem:[%s14102_s27 + $0x1c8] sm:$0xff]  }
 0x225   : > { %v945_v26 = vpop.xlane.xlu0 %944 }
 0x226   : > { %v956_v27 = vmul.f32 0.00390625, %v945_v26  ;;  %v14215_v26 = vshrl.u32 %v16104_v20, 7 }
 0x227   : > { %v951_v28 = vpop.xlane.xlu1 %950 }
 0x228   : > { %v958_v29 = vmul.f32 0.00390625, %v951_v28  ;;  %v14154_v30 = vsub.f32 %v933_v8, %v956_v27  ;;  %v14156_v31 = vsub.f32 %v934_v9, %v956_v27  ;;  %v12216_v8 = vld [vmem:[%s14102_s27 + $0x70] sm:$0xff]  }
 0x229   : > { %v948_v34 = vpop.xlane.xlu0 %947  ;;  %v12217_v9 = vld [vmem:[%s14102_s27 + $0xf0] sm:$0xff]   ;;  %11081 = vmatprep.subr.bf16.mxu0 %v12216_v8 }
 0x22a   : > { %v14158_v32 = vsub.f32 %v937_v10, %v958_v29  ;;  %v14160_v33 = vsub.f32 %v938_v12, %v958_v29  ;;  %v957_v35 = vmul.f32 0.00390625, %v948_v34  ;;  %v968_v37 = vmul.f32 %v14154_v30, %v14154_v30  ;;  %v12218_v10 = vld [vmem:[%s14102_s27 + $0x30] sm:$0xff]   ;;  %11109 = vmatprep.subr.bf16.mxu1 %v12217_v9  ;;  %v12220_v12 = vld [vmem:[%s14102_s27 + $0x78] sm:$0xff]  }
 0x22b   : > { %v954_v36 = vpop.xlane.xlu1 %953  ;;  %v969_v38 = vmul.f32 %v14156_v31, %v14156_v31  ;;  %11082 = vmatpush3.bf16.msra.mxu0 %v12218_v10  ;;  %11110 = vmatpush3.bf16.msra.mxu1 %v12219_v11  ;;  %v12231_v10 = vld [vmem:[%s14102_s27 + $0x188] sm:$0xff]   ;;  %v12232_v11 = vld [vmem:[%s14102_s27 + $0x150] sm:$0xff]  }
 0x22c   : > { %v959_v39 = vmul.f32 0.00390625, %v954_v36  ;;  %v972_v40 = vmul.f32 %v14158_v32, %v14158_v32  ;;  %v973_v41 = vmul.f32 %v14160_v33, %v14160_v33  ;;  %v14170_v42 = vsub.f32 %v935_v13, %v957_v35  ;;  %v12221_v13 = vld [vmem:[%s14102_s27 + $0xf8] sm:$0xff]   ;;  %11083 = vmatprep.subr.bf16.mxu0 %v12220_v12 }
 0x22d   : > { %v14172_v43 = vsub.f32 %v936_v14, %v957_v35  ;;  %v976_v44 = vadd.f32 %v969_v38, %v968_v37  ;;  %v12222_v14 = vld [vmem:[%s14102_s27 + $0x38] sm:$0xff]   ;;  %11111 = vmatprep.subr.bf16.mxu1 %v12221_v13  ;;  %v941_v35 = vld [vmem:[%s16179_s21] sm:$0x3]  ;;  %v14220_v36 = vsub.s32 0, %v14215_v26  ;;  %v14223_v37 = vsub.s32 1, %v14215_v26  ;;  %v12233_v13 = vld [vmem:[%s14102_s27 + $0x1d0] sm:$0xff]  }
 0x22e   : > { %v14174_v45 = vsub.f32 %v939_v16, %v959_v39  ;;  %v14176_v46 = vsub.f32 %v940_v17, %v959_v39  ;;  %v982_v47 = vadd.f32 %v973_v41, %v972_v40  ;;  %v970_v48 = vmul.f32 %v14170_v42, %v14170_v42  ;;  %v12224_v16 = vld [vmem:[%s14102_s27 + $0x140] sm:$0xff]  }
 0x22f   : > { %977 = vadd.xlane.f32.xlu0 %v976_v44  ;;  %v971_v49 = vmul.f32 %v14172_v43, %v14172_v43  ;;  %11084 = vmatpush3.bf16.msra.mxu0 %v12222_v14  ;;  %v12225_v17 = vld [vmem:[%s14102_s27 + $0x1c0] sm:$0xff]   ;;  %v1012_v41 = vrot.slane %v941_v35, %v14220_v36  ;;  %v1016_v44 = vrot.slane %v941_v35, %v14223_v37  ;;  %v12234_v14 = vld [vmem:[%s14102_s27 + $0x110] sm:$0xff]   ;;  %v12247_v35 = vld [vmem:[%s14102_s27 + $0x1a8] sm:$0xff]  }
 0x230   : > { %v974_v50 = vmul.f32 %v14174_v45, %v14174_v45  ;;  %v975_v51 = vmul.f32 %v14176_v46, %v14176_v46  ;;  %11112 = vmatpush3.bf16.msra.mxu1 %v12223_v15  ;;  %11125 = vmatprep.subr.bf16.mxu0 %v12224_v16  ;;  %v942_v40 = vld [vmem:[%s16180_s8] sm:$0x3]  ;;  %v12235_v16 = vld [vmem:[%s14102_s27 + $0x190] sm:$0xff]  }
 0x231   : > { %v979_v52 = vadd.f32 %v971_v49, %v970_v48  ;;  %11153 = vmatprep.subr.bf16.mxu1 %v12225_v17 }
 0x232   : > { %v985_v53 = vadd.f32 %v975_v51, %v974_v50  ;;  %v1031_v50 = vrot.slane %v942_v40, %v14220_v36  ;;  %v1035_v51 = vrot.slane %v942_v40, %v14223_v37  ;;  %v12250_v40 = vld [vmem:[%s14102_s27 + $0x130] sm:$0xff]  }
 0x233   : > { %983 = vadd.xlane.f32.xlu0 %v982_v47  ;;  %980 = vadd.xlane.f32.xlu1 %v979_v52 }
 0x237   : > { %986 = vadd.xlane.f32.xlu1 %v985_v53 }
 0x2bc   : > { %v978_v18 = vpop.xlane.xlu0 %977 }
 0x2bd   : > { %v988_v19 = vmul.f32 0.00390625, %v978_v18  ;;  %v12236_v18 = vld [vmem:[%s14102_s27 + $0x158] sm:$0xff]  }
 0x2bf   : > { %v992_v21 = vadd.f32 1e-05, %v988_v19  ;;  %v12237_v19 = vld [vmem:[%s14102_s27 + $0x1d8] sm:$0xff]  }
 0x2c0   : > { %v981_v22 = vpop.xlane.xlu1 %980  ;;  %v984_v23 = vpop.xlane.xlu0 %983 }
 0x2c1   : > { %12816 = vrsqrt.f32 %v992_v21  ;;  %v989_v24 = vmul.f32 0.00390625, %v981_v22  ;;  %v990_v25 = vmul.f32 0.00390625, %v984_v23  ;;  %v12238_v21 = vld [vmem:[%s14102_s27 + $0x118] sm:$0xff]   ;;  %v12240_v23 = vld [vmem:[%s14102_s27 + $0x160] sm:$0xff]  }
 0x2c2   : > { %v12239_v22 = vld [vmem:[%s14102_s27 + $0x198] sm:$0xff]  }
 0x2c3   : > { %v993_v27 = vadd.f32 1e-05, %v989_v24  ;;  %v994_v28 = vadd.f32 1e-05, %v990_v25  ;;  %v12241_v24 = vld [vmem:[%s14102_s27 + $0x1e0] sm:$0xff]  }
 0x2c4   : > { %v987_v29 = vpop.xlane.xlu1 %986  ;;  %v12242_v25 = vld [vmem:[%s14102_s27 + $0x120] sm:$0xff]  }
 0x2c5   : > { %12818 = vrsqrt.f32 %v993_v27  ;;  %v991_v34 = vmul.f32 0.00390625, %v987_v29  ;;  %v12243_v27 = vld [vmem:[%s14102_s27 + $0x1a0] sm:$0xff]   ;;  %v12245_v29 = vld [vmem:[%s14102_s27 + $0x1e8] sm:$0xff]  }
 0x2c6   : > { %12820 = vrsqrt.f32 %v994_v28  ;;  %v12244_v28 = vld [vmem:[%s14102_s27 + $0x168] sm:$0xff]  }
 0x2c7   : > { %v995_v38 = vadd.f32 1e-05, %v991_v34  ;;  %v12246_v34 = vld [vmem:[%s14102_s27 + $0x128] sm:$0xff]  }
 0x2c9   : > { %12822 = vrsqrt.f32 %v995_v38  ;;  %v12248_v38 = vld [vmem:[%s14102_s27 + $0x170] sm:$0xff]  }
 0x2cb   : > { %v12817_v39 = vpop.eup %12816 }
 0x2cc   : > { %v1000_v47 = vmul.f32 %v12817_v39, %v14154_v30  ;;  %v1001_v48 = vmul.f32 %v12817_v39, %v14156_v31  ;;  %v12249_v39 = vld [vmem:[%s14102_s27 + $0x1f0] sm:$0xff]  }
 0x2ce   : > { %v1019_v52 = vmul.f32 %v1012_v41, %v1000_v47  ;;  %v1020_v53 = vmul.f32 %v1016_v44, %v1001_v48  ;;  %v12253_v47 = vld [vmem:[%s14102_s27 + $0x1f8] sm:$0xff]  }
 0x2cf   : > { %v12819_v49 = vpop.eup %12818  ;;  %v12254_v48 = vld [vmem:[%s14102_s27 + $0x138] sm:$0xff]  }
 0x2d0   : > { %v12821_v54 = vpop.eup %12820  ;;  %v1002_v55 = vmul.f32 %v12819_v49, %v14170_v42  ;;  %v1003_v56 = vmul.f32 %v12819_v49, %v14172_v43  ;;  %v1038_v59 = vadd.f32 %v1031_v50, %v1019_v52  ;;  %v1039_v60 = vadd.f32 %v1035_v51, %v1020_v53  ;;  %v12255_v49 = vld [vmem:[%s14102_s27 + $0x1b8] sm:$0xff]   ;;  %v12258_v52 = vld [vmem:[%s14102_s27 + $0x200] sm:$0xff]  }
 0x2d1   : > { %v1005_v57 = vmul.f32 %v12821_v54, %v14160_v33  ;;  %v1004_v43 = vmul.f32 %v12821_v54, %v14158_v32  ;;  %v12230_v32 = vld [vmem:[%s14102_s27 + $0x108] sm:$0xff]   ;;  %v12259_v53 = vld [vmem:[%s14102_s27 + $0x280] sm:$0xff]  }
 0x2d2   : > { %v1021_v58 = vmul.f32 %v1012_v41, %v1002_v55  ;;  %v1022_v30 = vmul.f32 %v1016_v44, %v1003_v56  ;;  %v12260_v54 = vld [vmem:[%s14102_s27 + $0x248] sm:$0xff]  }
 0x2d3   : > { %v12823_v31 = vpop.eup %12822  ;;  %v1024_v61 = vmul.f32 %v1016_v44, %v1005_v57  ;;  %v12261_v55 = vld [vmem:[%s14102_s27 + $0x2c8] sm:$0xff]  }
 0x2d4   : > { %v1040_v62 = vadd.f32 %v1031_v50, %v1021_v58  ;;  %v1041_v63 = vadd.f32 %v1035_v51, %v1022_v30  ;;  %v1006_v0 = vmul.f32 %v12823_v31, %v14174_v45  ;;  %v1007_v42 = vmul.f32 %v12823_v31, %v14176_v46  ;;  %v12262_v56 = vld [vmem:[%s14102_s27 + $0x208] sm:$0xff]   ;;  %v12264_v58 = vld [vmem:[%s14102_s27 + $0x250] sm:$0xff]  }
 0x2d5   : > { %v1043_v8 = vadd.f32 %v1035_v51, %v1024_v61  ;;  %v1023_v45 = vmul.f32 %v1012_v41, %v1004_v43  ;;  %v12263_v57 = vld [vmem:[%s14102_s27 + $0x288] sm:$0xff]   ;;  %v12265_v30 = vld [vmem:[%s14102_s27 + $0x2d0] sm:$0xff]   ;;  %v12269_v61 = vld [vmem:[%s14102_s27 + $0x2d8] sm:$0xff]  }
 0x2d6   : > { %v14240_v33 = vpack.c.bf16 %v1040_v62, %v1038_v59  ;;  %v14242_v2 = vpack.c.bf16 %v1041_v63, %v1039_v60  ;;  %v1026_v3 = vmul.f32 %v1016_v44, %v1007_v42  ;;  %v1025_v6 = vmul.f32 %v1012_v41, %v1006_v0  ;;  %v12251_v41 = vld [vmem:[%s14102_s27 + $0x1b0] sm:$0xff]   ;;  %v12252_v44 = vld [vmem:[%s14102_s27 + $0x178] sm:$0xff]   ;;  %v12272_v0 = vld [vmem:[%s14102_s27 + $0x260] sm:$0xff]  }
 0x2d7   : > { %v1042_v15 = vadd.f32 %v1031_v50, %v1023_v45  ;;  %v12266_v31 = vld [vmem:[%s14102_s27 + $0x210] sm:$0xff]   ;;  %v12268_v60 = vld [vmem:[%s14102_s27 + $0x258] sm:$0xff]   ;;  %v12273_v42 = vld [vmem:[%s14102_s27 + $0x2e0] sm:$0xff]  }
 0x2d8   : > { %v1045_v9 = vadd.f32 %v1035_v51, %v1026_v3  ;;  %1434 = vmatprep.mubr.bf16.mxu0 %v14242_v2  ;;  %1579 = vmatprep.mubr.bf16.mxu1 %v14242_v2  ;;  %v1044_v12 = vadd.f32 %v1031_v50, %v1025_v6  ;;  %v12256_v50 = vld [vmem:[%s14102_s27 + $0x240] sm:$0xff]   ;;  %v12267_v59 = vld [vmem:[%s14102_s27 + $0x290] sm:$0xff]   ;;  %v12270_v62 = vld [vmem:[%s14102_s27 + $0x218] sm:$0xff]  }
 0x2d9   : > { %1435 = vmatmul.mubr.bf16.vlgmr.msra.gmra.mrb[0].mxu0 %v14240_v33  ;;  %1580 = vmatmul.mubr.bf16.vlgmr.msra.gmra.mrb[0].mxu1 %v14240_v33  ;;  %v12257_v51 = vld [vmem:[%s14102_s27 + $0x2c0] sm:$0xff]   ;;  %v12271_v63 = vld [vmem:[%s14102_s27 + $0x298] sm:$0xff]   ;;  %v12276_v3 = vld [vmem:[%s14102_s27 + $0x268] sm:$0xff]  }
 0x2da   : > { %v14252_v46 = vpack.c.bf16 %v1045_v9, %v1043_v8  ;;  %11126 = vmatpush3.bf16.msra.mxu0 %v12226_v1  ;;  %11154 = vmatpush3.bf16.msra.mxu1 %v12227_v4  ;;  %v14261_v17 = vpack.c.bf16 %v1044_v12, %v1042_v15  ;;  %v12274_v43 = vld [vmem:[%s14102_s27 + $0x220] sm:$0xff]   ;;  %v12277_v4 = vld [vmem:[%s14102_s27 + $0x2e8] sm:$0xff]   ;;  %v12281_v8 = vld [vmem:[%s14102_s27 + $0x2f0] sm:$0xff]  }
 0x2db   : > { %11127 = vmatprep.subr.bf16.mxu0 %v12228_v5  ;;  %11155 = vmatprep.subr.bf16.mxu1 %v12229_v7  ;;  %v12275_v1 = vld [vmem:[%s14102_s27 + $0x2a0] sm:$0xff]   ;;  %v12278_v5 = vld [vmem:[%s14102_s27 + $0x228] sm:$0xff]   ;;  %v12280_v7 = vld [vmem:[%s14102_s27 + $0x270] sm:$0xff]  }
 0x2dc   : > { %1442 = vmatprep.mubr.bf16.mxu0 %v14252_v46  ;;  %1587 = vmatprep.mubr.bf16.mxu1 %v14252_v46  ;;  %v12279_v6 = vld [vmem:[%s14102_s27 + $0x2a8] sm:$0xff]   ;;  %v12282_v9 = vld [vmem:[%s14102_s27 + $0x230] sm:$0xff]   ;;  %v12284_v45 = vld [vmem:[%s14102_s27 + $0x278] sm:$0xff]  }
 0x2dd   : > { %v12287_v12 = vld [vmem:[%s14102_s27 + $0x2b8] sm:$0xff]   ;;  %v12290_v15 = vld [vmem:[%s14102_s27 + $0x300] sm:$0xff]  }
 0x2de   : > { %11128 = vmatpush3.bf16.msra.mxu0 %v12230_v32  ;;  %11156 = vmatpush3.bf16.msra.mxu1 %v12231_v10  ;;  %v12283_v32 = vld [vmem:[%s14102_s27 + $0x2b0] sm:$0xff]   ;;  %v12285_v10 = vld [vmem:[%s14102_s27 + $0x2f8] sm:$0xff]  }
 0x2df   : > { %11129 = vmatprep.subr.bf16.mxu0 %v12232_v11  ;;  %11157 = vmatprep.subr.bf16.mxu1 %v12233_v13  ;;  %v12286_v11 = vld [vmem:[%s14102_s27 + $0x238] sm:$0xff]   ;;  %v12288_v13 = vld [vmem:[%s14102_s27 + $0x340] sm:$0xff]  }
 0x2e1   : > { %1443 = vmatmul.mubr.bf16.gmra.mrb[4].mxu0 %v14261_v17  ;;  %1588 = vmatmul.mubr.bf16.gmra.mrb[4].mxu1 %v14261_v17 }
 0x2e2   : > { %11130 = vmatpush3.bf16.msra.mxu0 %v12234_v14  ;;  %11158 = vmatpush3.bf16.msra.mxu1 %v12235_v16  ;;  %v12289_v14 = vld [vmem:[%s14102_s27 + $0x3c0] sm:$0xff]  }
 0x2e3   : > { %1724 = vmatprep.mubr.bf16.mxu0 %v14242_v2  ;;  %1869 = vmatprep.mubr.bf16.mxu1 %v14242_v2  ;;  %v12291_v16 = vld [vmem:[%s14102_s27 + $0x380] sm:$0xff]  }
 0x2e4   : > { %11131 = vmatprep.subr.bf16.mxu0 %v12236_v18  ;;  %11159 = vmatprep.subr.bf16.mxu1 %v12237_v19  ;;  %v12292_v18 = vld [vmem:[%s14102_s27 + $0x348] sm:$0xff]  }
 0x2e5   : > { %v12293_v19 = vld [vmem:[%s14102_s27 + $0x3c8] sm:$0xff]  }
 0x2e6   : > { %11132 = vmatpush3.bf16.msra.mxu0 %v12238_v21  ;;  %11160 = vmatpush3.bf16.msra.mxu1 %v12239_v22  ;;  %v12294_v21 = vld [vmem:[%s14102_s27 + $0x308] sm:$0xff]  }
 0x2e7   : > { %11133 = vmatprep.subr.bf16.mxu0 %v12240_v23  ;;  %11161 = vmatprep.subr.bf16.mxu1 %v12241_v24  ;;  %v12295_v22 = vld [vmem:[%s14102_s27 + $0x388] sm:$0xff]   ;;  %v12296_v23 = vld [vmem:[%s14102_s27 + $0x350] sm:$0xff]  }
 0x2e8   : > { %v12297_v24 = vld [vmem:[%s14102_s27 + $0x3d0] sm:$0xff]  }
 0x2ea   : > { %11134 = vmatpush3.bf16.msra.mxu0 %v12242_v25  ;;  %11162 = vmatpush3.bf16.msra.mxu1 %v12243_v27  ;;  %v12298_v25 = vld [vmem:[%s14102_s27 + $0x310] sm:$0xff]  }
 0x2eb   : > { %11135 = vmatprep.subr.bf16.mxu0 %v12244_v28  ;;  %11163 = vmatprep.subr.bf16.mxu1 %v12245_v29  ;;  %v12299_v27 = vld [vmem:[%s14102_s27 + $0x390] sm:$0xff]   ;;  %v12300_v28 = vld [vmem:[%s14102_s27 + $0x358] sm:$0xff]  }
 0x2ec   : > { %v12301_v29 = vld [vmem:[%s14102_s27 + $0x3d8] sm:$0xff]  }
 0x2ee   : > { %11136 = vmatpush3.bf16.msra.mxu0 %v12246_v34  ;;  %11164 = vmatpush3.bf16.msra.mxu1 %v12247_v35  ;;  %v12302_v34 = vld [vmem:[%s14102_s27 + $0x318] sm:$0xff]  }
 0x2ef   : > { %11137 = vmatprep.subr.bf16.mxu0 %v12248_v38  ;;  %11165 = vmatprep.subr.bf16.mxu1 %v12249_v39  ;;  %v12303_v35 = vld [vmem:[%s14102_s27 + $0x398] sm:$0xff]   ;;  %v12304_v38 = vld [vmem:[%s14102_s27 + $0x360] sm:$0xff]  }
 0x2f0   : > { %v12305_v39 = vld [vmem:[%s14102_s27 + $0x3e0] sm:$0xff]  }
 0x2f2   : > { %11138 = vmatpush3.bf16.msra.mxu0 %v12250_v40  ;;  %11166 = vmatpush3.bf16.msra.mxu1 %v12251_v41  ;;  %v12306_v40 = vld [vmem:[%s14102_s27 + $0x320] sm:$0xff]  }
 0x2f3   : > { %11139 = vmatprep.subr.bf16.mxu0 %v12252_v44  ;;  %11167 = vmatprep.subr.bf16.mxu1 %v12253_v47  ;;  %v12307_v41 = vld [vmem:[%s14102_s27 + $0x3a0] sm:$0xff]   ;;  %v12308_v44 = vld [vmem:[%s14102_s27 + $0x368] sm:$0xff]  }
 0x2f4   : > { %v12309_v47 = vld [vmem:[%s14102_s27 + $0x3e8] sm:$0xff]  }
 0x2f6   : > { %11140 = vmatpush3.bf16.msra.mxu0 %v12254_v48  ;;  %11168 = vmatpush3.bf16.msra.mxu1 %v12255_v49  ;;  %v12310_v48 = vld [vmem:[%s14102_s27 + $0x328] sm:$0xff]  }
 0x2f7   : > { %11181 = vmatprep.subr.bf16.mxu0 %v12256_v50  ;;  %11209 = vmatprep.subr.bf16.mxu1 %v12257_v51  ;;  %v12311_v49 = vld [vmem:[%s14102_s27 + $0x3a8] sm:$0xff]   ;;  %v12312_v50 = vld [vmem:[%s14102_s27 + $0x370] sm:$0xff]  }
 0x2f8   : > { %v12313_v51 = vld [vmem:[%s14102_s27 + $0x3f0] sm:$0xff]  }
 0x2f9   : > { %1725 = vmatmul.mubr.bf16.vlgmr.msra.gmra.mrb[8].mxu0 %v14240_v33  ;;  %1870 = vmatmul.mubr.bf16.vlgmr.msra.gmra.mrb[8].mxu1 %v14240_v33 }
 0x2fa   : > { %1732 = vmatprep.mubr.bf16.mxu0 %v14252_v46  ;;  %1877 = vmatprep.mubr.bf16.mxu1 %v14252_v46 }
 0x2fb   : > { %11182 = vmatpush3.bf16.msra.mxu0 %v12258_v52  ;;  %11210 = vmatpush3.bf16.msra.mxu1 %v12259_v53  ;;  %v12314_v52 = vld [vmem:[%s14102_s27 + $0x330] sm:$0xff]  }
 0x2fc   : > { %11183 = vmatprep.subr.bf16.mxu0 %v12260_v54  ;;  %11211 = vmatprep.subr.bf16.mxu1 %v12261_v55  ;;  %v12315_v53 = vld [vmem:[%s14102_s27 + $0x3b0] sm:$0xff]   ;;  %v12316_v54 = vld [vmem:[%s14102_s27 + $0x378] sm:$0xff]  }
 0x2fd   : > { %v12317_v55 = vld [vmem:[%s14102_s27 + $0x3f8] sm:$0xff]  }
 0x2ff   : > { %11184 = vmatpush3.bf16.msra.mxu0 %v12262_v56  ;;  %11212 = vmatpush3.bf16.msra.mxu1 %v12263_v57  ;;  %v12318_v56 = vld [vmem:[%s14102_s27 + $0x338] sm:$0xff]  }
 0x300   : > { %11185 = vmatprep.subr.bf16.mxu0 %v12264_v58  ;;  %11213 = vmatprep.subr.bf16.mxu1 %v12265_v30  ;;  %v12319_v57 = vld [vmem:[%s14102_s27 + $0x3b8] sm:$0xff]   ;;  %v12320_v58 = vld [vmem:[%s14107_s25 + $0x40] sm:$0xff]  }
 0x301   : > { %1733 = vmatmul.mubr.bf16.gmra.mrb[12].mxu0 %v14261_v17  ;;  %1878 = vmatmul.mubr.bf16.gmra.mrb[12].mxu1 %v14261_v17  ;;  %v12321_v30 = vld [vmem:[%s14107_s25 + $0xc0] sm:$0xff]  }
 0x302   : > { %2014 = vmatprep.mubr.bf16.mxu0 %v14242_v2  ;;  %2159 = vmatprep.mubr.bf16.mxu1 %v14242_v2 }
 0x303   : > { %11186 = vmatpush3.bf16.msra.mxu0 %v12266_v31  ;;  %11214 = vmatpush3.bf16.msra.mxu1 %v12267_v59  ;;  %v12322_v31 = vld [vmem:[%s14107_s25] sm:$0xff]  }
 0x304   : > { %11187 = vmatprep.subr.bf16.mxu0 %v12268_v60  ;;  %11215 = vmatprep.subr.bf16.mxu1 %v12269_v61  ;;  %v12323_v59 = vld [vmem:[%s14107_s25 + $0x80] sm:$0xff]   ;;  %v12324_v60 = vld [vmem:[%s14107_s25 + $0x48] sm:$0xff]  }
 0x305   : > { %v12325_v61 = vld [vmem:[%s14107_s25 + $0xc8] sm:$0xff]  }
 0x307   : > { %11188 = vmatpush3.bf16.msra.mxu0 %v12270_v62  ;;  %11216 = vmatpush3.bf16.msra.mxu1 %v12271_v63  ;;  %v12326_v62 = vld [vmem:[%s14107_s25 + $0x8] sm:$0xff]  }
 0x308   : > { %11189 = vmatprep.subr.bf16.mxu0 %v12272_v0  ;;  %11217 = vmatprep.subr.bf16.mxu1 %v12273_v42  ;;  %v12327_v63 = vld [vmem:[%s14107_s25 + $0x88] sm:$0xff]   ;;  %v12328_v0 = vld [vmem:[%s14107_s25 + $0x50] sm:$0xff]  }
 0x309   : > { %v12329_v42 = vld [vmem:[%s14107_s25 + $0xd0] sm:$0xff]  }
 0x30b   : > { %11190 = vmatpush3.bf16.msra.mxu0 %v12274_v43  ;;  %11218 = vmatpush3.bf16.msra.mxu1 %v12275_v1  ;;  %v12330_v43 = vld [vmem:[%s14107_s25 + $0x10] sm:$0xff]  }
 0x30c   : > { %11191 = vmatprep.subr.bf16.mxu0 %v12276_v3  ;;  %11219 = vmatprep.subr.bf16.mxu1 %v12277_v4  ;;  %v12331_v1 = vld [vmem:[%s14107_s25 + $0x90] sm:$0xff]   ;;  %v12332_v3 = vld [vmem:[%s14107_s25 + $0x58] sm:$0xff]  }
 0x30d   : > { %v12333_v4 = vld [vmem:[%s14107_s25 + $0xd8] sm:$0xff]  }
 0x30f   : > { %11192 = vmatpush3.bf16.msra.mxu0 %v12278_v5  ;;  %11220 = vmatpush3.bf16.msra.mxu1 %v12279_v6  ;;  %v12334_v5 = vld [vmem:[%s14107_s25 + $0x18] sm:$0xff]  }
 0x310   : > { %11193 = vmatprep.subr.bf16.mxu0 %v12280_v7  ;;  %11221 = vmatprep.subr.bf16.mxu1 %v12281_v8  ;;  %v12335_v6 = vld [vmem:[%s14107_s25 + $0x98] sm:$0xff]   ;;  %v12336_v7 = vld [vmem:[%s14107_s25 + $0x60] sm:$0xff]  }
 0x311   : > { %v12337_v8 = vld [vmem:[%s14107_s25 + $0xe0] sm:$0xff]  }
 0x313   : > { %11194 = vmatpush3.bf16.msra.mxu0 %v12282_v9  ;;  %11222 = vmatpush3.bf16.msra.mxu1 %v12283_v32  ;;  %v12338_v9 = vld [vmem:[%s14107_s25 + $0x20] sm:$0xff]  }
 0x314   : > { %11195 = vmatprep.subr.bf16.mxu0 %v12284_v45  ;;  %11223 = vmatprep.subr.bf16.mxu1 %v12285_v10  ;;  %v12339_v32 = vld [vmem:[%s14107_s25 + $0xa0] sm:$0xff]   ;;  %v12340_v45 = vld [vmem:[%s14107_s25 + $0x68] sm:$0xff]  }
 0x315   : > { %v12341_v10 = vld [vmem:[%s14107_s25 + $0xe8] sm:$0xff]  }
 0x317   : > { %11196 = vmatpush3.bf16.msra.mxu0 %v12286_v11  ;;  %11224 = vmatpush3.bf16.msra.mxu1 %v12287_v12  ;;  %v12342_v11 = vld [vmem:[%s14107_s25 + $0x28] sm:$0xff]  }
 0x318   : > { %11237 = vmatprep.subr.bf16.mxu0 %v12288_v13  ;;  %11265 = vmatprep.subr.bf16.mxu1 %v12289_v14  ;;  %v12343_v12 = vld [vmem:[%s14107_s25 + $0xa8] sm:$0xff]   ;;  %v12344_v13 = vld [vmem:[%s14107_s25 + $0x70] sm:$0xff]  }
 0x319   : > { %v12345_v14 = vld [vmem:[%s14107_s25 + $0xf0] sm:$0xff]  }
 0x31a   : > { %2015 = vmatmul.mubr.bf16.vlgmr.msra.gmra.mrb[16].mxu0 %v14240_v33  ;;  %2160 = vmatmul.mubr.bf16.vlgmr.msra.gmra.mrb[16].mxu1 %v14240_v33 }
 0x31b   : > { %2022 = vmatprep.mubr.bf16.mxu0 %v14252_v46  ;;  %2167 = vmatprep.mubr.bf16.mxu1 %v14252_v46 }
 0x31c   : > { %11238 = vmatpush3.bf16.msra.mxu0 %v12290_v15  ;;  %11266 = vmatpush3.bf16.msra.mxu1 %v12291_v16  ;;  %v12346_v15 = vld [vmem:[%s14107_s25 + $0x30] sm:$0xff]  }
 0x31d   : > { %11239 = vmatprep.subr.bf16.mxu0 %v12292_v18  ;;  %11267 = vmatprep.subr.bf16.mxu1 %v12293_v19  ;;  %v12347_v16 = vld [vmem:[%s14107_s25 + $0xb0] sm:$0xff]   ;;  %v12348_v18 = vld [vmem:[%s14107_s25 + $0x78] sm:$0xff]  }
 0x31e   : > { %v12349_v19 = vld [vmem:[%s14107_s25 + $0xf8] sm:$0xff]  }
 0x320   : > { %11240 = vmatpush3.bf16.msra.mxu0 %v12294_v21  ;;  %11268 = vmatpush3.bf16.msra.mxu1 %v12295_v22  ;;  %v12350_v21 = vld [vmem:[%s14107_s25 + $0x38] sm:$0xff]  }
 0x321   : > { %11241 = vmatprep.subr.bf16.mxu0 %v12296_v23  ;;  %11269 = vmatprep.subr.bf16.mxu1 %v12297_v24  ;;  %v12351_v22 = vld [vmem:[%s14107_s25 + $0xb8] sm:$0xff]   ;;  %v12352_v23 = vld [vmem:[%s14107_s25 + $0x140] sm:$0xff]  }
 0x322   : > { %2023 = vmatmul.mubr.bf16.gmra.mrb[20].mxu0 %v14261_v17  ;;  %2168 = vmatmul.mubr.bf16.gmra.mrb[20].mxu1 %v14261_v17  ;;  %v12353_v24 = vld [vmem:[%s14107_s25 + $0x1c0] sm:$0xff]  }
 0x323   : > { %2304 = vmatprep.mubr.bf16.mxu0 %v14242_v2  ;;  %2449 = vmatprep.mubr.bf16.mxu1 %v14242_v2 }
 0x324   : > { %11242 = vmatpush3.bf16.msra.mxu0 %v12298_v25  ;;  %11270 = vmatpush3.bf16.msra.mxu1 %v12299_v27  ;;  %v12354_v25 = vld [vmem:[%s14107_s25 + $0x100] sm:$0xff]  }
 0x325   : > { %11243 = vmatprep.subr.bf16.mxu0 %v12300_v28  ;;  %11271 = vmatprep.subr.bf16.mxu1 %v12301_v29  ;;  %v12355_v27 = vld [vmem:[%s14107_s25 + $0x180] sm:$0xff]   ;;  %v12356_v28 = vld [vmem:[%s14107_s25 + $0x148] sm:$0xff]  }
 0x326   : > { %v12357_v29 = vld [vmem:[%s14107_s25 + $0x1c8] sm:$0xff]  }
 0x328   : > { %11244 = vmatpush3.bf16.msra.mxu0 %v12302_v34  ;;  %11272 = vmatpush3.bf16.msra.mxu1 %v12303_v35  ;;  %v12358_v34 = vld [vmem:[%s14107_s25 + $0x108] sm:$0xff]  }
 0x329   : > { %11245 = vmatprep.subr.bf16.mxu0 %v12304_v38  ;;  %11273 = vmatprep.subr.bf16.mxu1 %v12305_v39  ;;  %v12359_v35 = vld [vmem:[%s14107_s25 + $0x188] sm:$0xff]   ;;  %v12360_v38 = vld [vmem:[%s14107_s25 + $0x150] sm:$0xff]  }
 0x32a   : > { %v12361_v39 = vld [vmem:[%s14107_s25 + $0x1d0] sm:$0xff]  }
 0x32c   : > { %11246 = vmatpush3.bf16.msra.mxu0 %v12306_v40  ;;  %11274 = vmatpush3.bf16.msra.mxu1 %v12307_v41  ;;  %v12362_v40 = vld [vmem:[%s14107_s25 + $0x110] sm:$0xff]  }
 0x32d   : > { %11247 = vmatprep.subr.bf16.mxu0 %v12308_v44  ;;  %11275 = vmatprep.subr.bf16.mxu1 %v12309_v47  ;;  %v12363_v41 = vld [vmem:[%s14107_s25 + $0x190] sm:$0xff]   ;;  %v12364_v44 = vld [vmem:[%s14107_s25 + $0x158] sm:$0xff]  }
 0x32e   : > { %v12365_v47 = vld [vmem:[%s14107_s25 + $0x1d8] sm:$0xff]  }
 0x330   : > { %11248 = vmatpush3.bf16.msra.mxu0 %v12310_v48  ;;  %11276 = vmatpush3.bf16.msra.mxu1 %v12311_v49  ;;  %v12366_v48 = vld [vmem:[%s14107_s25 + $0x118] sm:$0xff]  }
 0x331   : > { %11249 = vmatprep.subr.bf16.mxu0 %v12312_v50  ;;  %11277 = vmatprep.subr.bf16.mxu1 %v12313_v51  ;;  %v12367_v49 = vld [vmem:[%s14107_s25 + $0x198] sm:$0xff]   ;;  %v12368_v50 = vld [vmem:[%s14107_s25 + $0x160] sm:$0xff]  }
 0x332   : > { %v12369_v51 = vld [vmem:[%s14107_s25 + $0x1e0] sm:$0xff]  }
 0x334   : > { %11250 = vmatpush3.bf16.msra.mxu0 %v12314_v52  ;;  %11278 = vmatpush3.bf16.msra.mxu1 %v12315_v53  ;;  %v12370_v52 = vld [vmem:[%s14107_s25 + $0x120] sm:$0xff]  }
 0x335   : > { %11251 = vmatprep.subr.bf16.mxu0 %v12316_v54  ;;  %11279 = vmatprep.subr.bf16.mxu1 %v12317_v55  ;;  %v12371_v53 = vld [vmem:[%s14107_s25 + $0x1a0] sm:$0xff]   ;;  %v12372_v54 = vld [vmem:[%s14107_s25 + $0x168] sm:$0xff]  }
 0x336   : > { %v12373_v55 = vld [vmem:[%s14107_s25 + $0x1e8] sm:$0xff]  }
 0x338   : > { %11252 = vmatpush3.bf16.msra.mxu0 %v12318_v56  ;;  %11280 = vmatpush3.bf16.msra.mxu1 %v12319_v57  ;;  %v12374_v56 = vld [vmem:[%s14107_s25 + $0x128] sm:$0xff]  }
 0x339   : > { %11293 = vmatprep.subr.bf16.mxu0 %v12320_v58  ;;  %11321 = vmatprep.subr.bf16.mxu1 %v12321_v30  ;;  %v12375_v57 = vld [vmem:[%s14107_s25 + $0x1a8] sm:$0xff]   ;;  %v12376_v58 = vld [vmem:[%s14107_s25 + $0x170] sm:$0xff]  }
 0x33a   : > { %v12377_v30 = vld [vmem:[%s14107_s25 + $0x1f0] sm:$0xff]  }
 0x33b   : > { %2305 = vmatmul.mubr.bf16.vlgmr.msra.gmra.mrb[24].mxu0 %v14240_v33  ;;  %2450 = vmatmul.mubr.bf16.vlgmr.msra.gmra.mrb[24].mxu1 %v14240_v33 }
 0x33c   : > { %2312 = vmatprep.mubr.bf16.mxu0 %v14252_v46  ;;  %2457 = vmatprep.mubr.bf16.mxu1 %v14252_v46 }
 0x33d   : > { %11294 = vmatpush3.bf16.msra.mxu0 %v12322_v31  ;;  %11322 = vmatpush3.bf16.msra.mxu1 %v12323_v59  ;;  %v12378_v31 = vld [vmem:[%s14107_s25 + $0x130] sm:$0xff]  }
 0x33e   : > { %11295 = vmatprep.subr.bf16.mxu0 %v12324_v60  ;;  %11323 = vmatprep.subr.bf16.mxu1 %v12325_v61  ;;  %v12379_v59 = vld [vmem:[%s14107_s25 + $0x1b0] sm:$0xff]   ;;  %v12380_v60 = vld [vmem:[%s14107_s25 + $0x178] sm:$0xff]  }
 0x33f   : > { %v12381_v61 = vld [vmem:[%s14107_s25 + $0x1f8] sm:$0xff]  }
 0x341   : > { %11296 = vmatpush3.bf16.msra.mxu0 %v12326_v62  ;;  %11324 = vmatpush3.bf16.msra.mxu1 %v12327_v63  ;;  %v12382_v62 = vld [vmem:[%s14107_s25 + $0x138] sm:$0xff]  }
 0x342   : > { %11297 = vmatprep.subr.bf16.mxu0 %v12328_v0  ;;  %11325 = vmatprep.subr.bf16.mxu1 %v12329_v42  ;;  %v12383_v63 = vld [vmem:[%s14107_s25 + $0x1b8] sm:$0xff]   ;;  %v12384_v0 = vld [vmem:[%s14107_s25 + $0x240] sm:$0xff]  }
 0x343   : > { %2313 = vmatmul.mubr.bf16.gmra.mrb[28].mxu0 %v14261_v17  ;;  %2458 = vmatmul.mubr.bf16.gmra.mrb[28].mxu1 %v14261_v17  ;;  %v12385_v42 = vld [vmem:[%s14107_s25 + $0x2c0] sm:$0xff]  }
 0x344   : > { %2850 = vmatprep.mubr.bf16.mxu0 %v14242_v2  ;;  %2995 = vmatprep.mubr.bf16.mxu1 %v14242_v2 }
 0x345   : > { %11298 = vmatpush3.bf16.msra.mxu0 %v12330_v43  ;;  %11326 = vmatpush3.bf16.msra.mxu1 %v12331_v1  ;;  %v12386_v43 = vld [vmem:[%s14107_s25 + $0x200] sm:$0xff]  }
 0x346   : > { %11299 = vmatprep.subr.bf16.mxu0 %v12332_v3  ;;  %11327 = vmatprep.subr.bf16.mxu1 %v12333_v4  ;;  %v12387_v1 = vld [vmem:[%s14107_s25 + $0x280] sm:$0xff]   ;;  %v12388_v3 = vld [vmem:[%s14107_s25 + $0x248] sm:$0xff]  }
 0x347   : > { %v12389_v4 = vld [vmem:[%s14107_s25 + $0x2c8] sm:$0xff]  }
 0x349   : > { %11300 = vmatpush3.bf16.msra.mxu0 %v12334_v5  ;;  %11328 = vmatpush3.bf16.msra.mxu1 %v12335_v6  ;;  %v12390_v5 = vld [vmem:[%s14107_s25 + $0x208] sm:$0xff]  }
 0x34a   : > { %11301 = vmatprep.subr.bf16.mxu0 %v12336_v7  ;;  %11329 = vmatprep.subr.bf16.mxu1 %v12337_v8  ;;  %v12391_v6 = vld [vmem:[%s14107_s25 + $0x288] sm:$0xff]   ;;  %v12392_v7 = vld [vmem:[%s14107_s25 + $0x250] sm:$0xff]  }
 0x34b   : > { %v12393_v8 = vld [vmem:[%s14107_s25 + $0x2d0] sm:$0xff]  }
 0x34d   : > { %11302 = vmatpush3.bf16.msra.mxu0 %v12338_v9  ;;  %11330 = vmatpush3.bf16.msra.mxu1 %v12339_v32  ;;  %v12394_v9 = vld [vmem:[%s14107_s25 + $0x210] sm:$0xff]  }
 0x34e   : > { %11303 = vmatprep.subr.bf16.mxu0 %v12340_v45  ;;  %11331 = vmatprep.subr.bf16.mxu1 %v12341_v10  ;;  %v12395_v32 = vld [vmem:[%s14107_s25 + $0x290] sm:$0xff]   ;;  %v12396_v45 = vld [vmem:[%s14107_s25 + $0x258] sm:$0xff]  }
 0x34f   : > { %v12397_v10 = vld [vmem:[%s14107_s25 + $0x2d8] sm:$0xff]  }
 0x351   : > { %11304 = vmatpush3.bf16.msra.mxu0 %v12342_v11  ;;  %11332 = vmatpush3.bf16.msra.mxu1 %v12343_v12  ;;  %v12398_v11 = vld [vmem:[%s14107_s25 + $0x218] sm:$0xff]  }
 0x352   : > { %11305 = vmatprep.subr.bf16.mxu0 %v12344_v13  ;;  %11333 = vmatprep.subr.bf16.mxu1 %v12345_v14  ;;  %v12399_v12 = vld [vmem:[%s14107_s25 + $0x298] sm:$0xff]   ;;  %v12400_v13 = vld [vmem:[%s14107_s25 + $0x260] sm:$0xff]  }
 0x353   : > { %v12401_v14 = vld [vmem:[%s14107_s25 + $0x2e0] sm:$0xff]  }
 0x355   : > { %11306 = vmatpush3.bf16.msra.mxu0 %v12346_v15  ;;  %11334 = vmatpush3.bf16.msra.mxu1 %v12347_v16  ;;  %v12402_v15 = vld [vmem:[%s14107_s25 + $0x220] sm:$0xff]  }
 0x356   : > { %11307 = vmatprep.subr.bf16.mxu0 %v12348_v18  ;;  %11335 = vmatprep.subr.bf16.mxu1 %v12349_v19  ;;  %v12403_v16 = vld [vmem:[%s14107_s25 + $0x2a0] sm:$0xff]   ;;  %v12404_v18 = vld [vmem:[%s14107_s25 + $0x268] sm:$0xff]  }
 0x357   : > { %v12405_v19 = vld [vmem:[%s14107_s25 + $0x2e8] sm:$0xff]  }
 0x359   : > { %11308 = vmatpush3.bf16.msra.mxu0 %v12350_v21  ;;  %11336 = vmatpush3.bf16.msra.mxu1 %v12351_v22  ;;  %v12406_v21 = vld [vmem:[%s14107_s25 + $0x228] sm:$0xff]  }
 0x35a   : > { %11349 = vmatprep.subr.bf16.mxu0 %v12352_v23  ;;  %11377 = vmatprep.subr.bf16.mxu1 %v12353_v24  ;;  %v12407_v22 = vld [vmem:[%s14107_s25 + $0x2a8] sm:$0xff]   ;;  %v12408_v23 = vld [vmem:[%s14107_s25 + $0x270] sm:$0xff]  }
 0x35b   : > { %v12409_v24 = vld [vmem:[%s14107_s25 + $0x2f0] sm:$0xff]  }
 0x35c   : > { %2851 = vmatmul.mubr.bf16.vlgmr.msra.gmra.mrb[32].mxu0 %v14240_v33  ;;  %2996 = vmatmul.mubr.bf16.vlgmr.msra.gmra.mrb[32].mxu1 %v14240_v33 }
 0x35d   : > { %2858 = vmatprep.mubr.bf16.mxu0 %v14252_v46  ;;  %3003 = vmatprep.mubr.bf16.mxu1 %v14252_v46 }
 0x35e   : > { %11350 = vmatpush3.bf16.msra.mxu0 %v12354_v25  ;;  %11378 = vmatpush3.bf16.msra.mxu1 %v12355_v27  ;;  %v12410_v25 = vld [vmem:[%s14107_s25 + $0x230] sm:$0xff]  }
 0x35f   : > { %11351 = vmatprep.subr.bf16.mxu0 %v12356_v28  ;;  %11379 = vmatprep.subr.bf16.mxu1 %v12357_v29  ;;  %v12411_v27 = vld [vmem:[%s14107_s25 + $0x2b0] sm:$0xff]   ;;  %v12412_v28 = vld [vmem:[%s14107_s25 + $0x278] sm:$0xff]  }
 0x360   : > { %v12413_v29 = vld [vmem:[%s14107_s25 + $0x2f8] sm:$0xff]  }
 0x362   : > { %11352 = vmatpush3.bf16.msra.mxu0 %v12358_v34  ;;  %11380 = vmatpush3.bf16.msra.mxu1 %v12359_v35  ;;  %v12414_v34 = vld [vmem:[%s14107_s25 + $0x238] sm:$0xff]  }
 0x363   : > { %11353 = vmatprep.subr.bf16.mxu0 %v12360_v38  ;;  %11381 = vmatprep.subr.bf16.mxu1 %v12361_v39  ;;  %v12415_v35 = vld [vmem:[%s14107_s25 + $0x2b8] sm:$0xff]   ;;  %v12416_v38 = vld [vmem:[%s14107_s25 + $0x340] sm:$0xff]  }
 0x364   : > { %2859 = vmatmul.mubr.bf16.gmra.mrb[36].mxu0 %v14261_v17  ;;  %3004 = vmatmul.mubr.bf16.gmra.mrb[36].mxu1 %v14261_v17  ;;  %v12417_v39 = vld [vmem:[%s14107_s25 + $0x3c0] sm:$0xff]  }
 0x365   : > { %3140 = vmatprep.mubr.bf16.mxu0 %v14242_v2  ;;  %3285 = vmatprep.mubr.bf16.mxu1 %v14242_v2 }
 0x366   : > { %11354 = vmatpush3.bf16.msra.mxu0 %v12362_v40  ;;  %11382 = vmatpush3.bf16.msra.mxu1 %v12363_v41  ;;  %v12418_v40 = vld [vmem:[%s14107_s25 + $0x300] sm:$0xff]  }
 0x367   : > { %11355 = vmatprep.subr.bf16.mxu0 %v12364_v44  ;;  %11383 = vmatprep.subr.bf16.mxu1 %v12365_v47  ;;  %v12419_v41 = vld [vmem:[%s14107_s25 + $0x380] sm:$0xff]   ;;  %v12420_v44 = vld [vmem:[%s14107_s25 + $0x348] sm:$0xff]  }
 0x368   : > { %v12421_v47 = vld [vmem:[%s14107_s25 + $0x3c8] sm:$0xff]  }
 0x36a   : > { %11356 = vmatpush3.bf16.msra.mxu0 %v12366_v48  ;;  %11384 = vmatpush3.bf16.msra.mxu1 %v12367_v49  ;;  %v12422_v48 = vld [vmem:[%s14107_s25 + $0x308] sm:$0xff]  }
 0x36b   : > { %11357 = vmatprep.subr.bf16.mxu0 %v12368_v50  ;;  %11385 = vmatprep.subr.bf16.mxu1 %v12369_v51  ;;  %v12423_v49 = vld [vmem:[%s14107_s25 + $0x388] sm:$0xff]   ;;  %v12424_v50 = vld [vmem:[%s14107_s25 + $0x350] sm:$0xff]  }
 0x36c   : > { %v12425_v51 = vld [vmem:[%s14107_s25 + $0x3d0] sm:$0xff]  }
 0x36e   : > { %11358 = vmatpush3.bf16.msra.mxu0 %v12370_v52  ;;  %11386 = vmatpush3.bf16.msra.mxu1 %v12371_v53  ;;  %v12426_v52 = vld [vmem:[%s14107_s25 + $0x310] sm:$0xff]  }
 0x36f   : > { %11359 = vmatprep.subr.bf16.mxu0 %v12372_v54  ;;  %11387 = vmatprep.subr.bf16.mxu1 %v12373_v55  ;;  %v12427_v53 = vld [vmem:[%s14107_s25 + $0x390] sm:$0xff]   ;;  %v12428_v54 = vld [vmem:[%s14107_s25 + $0x358] sm:$0xff]  }
 0x370   : > { %v12429_v55 = vld [vmem:[%s14107_s25 + $0x3d8] sm:$0xff]  }
 0x372   : > { %11360 = vmatpush3.bf16.msra.mxu0 %v12374_v56  ;;  %11388 = vmatpush3.bf16.msra.mxu1 %v12375_v57  ;;  %v12430_v56 = vld [vmem:[%s14107_s25 + $0x318] sm:$0xff]  }
 0x373   : > { %11361 = vmatprep.subr.bf16.mxu0 %v12376_v58  ;;  %11389 = vmatprep.subr.bf16.mxu1 %v12377_v30  ;;  %v12431_v57 = vld [vmem:[%s14107_s25 + $0x398] sm:$0xff]   ;;  %v12432_v58 = vld [vmem:[%s14107_s25 + $0x360] sm:$0xff]  }
 0x374   : > { %v12433_v30 = vld [vmem:[%s14107_s25 + $0x3e0] sm:$0xff]  }
 0x376   : > { %11362 = vmatpush3.bf16.msra.mxu0 %v12378_v31  ;;  %11390 = vmatpush3.bf16.msra.mxu1 %v12379_v59  ;;  %v12434_v31 = vld [vmem:[%s14107_s25 + $0x320] sm:$0xff]  }
 0x377   : > { %11363 = vmatprep.subr.bf16.mxu0 %v12380_v60  ;;  %11391 = vmatprep.subr.bf16.mxu1 %v12381_v61  ;;  %v12435_v59 = vld [vmem:[%s14107_s25 + $0x3a0] sm:$0xff]  }
 0x37a   : > { %11364 = vmatpush3.bf16.msra.mxu0 %v12382_v62  ;;  %11392 = vmatpush3.bf16.msra.mxu1 %v12383_v63  ;;  %v12436_v62 = vld [vmem:[%s14107_s25 + $0x368] sm:$0xff]  }
 0x37b   : > { %11405 = vmatprep.subr.bf16.mxu0 %v12384_v0  ;;  %11433 = vmatprep.subr.bf16.mxu1 %v12385_v42  ;;  %v12437_v63 = vld [vmem:[%s14107_s25 + $0x3e8] sm:$0xff]  }
 0x37d   : > { %3141 = vmatmul.mubr.bf16.vlgmr.msra.gmra.mrb[40].mxu0 %v14240_v33  ;;  %3286 = vmatmul.mubr.bf16.vlgmr.msra.gmra.mrb[40].mxu1 %v14240_v33 }
 0x37e   : > { %3148 = vmatprep.mubr.bf16.mxu0 %v14252_v46  ;;  %3293 = vmatprep.mubr.bf16.mxu1 %v14252_v46 }
 0x37f   : > { %11406 = vmatpush3.bf16.msra.mxu0 %v12386_v43  ;;  %11434 = vmatpush3.bf16.msra.mxu1 %v12387_v1 }
 0x380   : > { %11407 = vmatprep.subr.bf16.mxu0 %v12388_v3  ;;  %11435 = vmatprep.subr.bf16.mxu1 %v12389_v4 }
 0x383   : > { %11408 = vmatpush3.bf16.msra.mxu0 %v12390_v5  ;;  %11436 = vmatpush3.bf16.msra.mxu1 %v12391_v6 }
 0x384   : > { %11409 = vmatprep.subr.bf16.mxu0 %v12392_v7  ;;  %11437 = vmatprep.subr.bf16.mxu1 %v12393_v8  ;;  %v12438_v7 = vld [vmem:[%s14107_s25 + $0x328] sm:$0xff]  }
 0x385   : > { %3149 = vmatmul.mubr.bf16.gmra.mrb[44].mxu0 %v14261_v17  ;;  %3294 = vmatmul.mubr.bf16.gmra.mrb[44].mxu1 %v14261_v17  ;;  %v12439_v8 = vld [vmem:[%s14107_s25 + $0x3a8] sm:$0xff]  }
 0x386   : > { %3430 = vmatprep.mubr.bf16.mxu0 %v14242_v2  ;;  %3575 = vmatprep.mubr.bf16.mxu1 %v14242_v2 }
 0x387   : > { %11410 = vmatpush3.bf16.msra.mxu0 %v12394_v9  ;;  %11438 = vmatpush3.bf16.msra.mxu1 %v12395_v32 }
 0x388   : > { %11411 = vmatprep.subr.bf16.mxu0 %v12396_v45  ;;  %11439 = vmatprep.subr.bf16.mxu1 %v12397_v10  ;;  %v12440_v45 = vld [vmem:[%s14107_s25 + $0x370] sm:$0xff]  }
 0x389   : > { %v12441_v10 = vld [vmem:[%s14107_s25 + $0x3f0] sm:$0xff]  }
 0x38b   : > { %11412 = vmatpush3.bf16.msra.mxu0 %v12398_v11  ;;  %11440 = vmatpush3.bf16.msra.mxu1 %v12399_v12 }
 0x38c   : > { %11413 = vmatprep.subr.bf16.mxu0 %v12400_v13  ;;  %11441 = vmatprep.subr.bf16.mxu1 %v12401_v14  ;;  %v12442_v13 = vld [vmem:[%s14107_s25 + $0x330] sm:$0xff]  }
 0x38d   : > { %v12443_v14 = vld [vmem:[%s14107_s25 + $0x3b0] sm:$0xff]  }
 0x38f   : > { %11414 = vmatpush3.bf16.msra.mxu0 %v12402_v15  ;;  %11442 = vmatpush3.bf16.msra.mxu1 %v12403_v16 }
 0x390   : > { %11415 = vmatprep.subr.bf16.mxu0 %v12404_v18  ;;  %11443 = vmatprep.subr.bf16.mxu1 %v12405_v19  ;;  %v12444_v18 = vld [vmem:[%s14107_s25 + $0x378] sm:$0xff]  }
 0x391   : > { %v12445_v19 = vld [vmem:[%s14107_s25 + $0x3f8] sm:$0xff]  }
 0x393   : > { %11416 = vmatpush3.bf16.msra.mxu0 %v12406_v21  ;;  %11444 = vmatpush3.bf16.msra.mxu1 %v12407_v22 }
 0x394   : > { %11417 = vmatprep.subr.bf16.mxu0 %v12408_v23  ;;  %11445 = vmatprep.subr.bf16.mxu1 %v12409_v24 }
 0x397   : > { %11418 = vmatpush3.bf16.msra.mxu0 %v12410_v25  ;;  %11446 = vmatpush3.bf16.msra.mxu1 %v12411_v27 }
 0x398   : > { %11419 = vmatprep.subr.bf16.mxu0 %v12412_v28  ;;  %11447 = vmatprep.subr.bf16.mxu1 %v12413_v29 }
 0x39b   : > { %11420 = vmatpush3.bf16.msra.mxu0 %v12414_v34  ;;  %11448 = vmatpush3.bf16.msra.mxu1 %v12415_v35  ;;  %v12446_v34 = vld [vmem:[%s14107_s25 + $0x338] sm:$0xff]  }
 0x39c   : > { %11461 = vmatprep.subr.bf16.mxu0 %v12416_v38  ;;  %11489 = vmatprep.subr.bf16.mxu1 %v12417_v39  ;;  %v12447_v35 = vld [vmem:[%s14107_s25 + $0x3b8] sm:$0xff]  }
 0x39e   : > { %3431 = vmatmul.mubr.bf16.vlgmr.msra.gmra.mrb[48].mxu0 %v14240_v33  ;;  %3576 = vmatmul.mubr.bf16.vlgmr.msra.gmra.mrb[48].mxu1 %v14240_v33 }
 0x39f   : > { %3438 = vmatprep.mubr.bf16.mxu0 %v14252_v46  ;;  %3583 = vmatprep.mubr.bf16.mxu1 %v14252_v46 }
 0x3a0   : > { %11462 = vmatpush3.bf16.msra.mxu0 %v12418_v40  ;;  %11490 = vmatpush3.bf16.msra.mxu1 %v12419_v41  ;;  %v12448_v40 = vld [vmem:[%s14112_s5 + $0x40] sm:$0xff]  }
 0x3a1   : > { %11463 = vmatprep.subr.bf16.mxu0 %v12420_v44  ;;  %11491 = vmatprep.subr.bf16.mxu1 %v12421_v47  ;;  %v12449_v41 = vld [vmem:[%s14112_s5 + $0xc0] sm:$0xff]  }
 0x3a4   : > { %11464 = vmatpush3.bf16.msra.mxu0 %v12422_v48  ;;  %11492 = vmatpush3.bf16.msra.mxu1 %v12423_v49  ;;  %v12450_v48 = vld [vmem:[%s14112_s5] sm:$0xff]  }
 0x3a5   : > { %11465 = vmatprep.subr.bf16.mxu0 %v12424_v50  ;;  %11493 = vmatprep.subr.bf16.mxu1 %v12425_v51  ;;  %v12451_v49 = vld [vmem:[%s14112_s5 + $0x80] sm:$0xff]   ;;  %v12452_v50 = vld [vmem:[%s14112_s5 + $0x48] sm:$0xff]  }
 0x3a6   : > { %3439 = vmatmul.mubr.bf16.gmra.mrb[52].mxu0 %v14261_v17  ;;  %3584 = vmatmul.mubr.bf16.gmra.mrb[52].mxu1 %v14261_v17  ;;  %v12453_v51 = vld [vmem:[%s14112_s5 + $0xc8] sm:$0xff]  }
 0x3a7   : > { %3720 = vmatprep.mubr.bf16.mxu0 %v14242_v2  ;;  %3865 = vmatprep.mubr.bf16.mxu1 %v14242_v2 }
 0x3a8   : > { %11466 = vmatpush3.bf16.msra.mxu0 %v12426_v52  ;;  %11494 = vmatpush3.bf16.msra.mxu1 %v12427_v53  ;;  %v12454_v52 = vld [vmem:[%s14112_s5 + $0x8] sm:$0xff]  }
 0x3a9   : > { %11467 = vmatprep.subr.bf16.mxu0 %v12428_v54  ;;  %11495 = vmatprep.subr.bf16.mxu1 %v12429_v55  ;;  %v12455_v53 = vld [vmem:[%s14112_s5 + $0x88] sm:$0xff]   ;;  %v12456_v54 = vld [vmem:[%s14112_s5 + $0x50] sm:$0xff]  }
 0x3aa   : > { %v12457_v55 = vld [vmem:[%s14112_s5 + $0xd0] sm:$0xff]  }
 0x3ac   : > { %11468 = vmatpush3.bf16.msra.mxu0 %v12430_v56  ;;  %11496 = vmatpush3.bf16.msra.mxu1 %v12431_v57  ;;  %v11085_v60 = vpop.f32.mrb[0].mxu0  ;;  %v11113_v61 = vpop.f32.mrb[0].mxu1  ;;  %v12458_v56 = vld [vmem:[%s14112_s5 + $0x10] sm:$0xff]  }
 0x3ad   : > { %11469 = vmatprep.subr.bf16.mxu0 %v12432_v58  ;;  %11497 = vmatprep.subr.bf16.mxu1 %v12433_v30  ;;  %v11086_v0 = vpop.f32.mrb[1].mxu0  ;;  %v11114_v42 = vpop.f32.mrb[1].mxu1  ;;  %v12459_v57 = vld [vmem:[%s14112_s5 + $0x90] sm:$0xff]   ;;  %v12460_v58 = vld [vmem:[%s14112_s5 + $0x58] sm:$0xff]  }
 0x3ae   : > { %v14517_v43 = vadd.f32 %v11086_v0, %v11085_v60  ;;  %v14519_v1 = vadd.f32 %v11114_v42, %v11113_v61  ;;  %v11088_v3 = vpop.f32.mrb[2].mxu0  ;;  %v11116_v4 = vpop.f32.mrb[2].mxu1  ;;  %v12461_v30 = vld [vmem:[%s14112_s5 + $0xd8] sm:$0xff]   ;;  %v12464_v60 = vld [vmem:[%s14112_s5 + $0x60] sm:$0xff]  }
 0x3af   : > { %v11089_v5 = vpop.f32.mrb[3].mxu0  ;;  %v11117_v6 = vpop.f32.mrb[3].mxu1  ;;  %v12465_v61 = vld [vmem:[%s14112_s5 + $0xe0] sm:$0xff]  }
 0x3b0   : > { %11470 = vmatpush3.bf16.msra.mxu0 %v12434_v31  ;;  %11498 = vmatpush3.bf16.msra.mxu1 %v12435_v59  ;;  %v14523_v9 = vadd.f32 %v11089_v5, %v11088_v3  ;;  %v14525_v32 = vadd.f32 %v11117_v6, %v11116_v4  ;;  %v12462_v31 = vld [vmem:[%s14112_s5 + $0x18] sm:$0xff]   ;;  %v12466_v0 = vld [vmem:[%s14112_s5 + $0x20] sm:$0xff]  }
 0x3b1   : > { %11471 = vmatprep.subr.bf16.mxu0 %v12436_v62  ;;  %11499 = vmatprep.subr.bf16.mxu1 %v12437_v63  ;;  %v12463_v59 = vld [vmem:[%s14112_s5 + $0x98] sm:$0xff]   ;;  %v12467_v42 = vld [vmem:[%s14112_s5 + $0xa0] sm:$0xff]  }
 0x3b2   : > { %v5298_v11 = vpack.c.bf16 %v14523_v9, %v14517_v43  ;;  %v5300_v12 = vpack.c.bf16 %v14525_v32, %v14519_v1 }
 0x3b4   : > { %11472 = vmatpush3.bf16.msra.mxu0 %v12438_v7  ;;  %11500 = vmatpush3.bf16.msra.mxu1 %v12439_v8  ;;  %v11091_v15 = vpop.f32.mrb[4].mxu0  ;;  %v11119_v16 = vpop.f32.mrb[4].mxu1  ;;  %v12468_v7 = vld [vmem:[%s14112_s5 + $0x68] sm:$0xff]  }
 0x3b5   : > { %11473 = vmatprep.subr.bf16.mxu0 %v12440_v45  ;;  %11501 = vmatprep.subr.bf16.mxu1 %v12441_v10  ;;  %v11092_v21 = vpop.f32.mrb[5].mxu0  ;;  %v11120_v22 = vpop.f32.mrb[5].mxu1  ;;  %v12469_v8 = vld [vmem:[%s14112_s5 + $0xe8] sm:$0xff]  }
 0x3b6   : > { %v14537_v23 = vadd.f32 %v11092_v21, %v11091_v15  ;;  %v14539_v24 = vadd.f32 %v11120_v22, %v11119_v16  ;;  %v11094_v25 = vpop.f32.mrb[6].mxu0  ;;  %v11122_v27 = vpop.f32.mrb[6].mxu1 }
 0x3b7   : > { %v11095_v28 = vpop.f32.mrb[7].mxu0  ;;  %v11123_v29 = vpop.f32.mrb[7].mxu1 }
 0x3b8   : > { %11474 = vmatpush3.bf16.msra.mxu0 %v12442_v13  ;;  %11502 = vmatpush3.bf16.msra.mxu1 %v12443_v14  ;;  %v14543_v38 = vadd.f32 %v11095_v28, %v11094_v25  ;;  %v14545_v39 = vadd.f32 %v11123_v29, %v11122_v27  ;;  %v12472_v25 = vld [vmem:[%s14112_s5 + $0x70] sm:$0xff]  }
 0x3b9   : > { %11475 = vmatprep.subr.bf16.mxu0 %v12444_v18  ;;  %11503 = vmatprep.subr.bf16.mxu1 %v12445_v19  ;;  %v12470_v18 = vld [vmem:[%s14112_s5 + $0x28] sm:$0xff]   ;;  %v12473_v27 = vld [vmem:[%s14112_s5 + $0xf0] sm:$0xff]  }
 0x3ba   : > { %v12471_v19 = vld [vmem:[%s14112_s5 + $0xa8] sm:$0xff]  }
 0x3bc   : > { %11476 = vmatpush3.bf16.msra.mxu0 %v12446_v34  ;;  %11504 = vmatpush3.bf16.msra.mxu1 %v12447_v35  ;;  %v12474_v34 = vld [vmem:[%s14112_s5 + $0x30] sm:$0xff]  }
 0x3bd   : > { %11517 = vmatprep.subr.bf16.mxu0 %v12448_v40  ;;  %11545 = vmatprep.subr.bf16.mxu1 %v12449_v41  ;;  %v12475_v35 = vld [vmem:[%s14112_s5 + $0xb0] sm:$0xff]  }
 0x3bf   : > { %3721 = vmatmul.mubr.bf16.vlgmr.msra.gmra.mrb[56].mxu0 %v14240_v33  ;;  %3866 = vmatmul.mubr.bf16.vlgmr.msra.gmra.mrb[56].mxu1 %v14240_v33 }
 0x3c0   : > { %3728 = vmatprep.mubr.bf16.mxu0 %v14252_v46  ;;  %3873 = vmatprep.mubr.bf16.mxu1 %v14252_v46 }
 0x3c1   : > { %11518 = vmatpush3.bf16.msra.mxu0 %v12450_v48  ;;  %11546 = vmatpush3.bf16.msra.mxu1 %v12451_v49 }
 0x3c2   : > { %11519 = vmatprep.subr.bf16.mxu0 %v12452_v50  ;;  %11547 = vmatprep.subr.bf16.mxu1 %v12453_v51  ;;  %v12476_v50 = vld [vmem:[%s14112_s5 + $0x78] sm:$0xff]  }
 0x3c3   : > { %v12477_v51 = vld [vmem:[%s14112_s5 + $0xf8] sm:$0xff]  }
 0x3c5   : > { %11520 = vmatpush3.bf16.msra.mxu0 %v12454_v52  ;;  %11548 = vmatpush3.bf16.msra.mxu1 %v12455_v53 }
 0x3c6   : > { %11521 = vmatprep.subr.bf16.mxu0 %v12456_v54  ;;  %11549 = vmatprep.subr.bf16.mxu1 %v12457_v55 }
 0x3c7   : > { %3729 = vmatmul.mubr.bf16.gmra.mrb[60].mxu0 %v14261_v17  ;;  %3874 = vmatmul.mubr.bf16.gmra.mrb[60].mxu1 %v14261_v17 }
 0x3c8   : > { %4266 = vmatprep.mubr.bf16.mxu0 %v14242_v2  ;;  %4411 = vmatprep.mubr.bf16.mxu1 %v14242_v2 }
 0x3c9   : > { %11522 = vmatpush3.bf16.msra.mxu0 %v12458_v56  ;;  %11550 = vmatpush3.bf16.msra.mxu1 %v12459_v57 }
 0x3ca   : > { %11523 = vmatprep.subr.bf16.mxu0 %v12460_v58  ;;  %11551 = vmatprep.subr.bf16.mxu1 %v12461_v30  ;;  %v12478_v58 = vld [vmem:[%s14112_s5 + $0x38] sm:$0xff]  }
 0x3cb   : > { %v12479_v30 = vld [vmem:[%s14112_s5 + $0xb8] sm:$0xff]  }
 0x3cc   : > { %v11141_v62 = vpop.f32.mrb[8].mxu0  ;;  %v11169_v63 = vpop.f32.mrb[8].mxu1 }
 0x3cd   : > { %11524 = vmatpush3.bf16.msra.mxu0 %v12462_v31  ;;  %11552 = vmatpush3.bf16.msra.mxu1 %v12463_v59  ;;  %v11142_v3 = vpop.f32.mrb[9].mxu0  ;;  %v11170_v4 = vpop.f32.mrb[9].mxu1  ;;  %v12566_v59 = vld [vmem:[%s14112_s5 + $0x328] sm:$0xff]  }
 0x3ce   : > { %11525 = vmatprep.subr.bf16.mxu0 %v12464_v60  ;;  %11553 = vmatprep.subr.bf16.mxu1 %v12465_v61  ;;  %v14579_v5 = vadd.f32 %v11142_v3, %v11141_v62  ;;  %v14581_v6 = vadd.f32 %v11170_v4, %v11169_v63  ;;  %v11144_v45 = vpop.f32.mrb[10].mxu0  ;;  %v11172_v10 = vpop.f32.mrb[10].mxu1  ;;  %v12480_v60 = vld [vmem:[%s14112_s5 + $0x140] sm:$0xff]   ;;  %v12486_v3 = vld [vmem:[%s14112_s5 + $0x108] sm:$0xff]  }
 0x3cf   : > { %v11145_v13 = vpop.f32.mrb[11].mxu0  ;;  %v11173_v14 = vpop.f32.mrb[11].mxu1  ;;  %v12481_v61 = vld [vmem:[%s14112_s5 + $0x1c0] sm:$0xff]   ;;  %v12487_v4 = vld [vmem:[%s14112_s5 + $0x188] sm:$0xff]  }
 0x3d0   : > { %v14585_v15 = vadd.f32 %v11145_v13, %v11144_v45  ;;  %v14587_v16 = vadd.f32 %v11173_v14, %v11172_v10  ;;  %v12482_v62 = vld [vmem:[%s14112_s5 + $0x100] sm:$0xff]   ;;  %v12490_v45 = vld [vmem:[%s14112_s5 + $0x110] sm:$0xff]   ;;  %v12492_v13 = vld [vmem:[%s14112_s5 + $0x158] sm:$0xff]  }
 0x3d1   : > { %11526 = vmatpush3.bf16.msra.mxu0 %v12466_v0  ;;  %11554 = vmatpush3.bf16.msra.mxu1 %v12467_v42  ;;  %v12483_v63 = vld [vmem:[%s14112_s5 + $0x180] sm:$0xff]   ;;  %v12484_v0 = vld [vmem:[%s14112_s5 + $0x148] sm:$0xff]   ;;  %v12491_v10 = vld [vmem:[%s14112_s5 + $0x190] sm:$0xff]  }
 0x3d2   : > { %11527 = vmatprep.subr.bf16.mxu0 %v12468_v7  ;;  %11555 = vmatprep.subr.bf16.mxu1 %v12469_v8  ;;  %v12485_v42 = vld [vmem:[%s14112_s5 + $0x1c8] sm:$0xff]   ;;  %v12488_v7 = vld [vmem:[%s14112_s5 + $0x150] sm:$0xff]   ;;  %v12493_v14 = vld [vmem:[%s14112_s5 + $0x1d8] sm:$0xff]  }
 0x3d3   : > { %v12489_v8 = vld [vmem:[%s14112_s5 + $0x1d0] sm:$0xff]   ;;  %v12567_v31 = vld [vmem:[%s14112_s5 + $0x3a8] sm:$0xff]  }
 0x3d4   : > { %v11147_v28 = vpop.f32.mrb[12].mxu0  ;;  %v11175_v29 = vpop.f32.mrb[12].mxu1 }
 0x3d5   : > { %11528 = vmatpush3.bf16.msra.mxu0 %v12470_v18  ;;  %11556 = vmatpush3.bf16.msra.mxu1 %v12471_v19  ;;  %v11148_v40 = vpop.f32.mrb[13].mxu0  ;;  %v11176_v41 = vpop.f32.mrb[13].mxu1  ;;  %v12494_v18 = vld [vmem:[%s14112_s5 + $0x118] sm:$0xff]  }
 0x3d6   : > { %11529 = vmatprep.subr.bf16.mxu0 %v12472_v25  ;;  %11557 = vmatprep.subr.bf16.mxu1 %v12473_v27  ;;  %v14599_v48 = vadd.f32 %v11148_v40, %v11147_v28  ;;  %v14601_v49 = vadd.f32 %v11176_v41, %v11175_v29  ;;  %v11150_v52 = vpop.f32.mrb[14].mxu0  ;;  %v11178_v53 = vpop.f32.mrb[14].mxu1  ;;  %v12495_v19 = vld [vmem:[%s14112_s5 + $0x198] sm:$0xff]   ;;  %v12496_v25 = vld [vmem:[%s14112_s5 + $0x160] sm:$0xff]  }
 0x3d7   : > { %v11151_v54 = vpop.f32.mrb[15].mxu0  ;;  %v11179_v55 = vpop.f32.mrb[15].mxu1  ;;  %v12497_v27 = vld [vmem:[%s14112_s5 + $0x1e0] sm:$0xff]  }
 0x3d8   : > { %v14605_v56 = vadd.f32 %v11151_v54, %v11150_v52  ;;  %v14607_v57 = vadd.f32 %v11179_v55, %v11178_v53  ;;  %v12500_v52 = vld [vmem:[%s14112_s5 + $0x168] sm:$0xff]  }
 0x3d9   : > { %11530 = vmatpush3.bf16.msra.mxu0 %v12474_v34  ;;  %11558 = vmatpush3.bf16.msra.mxu1 %v12475_v35  ;;  %v12498_v34 = vld [vmem:[%s14112_s5 + $0x120] sm:$0xff]   ;;  %v12501_v53 = vld [vmem:[%s14112_s5 + $0x1e8] sm:$0xff]  }
 0x3da   : > { %11531 = vmatprep.subr.bf16.mxu0 %v12476_v50  ;;  %11559 = vmatprep.subr.bf16.mxu1 %v12477_v51  ;;  %v12499_v35 = vld [vmem:[%s14112_s5 + $0x1a0] sm:$0xff]  }
 0x3dd   : > { %11532 = vmatpush3.bf16.msra.mxu0 %v12478_v58  ;;  %11560 = vmatpush3.bf16.msra.mxu1 %v12479_v30 }
 0x3de   : > { %11573 = vmatprep.subr.bf16.mxu0 %v12480_v60  ;;  %11601 = vmatprep.subr.bf16.mxu1 %v12481_v61 }
 0x3e0   : > { %4267 = vmatmul.mubr.bf16.vlgmr.msra.gmra.mrb[64].mxu0 %v14240_v33  ;;  %4412 = vmatmul.mubr.bf16.vlgmr.msra.gmra.mrb[64].mxu1 %v14240_v33 }
 0x3e1   : > { %4274 = vmatprep.mubr.bf16.mxu0 %v14252_v46  ;;  %4419 = vmatprep.mubr.bf16.mxu1 %v14252_v46 }
 0x3e2   : > { %11574 = vmatpush3.bf16.msra.mxu0 %v12482_v62  ;;  %11602 = vmatpush3.bf16.msra.mxu1 %v12483_v63  ;;  %v12502_v62 = vld [vmem:[%s14112_s5 + $0x128] sm:$0xff]  }
 0x3e3   : > { %11575 = vmatprep.subr.bf16.mxu0 %v12484_v0  ;;  %11603 = vmatprep.subr.bf16.mxu1 %v12485_v42  ;;  %v12503_v63 = vld [vmem:[%s14112_s5 + $0x1a8] sm:$0xff]  }
 0x3e6   : > { %11576 = vmatpush3.bf16.msra.mxu0 %v12486_v3  ;;  %11604 = vmatpush3.bf16.msra.mxu1 %v12487_v4  ;;  %v12504_v3 = vld [vmem:[%s14112_s5 + $0x170] sm:$0xff]  }
 0x3e7   : > { %11577 = vmatprep.subr.bf16.mxu0 %v12488_v7  ;;  %11605 = vmatprep.subr.bf16.mxu1 %v12489_v8  ;;  %v12505_v4 = vld [vmem:[%s14112_s5 + $0x1f0] sm:$0xff]  }
 0x3e8   : > { %4275 = vmatmul.mubr.bf16.gmra.mrb[68].mxu0 %v14261_v17  ;;  %4420 = vmatmul.mubr.bf16.gmra.mrb[68].mxu1 %v14261_v17 }
 0x3e9   : > { %4556 = vmatprep.mubr.bf16.mxu0 %v14242_v2  ;;  %4701 = vmatprep.mubr.bf16.mxu1 %v14242_v2 }
 0x3ea   : > { %11578 = vmatpush3.bf16.msra.mxu0 %v12490_v45  ;;  %11606 = vmatpush3.bf16.msra.mxu1 %v12491_v10  ;;  %v12506_v45 = vld [vmem:[%s14112_s5 + $0x130] sm:$0xff]  }
 0x3eb   : > { %11579 = vmatprep.subr.bf16.mxu0 %v12492_v13  ;;  %11607 = vmatprep.subr.bf16.mxu1 %v12493_v14  ;;  %v12507_v10 = vld [vmem:[%s14112_s5 + $0x1b0] sm:$0xff]  }
 0x3ed   : > { %v11197_v28 = vpop.f32.mrb[16].mxu0  ;;  %v11225_v29 = vpop.f32.mrb[16].mxu1 }
 0x3ee   : > { %11580 = vmatpush3.bf16.msra.mxu0 %v12494_v18  ;;  %11608 = vmatpush3.bf16.msra.mxu1 %v12495_v19  ;;  %v11198_v40 = vpop.f32.mrb[17].mxu0  ;;  %v11226_v41 = vpop.f32.mrb[17].mxu1 }
 0x3ef   : > { %11581 = vmatprep.subr.bf16.mxu0 %v12496_v25  ;;  %11609 = vmatprep.subr.bf16.mxu1 %v12497_v27  ;;  %v14643_v50 = vadd.f32 %v11198_v40, %v11197_v28  ;;  %v14645_v51 = vadd.f32 %v11226_v41, %v11225_v29  ;;  %v11200_v54 = vpop.f32.mrb[18].mxu0  ;;  %v11228_v55 = vpop.f32.mrb[18].mxu1  ;;  %v12508_v25 = vld [vmem:[%s14112_s5 + $0x178] sm:$0xff]  }
 0x3f0   : > { %v11201_v58 = vpop.f32.mrb[19].mxu0  ;;  %v11229_v30 = vpop.f32.mrb[19].mxu1  ;;  %v12509_v27 = vld [vmem:[%s14112_s5 + $0x1f8] sm:$0xff]  }
 0x3f1   : > { %v14649_v60 = vadd.f32 %v11201_v58, %v11200_v54  ;;  %v14651_v61 = vadd.f32 %v11229_v30, %v11228_v55  ;;  %v12512_v58 = vld [vmem:[%s14112_s5 + $0x240] sm:$0xff]  }
 0x3f2   : > { %11582 = vmatpush3.bf16.msra.mxu0 %v12498_v34  ;;  %11610 = vmatpush3.bf16.msra.mxu1 %v12499_v35  ;;  %v12513_v30 = vld [vmem:[%s14112_s5 + $0x2c0] sm:$0xff]  }
 0x3f3   : > { %11583 = vmatprep.subr.bf16.mxu0 %v12500_v52  ;;  %11611 = vmatprep.subr.bf16.mxu1 %v12501_v53  ;;  %v12510_v52 = vld [vmem:[%s14112_s5 + $0x138] sm:$0xff]  }
 0x3f4   : > { %v12511_v53 = vld [vmem:[%s14112_s5 + $0x1b8] sm:$0xff]  }
 0x3f5   : > { %v11203_v7 = vpop.f32.mrb[20].mxu0  ;;  %v11231_v8 = vpop.f32.mrb[20].mxu1 }
 0x3f6   : > { %11584 = vmatpush3.bf16.msra.mxu0 %v12502_v62  ;;  %11612 = vmatpush3.bf16.msra.mxu1 %v12503_v63  ;;  %v11204_v13 = vpop.f32.mrb[21].mxu0  ;;  %v11232_v14 = vpop.f32.mrb[21].mxu1  ;;  %v12514_v62 = vld [vmem:[%s14112_s5 + $0x200] sm:$0xff]  }
 0x3f7   : > { %11585 = vmatprep.subr.bf16.mxu0 %v12504_v3  ;;  %11613 = vmatprep.subr.bf16.mxu1 %v12505_v4  ;;  %v14663_v18 = vadd.f32 %v11204_v13, %v11203_v7  ;;  %v14665_v19 = vadd.f32 %v11232_v14, %v11231_v8  ;;  %v11206_v28 = vpop.f32.mrb[22].mxu0  ;;  %v11234_v29 = vpop.f32.mrb[22].mxu1  ;;  %v12515_v63 = vld [vmem:[%s14112_s5 + $0x280] sm:$0xff]   ;;  %v12516_v3 = vld [vmem:[%s14112_s5 + $0x248] sm:$0xff]   ;;  %v12522_v13 = vld [vmem:[%s14112_s5 + $0x210] sm:$0xff]  }
 0x3f8   : > { %v11207_v34 = vpop.f32.mrb[23].mxu0  ;;  %v11235_v35 = vpop.f32.mrb[23].mxu1  ;;  %v12517_v4 = vld [vmem:[%s14112_s5 + $0x2c8] sm:$0xff]   ;;  %v12523_v14 = vld [vmem:[%s14112_s5 + $0x290] sm:$0xff]  }
 0x3f9   : > { %v14669_v40 = vadd.f32 %v11207_v34, %v11206_v28  ;;  %v14671_v41 = vadd.f32 %v11235_v35, %v11234_v29  ;;  %v12518_v7 = vld [vmem:[%s14112_s5 + $0x208] sm:$0xff]   ;;  %v12526_v28 = vld [vmem:[%s14112_s5 + $0x218] sm:$0xff]   ;;  %v12528_v34 = vld [vmem:[%s14112_s5 + $0x260] sm:$0xff]  }
 0x3fa   : > { %11586 = vmatpush3.bf16.msra.mxu0 %v12506_v45  ;;  %11614 = vmatpush3.bf16.msra.mxu1 %v12507_v10  ;;  %v12519_v8 = vld [vmem:[%s14112_s5 + $0x288] sm:$0xff]   ;;  %v12520_v45 = vld [vmem:[%s14112_s5 + $0x250] sm:$0xff]   ;;  %v12527_v29 = vld [vmem:[%s14112_s5 + $0x298] sm:$0xff]  }
 0x3fb   : > { %11587 = vmatprep.subr.bf16.mxu0 %v12508_v25  ;;  %11615 = vmatprep.subr.bf16.mxu1 %v12509_v27  ;;  %v12521_v10 = vld [vmem:[%s14112_s5 + $0x2d0] sm:$0xff]   ;;  %v12524_v25 = vld [vmem:[%s14112_s5 + $0x258] sm:$0xff]   ;;  %v12529_v35 = vld [vmem:[%s14112_s5 + $0x2e0] sm:$0xff]  }
 0x3fc   : > { %v12525_v27 = vld [vmem:[%s14112_s5 + $0x2d8] sm:$0xff]  }
 0x3fe   : > { %11588 = vmatpush3.bf16.msra.mxu0 %v12510_v52  ;;  %11616 = vmatpush3.bf16.msra.mxu1 %v12511_v53 }
 0x3ff   : > { %11629 = vmatprep.subr.bf16.mxu0 %v12512_v58  ;;  %11657 = vmatprep.subr.bf16.mxu1 %v12513_v30  ;;  %v12530_v58 = vld [vmem:[%s14112_s5 + $0x220] sm:$0xff]  }
 0x400   : > { %v12531_v30 = vld [vmem:[%s14112_s5 + $0x2a0] sm:$0xff]  }
 0x401   : > { %4557 = vmatmul.mubr.bf16.vlgmr.msra.gmra.mrb[72].mxu0 %v14240_v33  ;;  %4702 = vmatmul.mubr.bf16.vlgmr.msra.gmra.mrb[72].mxu1 %v14240_v33 }
 0x402   : > { %4564 = vmatprep.mubr.bf16.mxu0 %v14252_v46  ;;  %4709 = vmatprep.mubr.bf16.mxu1 %v14252_v46 }
 0x403   : > { %11630 = vmatpush3.bf16.msra.mxu0 %v12514_v62  ;;  %11658 = vmatpush3.bf16.msra.mxu1 %v12515_v63 }
 0x404   : > { %11631 = vmatprep.subr.bf16.mxu0 %v12516_v3  ;;  %11659 = vmatprep.subr.bf16.mxu1 %v12517_v4 }
 0x407   : > { %11632 = vmatpush3.bf16.msra.mxu0 %v12518_v7  ;;  %11660 = vmatpush3.bf16.msra.mxu1 %v12519_v8  ;;  %v12532_v7 = vld [vmem:[%s14112_s5 + $0x268] sm:$0xff]  }
 0x408   : > { %11633 = vmatprep.subr.bf16.mxu0 %v12520_v45  ;;  %11661 = vmatprep.subr.bf16.mxu1 %v12521_v10  ;;  %v12533_v8 = vld [vmem:[%s14112_s5 + $0x2e8] sm:$0xff]  }
 0x409   : > { %4565 = vmatmul.mubr.bf16.gmra.mrb[76].mxu0 %v14261_v17  ;;  %4710 = vmatmul.mubr.bf16.gmra.mrb[76].mxu1 %v14261_v17 }
 0x40a   : > { %4846 = vmatprep.mubr.bf16.mxu0 %v14242_v2  ;;  %4991 = vmatprep.mubr.bf16.mxu1 %v14242_v2 }
 0x40b   : > { %11634 = vmatpush3.bf16.msra.mxu0 %v12522_v13  ;;  %11662 = vmatpush3.bf16.msra.mxu1 %v12523_v14 }
 0x40c   : > { %11635 = vmatprep.subr.bf16.mxu0 %v12524_v25  ;;  %11663 = vmatprep.subr.bf16.mxu1 %v12525_v27 }
 0x40e   : > { %v11253_v52 = vpop.f32.mrb[24].mxu0  ;;  %v11281_v53 = vpop.f32.mrb[24].mxu1 }
 0x40f   : > { %11636 = vmatpush3.bf16.msra.mxu0 %v12526_v28  ;;  %11664 = vmatpush3.bf16.msra.mxu1 %v12527_v29  ;;  %v11254_v62 = vpop.f32.mrb[25].mxu0  ;;  %v11282_v63 = vpop.f32.mrb[25].mxu1  ;;  %v12534_v28 = vld [vmem:[%s14112_s5 + $0x228] sm:$0xff]  }
 0x410   : > { %11637 = vmatprep.subr.bf16.mxu0 %v12528_v34  ;;  %11665 = vmatprep.subr.bf16.mxu1 %v12529_v35  ;;  %v14707_v3 = vadd.f32 %v11254_v62, %v11253_v52  ;;  %v14709_v4 = vadd.f32 %v11282_v63, %v11281_v53  ;;  %v11256_v45 = vpop.f32.mrb[26].mxu0  ;;  %v11284_v10 = vpop.f32.mrb[26].mxu1  ;;  %v12535_v29 = vld [vmem:[%s14112_s5 + $0x2a8] sm:$0xff]   ;;  %v12536_v52 = vld [vmem:[%s14112_s5 + $0x270] sm:$0xff]  }
 0x411   : > { %v11257_v13 = vpop.f32.mrb[27].mxu0  ;;  %v11285_v14 = vpop.f32.mrb[27].mxu1  ;;  %v12537_v53 = vld [vmem:[%s14112_s5 + $0x2f0] sm:$0xff]  }
 0x412   : > { %v14713_v25 = vadd.f32 %v11257_v13, %v11256_v45  ;;  %v14715_v27 = vadd.f32 %v11285_v14, %v11284_v10  ;;  %v12540_v13 = vld [vmem:[%s14112_s5 + $0x278] sm:$0xff]  }
 0x413   : > { %11638 = vmatpush3.bf16.msra.mxu0 %v12530_v58  ;;  %11666 = vmatpush3.bf16.msra.mxu1 %v12531_v30  ;;  %v12538_v58 = vld [vmem:[%s14112_s5 + $0x230] sm:$0xff]   ;;  %v12541_v14 = vld [vmem:[%s14112_s5 + $0x2f8] sm:$0xff]  }
 0x414   : > { %11639 = vmatprep.subr.bf16.mxu0 %v12532_v7  ;;  %11667 = vmatprep.subr.bf16.mxu1 %v12533_v8  ;;  %v12539_v30 = vld [vmem:[%s14112_s5 + $0x2b0] sm:$0xff]  }
 0x416   : > { %v11259_v62 = vpop.f32.mrb[28].mxu0  ;;  %v11287_v63 = vpop.f32.mrb[28].mxu1 }
 0x417   : > { %11640 = vmatpush3.bf16.msra.mxu0 %v12534_v28  ;;  %11668 = vmatpush3.bf16.msra.mxu1 %v12535_v29  ;;  %v11260_v45 = vpop.f32.mrb[29].mxu0  ;;  %v11288_v7 = vpop.f32.mrb[29].mxu1 }
 0x418   : > { %11641 = vmatprep.subr.bf16.mxu0 %v12536_v52  ;;  %11669 = vmatprep.subr.bf16.mxu1 %v12537_v53  ;;  %v14727_v8 = vadd.f32 %v11260_v45, %v11259_v62  ;;  %v14729_v10 = vadd.f32 %v11288_v7, %v11287_v63  ;;  %v11262_v20 = vpop.f32.mrb[30].mxu0  ;;  %v11290_v35 = vpop.f32.mrb[30].mxu1  ;;  %v12542_v52 = vld [vmem:[%s14112_s5 + $0x238] sm:$0xff]   ;;  %v12545_v45 = vld [vmem:[%s14112_s5 + $0x3c0] sm:$0xff]   ;;  %v12549_v7 = vld [vmem:[%s14112_s5 + $0x3c8] sm:$0xff]  }
 0x419   : > { %v11263_v28 = vpop.f32.mrb[31].mxu0  ;;  %v11291_v29 = vpop.f32.mrb[31].mxu1  ;;  %v12543_v53 = vld [vmem:[%s14112_s5 + $0x2b8] sm:$0xff]  }
 0x41a   : > { %v14733_v34 = vadd.f32 %v11263_v28, %v11262_v20  ;;  %v14735_v55 = vadd.f32 %v11291_v29, %v11290_v35  ;;  %v12544_v20 = vld [vmem:[%s14112_s5 + $0x340] sm:$0xff]   ;;  %v12552_v28 = vld [vmem:[%s14112_s5 + $0x350] sm:$0xff]  }
 0x41b   : > { %11642 = vmatpush3.bf16.msra.mxu0 %v12538_v58  ;;  %11670 = vmatpush3.bf16.msra.mxu1 %v12539_v30  ;;  %v12546_v35 = vld [vmem:[%s14112_s5 + $0x300] sm:$0xff]   ;;  %v12548_v30 = vld [vmem:[%s14112_s5 + $0x348] sm:$0xff]   ;;  %v12553_v29 = vld [vmem:[%s14112_s5 + $0x3d0] sm:$0xff]  }
 0x41c   : > { %11643 = vmatprep.subr.bf16.mxu0 %v12540_v13  ;;  %11671 = vmatprep.subr.bf16.mxu1 %v12541_v14  ;;  %v12547_v58 = vld [vmem:[%s14112_s5 + $0x380] sm:$0xff]   ;;  %v12550_v13 = vld [vmem:[%s14112_s5 + $0x308] sm:$0xff]  }
 0x41d   : > { %v12551_v14 = vld [vmem:[%s14112_s5 + $0x388] sm:$0xff]  }
 0x41f   : > { %11644 = vmatpush3.bf16.msra.mxu0 %v12542_v52  ;;  %11672 = vmatpush3.bf16.msra.mxu1 %v12543_v53  ;;  %v12554_v52 = vld [vmem:[%s14112_s5 + $0x310] sm:$0xff]  }
 0x420   : > { %11685 = vmatprep.subr.bf16.mxu0 %v12544_v20  ;;  %11713 = vmatprep.subr.bf16.mxu1 %v12545_v45  ;;  %v12555_v53 = vld [vmem:[%s14112_s5 + $0x390] sm:$0xff]   ;;  %v12556_v20 = vld [vmem:[%s14112_s5 + $0x358] sm:$0xff]  }
 0x421   : > { %v12557_v45 = vld [vmem:[%s14112_s5 + $0x3d8] sm:$0xff]  }
 0x422   : > { %4847 = vmatmul.mubr.bf16.vlgmr.msra.gmra.mrb[80].mxu0 %v14240_v33  ;;  %4992 = vmatmul.mubr.bf16.vlgmr.msra.gmra.mrb[80].mxu1 %v14240_v33 }
 0x423   : > { %4854 = vmatprep.mubr.bf16.mxu0 %v14252_v46  ;;  %4999 = vmatprep.mubr.bf16.mxu1 %v14252_v46 }
 0x424   : > { %11686 = vmatpush3.bf16.msra.mxu0 %v12546_v35  ;;  %11714 = vmatpush3.bf16.msra.mxu1 %v12547_v58  ;;  %v12558_v35 = vld [vmem:[%s14112_s5 + $0x318] sm:$0xff]  }
 0x425   : > { %11687 = vmatprep.subr.bf16.mxu0 %v12548_v30  ;;  %11715 = vmatprep.subr.bf16.mxu1 %v12549_v7  ;;  %v12559_v58 = vld [vmem:[%s14112_s5 + $0x398] sm:$0xff]   ;;  %v12560_v30 = vld [vmem:[%s14112_s5 + $0x360] sm:$0xff]  }
 0x426   : > { %v12561_v7 = vld [vmem:[%s14112_s5 + $0x3e0] sm:$0xff]  }
 0x428   : > { %11688 = vmatpush3.bf16.msra.mxu0 %v12550_v13  ;;  %11716 = vmatpush3.bf16.msra.mxu1 %v12551_v14 }
 0x429   : > { %11689 = vmatprep.subr.bf16.mxu0 %v12552_v28  ;;  %11717 = vmatprep.subr.bf16.mxu1 %v12553_v29  ;;  %v12562_v28 = vld [vmem:[%s14112_s5 + $0x320] sm:$0xff]  }
 0x42a   : > { %4855 = vmatmul.mubr.bf16.gmra.mrb[84].mxu0 %v14261_v17  ;;  %5000 = vmatmul.mubr.bf16.gmra.mrb[84].mxu1 %v14261_v17  ;;  %v12563_v29 = vld [vmem:[%s14112_s5 + $0x3a0] sm:$0xff]  }
 0x42b   : > { %5136 = vmatprep.mubr.bf16.mxu0 %v14242_v2  ;;  %5281 = vmatprep.mubr.bf16.mxu1 %v14242_v2 }
 0x42c   : > { %11690 = vmatpush3.bf16.msra.mxu0 %v12554_v52  ;;  %11718 = vmatpush3.bf16.msra.mxu1 %v12555_v53  ;;  %v12564_v53 = vld [vmem:[%s14112_s5 + $0x368] sm:$0xff]  }
 0x42d   : > { %11691 = vmatprep.subr.bf16.mxu0 %v12556_v20  ;;  %11719 = vmatprep.subr.bf16.mxu1 %v12557_v45  ;;  %v12565_v20 = vld [vmem:[%s14112_s5 + $0x3e8] sm:$0xff]  }
 0x42f   : > { %v11309_v13 = vpop.f32.mrb[32].mxu0  ;;  %v11337_v14 = vpop.f32.mrb[32].mxu1 }
 0x430   : > { %11692 = vmatpush3.bf16.msra.mxu0 %v12558_v35  ;;  %11720 = vmatpush3.bf16.msra.mxu1 %v12559_v58  ;;  %v11310_v63 = vpop.f32.mrb[33].mxu0  ;;  %v11338_v62 = vpop.f32.mrb[33].mxu1 }
 0x431   : > { %11693 = vmatprep.subr.bf16.mxu0 %v12560_v30  ;;  %11721 = vmatprep.subr.bf16.mxu1 %v12561_v7  ;;  %v11311_v2 = vadd.f32 %v11310_v63, %v11309_v13  ;;  %v11339_v52 = vadd.f32 %v11338_v62, %v11337_v14  ;;  %v11312_v45 = vpop.f32.mrb[34].mxu0  ;;  %v11340_v54 = vpop.f32.mrb[34].mxu1  ;;  %v12568_v30 = vld [vmem:[%s14112_s5 + $0x370] sm:$0xff]  }
 0x432   : > { %v11313_v42 = vpop.f32.mrb[35].mxu0  ;;  %v11341_v0 = vpop.f32.mrb[35].mxu1  ;;  %v12569_v7 = vld [vmem:[%s14112_s5 + $0x3f0] sm:$0xff]  }
 0x433   : > { %v11314_v35 = vadd.f32 %v11313_v42, %v11312_v45  ;;  %v11342_v58 = vadd.f32 %v11341_v0, %v11340_v54  ;;  %v12570_v42 = vld [vmem:[%s14112_s5 + $0x330] sm:$0xff]  }
 0x434   : > { %11694 = vmatpush3.bf16.msra.mxu0 %v12562_v28  ;;  %11722 = vmatpush3.bf16.msra.mxu1 %v12563_v29  ;;  %v12571_v45 = vld [vmem:[%s14112_s5 + $0x3b0] sm:$0xff]  }
 0x435   : > { %11695 = vmatprep.subr.bf16.mxu0 %v12564_v53  ;;  %11723 = vmatprep.subr.bf16.mxu1 %v12565_v20  ;;  %v5314_v63 = vpack.c.bf16 %v11314_v35, %v11311_v2  ;;  %v5316_v62 = vpack.c.bf16 %v11342_v58, %v11339_v52  ;;  %v12572_v2 = vld [vmem:[%s14112_s5 + $0x378] sm:$0xff]  }
 0x436   : > { %v12573_v53 = vld [vmem:[%s14112_s5 + $0x3f8] sm:$0xff]  }
 0x437   : > { %v11315_v13 = vpop.f32.mrb[36].mxu0  ;;  %v11343_v14 = vpop.f32.mrb[36].mxu1 }
 0x438   : > { %11696 = vmatpush3.bf16.msra.mxu0 %v12566_v59  ;;  %11724 = vmatpush3.bf16.msra.mxu1 %v12567_v31  ;;  %v11316_v0 = vpop.f32.mrb[37].mxu0  ;;  %v11344_v54 = vpop.f32.mrb[37].mxu1  ;;  %v12574_v31 = vld [vmem:[%s14112_s5 + $0x338] sm:$0xff]  }
 0x439   : > { %11697 = vmatprep.subr.bf16.mxu0 %v12568_v30  ;;  %11725 = vmatprep.subr.bf16.mxu1 %v12569_v7  ;;  %v11317_v28 = vadd.f32 %v11316_v0, %v11315_v13  ;;  %v11345_v29 = vadd.f32 %v11344_v54, %v11343_v14  ;;  %v11318_v52 = vpop.f32.mrb[38].mxu0  ;;  %v11346_v20 = vpop.f32.mrb[38].mxu1  ;;  %v12575_v59 = vld [vmem:[%s14112_s5 + $0x3b8] sm:$0xff]   ;;  %v5338_v30 = vsel %vm5330_vm0, %v5314_v63, 0 }
 0x43a   : > { %v11319_v35 = vpop.f32.mrb[39].mxu0  ;;  %v11347_v58 = vpop.f32.mrb[39].mxu1 }
 0x43b   : > { %v11320_v22 = vadd.f32 %v11319_v35, %v11318_v52  ;;  %v11348_v21 = vadd.f32 %v11347_v58, %v11346_v20 }
 0x43c   : > { %11698 = vmatpush3.bf16.msra.mxu0 %v12570_v42  ;;  %11726 = vmatpush3.bf16.msra.mxu1 %v12571_v45 }
 0x43d   : > { %11699 = vmatprep.subr.bf16.mxu0 %v12572_v2  ;;  %11727 = vmatprep.subr.bf16.mxu1 %v12573_v53  ;;  %v5315_v47 = vpack.c.bf16 %v11320_v22, %v11317_v28  ;;  %v5317_v44 = vpack.c.bf16 %v11348_v21, %v11345_v29  ;;  %v5399_v22 = vsel %vm5330_vm0, %v5316_v62, 0  ;;  %v16183_v29 = vpack.c.bf16 %v14585_v15, %v14579_v5 }
 0x440   : > { %11700 = vmatpush3.bf16.msra.mxu0 %v12574_v31  ;;  %11728 = vmatpush3.bf16.msra.mxu1 %v12575_v59  ;;  %v16185_v59 = vpack.c.bf16 %v14605_v56, %v14599_v48 }
 0x441   : > { %12021 = vmatprep.subr.msk.bf16.mxu0 %vm5330_vm0, %v5314_v63  ;;  %12023 = vmatprep.subr.msk.bf16.mxu1 %vm5330_vm0, %v5316_v62 }
 0x443   : > { %5137 = vmatmul.mubr.bf16.vlgmr.msra.gmra.mrb[88].mxu0 %v14240_v33  ;;  %5282 = vmatmul.mubr.bf16.vlgmr.msra.gmra.mrb[88].mxu1 %v14240_v33  ;;  %v5341_v33 = vsel %vm5330_vm0, %v5315_v47, 0 }
 0x444   : > { %5144 = vmatprep.mubr.bf16.mxu0 %v14252_v46  ;;  %5289 = vmatprep.mubr.bf16.mxu1 %v14252_v46  ;;  %v5402_v46 = vsel %vm5330_vm0, %v5317_v44, 0 }
 0x449   : > { %11806 = vmatpush3.bf16.xpose.msra.mxu0 %v5338_v30  ;;  %11814 = vmatpush3.bf16.xpose.msra.mxu1 %v5399_v22  ;;  %v16186_v30 = vpack.c.bf16 %v14607_v57, %v14601_v49  ;;  %v16187_v22 = vpack.c.bf16 %v14649_v60, %v14643_v50 }
 0x44a   : > { %12022 = vmatprep.subr.msk.bf16.mxu0 %vm5330_vm0, %v5315_v47  ;;  %12024 = vmatprep.subr.msk.bf16.mxu1 %vm5330_vm0, %v5317_v44  ;;  %v16181_v47 = vpack.c.bf16 %v14543_v38, %v14537_v23  ;;  %v16182_v44 = vpack.c.bf16 %v14545_v39, %v14539_v24  ;;  %v16184_v23 = vpack.c.bf16 %v14587_v16, %v14581_v6 }
 0x44b   : > { %5145 = vmatmul.mubr.bf16.gmra.mrb[92].mxu0 %v14261_v17  ;;  %5290 = vmatmul.mubr.bf16.gmra.mrb[92].mxu1 %v14261_v17 }
 0x44c   : > { %11809 = vmatprep.mubr.msk.bf16.mxu0 %vm5330_vm0, %v5298_v11  ;;  %11817 = vmatprep.mubr.msk.bf16.mxu1 %vm5330_vm0, %v5300_v12 }
 0x450   : > { %v11365_v21 = vpop.f32.mrb[40].mxu0  ;;  %v11393_v63 = vpop.f32.mrb[40].mxu1 }
 0x451   : > { %11808 = vmatpush3.bf16.xpose.msra.mxu0 %v5341_v33  ;;  %11816 = vmatpush3.bf16.xpose.msra.mxu1 %v5402_v46  ;;  %v11366_v62 = vpop.f32.mrb[41].mxu0  ;;  %v11394_v17 = vpop.f32.mrb[41].mxu1  ;;  %v16188_v33 = vpack.c.bf16 %v14651_v61, %v14645_v51 }
 0x452   : > { %v11367_v7 = vadd.f32 %v11366_v62, %v11365_v21  ;;  %v11395_v13 = vadd.f32 %v11394_v17, %v11393_v63  ;;  %v11368_v43 = vpop.f32.mrb[42].mxu0  ;;  %v11396_v9 = vpop.f32.mrb[42].mxu1 }
 0x453   : > { %v11369_v11 = vpop.f32.mrb[43].mxu0  ;;  %v11397_v14 = vpop.f32.mrb[43].mxu1 }
 0x454   : > { %v11370_v42 = vadd.f32 %v11369_v11, %v11368_v43  ;;  %v11398_v1 = vadd.f32 %v11397_v14, %v11396_v9 }
 0x456   : > { %v5318_v32 = vpack.c.bf16 %v11370_v42, %v11367_v7  ;;  %v5320_v12 = vpack.c.bf16 %v11398_v1, %v11395_v13 }
 0x458   : > { %11810 = vmatmul.mubr.msk.bf16.vlgmr.msra.gmra.mrb[96].mxu0 %vm5330_vm0, %v16181_v47  ;;  %11818 = vmatmul.mubr.msk.bf16.vlgmr.msra.gmra.mrb[96].mxu1 %vm5330_vm0, %v16182_v44  ;;  %v11371_v45 = vpop.f32.mrb[44].mxu0  ;;  %v11399_v0 = vpop.f32.mrb[44].mxu1  ;;  %v5460_v54 = vsel %vm5330_vm0, %v5318_v32, 0  ;;  %v5521_v28 = vsel %vm5330_vm0, %v5320_v12, 0 }
 0x459   : > { %11825 = vmatprep.mubr.msk.bf16.mxu0 %vm5330_vm0, %v16183_v29  ;;  %11833 = vmatprep.mubr.msk.bf16.mxu1 %vm5330_vm0, %v16184_v23  ;;  %v11372_v38 = vpop.f32.mrb[45].mxu0  ;;  %v11400_v24 = vpop.f32.mrb[45].mxu1 }
 0x45a   : > { %12025 = vmatprep.subr.msk.bf16.mxu0 %vm5330_vm0, %v5318_v32  ;;  %12027 = vmatprep.subr.msk.bf16.mxu1 %vm5330_vm0, %v5320_v12  ;;  %v11373_v39 = vadd.f32 %v11372_v38, %v11371_v45  ;;  %v11401_v2 = vadd.f32 %v11400_v24, %v11399_v0  ;;  %v11374_v53 = vpop.f32.mrb[46].mxu0  ;;  %v11402_v52 = vpop.f32.mrb[46].mxu1  ;;  %v16189_v24 = vpack.c.bf16 %v14669_v40, %v14663_v18 }
 0x45b   : > { %11822 = vmatpush3.bf16.xpose.msra.mxu0 %v5460_v54  ;;  %11830 = vmatpush3.bf16.xpose.msra.mxu1 %v5521_v28  ;;  %v11375_v5 = vpop.f32.mrb[47].mxu0  ;;  %v11403_v15 = vpop.f32.mrb[47].mxu1 }
 0x45c   : > { %v11376_v20 = vadd.f32 %v11375_v5, %v11374_v53  ;;  %v11404_v35 = vadd.f32 %v11403_v15, %v11402_v52  ;;  %v16192_v53 = vpack.c.bf16 %v14715_v27, %v14709_v4 }
 0x45e   : > { %v5319_v58 = vpack.c.bf16 %v11376_v20, %v11373_v39  ;;  %v5321_v6 = vpack.c.bf16 %v11404_v35, %v11401_v2  ;;  %v16190_v39 = vpack.c.bf16 %v14671_v41, %v14665_v19  ;;  %v16191_v2 = vpack.c.bf16 %v14713_v25, %v14707_v3 }
 0x460   : > { %12026 = vmatprep.subr.msk.bf16.mxu0 %vm5330_vm0, %v5319_v58  ;;  %12028 = vmatprep.subr.msk.bf16.mxu1 %vm5330_vm0, %v5321_v6  ;;  %v5463_v16 = vsel %vm5330_vm0, %v5319_v58, 0  ;;  %v5524_v31 = vsel %vm5330_vm0, %v5321_v6, 0 }
 0x463   : > { %11824 = vmatpush3.bf16.xpose.msra.mxu0 %v5463_v16  ;;  %11832 = vmatpush3.bf16.xpose.msra.mxu1 %v5524_v31 }
 0x46a   : > { %11826 = vmatmul.mubr.msk.bf16.vlgmr.msra.gmra.mrb[100].mxu0 %vm5330_vm0, %v16185_v59  ;;  %11834 = vmatmul.mubr.msk.bf16.vlgmr.msra.gmra.mrb[100].mxu1 %vm5330_vm0, %v16186_v30 }
 0x46b   : > { %11841 = vmatprep.mubr.msk.bf16.mxu0 %vm5330_vm0, %v16187_v22  ;;  %11849 = vmatprep.mubr.msk.bf16.mxu1 %vm5330_vm0, %v16188_v33 }
 0x471   : > { %v11421_v46 = vpop.f32.mrb[48].mxu0  ;;  %v11449_v21 = vpop.f32.mrb[48].mxu1 }
 0x472   : > { %v11422_v48 = vpop.f32.mrb[49].mxu0  ;;  %v11450_v56 = vpop.f32.mrb[49].mxu1 }
 0x473   : > { %v11423_v63 = vadd.f32 %v11422_v48, %v11421_v46  ;;  %v11451_v62 = vadd.f32 %v11450_v56, %v11449_v21  ;;  %v11424_v17 = vpop.f32.mrb[50].mxu0  ;;  %v11452_v49 = vpop.f32.mrb[50].mxu1 }
 0x474   : > { %v11425_v57 = vpop.f32.mrb[51].mxu0  ;;  %v11453_v7 = vpop.f32.mrb[51].mxu1 }
 0x475   : > { %v11426_v13 = vadd.f32 %v11425_v57, %v11424_v17  ;;  %v11454_v43 = vadd.f32 %v11453_v7, %v11452_v49 }
 0x477   : > { %v5322_v50 = vpack.c.bf16 %v11426_v13, %v11423_v63  ;;  %v5324_v60 = vpack.c.bf16 %v11454_v43, %v11451_v62  ;;  %v16193_v43 = vpack.c.bf16 %v14733_v34, %v14727_v8 }
 0x479   : > { %v11427_v9 = vpop.f32.mrb[52].mxu0  ;;  %v11455_v11 = vpop.f32.mrb[52].mxu1  ;;  %12029 = vmatprep.subr.msk.bf16.mxu0 %vm5330_vm0, %v5322_v50  ;;  %12031 = vmatprep.subr.msk.bf16.mxu1 %vm5330_vm0, %v5324_v60  ;;  %v5582_v51 = vsel %vm5330_vm0, %v5322_v50, 0  ;;  %v5643_v61 = vsel %vm5330_vm0, %v5324_v60, 0  ;;  %v16194_v50 = vpack.c.bf16 %v14735_v55, %v14729_v10 }
 0x47a   : > { %v11428_v14 = vpop.f32.mrb[53].mxu0  ;;  %v11456_v42 = vpop.f32.mrb[53].mxu1  ;;  %11838 = vmatpush3.bf16.xpose.msra.mxu0 %v5582_v51  ;;  %11846 = vmatpush3.bf16.xpose.msra.mxu1 %v5643_v61 }
 0x47b   : > { %v11429_v1 = vadd.f32 %v11428_v14, %v11427_v9  ;;  %v11457_v32 = vadd.f32 %v11456_v42, %v11455_v11  ;;  %v11430_v12 = vpop.f32.mrb[54].mxu0  ;;  %v11458_v47 = vpop.f32.mrb[54].mxu1 }
 0x47c   : > { %v11431_v44 = vpop.f32.mrb[55].mxu0  ;;  %v11459_v45 = vpop.f32.mrb[55].mxu1 }
 0x47d   : > { %v11432_v0 = vadd.f32 %v11431_v44, %v11430_v12  ;;  %v11460_v54 = vadd.f32 %v11459_v45, %v11458_v47 }
 0x47f   : > { %v5323_v28 = vpack.c.bf16 %v11432_v0, %v11429_v1  ;;  %v5325_v29 = vpack.c.bf16 %v11460_v54, %v11457_v32 }
 0x481   : > { %12030 = vmatprep.subr.msk.bf16.mxu0 %vm5330_vm0, %v5323_v28  ;;  %12032 = vmatprep.subr.msk.bf16.mxu1 %vm5330_vm0, %v5325_v29  ;;  %v5585_v23 = vsel %vm5330_vm0, %v5323_v28, 0  ;;  %v5646_v38 = vsel %vm5330_vm0, %v5325_v29, 0 }
 0x482   : > { %11840 = vmatpush3.bf16.xpose.msra.mxu0 %v5585_v23  ;;  %11848 = vmatpush3.bf16.xpose.msra.mxu1 %v5646_v38 }
 0x489   : > { %11842 = vmatmul.mubr.msk.bf16.vlgmr.msra.gmra.mrb[104].mxu0 %vm5330_vm0, %v16189_v24  ;;  %11850 = vmatmul.mubr.msk.bf16.vlgmr.msra.gmra.mrb[104].mxu1 %vm5330_vm0, %v16190_v39 }
 0x48a   : > { %11857 = vmatprep.mubr.msk.bf16.mxu0 %vm5330_vm0, %v16191_v2  ;;  %11865 = vmatprep.mubr.msk.bf16.mxu1 %vm5330_vm0, %v16192_v53 }
 0x492   : > { %v11477_v52 = vpop.f32.mrb[56].mxu0  ;;  %v11505_v5 = vpop.f32.mrb[56].mxu1 }
 0x493   : > { %v11478_v18 = vpop.f32.mrb[57].mxu0  ;;  %v11506_v40 = vpop.f32.mrb[57].mxu1 }
 0x494   : > { %v11479_v15 = vadd.f32 %v11478_v18, %v11477_v52  ;;  %v11507_v20 = vadd.f32 %v11506_v40, %v11505_v5  ;;  %v11480_v35 = vpop.f32.mrb[58].mxu0  ;;  %v11508_v19 = vpop.f32.mrb[58].mxu1 }
 0x495   : > { %v11481_v41 = vpop.f32.mrb[59].mxu0  ;;  %v11509_v58 = vpop.f32.mrb[59].mxu1 }
 0x496   : > { %v11482_v6 = vadd.f32 %v11481_v41, %v11480_v35  ;;  %v11510_v16 = vadd.f32 %v11509_v58, %v11508_v19 }
 0x498   : > { %v5326_v3 = vpack.c.bf16 %v11482_v6, %v11479_v15  ;;  %v5328_v25 = vpack.c.bf16 %v11510_v16, %v11507_v20 }
 0x49a   : > { %v11483_v31 = vpop.f32.mrb[60].mxu0  ;;  %v11511_v59 = vpop.f32.mrb[60].mxu1  ;;  %12033 = vmatprep.subr.msk.bf16.mxu0 %vm5330_vm0, %v5326_v3  ;;  %12035 = vmatprep.subr.msk.bf16.mxu1 %vm5330_vm0, %v5328_v25  ;;  %v5704_v4 = vsel %vm5330_vm0, %v5326_v3, 0  ;;  %v5765_v27 = vsel %vm5330_vm0, %v5328_v25, 0 }
 0x49b   : > { %v11484_v30 = vpop.f32.mrb[61].mxu0  ;;  %v11512_v22 = vpop.f32.mrb[61].mxu1  ;;  %11854 = vmatpush3.bf16.xpose.msra.mxu0 %v5704_v4  ;;  %11862 = vmatpush3.bf16.xpose.msra.mxu1 %v5765_v27 }
 0x49c   : > { %v11485_v33 = vadd.f32 %v11484_v30, %v11483_v31  ;;  %v11513_v46 = vadd.f32 %v11512_v22, %v11511_v59  ;;  %v11486_v21 = vpop.f32.mrb[62].mxu0  ;;  %v11514_v48 = vpop.f32.mrb[62].mxu1 }
 0x49d   : > { %v11487_v56 = vpop.f32.mrb[63].mxu0  ;;  %v11515_v63 = vpop.f32.mrb[63].mxu1 }
 0x49e   : > { %v11488_v62 = vadd.f32 %v11487_v56, %v11486_v21  ;;  %v11516_v17 = vadd.f32 %v11515_v63, %v11514_v48 }
 0x4a0   : > { %v5327_v49 = vpack.c.bf16 %v11488_v62, %v11485_v33  ;;  %v5329_v57 = vpack.c.bf16 %v11516_v17, %v11513_v46 }
 0x4a2   : > { %12034 = vmatprep.subr.msk.bf16.mxu0 %vm5330_vm0, %v5327_v49  ;;  %12036 = vmatprep.subr.msk.bf16.mxu1 %vm5330_vm0, %v5329_v57  ;;  %v5707_v7 = vsel %vm5330_vm0, %v5327_v49, 0  ;;  %v5768_v13 = vsel %vm5330_vm0, %v5329_v57, 0 }
 0x4a3   : > { %11856 = vmatpush3.bf16.xpose.msra.mxu0 %v5707_v7  ;;  %11864 = vmatpush3.bf16.xpose.msra.mxu1 %v5768_v13 }
 0x4aa   : > { %11858 = vmatmul.mubr.msk.bf16.vlgmr.msra.gmra.mrb[108].mxu0 %vm5330_vm0, %v16193_v43  ;;  %11866 = vmatmul.mubr.msk.bf16.vlgmr.msra.gmra.mrb[108].mxu1 %vm5330_vm0, %v16194_v50 }
 0x4b3   : > { %v11533_v60 = vpop.f32.mrb[64].mxu0  ;;  %v11561_v9 = vpop.f32.mrb[64].mxu1 }
 0x4b4   : > { %v11534_v11 = vpop.f32.mrb[65].mxu0  ;;  %v11562_v51 = vpop.f32.mrb[65].mxu1 }
 0x4b5   : > { %v11535_v61 = vadd.f32 %v11534_v11, %v11533_v60  ;;  %v11563_v14 = vadd.f32 %v11562_v51, %v11561_v9  ;;  %v11536_v42 = vpop.f32.mrb[66].mxu0  ;;  %v11564_v1 = vpop.f32.mrb[66].mxu1 }
 0x4b6   : > { %v11537_v32 = vpop.f32.mrb[67].mxu0  ;;  %v11565_v12 = vpop.f32.mrb[67].mxu1 }
 0x4b7   : > { %v11538_v47 = vadd.f32 %v11537_v32, %v11536_v42  ;;  %v11566_v44 = vadd.f32 %v11565_v12, %v11564_v1 }
 0x4b9   : > { %v6271_v34 = vpack.c.bf16 %v11538_v47, %v11535_v61  ;;  %v6273_v8 = vpack.c.bf16 %v11566_v44, %v11563_v14 }
 0x4bb   : > { %v11539_v45 = vpop.f32.mrb[68].mxu0  ;;  %v11567_v0 = vpop.f32.mrb[68].mxu1  ;;  %11869 = vmatprep.subr.bf16.mxu0 %v6271_v34  ;;  %11877 = vmatprep.subr.bf16.mxu1 %v6273_v8 }
 0x4bc   : > { %v11540_v55 = vpop.f32.mrb[69].mxu0  ;;  %v11568_v10 = vpop.f32.mrb[69].mxu1  ;;  %11870 = vmatpush3.bf16.msra.mxu0 %v6271_v34  ;;  %11878 = vmatpush3.bf16.msra.mxu1 %v6273_v8 }
 0x4bd   : > { %v11541_v54 = vadd.f32 %v11540_v55, %v11539_v45  ;;  %v11569_v28 = vadd.f32 %v11568_v10, %v11567_v0  ;;  %v11542_v29 = vpop.f32.mrb[70].mxu0  ;;  %v11570_v23 = vpop.f32.mrb[70].mxu1 }
 0x4be   : > { %v11543_v38 = vpop.f32.mrb[71].mxu0  ;;  %v11571_v24 = vpop.f32.mrb[71].mxu1 }
 0x4bf   : > { %v11544_v39 = vadd.f32 %v11543_v38, %v11542_v29  ;;  %v11572_v2 = vadd.f32 %v11571_v24, %v11570_v23 }
 0x4c1   : > { %v6272_v53 = vpack.c.bf16 %v11544_v39, %v11541_v54  ;;  %v6274_v52 = vpack.c.bf16 %v11572_v2, %v11569_v28 }
 0x4c3   : > { %11871 = vmatprep.subr.bf16.mxu0 %v6272_v53  ;;  %11879 = vmatprep.subr.bf16.mxu1 %v6274_v52 }
 0x4c4   : > { %11872 = vmatpush3.bf16.msra.mxu0 %v6272_v53  ;;  %11880 = vmatpush3.bf16.msra.mxu1 %v6274_v52 }
 0x4d4   : > { %v11589_v5 = vpop.f32.mrb[72].mxu0  ;;  %v11617_v18 = vpop.f32.mrb[72].mxu1 }
 0x4d5   : > { %v11590_v40 = vpop.f32.mrb[73].mxu0  ;;  %v11618_v15 = vpop.f32.mrb[73].mxu1 }
 0x4d6   : > { %v11591_v20 = vadd.f32 %v11590_v40, %v11589_v5  ;;  %v11619_v35 = vadd.f32 %v11618_v15, %v11617_v18  ;;  %v11592_v19 = vpop.f32.mrb[74].mxu0  ;;  %v11620_v41 = vpop.f32.mrb[74].mxu1 }
 0x4d7   : > { %v11593_v58 = vpop.f32.mrb[75].mxu0  ;;  %v11621_v6 = vpop.f32.mrb[75].mxu1 }
 0x4d8   : > { %v11594_v16 = vadd.f32 %v11593_v58, %v11592_v19  ;;  %v11622_v3 = vadd.f32 %v11621_v6, %v11620_v41 }
 0x4da   : > { %v14885_v25 = vpack.c.bf16 %v11594_v16, %v11591_v20  ;;  %v14887_v31 = vpack.c.bf16 %v11622_v3, %v11619_v35 }
 0x4dc   : > { %v11595_v59 = vpop.f32.mrb[76].mxu0  ;;  %v11623_v4 = vpop.f32.mrb[76].mxu1  ;;  %11885 = vmatprep.subr.bf16.mxu0 %v14885_v25  ;;  %11893 = vmatprep.subr.bf16.mxu1 %v14887_v31 }
 0x4dd   : > { %v11596_v27 = vpop.f32.mrb[77].mxu0  ;;  %v11624_v30 = vpop.f32.mrb[77].mxu1 }
 0x4de   : > { %v11597_v22 = vadd.f32 %v11596_v27, %v11595_v59  ;;  %v11625_v33 = vadd.f32 %v11624_v30, %v11623_v4  ;;  %v11598_v46 = vpop.f32.mrb[78].mxu0  ;;  %v11626_v21 = vpop.f32.mrb[78].mxu1 }
 0x4df   : > { %v11599_v48 = vpop.f32.mrb[79].mxu0  ;;  %v11627_v56 = vpop.f32.mrb[79].mxu1 }
 0x4e0   : > { %v11600_v63 = vadd.f32 %v11599_v48, %v11598_v46  ;;  %v11628_v62 = vadd.f32 %v11627_v56, %v11626_v21 }
 0x4e2   : > { %v14891_v17 = vpack.c.bf16 %v11600_v63, %v11597_v22  ;;  %v14893_v49 = vpack.c.bf16 %v11628_v62, %v11625_v33  ;;  %v16195_v62 = vlaneseq }
 0x4f5   : > { %v11645_v57 = vpop.f32.mrb[80].mxu0  ;;  %v11673_v7 = vpop.f32.mrb[80].mxu1 }
 0x4f6   : > { %v11646_v13 = vpop.f32.mrb[81].mxu0  ;;  %v11674_v43 = vpop.f32.mrb[81].mxu1 }
 0x4f7   : > { %v11647_v50 = vadd.f32 %v11646_v13, %v11645_v57  ;;  %v11675_v60 = vadd.f32 %v11674_v43, %v11673_v7  ;;  %v11648_v9 = vpop.f32.mrb[82].mxu0  ;;  %v11676_v11 = vpop.f32.mrb[82].mxu1  ;;  %v5857_v57 = vand.u32 127, %v16195_v62 }
 0x4f8   : > { %v11649_v51 = vpop.f32.mrb[83].mxu0  ;;  %v11677_v61 = vpop.f32.mrb[83].mxu1 }
 0x4f9   : > { %v11650_v14 = vadd.f32 %v11649_v51, %v11648_v9  ;;  %v11678_v42 = vadd.f32 %v11677_v61, %v11676_v11  ;;  %vm5862_vm1 = vcmp.ge.s32.totalorder %v5857_v57, 16 }
 0x4fb   : > { %v14895_v1 = vpack.c.bf16 %v11650_v14, %v11647_v50  ;;  %v14897_v32 = vpack.c.bf16 %v11678_v42, %v11675_v60  ;;  %v13490_v60 = vmov 0.0  }
 0x4fc   : > { %v14912_v9 = vsel %vm5862_vm1, -1e+30, %v13490_v60 }
 0x4fd   : > { %v11651_v12 = vpop.f32.mrb[84].mxu0  ;;  %v11679_v47 = vpop.f32.mrb[84].mxu1 }
 0x4fe   : > { %v11652_v44 = vpop.f32.mrb[85].mxu0  ;;  %v11680_v34 = vpop.f32.mrb[85].mxu1 }
 0x4ff   : > { %v11653_v8 = vadd.f32 %v11652_v44, %v11651_v12  ;;  %v11681_v45 = vadd.f32 %v11680_v34, %v11679_v47  ;;  %v11654_v0 = vpop.f32.mrb[86].mxu0  ;;  %v11682_v55 = vpop.f32.mrb[86].mxu1 }
 0x500   : > { %v11655_v10 = vpop.f32.mrb[87].mxu0  ;;  %v11683_v54 = vpop.f32.mrb[87].mxu1 }
 0x501   : > { %v11656_v28 = vadd.f32 %v11655_v10, %v11654_v0  ;;  %v11684_v29 = vadd.f32 %v11683_v54, %v11682_v55 }
 0x503   : > { %v14899_v23 = vpack.c.bf16 %v11656_v28, %v11653_v8  ;;  %v14901_v38 = vpack.c.bf16 %v11684_v29, %v11681_v45 }
 0x516   : > { %v11701_v24 = vpop.f32.mrb[88].mxu0  ;;  %v11729_v39 = vpop.f32.mrb[88].mxu1 }
 0x517   : > { %v11702_v2 = vpop.f32.mrb[89].mxu0  ;;  %v11730_v53 = vpop.f32.mrb[89].mxu1 }
 0x518   : > { %v11703_v52 = vadd.f32 %v11702_v2, %v11701_v24  ;;  %v11731_v5 = vadd.f32 %v11730_v53, %v11729_v39  ;;  %v11704_v18 = vpop.f32.mrb[90].mxu0  ;;  %v11732_v40 = vpop.f32.mrb[90].mxu1 }
 0x519   : > { %v11705_v15 = vpop.f32.mrb[91].mxu0  ;;  %v11733_v20 = vpop.f32.mrb[91].mxu1 }
 0x51a   : > { %v11706_v35 = vadd.f32 %v11705_v15, %v11704_v18  ;;  %v11734_v19 = vadd.f32 %v11733_v20, %v11732_v40 }
 0x51c   : > { %v14903_v41 = vpack.c.bf16 %v11706_v35, %v11703_v52  ;;  %v14905_v58 = vpack.c.bf16 %v11734_v19, %v11731_v5 }
 0x51e   : > { %v11707_v6 = vpop.f32.mrb[92].mxu0  ;;  %v11735_v16 = vpop.f32.mrb[92].mxu1 }
 0x51f   : > { %v11708_v3 = vpop.f32.mrb[93].mxu0  ;;  %v11736_v59 = vpop.f32.mrb[93].mxu1 }
 0x520   : > { %v11709_v4 = vadd.f32 %v11708_v3, %v11707_v6  ;;  %v11737_v27 = vadd.f32 %v11736_v59, %v11735_v16  ;;  %v11710_v30 = vpop.f32.mrb[94].mxu0  ;;  %v11738_v22 = vpop.f32.mrb[94].mxu1 }
 0x521   : > { %v11711_v33 = vpop.f32.mrb[95].mxu0  ;;  %v11739_v46 = vpop.f32.mrb[95].mxu1 }
 0x522   : > { %v11712_v21 = vadd.f32 %v11711_v33, %v11710_v30  ;;  %v11740_v48 = vadd.f32 %v11739_v46, %v11738_v22 }
 0x524   : > { %v14907_v56 = vpack.c.bf16 %v11712_v21, %v11709_v4  ;;  %v14909_v63 = vpack.c.bf16 %v11740_v48, %v11737_v27 }
 0x52b   : > { %v11811_v7 = vpop.f32.mrb[96].mxu0  ;;  %v11819_v13 = vpop.f32.mrb[96].mxu1 }
 0x52c   : > { %v5377_v43 = vpop.f32.mrb[97].mxu0  ;;  %v5438_v50 = vpop.f32.mrb[97].mxu1  ;;  %v14917_v44 = vmul.f32 0.17677669, %v11811_v7  ;;  %v14938_v39 = vmul.f32 0.17677669, %v11819_v13 }
 0x52d   : > { %v5819_v11 = vmul.f32 0.17677669, %v5377_v43  ;;  %v11812_v51 = vpop.f32.mrb[98].mxu0  ;;  %v11820_v61 = vpop.f32.mrb[98].mxu1  ;;  %v5823_v34 = vmul.f32 0.17677669, %v5438_v50 }
 0x52e   : > { %v5380_v14 = vpop.f32.mrb[99].mxu0  ;;  %v5441_v42 = vpop.f32.mrb[99].mxu1  ;;  %v14924_v0 = vmul.f32 0.17677669, %v11812_v51  ;;  %v5909_v54 = vsel %vm5330_vm0, %v14917_v44, -inf  ;;  %v5921_v5 = vsel %vm5330_vm0, %v14938_v39, -inf }
 0x52f   : > { %v5820_v12 = vmul.f32 0.17677669, %v5380_v14  ;;  %v14915_v47 = vadd.f32 %v14912_v9, %v5819_v11  ;;  %v5824_v55 = vmul.f32 0.17677669, %v5441_v42  ;;  %v14931_v28 = vadd.f32 %v14912_v9, %v5823_v34 }
 0x530   : > { %v5912_v29 = vsel %vm5330_vm0, %v14924_v0, -inf  ;;  %v14942_v53 = vmul.f32 0.17677669, %v11820_v61 }
 0x531   : > { %v5903_v8 = vsel %vm5330_vm0, %v14915_v47, -inf  ;;  %v14922_v45 = vadd.f32 %v14912_v9, %v5820_v12  ;;  %v14936_v24 = vadd.f32 %v14912_v9, %v5824_v55  ;;  %v5915_v2 = vsel %vm5330_vm0, %v14931_v28, -inf }
 0x532   : > { %5904 = vmax.xlane.f32.xlu0 %v5903_v8  ;;  %v5924_v35 = vsel %vm5330_vm0, %v14942_v53, -inf }
 0x533   : > { %v5906_v10 = vsel %vm5330_vm0, %v14922_v45, -inf  ;;  %v5918_v52 = vsel %vm5330_vm0, %v14936_v24, -inf }
 0x534   : > { %5907 = vmax.xlane.f32.xlu1 %v5906_v10 }
 0x536   : > { %5910 = vmax.xlane.f32.xlu0 %v5909_v54 }
 0x538   : > { %5913 = vmax.xlane.f32.xlu1 %v5912_v29 }
 0x53a   : > { %5916 = vmax.xlane.f32.xlu0 %v5915_v2 }
 0x53c   : > { %5919 = vmax.xlane.f32.xlu1 %v5918_v52 }
 0x53d   : > { %v11827_v18 = vpop.f32.mrb[100].mxu0  ;;  %v11835_v40 = vpop.f32.mrb[100].mxu1 }
 0x53e   : > { %5922 = vmax.xlane.f32.xlu0 %v5921_v5  ;;  %v5499_v15 = vpop.f32.mrb[101].mxu0  ;;  %v5560_v20 = vpop.f32.mrb[101].mxu1  ;;  %v14953_v30 = vmul.f32 0.17677669, %v11827_v18  ;;  %v14974_v50 = vmul.f32 0.17677669, %v11835_v40 }
 0x53f   : > { %v5827_v19 = vmul.f32 0.17677669, %v5499_v15  ;;  %v11828_v6 = vpop.f32.mrb[102].mxu0  ;;  %v11836_v16 = vpop.f32.mrb[102].mxu1  ;;  %v5831_v22 = vmul.f32 0.17677669, %v5560_v20 }
 0x540   : > { %5925 = vmax.xlane.f32.xlu1 %v5924_v35  ;;  %v5502_v3 = vpop.f32.mrb[103].mxu0  ;;  %v5563_v59 = vpop.f32.mrb[103].mxu1  ;;  %v14960_v21 = vmul.f32 0.17677669, %v11828_v6  ;;  %v5933_v57 = vsel %vm5330_vm0, %v14953_v30, -inf  ;;  %v5945_v61 = vsel %vm5330_vm0, %v14974_v50, -inf }
 0x541   : > { %v5828_v4 = vmul.f32 0.17677669, %v5502_v3  ;;  %v14951_v27 = vadd.f32 %v14912_v9, %v5827_v19  ;;  %v5832_v48 = vmul.f32 0.17677669, %v5563_v59  ;;  %v14967_v7 = vadd.f32 %v14912_v9, %v5831_v22 }
 0x542   : > { %v5936_v13 = vsel %vm5330_vm0, %v14960_v21, -inf  ;;  %v14978_v11 = vmul.f32 0.17677669, %v11836_v16 }
 0x543   : > { %v5927_v33 = vsel %vm5330_vm0, %v14951_v27, -inf  ;;  %v14958_v46 = vadd.f32 %v14912_v9, %v5828_v4  ;;  %v14972_v43 = vadd.f32 %v14912_v9, %v5832_v48  ;;  %v5939_v60 = vsel %vm5330_vm0, %v14967_v7, -inf }
 0x544   : > { %5928 = vmax.xlane.f32.xlu0 %v5927_v33  ;;  %v5948_v14 = vsel %vm5330_vm0, %v14978_v11, -inf }
 0x545   : > { %v5930_v62 = vsel %vm5330_vm0, %v14958_v46, -inf  ;;  %v5942_v51 = vsel %vm5330_vm0, %v14972_v43, -inf }
 0x546   : > { %5931 = vmax.xlane.f32.xlu1 %v5930_v62 }
 0x548   : > { %5934 = vmax.xlane.f32.xlu0 %v5933_v57 }
 0x54a   : > { %5937 = vmax.xlane.f32.xlu1 %v5936_v13 }
 0x54c   : > { %5940 = vmax.xlane.f32.xlu0 %v5939_v60 }
 0x54e   : > { %5943 = vmax.xlane.f32.xlu1 %v5942_v51 }
 0x550   : > { %5946 = vmax.xlane.f32.xlu0 %v5945_v61 }
 0x552   : > { %5949 = vmax.xlane.f32.xlu1 %v5948_v14 }
 0x55c   : > { %v11843_v42 = vpop.f32.mrb[104].mxu0  ;;  %v11851_v12 = vpop.f32.mrb[104].mxu1 }
 0x55d   : > { %v5621_v34 = vpop.f32.mrb[105].mxu0  ;;  %v5682_v8 = vpop.f32.mrb[105].mxu1  ;;  %v14989_v18 = vmul.f32 0.17677669, %v11843_v42  ;;  %v15010_v22 = vmul.f32 0.17677669, %v11851_v12 }
 0x55e   : > { %v5835_v55 = vmul.f32 0.17677669, %v5621_v34  ;;  %v11844_v10 = vpop.f32.mrb[106].mxu0  ;;  %v11852_v54 = vpop.f32.mrb[106].mxu1  ;;  %v5839_v40 = vmul.f32 0.17677669, %v5682_v8 }
 0x55f   : > { %v5624_v29 = vpop.f32.mrb[107].mxu0  ;;  %v5685_v2 = vpop.f32.mrb[107].mxu1  ;;  %v14996_v35 = vmul.f32 0.17677669, %v11844_v10  ;;  %v5957_v16 = vsel %vm5330_vm0, %v14989_v18, -inf  ;;  %v5969_v57 = vsel %vm5330_vm0, %v15010_v22, -inf }
 0x560   : > { %v5836_v52 = vmul.f32 0.17677669, %v5624_v29  ;;  %v14987_v5 = vadd.f32 %v14912_v9, %v5835_v55  ;;  %v5840_v19 = vmul.f32 0.17677669, %v5685_v2  ;;  %v15003_v3 = vadd.f32 %v14912_v9, %v5839_v40 }
 0x561   : > { %v5960_v59 = vsel %vm5330_vm0, %v14996_v35, -inf  ;;  %v15014_v48 = vmul.f32 0.17677669, %v11852_v54 }
 0x562   : > { %v5951_v15 = vsel %vm5330_vm0, %v14987_v5, -inf  ;;  %v14994_v20 = vadd.f32 %v14912_v9, %v5836_v52  ;;  %v15008_v4 = vadd.f32 %v14912_v9, %v5840_v19  ;;  %v5963_v33 = vsel %vm5330_vm0, %v15003_v3, -inf }
 0x563   : > { %5952 = vmax.xlane.f32.xlu0 %v5951_v15  ;;  %v5972_v13 = vsel %vm5330_vm0, %v15014_v48, -inf }
 0x564   : > { %v5954_v6 = vsel %vm5330_vm0, %v14994_v20, -inf  ;;  %v5966_v62 = vsel %vm5330_vm0, %v15008_v4, -inf }
 0x565   : > { %5955 = vmax.xlane.f32.xlu1 %v5954_v6 }
 0x567   : > { %5958 = vmax.xlane.f32.xlu0 %v5957_v16 }
 0x569   : > { %5961 = vmax.xlane.f32.xlu1 %v5960_v59 }
 0x56b   : > { %5964 = vmax.xlane.f32.xlu0 %v5963_v33 }
 0x56d   : > { %5967 = vmax.xlane.f32.xlu1 %v5966_v62 }
 0x56f   : > { %5970 = vmax.xlane.f32.xlu0 %v5969_v57 }
 0x571   : > { %5973 = vmax.xlane.f32.xlu1 %v5972_v13 }
 0x57d   : > { %v11859_v60 = vpop.f32.mrb[108].mxu0  ;;  %v15022_v51 = vpop.f32.mrb[108].mxu1 }
 0x57e   : > { %v5743_v61 = vpop.f32.mrb[109].mxu0  ;;  %v15024_v14 = vpop.f32.mrb[109].mxu1 }
 0x57f   : > { %v11860_v42 = vpop.f32.mrb[110].mxu0  ;;  %v15026_v12 = vpop.f32.mrb[110].mxu1 }
 0x580   : > { %v5746_v34 = vpop.f32.mrb[111].mxu0  ;;  %v15028_v8 = vpop.f32.mrb[111].mxu1 }
 0x5bf   : > { %v5905_v55 = vpop.xlane.xlu0 %5904 }
 0x5c0   : > { %v5999_v10 = vsub.f32 %v14915_v47, %v5905_v55 }
 0x5c1   : > { %v5908_v54 = vpop.xlane.xlu1 %5907 }
 0x5c2   : > { %v6031_v29 = vmul.f32 1.442695, %v5999_v10  ;;  %v6000_v2 = vsub.f32 %v14922_v45, %v5908_v54  ;;  %v5843_v54 = vmul.f32 0.17677669, %v5743_v61 }
 0x5c3   : > { %v5911_v52 = vpop.xlane.xlu0 %5910 }
 0x5c4   : > { %12824 = vpow2.f32 %v6031_v29  ;;  %v6033_v40 = vmul.f32 1.442695, %v6000_v2  ;;  %v6001_v15 = vsub.f32 %v14917_v44, %v5911_v52 }
 0x5c5   : > { %v5914_v19 = vpop.xlane.xlu1 %5913 }
 0x5c6   : > { %12826 = vpow2.f32 %v6033_v40  ;;  %v6035_v6 = vmul.f32 1.442695, %v6001_v15  ;;  %v6002_v16 = vsub.f32 %v14924_v0, %v5914_v19 }
 0x5c7   : > { %v5917_v59 = vpop.xlane.xlu0 %5916 }
 0x5c8   : > { %12828 = vpow2.f32 %v6035_v6  ;;  %v6037_v33 = vmul.f32 1.442695, %v6002_v16  ;;  %v6003_v47 = vsub.f32 %v14931_v28, %v5917_v59  ;;  %v5844_v28 = vmul.f32 0.17677669, %v5746_v34 }
 0x5c9   : > { %v5920_v62 = vpop.xlane.xlu1 %5919  ;;  %v15051_v6 = vadd.f32 %v14912_v9, %v5843_v54 }
 0x5ca   : > { %12830 = vpow2.f32 %v6037_v33  ;;  %v6004_v45 = vsub.f32 %v14936_v24, %v5920_v62  ;;  %v6039_v10 = vmul.f32 1.442695, %v6003_v47  ;;  %v15058_v59 = vadd.f32 %v14912_v9, %v5844_v28 }
 0x5cb   : > { %v5923_v57 = vpop.xlane.xlu0 %5922  ;;  %v15060_v33 = vmul.f32 0.17677669, %v11859_v60  ;;  %v5975_v62 = vsel %vm5330_vm0, %v15051_v6, -inf }
 0x5cc   : > { %v6005_v44 = vsub.f32 %v14938_v39, %v5923_v57  ;;  %v6041_v2 = vmul.f32 1.442695, %v6004_v45  ;;  %12832 = vpow2.f32 %v6039_v10  ;;  %v15064_v57 = vmul.f32 0.17677669, %v11860_v42 }
 0x5cd   : > { %v5926_v13 = vpop.xlane.xlu1 %5925  ;;  %v5978_v45 = vsel %vm5330_vm0, %v15058_v59, -inf }
 0x5ce   : > { %v15036_v55 = vpop.eup %12824  ;;  %v6006_v52 = vsub.f32 %v14942_v53, %v5926_v13  ;;  %v6043_v19 = vmul.f32 1.442695, %v6005_v44  ;;  %12834 = vpow2.f32 %v6041_v2  ;;  %v5981_v44 = vsel %vm5330_vm0, %v15060_v33, -inf }
 0x5cf   : > { %v6095_v0 = vsel %vm5330_vm0, %v15036_v55, 0.0  ;;  %v5984_v42 = vsel %vm5330_vm0, %v15064_v57, -inf }
 0x5d0   : > { %v15041_v29 = vpop.eup %12826  ;;  %6096 = vadd.xlane.f32.xlu0 %v6095_v0  ;;  %v6045_v53 = vmul.f32 1.442695, %v6006_v52  ;;  %12836 = vpow2.f32 %v6043_v19 }
 0x5d1   : > { %v6098_v24 = vsel %vm5330_vm0, %v15041_v29, 0.0  ;;  %v5929_v40 = vpop.xlane.xlu0 %5928 }
 0x5d2   : > { %v15046_v15 = vpop.eup %12828  ;;  %6099 = vadd.xlane.f32.xlu1 %v6098_v24  ;;  %12838 = vpow2.f32 %v6045_v53  ;;  %v6007_v10 = vsub.f32 %v14951_v27, %v5929_v40  ;;  %v5847_v27 = vmul.f32 0.17677669, %v15024_v14 }
 0x5d3   : > { %v6101_v39 = vsel %vm5330_vm0, %v15046_v15, 0.0  ;;  %v5932_v61 = vpop.xlane.xlu1 %5931 }
 0x5d4   : > { %v15053_v16 = vpop.eup %12830  ;;  %6102 = vadd.xlane.f32.xlu0 %v6101_v39  ;;  %v6008_v54 = vsub.f32 %v14958_v46, %v5932_v61  ;;  %v6047_v52 = vmul.f32 1.442695, %v6007_v10  ;;  %v5848_v61 = vmul.f32 0.17677669, %v15028_v8 }
 0x5d5   : > { %v6104_v34 = vsel %vm5330_vm0, %v15053_v16, 0.0  ;;  %v5935_v47 = vpop.xlane.xlu0 %5934 }
 0x5d6   : > { %6105 = vadd.xlane.f32.xlu1 %v6104_v34  ;;  %v15071_v60 = vpop.eup %12832  ;;  %v6009_v28 = vsub.f32 %v14953_v30, %v5935_v47  ;;  %v6049_v46 = vmul.f32 1.442695, %v6008_v54  ;;  %12840 = vpow2.f32 %v6047_v52 }
 0x5d7   : > { %v5938_v13 = vpop.xlane.xlu1 %5937  ;;  %v6107_v40 = vsel %vm5330_vm0, %v15071_v60, 0.0 }
 0x5d8   : > { %5976 = vmax.xlane.f32.xlu0 %v5975_v62  ;;  %v15076_v2 = vpop.eup %12834  ;;  %v6010_v39 = vsub.f32 %v14960_v21, %v5938_v13  ;;  %v6051_v30 = vmul.f32 1.442695, %v6009_v28  ;;  %12842 = vpow2.f32 %v6049_v46  ;;  %v15110_v28 = vmul.f32 0.17677669, %v15026_v12 }
 0x5d9   : > { %v5941_v0 = vpop.xlane.xlu0 %5940  ;;  %v6110_v53 = vsel %vm5330_vm0, %v15076_v2, 0.0 }
 0x5da   : > { %5979 = vmax.xlane.f32.xlu1 %v5978_v45  ;;  %v15082_v19 = vpop.eup %12836  ;;  %v6011_v14 = vsub.f32 %v14967_v7, %v5941_v0  ;;  %v15094_v45 = vadd.f32 %v14912_v9, %v5847_v27  ;;  %v6053_v21 = vmul.f32 1.442695, %v6010_v39  ;;  %12844 = vpow2.f32 %v6051_v30 }
 0x5db   : > { %v5944_v24 = vpop.xlane.xlu1 %5943  ;;  %v6113_v47 = vsel %vm5330_vm0, %v15082_v19, 0.0  ;;  %v15104_v0 = vmul.f32 0.17677669, %v15022_v51 }
 0x5dc   : > { %5982 = vmax.xlane.f32.xlu0 %v5981_v44  ;;  %v15088_v34 = vpop.eup %12838  ;;  %v6012_v8 = vsub.f32 %v14972_v43, %v5944_v24  ;;  %v15100_v44 = vadd.f32 %v14912_v9, %v5848_v61  ;;  %v6055_v7 = vmul.f32 1.442695, %v6011_v14  ;;  %12846 = vpow2.f32 %v6053_v21 }
 0x5dd   : > { %v5947_v62 = vpop.xlane.xlu0 %5946  ;;  %v6116_v10 = vsel %vm5330_vm0, %v15088_v34, 0.0  ;;  %v5993_v51 = vsel %vm5330_vm0, %v15104_v0, -inf }
 0x5de   : > { %5985 = vmax.xlane.f32.xlu1 %v5984_v42  ;;  %v6013_v54 = vsub.f32 %v14974_v50, %v5947_v62  ;;  %v5987_v42 = vsel %vm5330_vm0, %v15094_v45, -inf  ;;  %v6057_v43 = vmul.f32 1.442695, %v6012_v8  ;;  %v5990_v9 = vsel %vm5330_vm0, %v15100_v44, -inf }
 0x5df   : > { %v5950_v13 = vpop.xlane.xlu1 %5949  ;;  %12848 = vpow2.f32 %v6055_v7 }
 0x5e0   : > { %6108 = vadd.xlane.f32.xlu0 %v6107_v40  ;;  %v6014_v52 = vsub.f32 %v14978_v11, %v5950_v13  ;;  %v6059_v50 = vmul.f32 1.442695, %v6013_v54  ;;  %v15116_v27 = vpop.eup %12840  ;;  %12850 = vpow2.f32 %v6057_v43  ;;  %v5996_v11 = vsel %vm5330_vm0, %v15110_v28, -inf }
 0x5e1   : > { %v6119_v12 = vsel %vm5330_vm0, %v15116_v27, 0.0 }
 0x5e2   : > { %6111 = vadd.xlane.f32.xlu1 %v6110_v53  ;;  %v6061_v24 = vmul.f32 1.442695, %v6014_v52  ;;  %v15120_v40 = vpop.eup %12842  ;;  %12852 = vpow2.f32 %v6059_v50 }
 0x5e3   : > { %v6122_v61 = vsel %vm5330_vm0, %v15120_v40, 0.0 }
 0x5e4   : > { %6114 = vadd.xlane.f32.xlu0 %v6113_v47  ;;  %v15124_v46 = vpop.eup %12844  ;;  %12854 = vpow2.f32 %v6061_v24 }
 0x5e5   : > { %v6125_v62 = vsel %vm5330_vm0, %v15124_v46, 0.0 }
 0x5e6   : > { %6117 = vadd.xlane.f32.xlu1 %v6116_v10  ;;  %v15129_v30 = vpop.eup %12846 }
 0x5e7   : > { %v6128_v10 = vsel %vm5330_vm0, %v15129_v30, 0.0 }
 0x5e8   : > { %5988 = vmax.xlane.f32.xlu0 %v5987_v42 }
 0x5e9   : > { %v15134_v8 = vpop.eup %12848 }
 0x5ea   : > { %5991 = vmax.xlane.f32.xlu1 %v5990_v9  ;;  %v15139_v54 = vpop.eup %12850  ;;  %v6131_v43 = vsel %vm5330_vm0, %v15134_v8, 0.0 }
 0x5ec   : > { %5994 = vmax.xlane.f32.xlu0 %v5993_v51  ;;  %v15144_v9 = vpop.eup %12852  ;;  %v6134_v51 = vsel %vm5330_vm0, %v15139_v54, 0.0 }
 0x5ee   : > { %5997 = vmax.xlane.f32.xlu1 %v5996_v11  ;;  %v15149_v11 = vpop.eup %12854 }
 0x5f0   : > { %6120 = vadd.xlane.f32.xlu0 %v6119_v12  ;;  %v5953_v39 = vpop.xlane.xlu0 %5952 }
 0x5f1   : > { %v6015_v53 = vsub.f32 %v14987_v5, %v5953_v39  ;;  %v6137_v39 = vsel %vm5330_vm0, %v15144_v9, 0.0 }
 0x5f2   : > { %6123 = vadd.xlane.f32.xlu1 %v6122_v61  ;;  %v5956_v14 = vpop.xlane.xlu1 %5955 }
 0x5f3   : > { %v6063_v47 = vmul.f32 1.442695, %v6015_v53  ;;  %v6016_v21 = vsub.f32 %v14994_v20, %v5956_v14  ;;  %v6140_v14 = vsel %vm5330_vm0, %v15149_v11, 0.0 }
 0x5f4   : > { %6126 = vadd.xlane.f32.xlu0 %v6125_v62  ;;  %v5959_v13 = vpop.xlane.xlu0 %5958 }
 0x5f5   : > { %12856 = vpow2.f32 %v6063_v47  ;;  %v6065_v7 = vmul.f32 1.442695, %v6016_v21  ;;  %v6017_v5 = vsub.f32 %v14989_v18, %v5959_v13 }
 0x5f6   : > { %6129 = vadd.xlane.f32.xlu1 %v6128_v10  ;;  %v5962_v42 = vpop.xlane.xlu1 %5961 }
 0x5f7   : > { %12858 = vpow2.f32 %v6065_v7  ;;  %v6067_v20 = vmul.f32 1.442695, %v6017_v5  ;;  %v6018_v52 = vsub.f32 %v14996_v35, %v5962_v42 }
 0x5f8   : > { %6132 = vadd.xlane.f32.xlu0 %v6131_v43  ;;  %v5965_v50 = vpop.xlane.xlu0 %5964 }
 0x5f9   : > { %12860 = vpow2.f32 %v6067_v20  ;;  %v6069_v18 = vmul.f32 1.442695, %v6018_v52  ;;  %v6019_v24 = vsub.f32 %v15003_v3, %v5965_v50 }
 0x5fa   : > { %6135 = vadd.xlane.f32.xlu1 %v6134_v51  ;;  %v5968_v12 = vpop.xlane.xlu1 %5967 }
 0x5fb   : > { %12862 = vpow2.f32 %v6069_v18  ;;  %v6071_v35 = vmul.f32 1.442695, %v6019_v24  ;;  %v6020_v61 = vsub.f32 %v15008_v4, %v5968_v12 }
 0x5fc   : > { %6138 = vadd.xlane.f32.xlu0 %v6137_v39  ;;  %v5971_v53 = vpop.xlane.xlu0 %5970 }
 0x5fd   : > { %12864 = vpow2.f32 %v6071_v35  ;;  %v6073_v62 = vmul.f32 1.442695, %v6020_v61  ;;  %v6021_v3 = vsub.f32 %v15010_v22, %v5971_v53 }
 0x5fe   : > { %6141 = vadd.xlane.f32.xlu1 %v6140_v14  ;;  %v5974_v47 = vpop.xlane.xlu1 %5973 }
 0x5ff   : > { %v15157_v21 = vpop.eup %12856  ;;  %12866 = vpow2.f32 %v6073_v62  ;;  %v6075_v13 = vmul.f32 1.442695, %v6021_v3  ;;  %v6022_v10 = vsub.f32 %v15014_v48, %v5974_v47 }
 0x600   : > { %v6143_v4 = vsel %vm5330_vm0, %v15157_v21, 0.0 }
 0x601   : > { %v15162_v7 = vpop.eup %12858  ;;  %12868 = vpow2.f32 %v6075_v13  ;;  %v6077_v5 = vmul.f32 1.442695, %v6022_v10  ;;  %6144 = vadd.xlane.f32.xlu0 %v6143_v4 }
 0x602   : > { %v6146_v42 = vsel %vm5330_vm0, %v15162_v7, 0.0 }
 0x603   : > { %v15166_v22 = vpop.eup %12860  ;;  %12870 = vpow2.f32 %v6077_v5  ;;  %6147 = vadd.xlane.f32.xlu1 %v6146_v42 }
 0x604   : > { %v6149_v43 = vsel %vm5330_vm0, %v15166_v22, 0.0 }
 0x605   : > { %v15170_v20 = vpop.eup %12862  ;;  %6150 = vadd.xlane.f32.xlu0 %v6149_v43 }
 0x606   : > { %v6152_v48 = vsel %vm5330_vm0, %v15170_v20, 0.0 }
 0x607   : > { %v15174_v52 = vpop.eup %12864  ;;  %6153 = vadd.xlane.f32.xlu1 %v6152_v48 }
 0x608   : > { %v6155_v50 = vsel %vm5330_vm0, %v15174_v52, 0.0 }
 0x609   : > { %v15178_v51 = vpop.eup %12866  ;;  %6156 = vadd.xlane.f32.xlu0 %v6155_v50 }
 0x60a   : > { %v6158_v18 = vsel %vm5330_vm0, %v15178_v51, 0.0 }
 0x60b   : > { %v15182_v24 = vpop.eup %12868  ;;  %6159 = vadd.xlane.f32.xlu1 %v6158_v18 }
 0x60c   : > { %v6161_v12 = vsel %vm5330_vm0, %v15182_v24, 0.0 }
 0x60d   : > { %v15186_v39 = vpop.eup %12870  ;;  %6162 = vadd.xlane.f32.xlu0 %v6161_v12 }
 0x60e   : > { %v6164_v35 = vsel %vm5330_vm0, %v15186_v39, 0.0 }
 0x60f   : > { %6165 = vadd.xlane.f32.xlu1 %v6164_v35 }
 0x65d   : > { %v6097_v61 = vpop.xlane.xlu0 %6096 }
 0x65e   : > { %12872 = vrcp.f32 %v6097_v61 }
 0x65f   : > { %v6100_v53 = vpop.xlane.xlu1 %6099 }
 0x660   : > { %12874 = vrcp.f32 %v6100_v53 }
 0x661   : > { %v6103_v14 = vpop.xlane.xlu0 %6102 }
 0x662   : > { %12876 = vrcp.f32 %v6103_v14 }
 0x663   : > { %v6106_v62 = vpop.xlane.xlu1 %6105 }
 0x664   : > { %12878 = vrcp.f32 %v6106_v62 }
 0x665   : > { %v5977_v3 = vpop.xlane.xlu0 %5976 }
 0x666   : > { %v6023_v47 = vsub.f32 %v15051_v6, %v5977_v3 }
 0x667   : > { %v5980_v13 = vpop.xlane.xlu1 %5979 }
 0x668   : > { %v12873_v10 = vpop.eup %12872  ;;  %v6079_v4 = vmul.f32 1.442695, %v6023_v47  ;;  %v6024_v5 = vsub.f32 %v15058_v59, %v5980_v13 }
 0x669   : > { %v5983_v42 = vpop.xlane.xlu0 %5982  ;;  %v6223_v12 = vmul.f32 %v12873_v10, %v15036_v55 }
 0x66a   : > { %v12875_v43 = vpop.eup %12874  ;;  %12880 = vpow2.f32 %v6079_v4  ;;  %v6081_v48 = vmul.f32 1.442695, %v6024_v5  ;;  %v6025_v50 = vsub.f32 %v15060_v33, %v5983_v42 }
 0x66b   : > { %v5986_v18 = vpop.xlane.xlu1 %5985  ;;  %v6224_v35 = vmul.f32 %v12875_v43, %v15041_v29 }
 0x66c   : > { %v12877_v61 = vpop.eup %12876  ;;  %12882 = vpow2.f32 %v6081_v48  ;;  %v6083_v53 = vmul.f32 1.442695, %v6025_v50  ;;  %v6026_v6 = vsub.f32 %v15064_v57, %v5986_v18 }
 0x66d   : > { %v6109_v14 = vpop.xlane.xlu0 %6108  ;;  %v6255_v62 = vpack.c.bf16 %v6224_v35, %v6223_v12  ;;  %v6225_v47 = vmul.f32 %v12877_v61, %v15046_v15 }
 0x66e   : > { %v12879_v3 = vpop.eup %12878  ;;  %12884 = vpow2.f32 %v6083_v53  ;;  %v6085_v59 = vmul.f32 1.442695, %v6026_v6 }
 0x66f   : > { %v6226_v13 = vmul.f32 %v12879_v3, %v15053_v16  ;;  %12886 = vrcp.f32 %v6109_v14  ;;  %11873 = vmatprep.mubr.msk.bf16.mxu0 %vm5330_vm0, %v6255_v62  ;;  %v6112_v55 = vpop.xlane.xlu1 %6111 }
 0x670   : > { %12888 = vpow2.f32 %v6085_v59 }
 0x671   : > { %12890 = vrcp.f32 %v6112_v55  ;;  %v6115_v29 = vpop.xlane.xlu0 %6114  ;;  %v6256_v33 = vpack.c.bf16 %v6226_v13, %v6225_v47 }
 0x672   : > { %12892 = vrcp.f32 %v6115_v29 }
 0x673   : > { %11874 = vmatmul.mubr.msk.bf16.vlgmr.msra.gmra.mrb[112].mxu0 %vm5330_vm0, %v6256_v33  ;;  %v6118_v57 = vpop.xlane.xlu1 %6117 }
 0x674   : > { %v15200_v10 = vpop.eup %12880  ;;  %11886 = vmatpush3.bf16.msra.mxu0 %v14885_v25  ;;  %12894 = vrcp.f32 %v6118_v57 }
 0x675   : > { %11887 = vmatprep.subr.bf16.mxu0 %v14891_v17  ;;  %v5989_v15 = vpop.xlane.xlu0 %5988  ;;  %v6167_v16 = vsel %vm5330_vm0, %v15200_v10, 0.0 }
 0x676   : > { %v15206_v4 = vpop.eup %12882  ;;  %v6027_v5 = vsub.f32 %v15094_v45, %v5989_v15  ;;  %6168 = vadd.xlane.f32.xlu0 %v6167_v16 }
 0x677   : > { %v5992_v42 = vpop.xlane.xlu1 %5991  ;;  %v6170_v43 = vsel %vm5330_vm0, %v15206_v4, 0.0 }
 0x678   : > { %v15211_v48 = vpop.eup %12884  ;;  %v6087_v50 = vmul.f32 1.442695, %v6027_v5  ;;  %11888 = vmatpush3.bf16.msra.mxu0 %v14891_v17  ;;  %v6028_v25 = vsub.f32 %v15100_v44, %v5992_v42  ;;  %6171 = vadd.xlane.f32.xlu1 %v6170_v43 }
 0x679   : > { %v12887_v18 = vpop.eup %12886  ;;  %11901 = vmatprep.subr.bf16.mxu0 %v14895_v1  ;;  %v5995_v12 = vpop.xlane.xlu0 %5994  ;;  %v6173_v45 = vsel %vm5330_vm0, %v15211_v48, 0.0 }
 0x67a   : > { %v15218_v35 = vpop.eup %12888  ;;  %12896 = vpow2.f32 %v6087_v50  ;;  %v6089_v61 = vmul.f32 1.442695, %v6028_v25  ;;  %v6029_v53 = vsub.f32 %v15104_v0, %v5995_v12  ;;  %6174 = vadd.xlane.f32.xlu0 %v6173_v45  ;;  %v6227_v44 = vmul.f32 %v12887_v18, %v15071_v60 }
 0x67b   : > { %v12891_v6 = vpop.eup %12890  ;;  %v5998_v14 = vpop.xlane.xlu1 %5997  ;;  %v6176_v17 = vsel %vm5330_vm0, %v15218_v35, 0.0 }
 0x67c   : > { %v12893_v62 = vpop.eup %12892  ;;  %12898 = vpow2.f32 %v6089_v61  ;;  %v6091_v3 = vmul.f32 1.442695, %v6029_v53  ;;  %v6030_v59 = vsub.f32 %v15110_v28, %v5998_v14  ;;  %6177 = vadd.xlane.f32.xlu1 %v6176_v17  ;;  %v6228_v47 = vmul.f32 %v12891_v6, %v15076_v2 }
 0x67d   : > { %v6121_v13 = vpop.xlane.xlu0 %6120  ;;  %v6229_v33 = vmul.f32 %v12893_v62, %v15082_v19 }
 0x67e   : > { %v12895_v55 = vpop.eup %12894  ;;  %12900 = vpow2.f32 %v6091_v3  ;;  %v6093_v0 = vmul.f32 1.442695, %v6030_v59  ;;  %v6257_v29 = vpack.c.bf16 %v6228_v47, %v6227_v44 }
 0x67f   : > { %v6230_v57 = vmul.f32 %v12895_v55, %v15088_v34  ;;  %12902 = vrcp.f32 %v6121_v13  ;;  %v6124_v15 = vpop.xlane.xlu1 %6123 }
 0x680   : > { %12904 = vpow2.f32 %v6093_v0  ;;  %11881 = vmatprep.mubr.msk.bf16.mxu1 %vm5330_vm0, %v6257_v29 }
 0x681   : > { %12906 = vrcp.f32 %v6124_v15  ;;  %v6127_v60 = vpop.xlane.xlu0 %6126  ;;  %v6258_v28 = vpack.c.bf16 %v6230_v57, %v6229_v33 }
 0x682   : > { %12908 = vrcp.f32 %v6127_v60 }
 0x683   : > { %11882 = vmatmul.mubr.msk.bf16.vlgmr.msra.gmra.mrb[112].mxu1 %vm5330_vm0, %v6258_v28  ;;  %v6130_v2 = vpop.xlane.xlu1 %6129 }
 0x684   : > { %v15230_v16 = vpop.eup %12896  ;;  %11894 = vmatpush3.bf16.msra.mxu1 %v14887_v31  ;;  %12910 = vrcp.f32 %v6130_v2 }
 0x685   : > { %11895 = vmatprep.subr.bf16.mxu1 %v14893_v49  ;;  %v6133_v19 = vpop.xlane.xlu0 %6132  ;;  %v6179_v34 = vsel %vm5330_vm0, %v15230_v16, 0.0 }
 0x686   : > { %v15236_v5 = vpop.eup %12898  ;;  %12912 = vrcp.f32 %v6133_v19  ;;  %6180 = vadd.xlane.f32.xlu0 %v6179_v34 }
 0x687   : > { %v6136_v42 = vpop.xlane.xlu1 %6135  ;;  %v6182_v43 = vsel %vm5330_vm0, %v15236_v5, 0.0 }
 0x688   : > { %v15240_v50 = vpop.eup %12900  ;;  %11896 = vmatpush3.bf16.msra.mxu1 %v14893_v49  ;;  %12914 = vrcp.f32 %v6136_v42  ;;  %6183 = vadd.xlane.f32.xlu1 %v6182_v43 }
 0x689   : > { %v12903_v31 = vpop.eup %12902  ;;  %11909 = vmatprep.subr.bf16.mxu1 %v14897_v32  ;;  %v6139_v25 = vpop.xlane.xlu0 %6138  ;;  %v6185_v18 = vsel %vm5330_vm0, %v15240_v50, 0.0 }
 0x68a   : > { %v15246_v12 = vpop.eup %12904  ;;  %12916 = vrcp.f32 %v6139_v25  ;;  %6186 = vadd.xlane.f32.xlu0 %v6185_v18  ;;  %v6231_v49 = vmul.f32 %v12903_v31, %v15116_v27 }
 0x68b   : > { %v12907_v45 = vpop.eup %12906  ;;  %v6142_v61 = vpop.xlane.xlu1 %6141  ;;  %v6188_v53 = vsel %vm5330_vm0, %v15246_v12, 0.0 }
 0x68c   : > { %v12909_v6 = vpop.eup %12908  ;;  %12918 = vrcp.f32 %v6142_v61  ;;  %6189 = vadd.xlane.f32.xlu1 %v6188_v53  ;;  %v6232_v14 = vmul.f32 %v12907_v45, %v15120_v40 }
 0x68d   : > { %v6233_v3 = vmul.f32 %v12909_v6, %v15124_v46  ;;  %v12578_v6 = vld [vmem:[%s14071_s24 + $0x4] ss:$8 sps:$4 sm:$0xff]  }
 0x68e   : > { %v12911_v17 = vpop.eup %12910  ;;  %v6259_v44 = vpack.c.bf16 %v6232_v14, %v6231_v49  ;;  %v6145_v62 = vpop.xlane.xlu0 %6144 }
 0x68f   : > { %v6234_v59 = vmul.f32 %v12911_v17, %v15129_v30  ;;  %12920 = vrcp.f32 %v6145_v62 }
 0x690   : > { %v12913_v47 = vpop.eup %12912  ;;  %11889 = vmatprep.mubr.msk.bf16.mxu0 %vm5330_vm0, %v6259_v44  ;;  %v6148_v13 = vpop.xlane.xlu1 %6147 }
 0x691   : > { %v6260_v55 = vpack.c.bf16 %v6234_v59, %v6233_v3  ;;  %12922 = vrcp.f32 %v6148_v13  ;;  %v6235_v27 = vmul.f32 %v12913_v47, %v15134_v8  ;;  %v12576_v13 = vld [vmem:[%s14071_s24] ss:$8 sps:$4 sm:$0xff]  }
 0x692   : > { %v12915_v0 = vpop.eup %12914  ;;  %v6151_v29 = vpop.xlane.xlu0 %6150 }
 0x693   : > { %11890 = vmatmul.mubr.msk.bf16.vlgmr.msra.gmra.mrb[116].mxu0 %vm5330_vm0, %v6260_v55  ;;  %12924 = vrcp.f32 %v6151_v29  ;;  %v6236_v40 = vmul.f32 %v12915_v0, %v15139_v54  ;;  %v12581_v0 = vld [vmem:[%s14071_s24 + $0x14] ss:$8 sps:$4 sm:$0xff]   ;;  %v12579_v29 = vld [vmem:[%s14071_s24 + $0x10] ss:$8 sps:$4 sm:$0xff]  }
 0x694   : > { %v12917_v33 = vpop.eup %12916  ;;  %11902 = vmatpush3.bf16.msra.mxu0 %v14895_v1  ;;  %v6154_v46 = vpop.xlane.xlu1 %6153 }
 0x695   : > { %11903 = vmatprep.subr.bf16.mxu0 %v14899_v23  ;;  %v6261_v30 = vpack.c.bf16 %v6236_v40, %v6235_v27  ;;  %12926 = vrcp.f32 %v6154_v46  ;;  %v6237_v60 = vmul.f32 %v12917_v33, %v15144_v9  ;;  %v13491_v27 = vmov 0  }
 0x696   : > { %v12919_v57 = vpop.eup %12918  ;;  %v6157_v15 = vpop.xlane.xlu0 %6156 }
 0x697   : > { %v6238_v28 = vmul.f32 %v12919_v57, %v15149_v11  ;;  %11897 = vmatprep.mubr.msk.bf16.mxu1 %vm5330_vm0, %v6261_v30  ;;  %12928 = vrcp.f32 %v6157_v15 }
 0x698   : > { %11904 = vmatpush3.bf16.msra.mxu0 %v14899_v23  ;;  %v6160_v8 = vpop.xlane.xlu1 %6159 }
 0x699   : > { %v12921_v54 = vpop.eup %12920  ;;  %11917 = vmatprep.subr.bf16.mxu0 %v14903_v41  ;;  %v6262_v1 = vpack.c.bf16 %v6238_v28, %v6237_v60  ;;  %12930 = vrcp.f32 %v6160_v8 }
 0x69a   : > { %v6163_v2 = vpop.xlane.xlu0 %6162  ;;  %v6239_v11 = vmul.f32 %v12921_v54, %v15157_v21 }
 0x69b   : > { %v12923_v19 = vpop.eup %12922  ;;  %11898 = vmatmul.mubr.msk.bf16.vlgmr.msra.gmra.mrb[116].mxu1 %vm5330_vm0, %v6262_v1  ;;  %12932 = vrcp.f32 %v6163_v2 }
 0x69c   : > { %11910 = vmatpush3.bf16.msra.mxu1 %v14897_v32  ;;  %v6166_v9 = vpop.xlane.xlu1 %6165  ;;  %v6240_v34 = vmul.f32 %v12923_v19, %v15162_v7  ;;  %v12582_v19 = vld [vmem:[%s14071_s24 + $0x20] ss:$8 sps:$4 sm:$0xff]  }
 0x69d   : > { %v12925_v42 = vpop.eup %12924  ;;  %11911 = vmatprep.subr.bf16.mxu1 %v14901_v38  ;;  %12934 = vrcp.f32 %v6166_v9 }
 0x69e   : > { %v6263_v23 = vpack.c.bf16 %v6240_v34, %v6239_v11  ;;  %v6241_v31 = vmul.f32 %v12925_v42, %v15166_v22  ;;  %v12587_v11 = vld [vmem:[%s14071_s24 + $0x34] ss:$8 sps:$4 sm:$0xff]  }
 0x69f   : > { %v12927_v43 = vpop.eup %12926 }
 0x6a0   : > { %v6242_v25 = vmul.f32 %v12927_v43, %v15170_v20  ;;  %11912 = vmatpush3.bf16.msra.mxu1 %v14901_v38  ;;  %11905 = vmatprep.mubr.msk.bf16.mxu0 %vm5330_vm0, %v6263_v23 }
 0x6a1   : > { %v12929_v32 = vpop.eup %12928  ;;  %11925 = vmatprep.subr.bf16.mxu1 %v14905_v58 }
 0x6a2   : > { %v6264_v21 = vpack.c.bf16 %v6242_v25, %v6241_v31  ;;  %v6243_v18 = vmul.f32 %v12929_v32, %v15174_v52  ;;  %v12588_v25 = vld [vmem:[%s14071_s24 + $0x40] ss:$8 sps:$4 sm:$0xff]  }
 0x6a3   : > { %v12931_v7 = vpop.eup %12930 }
 0x6a4   : > { %11906 = vmatmul.mubr.msk.bf16.vlgmr.msra.gmra.mrb[120].mxu0 %vm5330_vm0, %v6264_v21  ;;  %v6244_v45 = vmul.f32 %v12931_v7, %v15178_v51  ;;  %v12593_v21 = vld [vmem:[%s14071_s24 + $0x54] ss:$8 sps:$4 sm:$0xff]   ;;  %v12591_v7 = vld [vmem:[%s14071_s24 + $0x50] ss:$8 sps:$4 sm:$0xff]  }
 0x6a5   : > { %v12933_v61 = vpop.eup %12932  ;;  %11918 = vmatpush3.bf16.msra.mxu0 %v14903_v41 }
 0x6a6   : > { %11919 = vmatprep.subr.bf16.mxu0 %v14907_v56  ;;  %v6265_v38 = vpack.c.bf16 %v6244_v45, %v6243_v18  ;;  %v6245_v20 = vmul.f32 %v12933_v61, %v15182_v24  ;;  %v12596_v18 = vld [vmem:[%s14071_s24 + $0x64] ss:$8 sps:$4 sm:$0xff]  }
 0x6a7   : > { %v12935_v22 = vpop.eup %12934 }
 0x6a8   : > { %v6246_v53 = vmul.f32 %v12935_v22, %v15186_v39  ;;  %11913 = vmatprep.mubr.msk.bf16.mxu1 %vm5330_vm0, %v6265_v38 }
 0x6a9   : > { %11920 = vmatpush3.bf16.msra.mxu0 %v14907_v56 }
 0x6aa   : > { %v6266_v49 = vpack.c.bf16 %v6246_v53, %v6245_v20  ;;  %6801 = vmatprep.subr.bf16.mxu0 %v12578_v6  ;;  %v12594_v53 = vld [vmem:[%s14071_s24 + $0x60] ss:$8 sps:$4 sm:$0xff]  }
 0x6ac   : > { %11914 = vmatmul.mubr.msk.bf16.vlgmr.msra.gmra.mrb[120].mxu1 %vm5330_vm0, %v6266_v49  ;;  %v12599_v49 = vld [vmem:[%s14071_s24 + $0x74] ss:$8 sps:$4 sm:$0xff]  }
 0x6ad   : > { %11926 = vmatpush3.bf16.msra.mxu1 %v14905_v58 }
 0x6ae   : > { %11927 = vmatprep.subr.bf16.mxu1 %v14909_v63 }
 0x6b1   : > { %11928 = vmatpush3.bf16.msra.mxu1 %v14909_v63 }
 0x703   : > { %v6169_v41 = vpop.xlane.xlu0 %6168 }
 0x704   : > { %12936 = vrcp.f32 %v6169_v41  ;;  %v12597_v41 = vld [vmem:[%s14071_s24 + $0x70] ss:$8 sps:$4 sm:$0xff]  }
 0x705   : > { %v6172_v52 = vpop.xlane.xlu1 %6171 }
 0x706   : > { %12938 = vrcp.f32 %v6172_v52 }
 0x707   : > { %v6175_v51 = vpop.xlane.xlu0 %6174 }
 0x708   : > { %12940 = vrcp.f32 %v6175_v51  ;;  %v12602_v51 = vld [vmem:[%s14071_s24 + $0x84] ss:$8 sps:$4 sm:$0xff]  }
 0x709   : > { %v6178_v24 = vpop.xlane.xlu1 %6177 }
 0x70a   : > { %12942 = vrcp.f32 %v6178_v24 }
 0x70e   : > { %v12937_v56 = vpop.eup %12936 }
 0x70f   : > { %v6247_v14 = vmul.f32 %v12937_v56, %v15200_v10 }
 0x710   : > { %v12939_v39 = vpop.eup %12938 }
 0x711   : > { %v6248_v58 = vmul.f32 %v12939_v39, %v15206_v4 }
 0x712   : > { %v12941_v17 = vpop.eup %12940 }
 0x713   : > { %v6181_v44 = vpop.xlane.xlu0 %6180  ;;  %v6267_v62 = vpack.c.bf16 %v6248_v58, %v6247_v14  ;;  %v6249_v3 = vmul.f32 %v12941_v17, %v15211_v48  ;;  %v12584_v48 = vld [vmem:[%s14071_s24 + $0x24] ss:$8 sps:$4 sm:$0xff]  }
 0x714   : > { %v12943_v63 = vpop.eup %12942  ;;  %12944 = vrcp.f32 %v6181_v44 }
 0x715   : > { %v6250_v59 = vmul.f32 %v12943_v63, %v15218_v35  ;;  %11921 = vmatprep.mubr.msk.bf16.mxu0 %vm5330_vm0, %v6267_v62  ;;  %v6184_v47 = vpop.xlane.xlu1 %6183  ;;  %v12600_v63 = vld [vmem:[%s14071_s24 + $0x80] ss:$8 sps:$4 sm:$0xff]  }
 0x716   : > { %12946 = vrcp.f32 %v6184_v47  ;;  %v12605_v47 = vld [vmem:[%s14071_s24 + $0x94] ss:$8 sps:$4 sm:$0xff]  }
 0x717   : > { %v6187_v55 = vpop.xlane.xlu0 %6186  ;;  %v6268_v10 = vpack.c.bf16 %v6250_v59, %v6249_v3 }
 0x718   : > { %12948 = vrcp.f32 %v6187_v55  ;;  %v12603_v55 = vld [vmem:[%s14071_s24 + $0x90] ss:$8 sps:$4 sm:$0xff]  }
 0x719   : > { %11922 = vmatmul.mubr.msk.bf16.vlgmr.msra.gmra.mrb[124].mxu0 %vm5330_vm0, %v6268_v10  ;;  %v6190_v4 = vpop.xlane.xlu1 %6189  ;;  %v12608_v10 = vld [vmem:[%s14071_s24 + $0xa4] ss:$8 sps:$4 sm:$0xff]  }
 0x71a   : > { %12950 = vrcp.f32 %v6190_v4  ;;  %6802 = vmatpush1.bf16.msra.mxu0 %v12576_v13  ;;  %6833 = vmatprep.mubr.bf16.mxu0 %v13491_v27 }
 0x71b   : > { %6803 = vmatprep.subr.bf16.mxu0 %v12581_v0 }
 0x71e   : > { %v12945_v35 = vpop.eup %12944  ;;  %6804 = vmatpush1.bf16.msra.mxu0 %v12579_v29 }
 0x71f   : > { %6880 = vmatprep.subr.bf16.mxu0 %v12584_v48  ;;  %v6251_v33 = vmul.f32 %v12945_v35, %v15230_v16 }
 0x720   : > { %v12947_v40 = vpop.eup %12946 }
 0x721   : > { %v6252_v46 = vmul.f32 %v12947_v40, %v15236_v5 }
 0x722   : > { %v12949_v30 = vpop.eup %12948 }
 0x723   : > { %v6269_v57 = vpack.c.bf16 %v6252_v46, %v6251_v33  ;;  %v6253_v60 = vmul.f32 %v12949_v30, %v15240_v50  ;;  %v12585_v50 = vld [vmem:[%s14071_s24 + $0x30] ss:$8 sps:$4 sm:$0xff]   ;;  %v12606_v33 = vld [vmem:[%s14071_s24 + $0xa0] ss:$8 sps:$4 sm:$0xff]   ;;  %v12611_v46 = vld [vmem:[%s14071_s24 + $0xb4] ss:$8 sps:$4 sm:$0xff]  }
 0x724   : > { %v12951_v15 = vpop.eup %12950  ;;  %v12609_v30 = vld [vmem:[%s14071_s24 + $0xb0] ss:$8 sps:$4 sm:$0xff]  }
 0x725   : > { %v6254_v28 = vmul.f32 %v12951_v15, %v15246_v12  ;;  %11929 = vmatprep.mubr.msk.bf16.mxu1 %vm5330_vm0, %v6269_v57  ;;  %v12590_v12 = vld [vmem:[%s14071_s24 + $0x44] ss:$8 sps:$4 sm:$0xff]   ;;  %v12612_v15 = vld [vmem:[%s14071_s24 + $0xc0] ss:$8 sps:$4 sm:$0xff]  }
 0x726   : > { %v12614_v57 = vld [vmem:[%s14071_s24 + $0xc4] ss:$8 sps:$4 sm:$0xff]  }
 0x727   : > { %v6270_v8 = vpack.c.bf16 %v6254_v28, %v6253_v60  ;;  %v12617_v60 = vld [vmem:[%s14071_s24 + $0xd4] ss:$8 sps:$4 sm:$0xff]   ;;  %v12615_v28 = vld [vmem:[%s14071_s24 + $0xd0] ss:$8 sps:$4 sm:$0xff]  }
 0x729   : > { %11930 = vmatmul.mubr.msk.bf16.vlgmr.msra.gmra.mrb[124].mxu1 %vm5330_vm0, %v6270_v8  ;;  %v12620_v8 = vld [vmem:[%s14071_s24 + $0xe4] ss:$8 sps:$4 sm:$0xff]  }
 0x746   : > { %v11875_v54 = vpop.f32.mrb[112].mxu0 }
 0x747   : > { %v6327_v1 = vpop.f32.mrb[113].mxu0 }
 0x748   : > { %v11876_v16 = vpop.f32.mrb[114].mxu0 }
 0x749   : > { %v6728_v2 = vpack.c.bf16 %v11876_v16, %v11875_v54  ;;  %v6330_v5 = vpop.f32.mrb[115].mxu0 }
 0x74a   : > { %v6727_v9 = vpack.c.bf16 %v6330_v5, %v6327_v1 }
 0x74c   : > { %10749 = vmatmul.mubr.msk.bf16.vlgmr.msra.gmra.mrb[128].mxu0 %vm5330_vm0, %v6727_v9 }
 0x74d   : > { %6843 = vmatprep.mubr.bf16.mxu0 %v13491_v27  ;;  %6881 = vmatpush1.bf16.msra.mxu0 %v12582_v19  ;;  %v12618_v19 = vld [vmem:[%s14071_s24 + $0xe0] ss:$8 sps:$4 sm:$0xff]  }
 0x74e   : > { %6882 = vmatprep.subr.bf16.mxu0 %v12587_v11  ;;  %v12623_v11 = vld [vmem:[%s14071_s24 + $0xf4] ss:$8 sps:$4 sm:$0xff]  }
 0x751   : > { %6883 = vmatpush1.bf16.msra.mxu0 %v12585_v50  ;;  %v12621_v50 = vld [vmem:[%s14071_s24 + $0xf0] ss:$8 sps:$4 sm:$0xff]   ;;  %s9947_s24 = sshll.u32 %s14121_s15, 4  ;;  %s15988_s24 = int_to_ptr.vmem [resolvable:$true] %s9947_s24 }
 0x752   : > { %6959 = vmatprep.subr.bf16.mxu0 %v12590_v12  ;;  %s13332_s25 = scalar_lea.vmem %s15988_s24, 1024  ;;  %p13339_p10 = scmp.lt.s32.totalorder %s15988_s24, %s13337_s9 }
 0x753   : > { %p13333_p0 = scmp.ne.s32.totalorder %s15988_s24, %s13332_s25  ;;  %p13340_p13 = scmp.lt.s32.totalorder %s13338_s26, %s13332_s25 }
 0x754   : > { %10750 = vmatmul.mubr.msk.bf16.gmra.mrb[132].mxu0 %vm5330_vm0, %v6728_v2 }
 0x755   : > { %6912 = vmatprep.mubr.bf16.mxu0 %v13491_v27  ;;  %p13334_p2 = pnand %p13333_p0, %p16202_p8  ;;  %p13341_p5 = por %p13340_p13, %p13339_p10 }
 0x756   : > { %v11883_v34 = vpop.f32.mrb[112].mxu1 }
 0x757   : > { %v6382_v42 = vpop.f32.mrb[113].mxu1  ;;  %p13335_p12 = pneg %p13334_p2 }
 0x758   : > { %v11884_v23 = vpop.f32.mrb[114].mxu1 }
 0x759   : > { %v6730_v43 = vpack.c.bf16 %v11884_v23, %v11883_v34  ;;  %v6385_v31 = vpop.f32.mrb[115].mxu1  ;;  %p13342_p3 = pnand %p13341_p5, %p13335_p12 }
 0x75a   : > { %v6729_v32 = vpack.c.bf16 %v6385_v31, %v6382_v42 }
 0x75c   : > { %10755 = vmatmul.mubr.msk.bf16.vlgmr.msra.gmra.mrb[128].mxu0 %vm5330_vm0, %v6729_v32 }
 0x75d   : > { %6922 = vmatprep.mubr.bf16.mxu0 %v13491_v27  ;;  %6960 = vmatpush1.bf16.msra.mxu0 %v12588_v25  ;;  %v7471_v25 = vld [vmem:[%s16196_s18] sm:$0x3] }
 0x75e   : > { %6961 = vmatprep.subr.bf16.mxu0 %v12593_v21  ;;  %v7476_v32 = vrot.slane %v7471_v25, %v14220_v36 }
 0x761   : > { %6962 = vmatpush1.bf16.msra.mxu0 %v12591_v7  ;;  %v7480_v7 = vrot.slane %v7471_v25, %v14223_v37 }
 0x762   : > { %7038 = vmatprep.subr.bf16.mxu0 %v12596_v18  ;;  %v13024_v18 = vld [vmem:[%s14121_s15] sm:$0xff] }
 0x764   : > { %10756 = vmatmul.mubr.msk.bf16.gmra.mrb[132].mxu0 %vm5330_vm0, %v6730_v43 }
 0x765   : > { %6991 = vmatprep.mubr.bf16.mxu0 %v13491_v27 }
 0x766   : > { %v11891_v45 = vpop.f32.mrb[116].mxu0 }
 0x767   : > { %v6437_v61 = vpop.f32.mrb[117].mxu0 }
 0x768   : > { %v11892_v38 = vpop.f32.mrb[118].mxu0 }
 0x769   : > { %v6732_v22 = vpack.c.bf16 %v11892_v38, %v11891_v45  ;;  %v6440_v20 = vpop.f32.mrb[119].mxu0  ;;  %v13025_v38 = vld [vmem:[%s14121_s15 + $0x8] sm:$0xff] }
 0x76a   : > { %v6731_v6 = vpack.c.bf16 %v6440_v20, %v6437_v61 }
 0x76c   : > { %10761 = vmatmul.mubr.msk.bf16.vlgmr.msra.gmra.mrb[128].mxu0 %vm5330_vm0, %v6731_v6 }
 0x76d   : > { %7001 = vmatprep.mubr.bf16.mxu0 %v13491_v27  ;;  %7039 = vmatpush1.bf16.msra.mxu0 %v12594_v53 }
 0x76e   : > { %v11899_v52 = vpop.f32.mrb[116].mxu1  ;;  %7040 = vmatprep.subr.bf16.mxu0 %v12599_v49 }
 0x76f   : > { %v6492_v24 = vpop.f32.mrb[117].mxu1 }
 0x770   : > { %v11900_v56 = vpop.f32.mrb[118].mxu1 }
 0x771   : > { %v6734_v39 = vpack.c.bf16 %v11900_v56, %v11899_v52  ;;  %v6495_v14 = vpop.f32.mrb[119].mxu1  ;;  %7041 = vmatpush1.bf16.msra.mxu0 %v12597_v41  ;;  %v13027_v52 = vld [vmem:[%s14121_s15 + $0x18] sm:$0xff] }
 0x772   : > { %v6733_v58 = vpack.c.bf16 %v6495_v14, %v6492_v24  ;;  %7117 = vmatprep.subr.bf16.mxu0 %v12602_v51 }
 0x774   : > { %10762 = vmatmul.mubr.msk.bf16.gmra.mrb[132].mxu0 %vm5330_vm0, %v6732_v22 }
 0x775   : > { %7070 = vmatprep.mubr.bf16.mxu0 %v13491_v27 }
 0x777   : > { %v11907_v17 = vpop.f32.mrb[120].mxu0 }
 0x778   : > { %v6547_v44 = vpop.f32.mrb[121].mxu0 }
 0x779   : > { %v11908_v62 = vpop.f32.mrb[122].mxu0 }
 0x77a   : > { %v6736_v3 = vpack.c.bf16 %v11908_v62, %v11907_v17  ;;  %v6550_v59 = vpop.f32.mrb[123].mxu0  ;;  %v13028_v17 = vld [vmem:[%s14121_s15 + $0x20] sm:$0xff] }
 0x77b   : > { %v6735_v13 = vpack.c.bf16 %v6550_v59, %v6547_v44 }
 0x77c   : > { %10767 = vmatmul.mubr.msk.bf16.vlgmr.msra.gmra.mrb[128].mxu0 %vm5330_vm0, %v6733_v58 }
 0x77d   : > { %7080 = vmatprep.mubr.bf16.mxu0 %v13491_v27  ;;  %7118 = vmatpush1.bf16.msra.mxu0 %v12600_v63  ;;  %v13029_v63 = vld [vmem:[%s14121_s15 + $0x28] sm:$0xff] }
 0x77e   : > { %7119 = vmatprep.subr.bf16.mxu0 %v12605_v47 }
 0x77f   : > { %v11915_v0 = vpop.f32.mrb[120].mxu1 }
 0x780   : > { %v6602_v4 = vpop.f32.mrb[121].mxu1 }
 0x781   : > { %v11916_v29 = vpop.f32.mrb[122].mxu1  ;;  %7120 = vmatpush1.bf16.msra.mxu0 %v12603_v55 }
 0x782   : > { %v6738_v48 = vpack.c.bf16 %v11916_v29, %v11915_v0  ;;  %v6605_v35 = vpop.f32.mrb[123].mxu1  ;;  %7196 = vmatprep.subr.bf16.mxu0 %v12608_v10 }
 0x783   : > { %v6737_v40 = vpack.c.bf16 %v6605_v35, %v6602_v4  ;;  %v13031_v4 = vld [vmem:[%s14121_s15 + $0x38] sm:$0xff] }
 0x784   : > { %10768 = vmatmul.mubr.msk.bf16.gmra.mrb[132].mxu0 %vm5330_vm0, %v6734_v39 }
 0x785   : > { %7149 = vmatprep.mubr.bf16.mxu0 %v13491_v27 }
 0x78c   : > { %10773 = vmatmul.mubr.msk.bf16.vlgmr.msra.gmra.mrb[128].mxu0 %vm5330_vm0, %v6735_v13  ;;  %v13030_v13 = vld [vmem:[%s14121_s15 + $0x30] sm:$0xff] }
 0x78d   : > { %7159 = vmatprep.mubr.bf16.mxu0 %v13491_v27  ;;  %7197 = vmatpush1.bf16.msra.mxu0 %v12606_v33 }
 0x78e   : > { %7198 = vmatprep.subr.bf16.mxu0 %v12611_v46  ;;  %v7599_v46 = vld [vmem:[%s14117_s17] sm:$0xff] }
 0x791   : > { %7199 = vmatpush1.bf16.msra.mxu0 %v12609_v30  ;;  %v7603_v30 = vld [vmem:[%s14117_s17 + $0x20] sm:$0xff] }
 0x792   : > { %7275 = vmatprep.subr.bf16.mxu0 %v12614_v57  ;;  %v7607_v57 = vld [vmem:[%s14117_s17 + $0x40] sm:$0xff] }
 0x794   : > { %10774 = vmatmul.mubr.msk.bf16.gmra.mrb[132].mxu0 %vm5330_vm0, %v6736_v3 }
 0x795   : > { %7228 = vmatprep.mubr.bf16.mxu0 %v13491_v27 }
 0x79c   : > { %10779 = vmatmul.mubr.msk.bf16.vlgmr.msra.gmra.mrb[128].mxu0 %vm5330_vm0, %v6737_v40 }
 0x79d   : > { %7238 = vmatprep.mubr.bf16.mxu0 %v13491_v27  ;;  %7276 = vmatpush1.bf16.msra.mxu0 %v12612_v15  ;;  %v10793_v15 = vcombine.low %v7599_v46, %v7603_v30 }
 0x79e   : > { %7277 = vmatprep.subr.bf16.mxu0 %v12617_v60  ;;  %v10794_v60 = vcombine.high %v7599_v46, %v7603_v30 }
 0x7a0   : > { %8409 = vmatprep.subr.bf16.mxu1 %v10794_v60 }
 0x7a1   : > { %7278 = vmatpush1.bf16.msra.mxu0 %v12615_v28  ;;  %v7611_v28 = vld [vmem:[%s14117_s17 + $0x60] sm:$0xff]  ;;  %8410 = vmatpush1.bf16.msra.mxu1 %v10793_v15 }
 0x7a2   : > { %7354 = vmatprep.subr.bf16.mxu0 %v12620_v8  ;;  %v10802_v8 = vcombine.high %v7607_v57, %v7611_v28 }
 0x7a4   : > { %10780 = vmatmul.mubr.msk.bf16.gmra.mrb[132].mxu0 %vm5330_vm0, %v6738_v48  ;;  %8411 = vmatprep.subr.bf16.mxu1 %v10802_v8 }
 0x7a5   : > { %7307 = vmatprep.mubr.bf16.mxu0 %v13491_v27 }
 0x7ec   : > { %v11923_v54 = vpop.f32.mrb[124].mxu0 }
 0x7ed   : > { %v6657_v1 = vpop.f32.mrb[125].mxu0 }
 0x7ee   : > { %v11924_v16 = vpop.f32.mrb[126].mxu0 }
 0x7ef   : > { %v6740_v2 = vpack.c.bf16 %v11924_v16, %v11923_v54  ;;  %v6660_v5 = vpop.f32.mrb[127].mxu0  ;;  %v7615_v54 = vld [vmem:[%s14117_s17 + $0x80] sm:$0xff]  ;;  %v10801_v16 = vcombine.low %v7607_v57, %v7611_v28 }
 0x7f0   : > { %v6739_v9 = vpack.c.bf16 %v6660_v5, %v6657_v1  ;;  %v7619_v1 = vld [vmem:[%s14117_s17 + $0xa0] sm:$0xff] }
 0x7f1   : > { %v7623_v5 = vld [vmem:[%s14117_s17 + $0xc0] sm:$0xff]  ;;  %8412 = vmatpush1.bf16.msra.mxu1 %v10801_v16 }
 0x7f2   : > { %10785 = vmatmul.mubr.msk.bf16.vlgmr.msra.gmra.mrb[128].mxu0 %vm5330_vm0, %v6739_v9  ;;  %v10809_v9 = vcombine.low %v7615_v54, %v7619_v1 }
 0x7f3   : > { %7355 = vmatpush1.bf16.msra.mxu0 %v12618_v19  ;;  %7317 = vmatprep.mubr.bf16.mxu0 %v13491_v27  ;;  %v7627_v19 = vld [vmem:[%s14117_s17 + $0xe0] sm:$0xff] }
 0x7f4   : > { %7356 = vmatprep.subr.bf16.mxu0 %v12623_v11  ;;  %v10818_v11 = vcombine.high %v7623_v5, %v7627_v19 }
 0x7f7   : > { %7357 = vmatpush1.bf16.msra.mxu0 %v12621_v50  ;;  %v7631_v50 = vld [vmem:[%s14117_s17 + $0x100] sm:$0xff] }
 0x7fa   : > { %10786 = vmatmul.mubr.msk.bf16.gmra.mrb[132].mxu0 %vm5330_vm0, %v6740_v2  ;;  %v10810_v2 = vcombine.high %v7615_v54, %v7619_v1 }
 0x7fb   : > { %7386 = vmatprep.mubr.bf16.mxu0 %v13491_v27 }
 0x7fc   : > { %v11931_v12 = vpop.f32.mrb[124].mxu1  ;;  %8413 = vmatprep.subr.bf16.mxu1 %v10810_v2 }
 0x7fd   : > { %v6712_v34 = vpop.f32.mrb[125].mxu1  ;;  %8414 = vmatpush1.bf16.msra.mxu1 %v10809_v9 }
 0x7fe   : > { %v11932_v42 = vpop.f32.mrb[126].mxu1  ;;  %8415 = vmatprep.subr.bf16.mxu1 %v10818_v11 }
 0x7ff   : > { %v6742_v23 = vpack.c.bf16 %v11932_v42, %v11931_v12  ;;  %v6715_v43 = vpop.f32.mrb[127].mxu1  ;;  %v7635_v12 = vld [vmem:[%s14117_s17 + $0x120] sm:$0xff] }
 0x800   : > { %v6741_v31 = vpack.c.bf16 %v6715_v43, %v6712_v34  ;;  %v10817_v34 = vcombine.low %v7623_v5, %v7627_v19  ;;  %v10826_v42 = vcombine.high %v7631_v50, %v7635_v12  ;;  %v7643_v43 = vld [vmem:[%s14117_s17 + $0x160] sm:$0xff] }
 0x802   : > { %10791 = vmatmul.mubr.msk.bf16.vlgmr.msra.gmra.mrb[128].mxu0 %vm5330_vm0, %v6741_v31  ;;  %8416 = vmatpush1.bf16.msra.mxu1 %v10817_v34  ;;  %v10825_v31 = vcombine.low %v7631_v50, %v7635_v12  ;;  %v7679_v50 = vld [vmem:[%s14117_s17 + $0x280] sm:$0xff] }
 0x803   : > { %7396 = vmatprep.mubr.bf16.mxu0 %v13491_v27  ;;  %v13026_v27 = vld [vmem:[%s14121_s15 + $0x10] sm:$0xff]  ;;  %8417 = vmatprep.subr.bf16.mxu1 %v10826_v42  ;;  %v7683_v12 = vld [vmem:[%s14117_s17 + $0x2a0] sm:$0xff] }
 0x804   : > { %v10874_v34 = vcombine.high %v7679_v50, %v7683_v12  ;;  %v10873_v42 = vcombine.low %v7679_v50, %v7683_v12 }
 0x806   : > { %8418 = vmatpush1.bf16.msra.mxu1 %v10825_v31 }
 0x80a   : > { %10792 = vmatmul.mubr.msk.bf16.gmra.mrb[132].mxu0 %vm5330_vm0, %v6742_v23  ;;  %v7639_v23 = vld [vmem:[%s14117_s17 + $0x140] sm:$0xff] }
 0x80b   : > { %v10834_v25 = vcombine.high %v7639_v23, %v7643_v43 }
 0x80d   : > { %8419 = vmatprep.subr.bf16.mxu1 %v10834_v25 }
 0x8d5   : > { %v7388_v21 = vpop.f32.mrb[128].mxu0 }
 0x8d6   : > { %v7463_v45 = vadd.f32 %v13024_v18, %v7388_v21  ;;  %v7390_v61 = vpop.f32.mrb[129].mxu0  ;;  %v7651_v21 = vld [vmem:[%s14117_s17 + $0x1a0] sm:$0xff] }
 0x8d7   : > { %v7464_v22 = vadd.f32 %v13025_v38, %v7390_v61  ;;  %v7392_v20 = vpop.f32.mrb[130].mxu0  ;;  %v7659_v61 = vld [vmem:[%s14117_s17 + $0x1e0] sm:$0xff] }
 0x8d8   : > { %v15370_v53 = vadd.f32 %v7476_v32, %v7463_v45  ;;  %v7465_v6 = vadd.f32 %v13026_v27, %v7392_v20  ;;  %v7394_v49 = vpop.f32.mrb[131].mxu0  ;;  %v7655_v45 = vld [vmem:[%s14117_s17 + $0x1c0] sm:$0xff] }
 0x8d9   : > { %v15373_v41 = vadd.f32 %v7480_v7, %v7464_v22  ;;  %v7466_v51 = vadd.f32 %v13027_v52, %v7394_v49  ;;  %v10850_v22 = vcombine.high %v7655_v45, %v7659_v61  ;;  %v7663_v20 = vld [vmem:[%s14117_s17 + $0x200] sm:$0xff] }
 0x8da   : > { %v15376_v24 = vadd.f32 %v7476_v32, %v7465_v6  ;;  %v7667_v27 = vld [vmem:[%s14117_s17 + $0x220] sm:$0xff]  ;;  %v10849_v6 = vcombine.low %v7655_v45, %v7659_v61 }
 0x8db   : > { %v15378_v56 = vadd.f32 %v7480_v7, %v7466_v51  ;;  %v7493_v39 = vadd.f32 %v15373_v41, %v15370_v53  ;;  %v10858_v49 = vcombine.high %v7663_v20, %v7667_v27  ;;  %v7671_v52 = vld [vmem:[%s14117_s17 + $0x240] sm:$0xff] }
 0x8dc   : > { %v7675_v51 = vld [vmem:[%s14117_s17 + $0x260] sm:$0xff] }
 0x8dd   : > { %7494 = vadd.xlane.f32.xlu0 %v7493_v39  ;;  %v7398_v14 = vpop.f32.mrb[132].mxu0  ;;  %v7496_v58 = vadd.f32 %v15378_v56, %v15376_v24  ;;  %v10857_v39 = vcombine.low %v7663_v20, %v7667_v27  ;;  %v7703_v45 = vld [vmem:[%s14117_s17 + $0x340] sm:$0xff] }
 0x8de   : > { %v7467_v44 = vadd.f32 %v13028_v17, %v7398_v14  ;;  %v7400_v62 = vpop.f32.mrb[133].mxu0  ;;  %v10866_v14 = vcombine.high %v7671_v52, %v7675_v51  ;;  %v7707_v61 = vld [vmem:[%s14117_s17 + $0x360] sm:$0xff] }
 0x8df   : > { %v7468_v3 = vadd.f32 %v13029_v63, %v7400_v62  ;;  %7497 = vadd.xlane.f32.xlu1 %v7496_v58  ;;  %v7402_v59 = vpop.f32.mrb[134].mxu0  ;;  %v10865_v58 = vcombine.low %v7671_v52, %v7675_v51  ;;  %v7711_v20 = vld [vmem:[%s14117_s17 + $0x380] sm:$0xff] }
 0x8e0   : > { %v15386_v47 = vadd.f32 %v7476_v32, %v7467_v44  ;;  %v7469_v55 = vadd.f32 %v13030_v13, %v7402_v59  ;;  %v7404_v10 = vpop.f32.mrb[135].mxu0  ;;  %v7715_v27 = vld [vmem:[%s14117_s17 + $0x3a0] sm:$0xff] }
 0x8e1   : > { %v15389_v0 = vadd.f32 %v7480_v7, %v7468_v3  ;;  %v7470_v29 = vadd.f32 %v13031_v4, %v7404_v10  ;;  %v7719_v52 = vld [vmem:[%s14117_s17 + $0x3c0] sm:$0xff] }
 0x8e2   : > { %v15392_v48 = vadd.f32 %v7476_v32, %v7469_v55  ;;  %v7647_v32 = vld [vmem:[%s14117_s17 + $0x180] sm:$0xff] }
 0x8e3   : > { %v15394_v35 = vadd.f32 %v7480_v7, %v7470_v29  ;;  %v7499_v40 = vadd.f32 %v15389_v0, %v15386_v47  ;;  %v10833_v7 = vcombine.low %v7639_v23, %v7643_v43  ;;  %v10842_v18 = vcombine.high %v7647_v32, %v7651_v21  ;;  %v7687_v23 = vld [vmem:[%s14117_s17 + $0x2c0] sm:$0xff] }
 0x8e4   : > { %v10841_v38 = vcombine.low %v7647_v32, %v7651_v21  ;;  %v7691_v43 = vld [vmem:[%s14117_s17 + $0x2e0] sm:$0xff] }
 0x8e5   : > { %7500 = vadd.xlane.f32.xlu0 %v7499_v40  ;;  %v7502_v33 = vadd.f32 %v15394_v35, %v15392_v48  ;;  %8420 = vmatpush1.bf16.msra.mxu1 %v10833_v7  ;;  %v10882_v31 = vcombine.high %v7687_v23, %v7691_v43  ;;  %v10881_v25 = vcombine.low %v7687_v23, %v7691_v43  ;;  %v7695_v32 = vld [vmem:[%s14117_s17 + $0x300] sm:$0xff] }
 0x8e6   : > { %8421 = vmatprep.subr.bf16.mxu1 %v10842_v18  ;;  %v7699_v21 = vld [vmem:[%s14117_s17 + $0x320] sm:$0xff] }
 0x8e7   : > { %7503 = vadd.xlane.f32.xlu1 %v7502_v33  ;;  %v10890_v7 = vcombine.high %v7695_v32, %v7699_v21  ;;  %v10889_v18 = vcombine.low %v7695_v32, %v7699_v21  ;;  %v7723_v51 = vld [vmem:[%s14117_s17 + $0x3e0] sm:$0xff] }
 0x8e9   : > { %8422 = vmatpush1.bf16.msra.mxu1 %v10841_v38  ;;  %v10898_v38 = vcombine.high %v7703_v45, %v7707_v61 }
 0x8ea   : > { %8423 = vmatprep.subr.bf16.mxu1 %v10850_v22  ;;  %v10897_v22 = vcombine.low %v7703_v45, %v7707_v61 }
 0x8ed   : > { %8424 = vmatpush1.bf16.msra.mxu1 %v10849_v6  ;;  %v10906_v6 = vcombine.high %v7711_v20, %v7715_v27 }
 0x8ee   : > { %8425 = vmatprep.subr.bf16.mxu1 %v10858_v49  ;;  %v10905_v49 = vcombine.low %v7711_v20, %v7715_v27 }
 0x8f1   : > { %8426 = vmatpush1.bf16.msra.mxu1 %v10857_v39  ;;  %v10914_v39 = vcombine.high %v7719_v52, %v7723_v51 }
 0x8f2   : > { %8427 = vmatprep.subr.bf16.mxu1 %v10866_v14  ;;  %v10913_v14 = vcombine.low %v7719_v52, %v7723_v51 }
 0x8f5   : > { %8428 = vmatpush1.bf16.msra.mxu1 %v10865_v58  ;;  %v7600_v58 = vld [vmem:[%s14117_s17 + $0x8] sm:$0xff] }
 0x8f6   : > { %8429 = vmatprep.subr.bf16.mxu1 %v10874_v34 }
 0x8f9   : > { %8430 = vmatpush1.bf16.msra.mxu1 %v10873_v42 }
 0x8fa   : > { %8431 = vmatprep.subr.bf16.mxu1 %v10882_v31 }
 0x8fd   : > { %8432 = vmatpush1.bf16.msra.mxu1 %v10881_v25 }
 0x8fe   : > { %8433 = vmatprep.subr.bf16.mxu1 %v10890_v7 }
 0x901   : > { %8434 = vmatpush1.bf16.msra.mxu1 %v10889_v18 }
 0x902   : > { %8435 = vmatprep.subr.bf16.mxu1 %v10898_v38  ;;  %v7612_v38 = vld [vmem:[%s14117_s17 + $0x68] sm:$0xff] }
 0x905   : > { %8436 = vmatpush1.bf16.msra.mxu1 %v10897_v22 }
 0x906   : > { %8437 = vmatprep.subr.bf16.mxu1 %v10906_v6 }
 0x909   : > { %8438 = vmatpush1.bf16.msra.mxu1 %v10905_v49 }
 0x90a   : > { %8439 = vmatprep.subr.bf16.mxu1 %v10914_v39 }
 0x90d   : > { %8440 = vmatpush1.bf16.msra.mxu1 %v10913_v14  ;;  %v7616_v14 = vld [vmem:[%s14117_s17 + $0x88] sm:$0xff] }
 0x96a   : > { %v7495_v17 = vpop.xlane.xlu0 %7494 }
 0x96b   : > { %v7505_v44 = vmul.f32 0.00390625, %v7495_v17  ;;  %v7604_v17 = vld [vmem:[%s14117_s17 + $0x28] sm:$0xff] }
 0x96c   : > { %v7498_v62 = vpop.xlane.xlu1 %7497 }
 0x96d   : > { %v15421_v63 = vsub.f32 %v15370_v53, %v7505_v44  ;;  %v15424_v3 = vsub.f32 %v15373_v41, %v7505_v44  ;;  %v7506_v59 = vmul.f32 0.00390625, %v7498_v62  ;;  %v10795_v44 = vcombine.low %v7600_v58, %v7604_v17 }
 0x96e   : > { %v10796_v62 = vcombine.high %v7600_v58, %v7604_v17  ;;  %v7620_v58 = vld [vmem:[%s14117_s17 + $0xa8] sm:$0xff] }
 0x96f   : > { %v15427_v13 = vsub.f32 %v15376_v24, %v7506_v59  ;;  %v15430_v55 = vsub.f32 %v15378_v56, %v7506_v59  ;;  %v7517_v10 = vmul.f32 %v15421_v63, %v15421_v63  ;;  %v7518_v4 = vmul.f32 %v15424_v3, %v15424_v3 }
 0x970   : > { %8462 = vmatprep.subr.bf16.mxu1 %v10796_v62 }
 0x971   : > { %v7525_v29 = vadd.f32 %v7518_v4, %v7517_v10  ;;  %v7519_v40 = vmul.f32 %v15427_v13, %v15427_v13  ;;  %v7520_v33 = vmul.f32 %v15430_v55, %v15430_v55 }
 0x972   : > { %v7501_v46 = vpop.xlane.xlu0 %7500 }
 0x973   : > { %v7507_v30 = vmul.f32 0.00390625, %v7501_v46  ;;  %7526 = vadd.xlane.f32.xlu0 %v7525_v29  ;;  %v7528_v57 = vadd.f32 %v7520_v33, %v7519_v40 }
 0x974   : > { %v7504_v15 = vpop.xlane.xlu1 %7503 }
 0x975   : > { %v15441_v60 = vsub.f32 %v15386_v47, %v7507_v30  ;;  %v15444_v28 = vsub.f32 %v15389_v0, %v7507_v30  ;;  %v7508_v8 = vmul.f32 0.00390625, %v7504_v15  ;;  %7529 = vadd.xlane.f32.xlu1 %v7528_v57 }
 0x977   : > { %v15447_v54 = vsub.f32 %v15392_v48, %v7508_v8  ;;  %v15450_v1 = vsub.f32 %v15394_v35, %v7508_v8  ;;  %v7521_v16 = vmul.f32 %v15441_v60, %v15441_v60  ;;  %v7522_v2 = vmul.f32 %v15444_v28, %v15444_v28 }
 0x979   : > { %v7531_v5 = vadd.f32 %v7522_v2, %v7521_v16  ;;  %v7523_v19 = vmul.f32 %v15447_v54, %v15447_v54  ;;  %v7524_v9 = vmul.f32 %v15450_v1, %v15450_v1  ;;  %v7491_v16 = vld [vmem:[%s16197_s1] sm:$0x3] }
 0x97b   : > { %7532 = vadd.xlane.f32.xlu0 %v7531_v5  ;;  %v7534_v11 = vadd.f32 %v7524_v9, %v7523_v19  ;;  %v7492_v5 = vld [vmem:[%s16198_s2] sm:$0x3]  ;;  %v7565_v19 = vrot.slane %v7491_v16, %v14223_v37  ;;  %v7561_v9 = vrot.slane %v7491_v16, %v14220_v36 }
 0x97c   : > { %v7584_v42 = vrot.slane %v7492_v5, %v14223_v37  ;;  %v7580_v23 = vrot.slane %v7492_v5, %v14220_v36  ;;  %v7644_v5 = vld [vmem:[%s14117_s17 + $0x168] sm:$0xff] }
 0x97d   : > { %7535 = vadd.xlane.f32.xlu1 %v7534_v11 }
 0xa00   : > { %v7527_v59 = vpop.xlane.xlu0 %7526 }
 0xa01   : > { %v7537_v10 = vmul.f32 0.00390625, %v7527_v59 }
 0xa02   : > { %v7530_v4 = vpop.xlane.xlu1 %7529 }
 0xa03   : > { %v7541_v29 = vadd.f32 1e-05, %v7537_v10  ;;  %v7538_v40 = vmul.f32 0.00390625, %v7530_v4 }
 0xa05   : > { %12952 = vrsqrt.f32 %v7541_v29  ;;  %v7542_v33 = vadd.f32 1e-05, %v7538_v40  ;;  %v7624_v29 = vld [vmem:[%s14117_s17 + $0xc8] sm:$0xff] }
 0xa06   : > { %v7628_v40 = vld [vmem:[%s14117_s17 + $0xe8] sm:$0xff] }
 0xa07   : > { %12954 = vrsqrt.f32 %v7542_v33 }
 0xa08   : > { %v7533_v46 = vpop.xlane.xlu0 %7532 }
 0xa09   : > { %v7539_v30 = vmul.f32 0.00390625, %v7533_v46  ;;  %v10811_v46 = vcombine.low %v7616_v14, %v7620_v58 }
 0xa0a   : > { %v7536_v57 = vpop.xlane.xlu1 %7535 }
 0xa0b   : > { %v7543_v15 = vadd.f32 1e-05, %v7539_v30  ;;  %v7540_v8 = vmul.f32 0.00390625, %v7536_v57  ;;  %v10820_v30 = vcombine.high %v7624_v29, %v7628_v40  ;;  %v7632_v57 = vld [vmem:[%s14117_s17 + $0x108] sm:$0xff] }
 0xa0d   : > { %12956 = vrsqrt.f32 %v7543_v15  ;;  %v7544_v2 = vadd.f32 1e-05, %v7540_v8  ;;  %v7636_v15 = vld [vmem:[%s14117_s17 + $0x128] sm:$0xff]  ;;  %v10819_v8 = vcombine.low %v7624_v29, %v7628_v40 }
 0xa0e   : > { %v10828_v16 = vcombine.high %v7632_v57, %v7636_v15  ;;  %v7724_v29 = vld [vmem:[%s14117_s17 + $0x3e8] sm:$0xff] }
 0xa0f   : > { %v12953_v11 = vpop.eup %12952  ;;  %12958 = vrsqrt.f32 %v7544_v2  ;;  %v7640_v2 = vld [vmem:[%s14117_s17 + $0x148] sm:$0xff] }
 0xa10   : > { %v7549_v50 = vmul.f32 %v12953_v11, %v15421_v63  ;;  %v7550_v12 = vmul.f32 %v12953_v11, %v15424_v3  ;;  %v7608_v3 = vld [vmem:[%s14117_s17 + $0x48] sm:$0xff] }
 0xa11   : > { %v12955_v34 = vpop.eup %12954  ;;  %v10804_v49 = vcombine.high %v7608_v3, %v7612_v38  ;;  %v7648_v11 = vld [vmem:[%s14117_s17 + $0x188] sm:$0xff] }
 0xa12   : > { %v7551_v43 = vmul.f32 %v12955_v34, %v15427_v13  ;;  %v7552_v31 = vmul.f32 %v12955_v34, %v15430_v55  ;;  %v7569_v25 = vmul.f32 %v7565_v19, %v7550_v12  ;;  %v7568_v32 = vmul.f32 %v7561_v9, %v7549_v50  ;;  %v7652_v50 = vld [vmem:[%s14117_s17 + $0x1a8] sm:$0xff] }
 0xa13   : > { %v10835_v12 = vcombine.low %v7640_v2, %v7644_v5  ;;  %v10844_v34 = vcombine.high %v7648_v11, %v7652_v50 }
 0xa14   : > { %v7571_v21 = vmul.f32 %v7565_v19, %v7552_v31  ;;  %v7570_v7 = vmul.f32 %v7561_v9, %v7551_v43  ;;  %v7588_v18 = vadd.f32 %v7584_v42, %v7569_v25  ;;  %v7587_v63 = vadd.f32 %v7580_v23, %v7568_v32  ;;  %v7664_v25 = vld [vmem:[%s14117_s17 + $0x208] sm:$0xff] }
 0xa15   : > { %v10843_v43 = vcombine.low %v7648_v11, %v7652_v50  ;;  %v7668_v32 = vld [vmem:[%s14117_s17 + $0x228] sm:$0xff]  ;;  %v7621_v11 = vld [vmem:[%s14117_s17 + $0xb0] sm:$0xff] }
 0xa16   : > { %v7590_v45 = vadd.f32 %v7584_v42, %v7571_v21  ;;  %v7589_v61 = vadd.f32 %v7580_v23, %v7570_v7  ;;  %v10860_v7 = vcombine.high %v7664_v25, %v7668_v32 }
 0xa17   : > { %v12957_v22 = vpop.eup %12956 }
 0xa18   : > { %v7553_v20 = vmul.f32 %v12957_v22, %v15441_v60  ;;  %v7554_v27 = vmul.f32 %v12957_v22, %v15444_v28  ;;  %v15490_v13 = vpack.c.bf16 %v7590_v45, %v7588_v18  ;;  %v15492_v55 = vpack.c.bf16 %v7589_v61, %v7587_v63  ;;  %v7672_v18 = vld [vmem:[%s14117_s17 + $0x248] sm:$0xff] }
 0xa19   : > { %v12959_v6 = vpop.eup %12958  ;;  %v10803_v28 = vcombine.low %v7608_v3, %v7612_v38  ;;  %v7676_v45 = vld [vmem:[%s14117_s17 + $0x268] sm:$0xff]  ;;  %v10859_v63 = vcombine.low %v7664_v25, %v7668_v32  ;;  %v7637_v25 = vld [vmem:[%s14117_s17 + $0x130] sm:$0xff] }
 0xa1a   : > { %v7555_v52 = vmul.f32 %v12959_v6, %v15447_v54  ;;  %v7556_v51 = vmul.f32 %v12959_v6, %v15450_v1  ;;  %8441 = vmatprep.mubr.bf16.mxu1 %v15490_v13  ;;  %v7573_v39 = vmul.f32 %v7565_v19, %v7554_v27  ;;  %v7572_v60 = vmul.f32 %v7561_v9, %v7553_v20  ;;  %v7680_v3 = vld [vmem:[%s14117_s17 + $0x288] sm:$0xff] }
 0xa1b   : > { %8442 = vmatmul.mubr.bf16.vlgmr.msra.gmra.mrb[128].mxu1 %v15492_v55  ;;  %v10812_v54 = vcombine.high %v7616_v14, %v7620_v58  ;;  %v10868_v61 = vcombine.high %v7672_v18, %v7676_v45  ;;  %v7684_v38 = vld [vmem:[%s14117_s17 + $0x2a8] sm:$0xff]  ;;  %v10867_v22 = vcombine.low %v7672_v18, %v7676_v45  ;;  %v7645_v18 = vld [vmem:[%s14117_s17 + $0x170] sm:$0xff] }
 0xa1c   : > { %8463 = vmatpush1.bf16.msra.mxu1 %v10795_v44  ;;  %v7575_v17 = vmul.f32 %v7565_v19, %v7556_v51  ;;  %v7574_v62 = vmul.f32 %v7561_v9, %v7555_v52  ;;  %v7592_v59 = vadd.f32 %v7584_v42, %v7573_v39  ;;  %v7591_v10 = vadd.f32 %v7580_v23, %v7572_v60  ;;  %v7688_v27 = vld [vmem:[%s14117_s17 + $0x2c8] sm:$0xff] }
 0xa1d   : > { %8464 = vmatprep.subr.bf16.mxu1 %v10804_v49  ;;  %v10827_v19 = vcombine.low %v7632_v57, %v7636_v15  ;;  %v10836_v9 = vcombine.high %v7640_v2, %v7644_v5  ;;  %v10876_v20 = vcombine.high %v7680_v3, %v7684_v38  ;;  %v7692_v6 = vld [vmem:[%s14117_s17 + $0x2e8] sm:$0xff]  ;;  %v10875_v49 = vcombine.low %v7680_v3, %v7684_v38  ;;  %v7605_v57 = vld [vmem:[%s14117_s17 + $0x30] sm:$0xff] }
 0xa1e   : > { %v7594_v1 = vadd.f32 %v7584_v42, %v7575_v17  ;;  %v7593_v4 = vadd.f32 %v7580_v23, %v7574_v62  ;;  %v7656_v42 = vld [vmem:[%s14117_s17 + $0x1c8] sm:$0xff]  ;;  %v10884_v52 = vcombine.high %v7688_v27, %v7692_v6  ;;  %v10883_v14 = vcombine.low %v7688_v27, %v7692_v6  ;;  %v7613_v2 = vld [vmem:[%s14117_s17 + $0x70] sm:$0xff] }
 0xa1f   : > { %v7660_v23 = vld [vmem:[%s14117_s17 + $0x1e8] sm:$0xff]  ;;  %v7653_v3 = vld [vmem:[%s14117_s17 + $0x1b0] sm:$0xff] }
 0xa20   : > { %8465 = vmatpush1.bf16.msra.mxu1 %v10803_v28  ;;  %v15502_v33 = vpack.c.bf16 %v7594_v1, %v7592_v59  ;;  %v15504_v44 = vpack.c.bf16 %v7593_v4, %v7591_v10  ;;  %v10852_v31 = vcombine.high %v7656_v42, %v7660_v23  ;;  %v10851_v21 = vcombine.low %v7656_v42, %v7660_v23  ;;  %v7696_v51 = vld [vmem:[%s14117_s17 + $0x308] sm:$0xff]  ;;  %v7629_v42 = vld [vmem:[%s14117_s17 + $0xf0] sm:$0xff] }
 0xa21   : > { %8466 = vmatprep.subr.bf16.mxu1 %v10812_v54  ;;  %v7700_v39 = vld [vmem:[%s14117_s17 + $0x328] sm:$0xff]  ;;  %v7661_v27 = vld [vmem:[%s14117_s17 + $0x1f0] sm:$0xff] }
 0xa22   : > { %8451 = vmatprep.mubr.bf16.mxu1 %v15502_v33  ;;  %v10892_v58 = vcombine.high %v7696_v51, %v7700_v39  ;;  %v7704_v60 = vld [vmem:[%s14117_s17 + $0x348] sm:$0xff]  ;;  %v10891_v17 = vcombine.low %v7696_v51, %v7700_v39  ;;  %v7669_v51 = vld [vmem:[%s14117_s17 + $0x230] sm:$0xff] }
 0xa23   : > { %8452 = vmatmul.mubr.bf16.gmra.mrb[132].mxu1 %v15504_v44  ;;  %v7708_v28 = vld [vmem:[%s14117_s17 + $0x368] sm:$0xff] }
 0xa24   : > { %8467 = vmatpush1.bf16.msra.mxu1 %v10811_v46  ;;  %8494 = vmatprep.mubr.bf16.mxu1 %v15490_v13  ;;  %v10900_v62 = vcombine.high %v7704_v60, %v7708_v28  ;;  %v7712_v54 = vld [vmem:[%s14117_s17 + $0x388] sm:$0xff]  ;;  %v10899_v1 = vcombine.low %v7704_v60, %v7708_v28  ;;  %v7677_v60 = vld [vmem:[%s14117_s17 + $0x270] sm:$0xff] }
 0xa25   : > { %8468 = vmatprep.subr.bf16.mxu1 %v10820_v30  ;;  %v7716_v59 = vld [vmem:[%s14117_s17 + $0x3a8] sm:$0xff]  ;;  %v7601_v30 = vld [vmem:[%s14117_s17 + $0x10] sm:$0xff] }
 0xa26   : > { %v10908_v10 = vcombine.high %v7712_v54, %v7716_v59  ;;  %v7720_v4 = vld [vmem:[%s14117_s17 + $0x3c8] sm:$0xff]  ;;  %v10907_v40 = vcombine.low %v7712_v54, %v7716_v59  ;;  %v10797_v5 = vcombine.low %v7601_v30, %v7605_v57  ;;  %v7685_v54 = vld [vmem:[%s14117_s17 + $0x2b0] sm:$0xff] }
 0xa27   : > { %v10916_v46 = vcombine.high %v7720_v4, %v7724_v29  ;;  %v10915_v15 = vcombine.low %v7720_v4, %v7724_v29  ;;  %v7693_v4 = vld [vmem:[%s14117_s17 + $0x2f0] sm:$0xff] }
 0xa28   : > { %8469 = vmatpush1.bf16.msra.mxu1 %v10819_v8  ;;  %v10798_v8 = vcombine.high %v7601_v30, %v7605_v57  ;;  %v7701_v30 = vld [vmem:[%s14117_s17 + $0x330] sm:$0xff] }
 0xa29   : > { %8470 = vmatprep.subr.bf16.mxu1 %v10828_v16  ;;  %v7609_v16 = vld [vmem:[%s14117_s17 + $0x50] sm:$0xff] }
 0xa2a   : > { %v10805_v50 = vcombine.low %v7609_v16, %v7613_v2 }
 0xa2c   : > { %8471 = vmatpush1.bf16.msra.mxu1 %v10827_v19  ;;  %v10806_v19 = vcombine.high %v7609_v16, %v7613_v2  ;;  %v7709_v16 = vld [vmem:[%s14117_s17 + $0x370] sm:$0xff] }
 0xa2d   : > { %8472 = vmatprep.subr.bf16.mxu1 %v10836_v9  ;;  %v7617_v9 = vld [vmem:[%s14117_s17 + $0x90] sm:$0xff] }
 0xa2e   : > { %v10813_v23 = vcombine.low %v7617_v9, %v7621_v11 }
 0xa30   : > { %8473 = vmatpush1.bf16.msra.mxu1 %v10835_v12  ;;  %v10814_v12 = vcombine.high %v7617_v9, %v7621_v11  ;;  %v7717_v9 = vld [vmem:[%s14117_s17 + $0x3b0] sm:$0xff] }
 0xa31   : > { %8474 = vmatprep.subr.bf16.mxu1 %v10844_v34  ;;  %v7625_v34 = vld [vmem:[%s14117_s17 + $0xd0] sm:$0xff] }
 0xa32   : > { %v10821_v32 = vcombine.low %v7625_v34, %v7629_v42 }
 0xa34   : > { %8475 = vmatpush1.bf16.msra.mxu1 %v10843_v43  ;;  %v10822_v43 = vcombine.high %v7625_v34, %v7629_v42  ;;  %v7725_v34 = vld [vmem:[%s14117_s17 + $0x3f0] sm:$0xff] }
 0xa35   : > { %8476 = vmatprep.subr.bf16.mxu1 %v10852_v31  ;;  %v7633_v31 = vld [vmem:[%s14117_s17 + $0x110] sm:$0xff] }
 0xa36   : > { %v10829_v45 = vcombine.low %v7633_v31, %v7637_v25  ;;  %v12668_v42 = vld [vmem:[%s14090_s22 + $0x104] ss:$8 sps:$4 sm:$0xff]  }
 0xa37   : > { %9758 = vmatprep.subr.bf16.mxu0 %v12668_v42  ;;  %v7666_v42 = vld [vmem:[%s14117_s17 + $0x218] sm:$0xff] }
 0xa38   : > { %8477 = vmatpush1.bf16.msra.mxu1 %v10851_v21  ;;  %v10830_v21 = vcombine.high %v7633_v31, %v7637_v25  ;;  %v7602_v25 = vld [vmem:[%s14117_s17 + $0x18] sm:$0xff] }
 0xa39   : > { %8478 = vmatprep.subr.bf16.mxu1 %v10860_v7  ;;  %v7641_v7 = vld [vmem:[%s14117_s17 + $0x150] sm:$0xff] }
 0xa3a   : > { %v10837_v38 = vcombine.low %v7641_v7, %v7645_v18 }
 0xa3c   : > { %8479 = vmatpush1.bf16.msra.mxu1 %v10859_v63  ;;  %v10838_v63 = vcombine.high %v7641_v7, %v7645_v18  ;;  %v12672_v18 = vld [vmem:[%s14090_s22 + $0x110] ss:$8 sps:$4 sm:$0xff]  }
 0xa3d   : > { %8480 = vmatprep.subr.bf16.mxu1 %v10868_v61  ;;  %v7649_v61 = vld [vmem:[%s14117_s17 + $0x190] sm:$0xff] }
 0xa3e   : > { %v10845_v6 = vcombine.low %v7649_v61, %v7653_v3 }
 0xa40   : > { %8481 = vmatpush1.bf16.msra.mxu1 %v10867_v22  ;;  %v10846_v22 = vcombine.high %v7649_v61, %v7653_v3  ;;  %v7614_v61 = vld [vmem:[%s14117_s17 + $0x78] sm:$0xff]  ;;  %v12680_v3 = vld [vmem:[%s14090_s22 + $0x124] ss:$8 sps:$4 sm:$0xff]  }
 0xa41   : > { %8482 = vmatprep.subr.bf16.mxu1 %v10876_v20  ;;  %v7657_v20 = vld [vmem:[%s14117_s17 + $0x1d0] sm:$0xff] }
 0xa42   : > { %v10853_v39 = vcombine.low %v7657_v20, %v7661_v27 }
 0xa44   : > { %8483 = vmatpush1.bf16.msra.mxu1 %v10875_v49  ;;  %v10854_v49 = vcombine.high %v7657_v20, %v7661_v27  ;;  %v7618_v27 = vld [vmem:[%s14117_s17 + $0x98] sm:$0xff] }
 0xa45   : > { %8484 = vmatprep.subr.bf16.mxu1 %v10884_v52  ;;  %v7665_v52 = vld [vmem:[%s14117_s17 + $0x210] sm:$0xff] }
 0xa46   : > { %v10861_v28 = vcombine.low %v7665_v52, %v7669_v51 }
 0xa48   : > { %8485 = vmatpush1.bf16.msra.mxu1 %v10883_v14  ;;  %v10862_v14 = vcombine.high %v7665_v52, %v7669_v51  ;;  %v12681_v52 = vld [vmem:[%s14090_s22 + $0x130] ss:$8 sps:$4 sm:$0xff]   ;;  %v12683_v51 = vld [vmem:[%s14090_s22 + $0x134] ss:$8 sps:$4 sm:$0xff]  }
 0xa49   : > { %8486 = vmatprep.subr.bf16.mxu1 %v10892_v58  ;;  %v7673_v58 = vld [vmem:[%s14117_s17 + $0x250] sm:$0xff] }
 0xa4a   : > { %v10869_v59 = vcombine.low %v7673_v58, %v7677_v60 }
 0xa4c   : > { %8487 = vmatpush1.bf16.msra.mxu1 %v10891_v17  ;;  %v10870_v17 = vcombine.high %v7673_v58, %v7677_v60  ;;  %v7626_v58 = vld [vmem:[%s14117_s17 + $0xd8] sm:$0xff] }
 0xa4d   : > { %8488 = vmatprep.subr.bf16.mxu1 %v10900_v62  ;;  %v7681_v62 = vld [vmem:[%s14117_s17 + $0x290] sm:$0xff]  ;;  %v7630_v60 = vld [vmem:[%s14117_s17 + $0xf8] sm:$0xff] }
 0xa4e   : > { %v10877_v29 = vcombine.low %v7681_v62, %v7685_v54 }
 0xa50   : > { %8489 = vmatpush1.bf16.msra.mxu1 %v10899_v1  ;;  %v10878_v1 = vcombine.high %v7681_v62, %v7685_v54  ;;  %v10824_v62 = vcombine.high %v7626_v58, %v7630_v60  ;;  %v7634_v54 = vld [vmem:[%s14117_s17 + $0x118] sm:$0xff] }
 0xa51   : > { %8490 = vmatprep.subr.bf16.mxu1 %v10908_v10  ;;  %v7689_v10 = vld [vmem:[%s14117_s17 + $0x2d0] sm:$0xff] }
 0xa52   : > { %v10885_v57 = vcombine.low %v7689_v10, %v7693_v4 }
 0xa54   : > { %8491 = vmatpush1.bf16.msra.mxu1 %v10907_v40  ;;  %v10886_v40 = vcombine.high %v7689_v10, %v7693_v4  ;;  %v12689_v10 = vld [vmem:[%s14090_s22 + $0x154] ss:$8 sps:$4 sm:$0xff]   ;;  %v10823_v4 = vcombine.low %v7626_v58, %v7630_v60 }
 0xa55   : > { %8492 = vmatprep.subr.bf16.mxu1 %v10916_v46  ;;  %v7697_v46 = vld [vmem:[%s14117_s17 + $0x310] sm:$0xff]  ;;  %v7698_v60 = vld [vmem:[%s14117_s17 + $0x318] sm:$0xff] }
 0xa56   : > { %v10893_v2 = vcombine.low %v7697_v46, %v7701_v30 }
 0xa58   : > { %8493 = vmatpush1.bf16.msra.mxu1 %v10915_v15  ;;  %v10894_v15 = vcombine.high %v7697_v46, %v7701_v30  ;;  %v7642_v46 = vld [vmem:[%s14117_s17 + $0x158] sm:$0xff] }
 0xa59   : > { %8515 = vmatprep.subr.bf16.mxu1 %v10798_v8  ;;  %v7705_v8 = vld [vmem:[%s14117_s17 + $0x350] sm:$0xff]  ;;  %v7646_v30 = vld [vmem:[%s14117_s17 + $0x178] sm:$0xff] }
 0xa5a   : > { %v10901_v11 = vcombine.low %v7705_v8, %v7709_v16 }
 0xa5b   : > { %8495 = vmatmul.mubr.bf16.vlgmr.msra.gmra.mrb[136].mxu1 %v15492_v55 }
 0xa5c   : > { %8504 = vmatprep.mubr.bf16.mxu1 %v15502_v33  ;;  %8516 = vmatpush1.bf16.msra.mxu1 %v10797_v5  ;;  %v10902_v5 = vcombine.high %v7705_v8, %v7709_v16  ;;  %v12695_v8 = vld [vmem:[%s14090_s22 + $0x174] ss:$8 sps:$4 sm:$0xff]  }
 0xa5d   : > { %8517 = vmatprep.subr.bf16.mxu1 %v10806_v19  ;;  %v7713_v19 = vld [vmem:[%s14117_s17 + $0x390] sm:$0xff]  ;;  %v7650_v16 = vld [vmem:[%s14117_s17 + $0x198] sm:$0xff] }
 0xa60   : > { %8518 = vmatpush1.bf16.msra.mxu1 %v10805_v50  ;;  %v10910_v50 = vcombine.high %v7713_v19, %v7717_v9 }
 0xa61   : > { %8519 = vmatprep.subr.bf16.mxu1 %v10814_v12  ;;  %v7721_v12 = vld [vmem:[%s14117_s17 + $0x3d0] sm:$0xff] }
 0xa62   : > { %v10918_v31 = vcombine.high %v7721_v12, %v7725_v34  ;;  %v10917_v7 = vcombine.low %v7721_v12, %v7725_v34 }
 0xa63   : > { %8505 = vmatmul.mubr.bf16.gmra.mrb[140].mxu1 %v15504_v44 }
 0xa64   : > { %8520 = vmatpush1.bf16.msra.mxu1 %v10813_v23  ;;  %8547 = vmatprep.mubr.bf16.mxu1 %v15490_v13  ;;  %v10909_v23 = vcombine.low %v7713_v19, %v7717_v9  ;;  %v10839_v19 = vcombine.low %v7642_v46, %v7646_v30 }
 0xa65   : > { %8521 = vmatprep.subr.bf16.mxu1 %v10822_v43  ;;  %v12666_v43 = vld [vmem:[%s14090_s22 + $0x100] ss:$8 sps:$4 sm:$0xff]  }
 0xa66   : > { %9759 = vmatpush1.bf16.msra.mxu0 %v12666_v43  ;;  %v12698_v43 = vld [vmem:[%s14090_s22 + $0x184] ss:$8 sps:$4 sm:$0xff]  }
 0xa68   : > { %8522 = vmatpush1.bf16.msra.mxu1 %v10821_v32  ;;  %v7606_v32 = vld [vmem:[%s14117_s17 + $0x38] sm:$0xff] }
 0xa69   : > { %8523 = vmatprep.subr.bf16.mxu1 %v10830_v21  ;;  %v12674_v21 = vld [vmem:[%s14090_s22 + $0x114] ss:$8 sps:$4 sm:$0xff]  }
 0xa6a   : > { %9760 = vmatprep.subr.bf16.mxu0 %v12674_v21  ;;  %v7674_v21 = vld [vmem:[%s14117_s17 + $0x258] sm:$0xff] }
 0xa6b   : > { %9761 = vmatpush1.bf16.msra.mxu0 %v12672_v18  ;;  %v12701_v18 = vld [vmem:[%s14090_s22 + $0x194] ss:$8 sps:$4 sm:$0xff]  }
 0xa6c   : > { %8524 = vmatpush1.bf16.msra.mxu1 %v10829_v45  ;;  %v10800_v45 = vcombine.high %v7602_v25, %v7606_v32  ;;  %9762 = vmatprep.subr.bf16.mxu0 %v12680_v3  ;;  %v7682_v3 = vld [vmem:[%s14117_s17 + $0x298] sm:$0xff] }
 0xa6d   : > { %8525 = vmatprep.subr.bf16.mxu1 %v10838_v63  ;;  %v7610_v63 = vld [vmem:[%s14117_s17 + $0x58] sm:$0xff] }
 0xa6e   : > { %v10808_v20 = vcombine.high %v7610_v63, %v7614_v61 }
 0xa70   : > { %8526 = vmatpush1.bf16.msra.mxu1 %v10837_v38  ;;  %v10799_v38 = vcombine.low %v7602_v25, %v7606_v32  ;;  %v12696_v25 = vld [vmem:[%s14090_s22 + $0x180] ss:$8 sps:$4 sm:$0xff]  }
 0xa71   : > { %8527 = vmatprep.subr.bf16.mxu1 %v10846_v22  ;;  %v12678_v22 = vld [vmem:[%s14090_s22 + $0x120] ss:$8 sps:$4 sm:$0xff]  }
 0xa72   : > { %9763 = vmatpush1.bf16.msra.mxu0 %v12678_v22  ;;  %v12704_v22 = vld [vmem:[%s14090_s22 + $0x1a4] ss:$8 sps:$4 sm:$0xff]  }
 0xa73   : > { %9764 = vmatprep.subr.bf16.mxu0 %v12683_v51  ;;  %v12707_v51 = vld [vmem:[%s14090_s22 + $0x1b4] ss:$8 sps:$4 sm:$0xff]  }
 0xa74   : > { %8528 = vmatpush1.bf16.msra.mxu1 %v10845_v6  ;;  %v7622_v6 = vld [vmem:[%s14117_s17 + $0xb8] sm:$0xff] }
 0xa75   : > { %8529 = vmatprep.subr.bf16.mxu1 %v10854_v49  ;;  %v10807_v49 = vcombine.low %v7610_v63, %v7614_v61  ;;  %v12699_v63 = vld [vmem:[%s14090_s22 + $0x190] ss:$8 sps:$4 sm:$0xff]  }
 0xa76   : > { %9765 = vmatpush1.bf16.msra.mxu0 %v12681_v52  ;;  %v7694_v52 = vld [vmem:[%s14117_s17 + $0x2f8] sm:$0xff] }
 0xa78   : > { %8530 = vmatpush1.bf16.msra.mxu1 %v10853_v39  ;;  %v10816_v39 = vcombine.high %v7618_v27, %v7622_v6 }
 0xa79   : > { %8531 = vmatprep.subr.bf16.mxu1 %v10862_v14  ;;  %v12686_v14 = vld [vmem:[%s14090_s22 + $0x144] ss:$8 sps:$4 sm:$0xff]  }
 0xa7a   : > { %9766 = vmatprep.subr.bf16.mxu0 %v12686_v14  ;;  %v12705_v14 = vld [vmem:[%s14090_s22 + $0x1b0] ss:$8 sps:$4 sm:$0xff]  }
 0xa7c   : > { %8532 = vmatpush1.bf16.msra.mxu1 %v10861_v28  ;;  %v12684_v28 = vld [vmem:[%s14090_s22 + $0x140] ss:$8 sps:$4 sm:$0xff]  }
 0xa7d   : > { %8533 = vmatprep.subr.bf16.mxu1 %v10870_v17  ;;  %v10815_v17 = vcombine.low %v7618_v27, %v7622_v6  ;;  %9767 = vmatpush1.bf16.msra.mxu0 %v12684_v28  ;;  %v12702_v27 = vld [vmem:[%s14090_s22 + $0x1a0] ss:$8 sps:$4 sm:$0xff]   ;;  %v7702_v28 = vld [vmem:[%s14117_s17 + $0x338] sm:$0xff] }
 0xa7e   : > { %9768 = vmatprep.subr.bf16.mxu0 %v12689_v10  ;;  %v7710_v10 = vld [vmem:[%s14117_s17 + $0x378] sm:$0xff] }
 0xa80   : > { %8534 = vmatpush1.bf16.msra.mxu1 %v10869_v59  ;;  %v7638_v59 = vld [vmem:[%s14117_s17 + $0x138] sm:$0xff] }
 0xa81   : > { %8535 = vmatprep.subr.bf16.mxu1 %v10878_v1  ;;  %v12687_v1 = vld [vmem:[%s14090_s22 + $0x150] ss:$8 sps:$4 sm:$0xff]  }
 0xa82   : > { %9769 = vmatpush1.bf16.msra.mxu0 %v12687_v1  ;;  %v7706_v1 = vld [vmem:[%s14117_s17 + $0x358] sm:$0xff] }
 0xa84   : > { %8536 = vmatpush1.bf16.msra.mxu1 %v10877_v29  ;;  %v12692_v29 = vld [vmem:[%s14090_s22 + $0x164] ss:$8 sps:$4 sm:$0xff]  }
 0xa85   : > { %8537 = vmatprep.subr.bf16.mxu1 %v10886_v40  ;;  %v10832_v40 = vcombine.high %v7634_v54, %v7638_v59  ;;  %9770 = vmatprep.subr.bf16.mxu0 %v12692_v29  ;;  %v10895_v29 = vcombine.low %v7698_v60, %v7702_v28 }
 0xa88   : > { %8538 = vmatpush1.bf16.msra.mxu1 %v10885_v57  ;;  %v12690_v57 = vld [vmem:[%s14090_s22 + $0x160] ss:$8 sps:$4 sm:$0xff]  }
 0xa89   : > { %8539 = vmatprep.subr.bf16.mxu1 %v10894_v15  ;;  %v10831_v15 = vcombine.low %v7634_v54, %v7638_v59  ;;  %9771 = vmatpush1.bf16.msra.mxu0 %v12690_v57  ;;  %v12708_v54 = vld [vmem:[%s14090_s22 + $0x1c0] ss:$8 sps:$4 sm:$0xff]   ;;  %v10896_v59 = vcombine.high %v7698_v60, %v7702_v28  ;;  %v7718_v57 = vld [vmem:[%s14117_s17 + $0x3b8] sm:$0xff] }
 0xa8a   : > { %9772 = vmatprep.subr.bf16.mxu0 %v12695_v8  ;;  %v12716_v8 = vld [vmem:[%s14090_s22 + $0x1e4] ss:$8 sps:$4 sm:$0xff]  }
 0xa8c   : > { %8540 = vmatpush1.bf16.msra.mxu1 %v10893_v2  ;;  %v7654_v2 = vld [vmem:[%s14117_s17 + $0x1b8] sm:$0xff] }
 0xa8d   : > { %8541 = vmatprep.subr.bf16.mxu1 %v10902_v5  ;;  %v12693_v5 = vld [vmem:[%s14090_s22 + $0x170] ss:$8 sps:$4 sm:$0xff]   ;;  %v10848_v9 = vcombine.high %v7650_v16, %v7654_v2  ;;  %v10847_v12 = vcombine.low %v7650_v16, %v7654_v2  ;;  %v10903_v16 = vcombine.low %v7706_v1, %v7710_v10 }
 0xa8e   : > { %9773 = vmatpush1.bf16.msra.mxu0 %v12693_v5  ;;  %v7722_v5 = vld [vmem:[%s14117_s17 + $0x3d8] sm:$0xff] }
 0xa8f   : > { %9774 = vmatprep.subr.bf16.mxu0 %v12698_v43  ;;  %v12629_v43 = vld [vmem:[%s14090_s22 + $0x14] ss:$8 sps:$4 sm:$0xff]  }
 0xa90   : > { %8542 = vmatpush1.bf16.msra.mxu1 %v10901_v11  ;;  %v7658_v11 = vld [vmem:[%s14117_s17 + $0x1d8] sm:$0xff] }
 0xa91   : > { %8543 = vmatprep.subr.bf16.mxu1 %v10910_v50  ;;  %v7662_v50 = vld [vmem:[%s14117_s17 + $0x1f8] sm:$0xff] }
 0xa92   : > { %v10856_v34 = vcombine.high %v7658_v11, %v7662_v50  ;;  %9775 = vmatpush1.bf16.msra.mxu0 %v12696_v25  ;;  %v12632_v25 = vld [vmem:[%s14090_s22 + $0x24] ss:$8 sps:$4 sm:$0xff]  }
 0xa93   : > { %9776 = vmatprep.subr.bf16.mxu0 %v12701_v18  ;;  %v15652_v18 = vld [vmem:[%s14084_s13] sm:$0xff] }
 0xa94   : > { %8544 = vmatpush1.bf16.msra.mxu1 %v10909_v23  ;;  %v7670_v23 = vld [vmem:[%s14117_s17 + $0x238] sm:$0xff] }
 0xa95   : > { %8545 = vmatprep.subr.bf16.mxu1 %v10918_v31  ;;  %v10855_v31 = vcombine.low %v7658_v11, %v7662_v50  ;;  %v10864_v32 = vcombine.high %v7666_v42, %v7670_v23  ;;  %v12722_v50 = vld [vmem:[%s14090_s22 + $0x204] ss:$8 sps:$4 sm:$0xff]  }
 0xa96   : > { %9777 = vmatpush1.bf16.msra.mxu0 %v12699_v63  ;;  %v7732_v63 = vrot.slane %v15652_v18, %v14220_v36 }
 0xa97   : > { %9778 = vmatprep.subr.bf16.mxu0 %v12704_v22 }
 0xa98   : > { %8546 = vmatpush1.bf16.msra.mxu1 %v10917_v7  ;;  %v7678_v7 = vld [vmem:[%s14117_s17 + $0x278] sm:$0xff] }
 0xa99   : > { %8568 = vmatprep.subr.bf16.mxu1 %v10800_v45  ;;  %v10863_v45 = vcombine.low %v7666_v42, %v7670_v23  ;;  %v10872_v61 = vcombine.high %v7674_v21, %v7678_v7  ;;  %v12626_v42 = vld [vmem:[%s14090_s22 + $0x4] ss:$8 sps:$4 sm:$0xff]   ;;  %v12624_v23 = vld [vmem:[%s14090_s22] ss:$8 sps:$4 sm:$0xff]  }
 0xa9a   : > { %9779 = vmatpush1.bf16.msra.mxu0 %v12702_v27 }
 0xa9b   : > { %8548 = vmatmul.mubr.bf16.vlgmr.msra.gmra.mrb[144].mxu1 %v15492_v55  ;;  %9780 = vmatprep.subr.bf16.mxu0 %v12707_v51 }
 0xa9c   : > { %8557 = vmatprep.mubr.bf16.mxu1 %v15502_v33  ;;  %8569 = vmatpush1.bf16.msra.mxu1 %v10799_v38  ;;  %v7686_v38 = vld [vmem:[%s14117_s17 + $0x2b8] sm:$0xff] }
 0xa9d   : > { %8570 = vmatprep.subr.bf16.mxu1 %v10808_v20  ;;  %v10871_v20 = vcombine.low %v7674_v21, %v7678_v7  ;;  %v10880_v6 = vcombine.high %v7682_v3, %v7686_v38  ;;  %v12635_v21 = vld [vmem:[%s14090_s22 + $0x34] ss:$8 sps:$4 sm:$0xff]   ;;  %v12633_v7 = vld [vmem:[%s14090_s22 + $0x30] ss:$8 sps:$4 sm:$0xff]  }
 0xa9e   : > { %9781 = vmatpush1.bf16.msra.mxu0 %v12705_v14  ;;  %v12647_v14 = vld [vmem:[%s14090_s22 + $0x74] ss:$8 sps:$4 sm:$0xff]  }
 0xaa0   : > { %8571 = vmatpush1.bf16.msra.mxu1 %v10807_v49  ;;  %v7690_v49 = vld [vmem:[%s14117_s17 + $0x2d8] sm:$0xff] }
 0xaa1   : > { %8572 = vmatprep.subr.bf16.mxu1 %v10816_v39  ;;  %v10879_v39 = vcombine.low %v7682_v3, %v7686_v38  ;;  %v10888_v58 = vcombine.high %v7690_v49, %v7694_v52  ;;  %v12644_v3 = vld [vmem:[%s14090_s22 + $0x64] ss:$8 sps:$4 sm:$0xff]  }
 0xaa3   : > { %8558 = vmatmul.mubr.bf16.gmra.mrb[148].mxu1 %v15504_v44 }
 0xaa4   : > { %8573 = vmatpush1.bf16.msra.mxu1 %v10815_v17  ;;  %8600 = vmatprep.mubr.bf16.mxu1 %v15490_v13  ;;  %v10840_v13 = vcombine.high %v7642_v46, %v7646_v30  ;;  %v12710_v17 = vld [vmem:[%s14090_s22 + $0x1c4] ss:$8 sps:$4 sm:$0xff]   ;;  %v10904_v46 = vcombine.high %v7706_v1, %v7710_v10  ;;  %v7714_v30 = vld [vmem:[%s14117_s17 + $0x398] sm:$0xff] }
 0xaa5   : > { %8574 = vmatprep.subr.bf16.mxu1 %v10824_v62  ;;  %v10887_v62 = vcombine.low %v7690_v49, %v7694_v52  ;;  %9782 = vmatprep.subr.bf16.mxu0 %v12710_v17  ;;  %v10912_v2 = vcombine.high %v7714_v30, %v7718_v57  ;;  %v10911_v11 = vcombine.low %v7714_v30, %v7718_v57  ;;  %v12642_v49 = vld [vmem:[%s14090_s22 + $0x60] ss:$8 sps:$4 sm:$0xff]  }
 0xaa6   : > { %9783 = vmatpush1.bf16.msra.mxu0 %v12708_v54 }
 0xaa8   : > { %8575 = vmatpush1.bf16.msra.mxu1 %v10823_v4  ;;  %v12713_v4 = vld [vmem:[%s14090_s22 + $0x1d4] ss:$8 sps:$4 sm:$0xff]  }
 0xaa9   : > { %8576 = vmatprep.subr.bf16.mxu1 %v10832_v40  ;;  %v12711_v40 = vld [vmem:[%s14090_s22 + $0x1d0] ss:$8 sps:$4 sm:$0xff]   ;;  %9784 = vmatprep.subr.bf16.mxu0 %v12713_v4  ;;  %v12650_v4 = vld [vmem:[%s14090_s22 + $0x84] ss:$8 sps:$4 sm:$0xff]  }
 0xaaa   : > { %9785 = vmatpush1.bf16.msra.mxu0 %v12711_v40 }
 0xaab   : > { %9786 = vmatprep.subr.bf16.mxu0 %v12716_v8 }
 0xaac   : > { %8577 = vmatpush1.bf16.msra.mxu1 %v10831_v15  ;;  %v12714_v15 = vld [vmem:[%s14090_s22 + $0x1e0] ss:$8 sps:$4 sm:$0xff]  }
 0xaad   : > { %8578 = vmatprep.subr.bf16.mxu1 %v10840_v13  ;;  %v12719_v13 = vld [vmem:[%s14090_s22 + $0x1f4] ss:$8 sps:$4 sm:$0xff]  }
 0xaae   : > { %9787 = vmatpush1.bf16.msra.mxu0 %v12714_v15 }
 0xaaf   : > { %9788 = vmatprep.subr.bf16.mxu0 %v12719_v13 }
 0xab0   : > { %8579 = vmatpush1.bf16.msra.mxu1 %v10839_v19  ;;  %v7726_v19 = vld [vmem:[%s14117_s17 + $0x3f8] sm:$0xff]  ;;  %s16199_s17 = scalar_lea.vmem [#allocation17], %s14063_s29  ;;  %s16200_s29 = sld [smem:[#allocation31_spill]] }
 0xab1   : > { %8580 = vmatprep.subr.bf16.mxu1 %v10848_v9  ;;  %v12717_v9 = vld [vmem:[%s14090_s22 + $0x1f0] ss:$8 sps:$4 sm:$0xff]  }
 0xab2   : > { %9789 = vmatpush1.bf16.msra.mxu0 %v12717_v9 }
 0xab3   : > { %9811 = vmatprep.subr.bf16.mxu0 %v12722_v50 }
 0xab4   : > { %8581 = vmatpush1.bf16.msra.mxu1 %v10847_v12  ;;  %v10920_v12 = vcombine.high %v7722_v5, %v7726_v19 }
 0xab5   : > { %8582 = vmatprep.subr.bf16.mxu1 %v10856_v34  ;;  %v10919_v34 = vcombine.low %v7722_v5, %v7726_v19  ;;  %v12648_v19 = vld [vmem:[%s14090_s22 + $0x80] ss:$8 sps:$4 sm:$0xff]  }
 0xab6   : > { %s11068_s19 = sshll.u32 %s16200_s29, 10 }
 0xab7   : > { %s15986_s13 = scalar_lea.hbm %s16201_s28, %s11068_s19 }
 0xab8   : > { %8583 = vmatpush1.bf16.msra.mxu1 %v10855_v31  ;;  %v12627_v31 = vld [vmem:[%s14090_s22 + $0x10] ss:$8 sps:$4 sm:$0xff]  }
 0xab9   : > { %8584 = vmatprep.subr.bf16.mxu1 %v10864_v32  ;;  %v12630_v32 = vld [vmem:[%s14090_s22 + $0x20] ss:$8 sps:$4 sm:$0xff]  }
 0xabc   : > { %8585 = vmatpush1.bf16.msra.mxu1 %v10863_v45  ;;  %v12641_v45 = vld [vmem:[%s14090_s22 + $0x54] ss:$8 sps:$4 sm:$0xff]  }
 0xabd   : > { %8586 = vmatprep.subr.bf16.mxu1 %v10872_v61  ;;  %v12639_v61 = vld [vmem:[%s14090_s22 + $0x50] ss:$8 sps:$4 sm:$0xff]  }
 0xac0   : > { %8587 = vmatpush1.bf16.msra.mxu1 %v10871_v20 }
 0xac1   : > { %8588 = vmatprep.subr.bf16.mxu1 %v10880_v6 }
 0xac4   : > { %8589 = vmatpush1.bf16.msra.mxu1 %v10879_v39 }
 0xac5   : > { %8590 = vmatprep.subr.bf16.mxu1 %v10888_v58 }
 0xac8   : > { %8591 = vmatpush1.bf16.msra.mxu1 %v10887_v62 }
 0xac9   : > { %8592 = vmatprep.subr.bf16.mxu1 %v10896_v59  ;;  %v12645_v59 = vld [vmem:[%s14090_s22 + $0x70] ss:$8 sps:$4 sm:$0xff]  }
 0xacc   : > { %8593 = vmatpush1.bf16.msra.mxu1 %v10895_v29 }
 0xacd   : > { %8594 = vmatprep.subr.bf16.mxu1 %v10904_v46 }
 0xad0   : > { %8595 = vmatpush1.bf16.msra.mxu1 %v10903_v16 }
 0xad1   : > { %8596 = vmatprep.subr.bf16.mxu1 %v10912_v2 }
 0xad4   : > { %8597 = vmatpush1.bf16.msra.mxu1 %v10911_v11 }
 0xad5   : > { %8598 = vmatprep.subr.bf16.mxu1 %v10920_v12 }
 0xad8   : > { %8599 = vmatpush1.bf16.msra.mxu1 %v10919_v34 }
 0xad9   : > { %9705 = vmatprep.subr.bf16.mxu1 %v12626_v42  ;;  %v12653_v42 = vld [vmem:[%s14090_s22 + $0x94] ss:$8 sps:$4 sm:$0xff]  }
 0xadb   : > { %8601 = vmatmul.mubr.bf16.vlgmr.msra.gmra.mrb[152].mxu1 %v15492_v55  ;;  %v12638_v55 = vld [vmem:[%s14090_s22 + $0x44] ss:$8 sps:$4 sm:$0xff]  }
 0xadc   : > { %8610 = vmatprep.mubr.bf16.mxu1 %v15502_v33  ;;  %9706 = vmatpush1.bf16.msra.mxu1 %v12624_v23  ;;  %v12636_v33 = vld [vmem:[%s14090_s22 + $0x40] ss:$8 sps:$4 sm:$0xff]  }
 0xadd   : > { %9707 = vmatprep.subr.bf16.mxu1 %v12629_v43 }
 0xae0   : > { %9708 = vmatpush1.bf16.msra.mxu1 %v12627_v31 }
 0xae1   : > { %9709 = vmatprep.subr.bf16.mxu1 %v12632_v25 }
 0xae3   : > { %8611 = vmatmul.mubr.bf16.gmra.mrb[156].mxu1 %v15504_v44  ;;  %v7736_v44 = vrot.slane %v15652_v18, %v14223_v37 }
 0xae4   : > { %9710 = vmatpush1.bf16.msra.mxu1 %v12630_v32 }
 0xae5   : > { %9711 = vmatprep.subr.bf16.mxu1 %v12635_v21 }
 0xae8   : > { %9712 = vmatpush1.bf16.msra.mxu1 %v12633_v7 }
 0xae9   : > { %9713 = vmatprep.subr.bf16.mxu1 %v12638_v55 }
 0xaec   : > { %9714 = vmatpush1.bf16.msra.mxu1 %v12636_v33 }
 0xaed   : > { %9715 = vmatprep.subr.bf16.mxu1 %v12641_v45 }
 0xaee   : > { %v8443_v38 = vpop.f32.mrb[128].mxu1 }
 0xaef   : > { %v15661_v22 = vadd.f32 %v8443_v38, %v7732_v63  ;;  %v8445_v20 = vpop.f32.mrb[129].mxu1 }
 0xaf0   : > { %v15663_v27 = vadd.f32 %v8445_v20, %v7736_v44  ;;  %9716 = vmatpush1.bf16.msra.mxu1 %v12639_v61  ;;  %v8447_v6 = vpop.f32.mrb[130].mxu1 }
 0xaf1   : > { %v8653_v52 = vmul.f32 %v15661_v22, %v15661_v22  ;;  %v15668_v51 = vadd.f32 %v8447_v6, %v7732_v63  ;;  %v8449_v39 = vpop.f32.mrb[131].mxu1  ;;  %9717 = vmatprep.subr.bf16.mxu1 %v12644_v3  ;;  %v12656_v3 = vld [vmem:[%s14090_s22 + $0xa4] ss:$8 sps:$4 sm:$0xff]  }
 0xaf2   : > { %v8654_v58 = vmul.f32 %v15663_v27, %v15663_v27  ;;  %v15673_v60 = vadd.f32 %v8449_v39, %v7736_v44 }
 0xaf3   : > { %v8685_v28 = vmul.f32 %v8653_v52, %v15661_v22  ;;  %v8661_v17 = vmul.f32 %v15668_v51, %v15668_v51 }
 0xaf4   : > { %v8686_v62 = vmul.f32 %v8654_v58, %v15663_v27  ;;  %v8662_v54 = vmul.f32 %v15673_v60, %v15673_v60  ;;  %9718 = vmatpush1.bf16.msra.mxu1 %v12642_v49 }
 0xaf5   : > { %v8717_v1 = vmul.f32 0.044715, %v8685_v28  ;;  %v8693_v10 = vmul.f32 %v8661_v17, %v15668_v51  ;;  %9719 = vmatprep.subr.bf16.mxu1 %v12647_v14  ;;  %v12654_v14 = vld [vmem:[%s14090_s22 + $0xa0] ss:$8 sps:$4 sm:$0xff]   ;;  %v12659_v17 = vld [vmem:[%s14090_s22 + $0xb4] ss:$8 sps:$4 sm:$0xff]  }
 0xaf6   : > { %v8718_v29 = vmul.f32 0.044715, %v8686_v62  ;;  %v8694_v40 = vmul.f32 %v8662_v54, %v15673_v60  ;;  %v8453_v46 = vpop.f32.mrb[132].mxu1 }
 0xaf7   : > { %v8749_v30 = vadd.f32 %v8717_v1, %v15661_v22  ;;  %v8725_v57 = vmul.f32 0.044715, %v8693_v10  ;;  %v15686_v15 = vadd.f32 %v8453_v46, %v7732_v63  ;;  %v8455_v8 = vpop.f32.mrb[133].mxu1  ;;  %v12657_v10 = vld [vmem:[%s14090_s22 + $0xb0] ss:$8 sps:$4 sm:$0xff]  }
 0xaf8   : > { %v8750_v13 = vadd.f32 %v8718_v29, %v15663_v27  ;;  %v8726_v16 = vmul.f32 0.044715, %v8694_v40  ;;  %v15689_v2 = vadd.f32 %v8455_v8, %v7736_v44  ;;  %9720 = vmatpush1.bf16.msra.mxu1 %v12645_v59  ;;  %v8457_v5 = vpop.f32.mrb[134].mxu1  ;;  %v12662_v29 = vld [vmem:[%s14090_s22 + $0xc4] ss:$8 sps:$4 sm:$0xff]  }
 0xaf9   : > { %v8781_v9 = vmul.f32 0.7978846, %v8749_v30  ;;  %v8757_v11 = vadd.f32 %v8725_v57, %v15668_v51  ;;  %v8669_v50 = vmul.f32 %v15686_v15, %v15686_v15  ;;  %v15695_v12 = vadd.f32 %v8457_v5, %v7732_v63  ;;  %v8459_v34 = vpop.f32.mrb[135].mxu1  ;;  %9721 = vmatprep.subr.bf16.mxu1 %v12650_v4  ;;  %v12651_v63 = vld [vmem:[%s14090_s22 + $0x90] ss:$8 sps:$4 sm:$0xff]  }
 0xafa   : > { %v8782_v23 = vmul.f32 0.7978846, %v8750_v13  ;;  %v8758_v43 = vadd.f32 %v8726_v16, %v15673_v60  ;;  %v8670_v31 = vmul.f32 %v15689_v2, %v15689_v2  ;;  %v15701_v25 = vadd.f32 %v8459_v34, %v7736_v44 }
 0xafb   : > { %12960 = vtanh.f32 %v8781_v9  ;;  %v8789_v32 = vmul.f32 0.7978846, %v8757_v11  ;;  %v8701_v21 = vmul.f32 %v8669_v50, %v15686_v15  ;;  %v8677_v7 = vmul.f32 %v15695_v12, %v15695_v12  ;;  %v12665_v9 = vld [vmem:[%s14090_s22 + $0xd4] ss:$8 sps:$4 sm:$0xff]  }
 0xafc   : > { %12962 = vtanh.f32 %v8782_v23  ;;  %v8790_v55 = vmul.f32 0.7978846, %v8758_v43  ;;  %v8702_v33 = vmul.f32 %v8670_v31, %v15689_v2  ;;  %v8678_v45 = vmul.f32 %v15701_v25, %v15701_v25  ;;  %9722 = vmatpush1.bf16.msra.mxu1 %v12648_v19  ;;  %v12660_v19 = vld [vmem:[%s14090_s22 + $0xc0] ss:$8 sps:$4 sm:$0xff]  }
 0xafd   : > { %12964 = vtanh.f32 %v8789_v32  ;;  %v8733_v61 = vmul.f32 0.044715, %v8701_v21  ;;  %v8709_v44 = vmul.f32 %v8677_v7, %v15695_v12  ;;  %9723 = vmatprep.subr.bf16.mxu1 %v12653_v42  ;;  %v8621_v13 = vmul.f32 0.5, %v15661_v22  ;;  %v12663_v22 = vld [vmem:[%s14090_s22 + $0xd0] ss:$8 sps:$4 sm:$0xff]  }
 0xafe   : > { %12966 = vtanh.f32 %v8790_v55  ;;  %v8734_v38 = vmul.f32 0.044715, %v8702_v33  ;;  %v8710_v20 = vmul.f32 %v8678_v45, %v15701_v25  ;;  %v8629_v16 = vmul.f32 0.5, %v15668_v51  ;;  %v12671_v7 = vld [vmem:[%s14090_s22 + $0xe4] ss:$8 sps:$4 sm:$0xff]  }
 0xaff   : > { %v8765_v6 = vadd.f32 %v8733_v61, %v15686_v15  ;;  %v8741_v49 = vmul.f32 0.044715, %v8709_v44  ;;  %v8622_v11 = vmul.f32 0.5, %v15663_v27  ;;  %v8630_v50 = vmul.f32 0.5, %v15673_v60 }
 0xb00   : > { %v8766_v52 = vadd.f32 %v8734_v38, %v15689_v2  ;;  %v8742_v39 = vmul.f32 0.044715, %v8710_v20  ;;  %9724 = vmatpush1.bf16.msra.mxu1 %v12651_v63  ;;  %v12669_v63 = vld [vmem:[%s14090_s22 + $0xe0] ss:$8 sps:$4 sm:$0xff]   ;;  %v8637_v61 = vmul.f32 0.5, %v15686_v15  ;;  %v8645_v44 = vmul.f32 0.5, %v15695_v12 }
 0xb01   : > { %v8797_v58 = vmul.f32 0.7978846, %v8765_v6  ;;  %v8773_v28 = vadd.f32 %v8741_v49, %v15695_v12  ;;  %9725 = vmatprep.subr.bf16.mxu1 %v12656_v3  ;;  %v12677_v38 = vld [vmem:[%s14090_s22 + $0xf4] ss:$8 sps:$4 sm:$0xff]   ;;  %v8638_v20 = vmul.f32 0.5, %v15689_v2  ;;  %v8646_v6 = vmul.f32 0.5, %v15701_v25 }
 0xb02   : > { %v8798_v62 = vmul.f32 0.7978846, %v8766_v52  ;;  %v8774_v54 = vadd.f32 %v8742_v39, %v15701_v25  ;;  %v7739_v15 = vsub.s32 2, %v14215_v26  ;;  %v7743_v2 = vsub.s32 3, %v14215_v26 }
 0xb03   : > { %12968 = vtanh.f32 %v8797_v58  ;;  %v8805_v59 = vmul.f32 0.7978846, %v8773_v28  ;;  %v12675_v28 = vld [vmem:[%s14090_s22 + $0xf0] ss:$8 sps:$4 sm:$0xff]  }
 0xb04   : > { %12970 = vtanh.f32 %v8798_v62  ;;  %v8806_v1 = vmul.f32 0.7978846, %v8774_v54  ;;  %9726 = vmatpush1.bf16.msra.mxu1 %v12654_v14  ;;  %v7740_v12 = vrot.slane %v15652_v18, %v7739_v15  ;;  %v7744_v25 = vrot.slane %v15652_v18, %v7743_v2 }
 0xb05   : > { %v12961_v4 = vpop.eup %12960  ;;  %12972 = vtanh.f32 %v8805_v59  ;;  %9727 = vmatprep.subr.bf16.mxu1 %v12659_v17 }
 0xb06   : > { %v12963_v40 = vpop.eup %12962  ;;  %v8845_v46 = vadd.f32 1.0, %v12961_v4  ;;  %12974 = vtanh.f32 %v8806_v1 }
 0xb07   : > { %v12965_v30 = vpop.eup %12964  ;;  %v8846_v57 = vadd.f32 1.0, %v12963_v40 }
 0xb08   : > { %v12967_v8 = vpop.eup %12966  ;;  %v8853_v5 = vadd.f32 1.0, %v12965_v30  ;;  %9728 = vmatpush1.bf16.msra.mxu1 %v12657_v10  ;;  %v8877_v42 = vmul.f32 %v8845_v46, %v8621_v13 }
 0xb09   : > { %9729 = vmatprep.subr.bf16.mxu1 %v12662_v29  ;;  %v8854_v34 = vadd.f32 1.0, %v12967_v8  ;;  %v8878_v43 = vmul.f32 %v8846_v57, %v8622_v11 }
 0xb0a   : > { %v8885_v23 = vmul.f32 %v8853_v5, %v8629_v16 }
 0xb0b   : > { %v8886_v31 = vmul.f32 %v8854_v34, %v8630_v50 }
 0xb0c   : > { %9730 = vmatpush1.bf16.msra.mxu1 %v12660_v19  ;;  %v8909_v32 = vpack.c.bf16 %v8885_v23, %v8877_v42 }
 0xb0d   : > { %v12969_v51 = vpop.eup %12968  ;;  %9731 = vmatprep.subr.bf16.mxu1 %v12665_v9  ;;  %v8910_v21 = vpack.c.bf16 %v8886_v31, %v8878_v43 }
 0xb0e   : > { %v12971_v55 = vpop.eup %12970  ;;  %v8861_v33 = vadd.f32 1.0, %v12969_v51 }
 0xb0f   : > { %v12973_v45 = vpop.eup %12972  ;;  %9737 = vmatprep.mubr.bf16.mxu1 %v8910_v21  ;;  %v8862_v27 = vadd.f32 1.0, %v12971_v55 }
 0xb10   : > { %v12975_v60 = vpop.eup %12974  ;;  %9732 = vmatpush1.bf16.msra.mxu1 %v12663_v22  ;;  %v8869_v3 = vadd.f32 1.0, %v12973_v45  ;;  %v8893_v52 = vmul.f32 %v8861_v33, %v8637_v61 }
 0xb11   : > { %9733 = vmatprep.subr.bf16.mxu1 %v12671_v7  ;;  %v8870_v49 = vadd.f32 1.0, %v12975_v60  ;;  %v8894_v14 = vmul.f32 %v8862_v27, %v8638_v20 }
 0xb12   : > { %v8901_v39 = vmul.f32 %v8869_v3, %v8645_v44 }
 0xb13   : > { %v8902_v58 = vmul.f32 %v8870_v49, %v8646_v6 }
 0xb14   : > { %9734 = vmatpush1.bf16.msra.mxu1 %v12669_v63  ;;  %v8917_v17 = vpack.c.bf16 %v8901_v39, %v8893_v52 }
 0xb15   : > { %9735 = vmatprep.subr.bf16.mxu1 %v12677_v38  ;;  %v8918_v62 = vpack.c.bf16 %v8902_v58, %v8894_v14 }
 0xb18   : > { %9736 = vmatpush1.bf16.msra.mxu1 %v12675_v28 }
 0xb1b   : > { %9738 = vmatmul.mubr.bf16.vlgmr.msra.gmra.mrb[160].mxu1 %v8909_v32 }
 0xb1c   : > { %9747 = vmatprep.mubr.bf16.mxu1 %v8918_v62 }
 0xb23   : > { %9748 = vmatmul.mubr.bf16.gmra.mrb[164].mxu1 %v8917_v17 }
 0xb2e   : > { %v8496_v54 = vpop.f32.mrb[136].mxu1 }
 0xb2f   : > { %v15740_v59 = vadd.f32 %v8496_v54, %v7740_v12  ;;  %v8498_v1 = vpop.f32.mrb[137].mxu1 }
 0xb30   : > { %v15742_v10 = vadd.f32 %v8498_v1, %v7744_v25  ;;  %v8500_v4 = vpop.f32.mrb[138].mxu1 }
 0xb31   : > { %v8655_v29 = vmul.f32 %v15740_v59, %v15740_v59  ;;  %v15746_v40 = vadd.f32 %v8500_v4, %v7740_v12  ;;  %v8502_v46 = vpop.f32.mrb[139].mxu1 }
 0xb32   : > { %v8656_v30 = vmul.f32 %v15742_v10, %v15742_v10  ;;  %v15750_v57 = vadd.f32 %v8502_v46, %v7744_v25 }
 0xb33   : > { %v8687_v8 = vmul.f32 %v8655_v29, %v15740_v59  ;;  %v8663_v13 = vmul.f32 %v15746_v40, %v15746_v40 }
 0xb34   : > { %v8688_v16 = vmul.f32 %v8656_v30, %v15742_v10  ;;  %v8664_v5 = vmul.f32 %v15750_v57, %v15750_v57 }
 0xb35   : > { %v8719_v19 = vmul.f32 0.044715, %v8687_v8  ;;  %v8695_v9 = vmul.f32 %v8663_v13, %v15746_v40 }
 0xb36   : > { %v8720_v11 = vmul.f32 0.044715, %v8688_v16  ;;  %v8696_v50 = vmul.f32 %v8664_v5, %v15750_v57  ;;  %v8506_v34 = vpop.f32.mrb[140].mxu1 }
 0xb37   : > { %v8751_v42 = vadd.f32 %v8719_v19, %v15740_v59  ;;  %v8727_v23 = vmul.f32 0.044715, %v8695_v9  ;;  %v15761_v43 = vadd.f32 %v8506_v34, %v7740_v12  ;;  %v8508_v31 = vpop.f32.mrb[141].mxu1  ;;  %v8623_v19 = vmul.f32 0.5, %v15740_v59 }
 0xb38   : > { %v8752_v22 = vadd.f32 %v8720_v11, %v15742_v10  ;;  %v8728_v32 = vmul.f32 0.044715, %v8696_v50  ;;  %v15764_v51 = vadd.f32 %v8508_v31, %v7744_v25  ;;  %v8510_v21 = vpop.f32.mrb[142].mxu1  ;;  %v8631_v9 = vmul.f32 0.5, %v15746_v40 }
 0xb39   : > { %v8783_v7 = vmul.f32 0.7978846, %v8751_v42  ;;  %v8759_v55 = vadd.f32 %v8727_v23, %v15746_v40  ;;  %v8671_v33 = vmul.f32 %v15761_v43, %v15761_v43  ;;  %v8511_v45 = vadd.f32 %v8510_v21, %v7740_v12  ;;  %v8512_v27 = vpop.f32.mrb[143].mxu1 }
 0xb3a   : > { %v8784_v60 = vmul.f32 0.7978846, %v8752_v22  ;;  %v8760_v63 = vadd.f32 %v8728_v32, %v15750_v57  ;;  %v8672_v61 = vmul.f32 %v15764_v51, %v15764_v51  ;;  %v8513_v44 = vadd.f32 %v8512_v27, %v7744_v25 }
 0xb3b   : > { %12976 = vtanh.f32 %v8783_v7  ;;  %v8791_v3 = vmul.f32 0.7978846, %v8759_v55  ;;  %v8703_v38 = vmul.f32 %v8671_v33, %v15761_v43  ;;  %v8679_v20 = vmul.f32 %v8511_v45, %v8511_v45  ;;  %v12720_v33 = vld [vmem:[%s14090_s22 + $0x200] ss:$8 sps:$4 sm:$0xff]  }
 0xb3c   : > { %12978 = vtanh.f32 %v8784_v60  ;;  %v8792_v6 = vmul.f32 0.7978846, %v8760_v63  ;;  %v8704_v49 = vmul.f32 %v8672_v61, %v15764_v51  ;;  %v8680_v52 = vmul.f32 %v8513_v44, %v8513_v44  ;;  %v12725_v60 = vld [vmem:[%s14090_s22 + $0x214] ss:$8 sps:$4 sm:$0xff]  }
 0xb3d   : > { %12980 = vtanh.f32 %v8791_v3  ;;  %v8735_v39 = vmul.f32 0.044715, %v8703_v38  ;;  %v8711_v14 = vmul.f32 %v8679_v20, %v8511_v45  ;;  %v8624_v50 = vmul.f32 0.5, %v15742_v10  ;;  %v12723_v38 = vld [vmem:[%s14090_s22 + $0x210] ss:$8 sps:$4 sm:$0xff]  }
 0xb3e   : > { %12982 = vtanh.f32 %v8792_v6  ;;  %v8736_v58 = vmul.f32 0.044715, %v8704_v49  ;;  %v8712_v28 = vmul.f32 %v8680_v52, %v8513_v44  ;;  %v8632_v34 = vmul.f32 0.5, %v15750_v57 }
 0xb3f   : > { %v8767_v17 = vadd.f32 %v8735_v39, %v15761_v43  ;;  %v8743_v62 = vmul.f32 0.044715, %v8711_v14  ;;  %v8639_v57 = vmul.f32 0.5, %v15761_v43  ;;  %v8647_v61 = vmul.f32 0.5, %v8511_v45  ;;  %v12728_v14 = vld [vmem:[%s14090_s22 + $0x224] ss:$8 sps:$4 sm:$0xff]  }
 0xb40   : > { %v8768_v15 = vadd.f32 %v8736_v58, %v15764_v51  ;;  %v8744_v2 = vmul.f32 0.044715, %v8712_v28  ;;  %v8640_v20 = vmul.f32 0.5, %v15764_v51  ;;  %v8648_v6 = vmul.f32 0.5, %v8513_v44  ;;  %v12731_v51 = vld [vmem:[%s14090_s22 + $0x234] ss:$8 sps:$4 sm:$0xff]  }
 0xb41   : > { %v8799_v12 = vmul.f32 0.7978846, %v8767_v17  ;;  %v8775_v25 = vadd.f32 %v8743_v62, %v8511_v45  ;;  %v12726_v17 = vld [vmem:[%s14090_s22 + $0x220] ss:$8 sps:$4 sm:$0xff]   ;;  %v12734_v62 = vld [vmem:[%s14090_s22 + $0x244] ss:$8 sps:$4 sm:$0xff]  }
 0xb42   : > { %v8800_v54 = vmul.f32 0.7978846, %v8768_v15  ;;  %v8776_v1 = vadd.f32 %v8744_v2, %v8513_v44  ;;  %v12729_v44 = vld [vmem:[%s14090_s22 + $0x230] ss:$8 sps:$4 sm:$0xff]   ;;  %v12732_v15 = vld [vmem:[%s14090_s22 + $0x240] ss:$8 sps:$4 sm:$0xff]  }
 0xb43   : > { %12984 = vtanh.f32 %v8799_v12  ;;  %v8807_v4 = vmul.f32 0.7978846, %v8775_v25  ;;  %v12737_v2 = vld [vmem:[%s14090_s22 + $0x254] ss:$8 sps:$4 sm:$0xff]   ;;  %v12735_v12 = vld [vmem:[%s14090_s22 + $0x250] ss:$8 sps:$4 sm:$0xff]  }
 0xb44   : > { %12986 = vtanh.f32 %v8800_v54  ;;  %v8808_v29 = vmul.f32 0.7978846, %v8776_v1  ;;  %v12740_v25 = vld [vmem:[%s14090_s22 + $0x264] ss:$8 sps:$4 sm:$0xff]   ;;  %v12738_v54 = vld [vmem:[%s14090_s22 + $0x260] ss:$8 sps:$4 sm:$0xff]  }
 0xb45   : > { %v12977_v46 = vpop.eup %12976  ;;  %12988 = vtanh.f32 %v8807_v4  ;;  %v12743_v1 = vld [vmem:[%s14090_s22 + $0x274] ss:$8 sps:$4 sm:$0xff]   ;;  %v7747_v4 = vsub.s32 4, %v14215_v26 }
 0xb46   : > { %v12979_v30 = vpop.eup %12978  ;;  %v8847_v8 = vadd.f32 1.0, %v12977_v46  ;;  %12990 = vtanh.f32 %v8808_v29  ;;  %v7751_v29 = vsub.s32 5, %v14215_v26  ;;  %v12741_v46 = vld [vmem:[%s14090_s22 + $0x270] ss:$8 sps:$4 sm:$0xff]  }
 0xb47   : > { %v12981_v13 = vpop.eup %12980  ;;  %v8848_v16 = vadd.f32 1.0, %v12979_v30  ;;  %v12746_v30 = vld [vmem:[%s14090_s22 + $0x284] ss:$8 sps:$4 sm:$0xff]  }
 0xb48   : > { %v12983_v5 = vpop.eup %12982  ;;  %v8855_v11 = vadd.f32 1.0, %v12981_v13  ;;  %v8879_v23 = vmul.f32 %v8847_v8, %v8623_v19  ;;  %v7748_v8 = vrot.slane %v15652_v18, %v7747_v4  ;;  %v7752_v13 = vrot.slane %v15652_v18, %v7751_v29  ;;  %v12749_v19 = vld [vmem:[%s14090_s22 + $0x294] ss:$8 sps:$4 sm:$0xff]  }
 0xb49   : > { %v8856_v42 = vadd.f32 1.0, %v12983_v5  ;;  %v8880_v22 = vmul.f32 %v8848_v16, %v8624_v50  ;;  %v12744_v16 = vld [vmem:[%s14090_s22 + $0x280] ss:$8 sps:$4 sm:$0xff]  }
 0xb4a   : > { %v8887_v31 = vmul.f32 %v8855_v11, %v8631_v9 }
 0xb4b   : > { %v8888_v32 = vmul.f32 %v8856_v42, %v8632_v34 }
 0xb4c   : > { %v8911_v21 = vpack.c.bf16 %v8887_v31, %v8879_v23 }
 0xb4d   : > { %v12985_v7 = vpop.eup %12984  ;;  %v8912_v55 = vpack.c.bf16 %v8888_v32, %v8880_v22  ;;  %v12747_v22 = vld [vmem:[%s14090_s22 + $0x290] ss:$8 sps:$4 sm:$0xff]  }
 0xb4e   : > { %v12987_v27 = vpop.eup %12986  ;;  %v8863_v59 = vadd.f32 1.0, %v12985_v7  ;;  %v12752_v7 = vld [vmem:[%s14090_s22 + $0x2a4] ss:$8 sps:$4 sm:$0xff]  }
 0xb4f   : > { %v12989_v63 = vpop.eup %12988  ;;  %9790 = vmatprep.mubr.bf16.mxu0 %v8912_v55  ;;  %v8864_v40 = vadd.f32 1.0, %v12987_v27 }
 0xb50   : > { %v12991_v10 = vpop.eup %12990  ;;  %9791 = vmatmul.mubr.bf16.vlgmr.msra.gmra.mrb[136].mxu0 %v8911_v21  ;;  %v8871_v3 = vadd.f32 1.0, %v12989_v63  ;;  %v8895_v52 = vmul.f32 %v8863_v59, %v8639_v57 }
 0xb51   : > { %9812 = vmatpush1.bf16.msra.mxu0 %v12720_v33  ;;  %v8872_v49 = vadd.f32 1.0, %v12991_v10  ;;  %v8896_v58 = vmul.f32 %v8864_v40, %v8640_v20  ;;  %v12750_v40 = vld [vmem:[%s14090_s22 + $0x2a0] ss:$8 sps:$4 sm:$0xff]  }
 0xb52   : > { %9813 = vmatprep.subr.bf16.mxu0 %v12725_v60  ;;  %v8903_v39 = vmul.f32 %v8871_v3, %v8647_v61  ;;  %v12755_v3 = vld [vmem:[%s14090_s22 + $0x2b4] ss:$8 sps:$4 sm:$0xff]  }
 0xb53   : > { %v8904_v28 = vmul.f32 %v8872_v49, %v8648_v6 }
 0xb54   : > { %v8919_v43 = vpack.c.bf16 %v8903_v39, %v8895_v52 }
 0xb55   : > { %9814 = vmatpush1.bf16.msra.mxu0 %v12723_v38  ;;  %v8920_v45 = vpack.c.bf16 %v8904_v28, %v8896_v58 }
 0xb56   : > { %9815 = vmatprep.subr.bf16.mxu0 %v12728_v14 }
 0xb57   : > { %9800 = vmatprep.mubr.bf16.mxu0 %v8920_v45 }
 0xb58   : > { %9801 = vmatmul.mubr.bf16.gmra.mrb[140].mxu0 %v8919_v43 }
 0xb59   : > { %9816 = vmatpush1.bf16.msra.mxu0 %v12726_v17 }
 0xb5a   : > { %9817 = vmatprep.subr.bf16.mxu0 %v12731_v51 }
 0xb5d   : > { %9818 = vmatpush1.bf16.msra.mxu0 %v12729_v44  ;;  %v12753_v44 = vld [vmem:[%s14090_s22 + $0x2b0] ss:$8 sps:$4 sm:$0xff]  }
 0xb5e   : > { %9819 = vmatprep.subr.bf16.mxu0 %v12734_v62 }
 0xb61   : > { %9820 = vmatpush1.bf16.msra.mxu0 %v12732_v15 }
 0xb62   : > { %9821 = vmatprep.subr.bf16.mxu0 %v12737_v2 }
 0xb65   : > { %9822 = vmatpush1.bf16.msra.mxu0 %v12735_v12 }
 0xb66   : > { %9823 = vmatprep.subr.bf16.mxu0 %v12740_v25  ;;  %v12758_v25 = vld [vmem:[%s14090_s22 + $0x2c4] ss:$8 sps:$4 sm:$0xff]  }
 0xb69   : > { %9824 = vmatpush1.bf16.msra.mxu0 %v12738_v54 }
 0xb6a   : > { %9825 = vmatprep.subr.bf16.mxu0 %v12743_v1 }
 0xb6d   : > { %9826 = vmatpush1.bf16.msra.mxu0 %v12741_v46 }
 0xb6e   : > { %v8549_v5 = vpop.f32.mrb[144].mxu1  ;;  %9827 = vmatprep.subr.bf16.mxu0 %v12746_v30 }
 0xb6f   : > { %v15804_v9 = vadd.f32 %v8549_v5, %v7748_v8  ;;  %v8551_v11 = vpop.f32.mrb[145].mxu1 }
 0xb70   : > { %v15806_v50 = vadd.f32 %v8551_v11, %v7752_v13  ;;  %v8553_v34 = vpop.f32.mrb[146].mxu1  ;;  %v12761_v11 = vld [vmem:[%s14090_s22 + $0x2d4] ss:$8 sps:$4 sm:$0xff]  }
 0xb71   : > { %v8657_v42 = vmul.f32 %v15804_v9, %v15804_v9  ;;  %v15810_v23 = vadd.f32 %v8553_v34, %v7748_v8  ;;  %v8555_v31 = vpop.f32.mrb[147].mxu1  ;;  %9828 = vmatpush1.bf16.msra.mxu0 %v12744_v16  ;;  %v12756_v16 = vld [vmem:[%s14090_s22 + $0x2c0] ss:$8 sps:$4 sm:$0xff]  }
 0xb72   : > { %v8658_v32 = vmul.f32 %v15806_v50, %v15806_v50  ;;  %v15815_v21 = vadd.f32 %v8555_v31, %v7752_v13  ;;  %9829 = vmatprep.subr.bf16.mxu0 %v12749_v19 }
 0xb73   : > { %v8689_v55 = vmul.f32 %v8657_v42, %v15804_v9  ;;  %v8665_v33 = vmul.f32 %v15810_v23, %v15810_v23 }
 0xb74   : > { %v8690_v27 = vmul.f32 %v8658_v32, %v15806_v50  ;;  %v8666_v60 = vmul.f32 %v15815_v21, %v15815_v21 }
 0xb75   : > { %v8721_v59 = vmul.f32 0.044715, %v8689_v55  ;;  %v8697_v63 = vmul.f32 %v8665_v33, %v15810_v23  ;;  %9830 = vmatpush1.bf16.msra.mxu0 %v12747_v22  ;;  %v12759_v55 = vld [vmem:[%s14090_s22 + $0x2d0] ss:$8 sps:$4 sm:$0xff]  }
 0xb76   : > { %v8722_v10 = vmul.f32 0.044715, %v8690_v27  ;;  %v8698_v57 = vmul.f32 %v8666_v60, %v15815_v21  ;;  %v8559_v61 = vpop.f32.mrb[148].mxu1  ;;  %9831 = vmatprep.subr.bf16.mxu0 %v12752_v7  ;;  %v12764_v60 = vld [vmem:[%s14090_s22 + $0x2e4] ss:$8 sps:$4 sm:$0xff]  }
 0xb77   : > { %v8753_v38 = vadd.f32 %v8721_v59, %v15804_v9  ;;  %v8729_v20 = vmul.f32 0.044715, %v8697_v63  ;;  %v15829_v6 = vadd.f32 %v8559_v61, %v7748_v8  ;;  %v8561_v49 = vpop.f32.mrb[149].mxu1 }
 0xb78   : > { %v8754_v52 = vadd.f32 %v8722_v10, %v15806_v50  ;;  %v8730_v39 = vmul.f32 0.044715, %v8698_v57  ;;  %v15832_v14 = vadd.f32 %v8561_v49, %v7752_v13  ;;  %v8563_v58 = vpop.f32.mrb[150].mxu1  ;;  %v12762_v10 = vld [vmem:[%s14090_s22 + $0x2e0] ss:$8 sps:$4 sm:$0xff]  }
 0xb79   : > { %v8785_v28 = vmul.f32 0.7978846, %v8753_v38  ;;  %v8761_v43 = vadd.f32 %v8729_v20, %v15810_v23  ;;  %v8673_v45 = vmul.f32 %v15829_v6, %v15829_v6  ;;  %v15837_v17 = vadd.f32 %v8563_v58, %v7748_v8  ;;  %v8565_v51 = vpop.f32.mrb[151].mxu1  ;;  %9832 = vmatpush1.bf16.msra.mxu0 %v12750_v40 }
 0xb7a   : > { %v8786_v62 = vmul.f32 0.7978846, %v8754_v52  ;;  %v8762_v15 = vadd.f32 %v8730_v39, %v15815_v21  ;;  %v8674_v2 = vmul.f32 %v15832_v14, %v15832_v14  ;;  %v15843_v12 = vadd.f32 %v8565_v51, %v7752_v13  ;;  %9833 = vmatprep.subr.bf16.mxu0 %v12755_v3  ;;  %v12767_v3 = vld [vmem:[%s14090_s22 + $0x2f4] ss:$8 sps:$4 sm:$0xff]  }
 0xb7b   : > { %12992 = vtanh.f32 %v8785_v28  ;;  %v8793_v54 = vmul.f32 0.7978846, %v8761_v43  ;;  %v8705_v1 = vmul.f32 %v8673_v45, %v15829_v6  ;;  %v8681_v4 = vmul.f32 %v15837_v17, %v15837_v17  ;;  %v12765_v28 = vld [vmem:[%s14090_s22 + $0x2f0] ss:$8 sps:$4 sm:$0xff]  }
 0xb7c   : > { %12994 = vtanh.f32 %v8786_v62  ;;  %v8794_v29 = vmul.f32 0.7978846, %v8762_v15  ;;  %v8706_v46 = vmul.f32 %v8674_v2, %v15832_v14  ;;  %v8682_v30 = vmul.f32 %v15843_v12, %v15843_v12  ;;  %v12770_v15 = vld [vmem:[%s14090_s22 + $0x304] ss:$8 sps:$4 sm:$0xff]  }
 0xb7d   : > { %12996 = vtanh.f32 %v8793_v54  ;;  %v8737_v8 = vmul.f32 0.044715, %v8705_v1  ;;  %v8713_v13 = vmul.f32 %v8681_v4, %v15837_v17  ;;  %9834 = vmatpush1.bf16.msra.mxu0 %v12753_v44  ;;  %v8625_v52 = vmul.f32 0.5, %v15804_v9  ;;  %v12768_v1 = vld [vmem:[%s14090_s22 + $0x300] ss:$8 sps:$4 sm:$0xff]  }
 0xb7e   : > { %12998 = vtanh.f32 %v8794_v29  ;;  %v8738_v5 = vmul.f32 0.044715, %v8706_v46  ;;  %v8714_v19 = vmul.f32 %v8682_v30, %v15843_v12  ;;  %9835 = vmatprep.subr.bf16.mxu0 %v12758_v25  ;;  %v8633_v39 = vmul.f32 0.5, %v15810_v23  ;;  %v12773_v29 = vld [vmem:[%s14090_s22 + $0x314] ss:$8 sps:$4 sm:$0xff]  }
 0xb7f   : > { %v8769_v34 = vadd.f32 %v8737_v8, %v15829_v6  ;;  %v8745_v42 = vmul.f32 0.044715, %v8713_v13  ;;  %v8626_v43 = vmul.f32 0.5, %v15806_v50  ;;  %v8634_v45 = vmul.f32 0.5, %v15815_v21 }
 0xb80   : > { %v8770_v31 = vadd.f32 %v8738_v5, %v15832_v14  ;;  %v8746_v22 = vmul.f32 0.044715, %v8714_v19  ;;  %v8641_v8 = vmul.f32 0.5, %v15829_v6  ;;  %v8649_v13 = vmul.f32 0.5, %v15837_v17  ;;  %v12771_v5 = vld [vmem:[%s14090_s22 + $0x310] ss:$8 sps:$4 sm:$0xff]  }
 0xb81   : > { %v8801_v32 = vmul.f32 0.7978846, %v8769_v34  ;;  %v8777_v7 = vadd.f32 %v8745_v42, %v15837_v17  ;;  %9836 = vmatpush1.bf16.msra.mxu0 %v12756_v16  ;;  %v8642_v19 = vmul.f32 0.5, %v15832_v14  ;;  %v12779_v14 = vld [vmem:[%s14090_s22 + $0x334] ss:$8 sps:$4 sm:$0xff]  }
 0xb82   : > { %v8802_v33 = vmul.f32 0.7978846, %v8770_v31  ;;  %v8778_v27 = vadd.f32 %v8746_v22, %v15843_v12  ;;  %9837 = vmatprep.subr.bf16.mxu0 %v12761_v11  ;;  %v8650_v11 = vmul.f32 0.5, %v15843_v12  ;;  %v12776_v22 = vld [vmem:[%s14090_s22 + $0x324] ss:$8 sps:$4 sm:$0xff]  }
 0xb83   : > { %13000 = vtanh.f32 %v8801_v32  ;;  %v8809_v59 = vmul.f32 0.7978846, %v8777_v7  ;;  %v12777_v12 = vld [vmem:[%s14090_s22 + $0x330] ss:$8 sps:$4 sm:$0xff]  }
 0xb84   : > { %13002 = vtanh.f32 %v8802_v33  ;;  %v8810_v63 = vmul.f32 0.7978846, %v8778_v27  ;;  %v12782_v33 = vld [vmem:[%s14090_s22 + $0x344] ss:$8 sps:$4 sm:$0xff]   ;;  %v12780_v27 = vld [vmem:[%s14090_s22 + $0x340] ss:$8 sps:$4 sm:$0xff]  }
 0xb85   : > { %v12993_v40 = vpop.eup %12992  ;;  %13004 = vtanh.f32 %v8809_v59  ;;  %9838 = vmatpush1.bf16.msra.mxu0 %v12759_v55  ;;  %v12774_v55 = vld [vmem:[%s14090_s22 + $0x320] ss:$8 sps:$4 sm:$0xff]   ;;  %v12783_v59 = vld [vmem:[%s14090_s22 + $0x350] ss:$8 sps:$4 sm:$0xff]  }
 0xb86   : > { %v12995_v57 = vpop.eup %12994  ;;  %v8849_v61 = vadd.f32 1.0, %v12993_v40  ;;  %13006 = vtanh.f32 %v8810_v63  ;;  %9839 = vmatprep.subr.bf16.mxu0 %v12764_v60  ;;  %v12785_v60 = vld [vmem:[%s14090_s22 + $0x354] ss:$8 sps:$4 sm:$0xff]   ;;  %v12788_v63 = vld [vmem:[%s14090_s22 + $0x364] ss:$8 sps:$4 sm:$0xff]  }
 0xb87   : > { %v12997_v38 = vpop.eup %12996  ;;  %v8850_v20 = vadd.f32 1.0, %v12995_v57  ;;  %v12786_v40 = vld [vmem:[%s14090_s22 + $0x360] ss:$8 sps:$4 sm:$0xff]   ;;  %v7755_v57 = vsub.s32 6, %v14215_v26 }
 0xb88   : > { %v12999_v49 = vpop.eup %12998  ;;  %v8857_v58 = vadd.f32 1.0, %v12997_v38  ;;  %v8881_v44 = vmul.f32 %v8849_v61, %v8625_v52  ;;  %v7759_v61 = vsub.s32 7, %v14215_v26  ;;  %v12794_v38 = vld [vmem:[%s14090_s22 + $0x384] ss:$8 sps:$4 sm:$0xff]   ;;  %v12792_v52 = vld [vmem:[%s14090_s22 + $0x380] ss:$8 sps:$4 sm:$0xff]  }
 0xb89   : > { %9840 = vmatpush1.bf16.msra.mxu0 %v12762_v10  ;;  %v8858_v51 = vadd.f32 1.0, %v12999_v49  ;;  %v8882_v2 = vmul.f32 %v8850_v20, %v8626_v43  ;;  %v12791_v10 = vld [vmem:[%s14090_s22 + $0x374] ss:$8 sps:$4 sm:$0xff]   ;;  %v7756_v20 = vrot.slane %v15652_v18, %v7755_v57 }
 0xb8a   : > { %v8889_v62 = vmul.f32 %v8857_v58, %v8633_v39  ;;  %9841 = vmatprep.subr.bf16.mxu0 %v12767_v3  ;;  %v12789_v3 = vld [vmem:[%s14090_s22 + $0x370] ss:$8 sps:$4 sm:$0xff]   ;;  %v7760_v49 = vrot.slane %v15652_v18, %v7759_v61  ;;  %v12797_v58 = vld [vmem:[%s14090_s22 + $0x394] ss:$8 sps:$4 sm:$0xff]  }
 0xb8b   : > { %v8890_v25 = vmul.f32 %v8858_v51, %v8634_v45  ;;  %v12795_v18 = vld [vmem:[%s14090_s22 + $0x390] ss:$8 sps:$4 sm:$0xff]  }
 0xb8c   : > { %v8913_v54 = vpack.c.bf16 %v8889_v62, %v8881_v44 }
 0xb8d   : > { %v13001_v9 = vpop.eup %13000  ;;  %9842 = vmatpush1.bf16.msra.mxu0 %v12765_v28  ;;  %v8914_v23 = vpack.c.bf16 %v8890_v25, %v8882_v2  ;;  %v12800_v25 = vld [vmem:[%s14090_s22 + $0x3a4] ss:$8 sps:$4 sm:$0xff]  }
 0xb8e   : > { %v13003_v4 = vpop.eup %13002  ;;  %9864 = vmatprep.subr.bf16.mxu0 %v12770_v15  ;;  %v8865_v50 = vadd.f32 1.0, %v13001_v9 }
 0xb8f   : > { %v13005_v46 = vpop.eup %13004  ;;  %9843 = vmatprep.mubr.bf16.mxu0 %v8914_v23  ;;  %v8866_v21 = vadd.f32 1.0, %v13003_v4 }
 0xb90   : > { %v13007_v30 = vpop.eup %13006  ;;  %9844 = vmatmul.mubr.bf16.vlgmr.msra.gmra.mrb[136].mxu0 %v8913_v54  ;;  %v8873_v16 = vadd.f32 1.0, %v13005_v46  ;;  %v8897_v42 = vmul.f32 %v8865_v50, %v8641_v8  ;;  %v12798_v50 = vld [vmem:[%s14090_s22 + $0x3a0] ss:$8 sps:$4 sm:$0xff]   ;;  %v12803_v8 = vld [vmem:[%s14090_s22 + $0x3b4] ss:$8 sps:$4 sm:$0xff]  }
 0xb91   : > { %9865 = vmatpush1.bf16.msra.mxu0 %v12768_v1  ;;  %v8874_v34 = vadd.f32 1.0, %v13007_v30  ;;  %v8898_v6 = vmul.f32 %v8866_v21, %v8642_v19 }
 0xb92   : > { %9866 = vmatprep.subr.bf16.mxu0 %v12773_v29  ;;  %v8905_v31 = vmul.f32 %v8873_v16, %v8649_v13 }
 0xb93   : > { %v8906_v32 = vmul.f32 %v8874_v34, %v8650_v11 }
 0xb94   : > { %v8921_v17 = vpack.c.bf16 %v8905_v31, %v8897_v42 }
 0xb95   : > { %9867 = vmatpush1.bf16.msra.mxu0 %v12771_v5  ;;  %v8922_v7 = vpack.c.bf16 %v8906_v32, %v8898_v6 }
 0xb96   : > { %9868 = vmatprep.subr.bf16.mxu0 %v12776_v22 }
 0xb97   : > { %9853 = vmatprep.mubr.bf16.mxu0 %v8922_v7 }
 0xb98   : > { %9854 = vmatmul.mubr.bf16.gmra.mrb[140].mxu0 %v8921_v17 }
 0xb99   : > { %9869 = vmatpush1.bf16.msra.mxu0 %v12774_v55  ;;  %v12801_v55 = vld [vmem:[%s14090_s22 + $0x3b0] ss:$8 sps:$4 sm:$0xff]  }
 0xb9a   : > { %9870 = vmatprep.subr.bf16.mxu0 %v12779_v14 }
 0xb9d   : > { %9871 = vmatpush1.bf16.msra.mxu0 %v12777_v12 }
 0xb9e   : > { %9872 = vmatprep.subr.bf16.mxu0 %v12782_v33 }
 0xba1   : > { %9873 = vmatpush1.bf16.msra.mxu0 %v12780_v27 }
 0xba2   : > { %9874 = vmatprep.subr.bf16.mxu0 %v12785_v60  ;;  %v12806_v60 = vld [vmem:[%s14090_s22 + $0x3c4] ss:$8 sps:$4 sm:$0xff]  }
 0xba5   : > { %9875 = vmatpush1.bf16.msra.mxu0 %v12783_v59 }
 0xba6   : > { %9876 = vmatprep.subr.bf16.mxu0 %v12788_v63 }
 0xba9   : > { %9877 = vmatpush1.bf16.msra.mxu0 %v12786_v40 }
 0xbaa   : > { %9878 = vmatprep.subr.bf16.mxu0 %v12791_v10 }
 0xbad   : > { %9879 = vmatpush1.bf16.msra.mxu0 %v12789_v3 }
 0xbae   : > { %v8602_v39 = vpop.f32.mrb[152].mxu1  ;;  %9880 = vmatprep.subr.bf16.mxu0 %v12794_v38 }
 0xbaf   : > { %v15896_v28 = vadd.f32 %v8602_v39, %v7756_v20  ;;  %v8604_v43 = vpop.f32.mrb[153].mxu1  ;;  %v12809_v39 = vld [vmem:[%s14090_s22 + $0x3d4] ss:$8 sps:$4 sm:$0xff]  }
 0xbb0   : > { %v15898_v45 = vadd.f32 %v8604_v43, %v7760_v49  ;;  %v8606_v26 = vpop.f32.mrb[154].mxu1 }
 0xbb1   : > { %v8659_v51 = vmul.f32 %v15896_v28, %v15896_v28  ;;  %v15902_v44 = vadd.f32 %v8606_v26, %v7756_v20  ;;  %v8608_v62 = vpop.f32.mrb[155].mxu1  ;;  %9881 = vmatpush1.bf16.msra.mxu0 %v12792_v52 }
 0xbb2   : > { %v8660_v15 = vmul.f32 %v15898_v45, %v15898_v45  ;;  %v15907_v2 = vadd.f32 %v8608_v62, %v7760_v49  ;;  %9882 = vmatprep.subr.bf16.mxu0 %v12797_v58 }
 0xbb3   : > { %v8691_v54 = vmul.f32 %v8659_v51, %v15896_v28  ;;  %v8667_v9 = vmul.f32 %v15902_v44, %v15902_v44 }
 0xbb4   : > { %v8692_v23 = vmul.f32 %v8660_v15, %v15898_v45  ;;  %v8668_v1 = vmul.f32 %v15907_v2, %v15907_v2  ;;  %v12807_v15 = vld [vmem:[%s14090_s22 + $0x3d0] ss:$8 sps:$4 sm:$0xff]  }
 0xbb5   : > { %v8723_v4 = vmul.f32 0.044715, %v8691_v54  ;;  %v8699_v29 = vmul.f32 %v8667_v9, %v15902_v44  ;;  %9883 = vmatpush1.bf16.msra.mxu0 %v12795_v18  ;;  %v12812_v9 = vld [vmem:[%s14090_s22 + $0x3e4] ss:$8 sps:$4 sm:$0xff]  }
 0xbb6   : > { %v8724_v46 = vmul.f32 0.044715, %v8692_v23  ;;  %v8700_v21 = vmul.f32 %v8668_v1, %v15907_v2  ;;  %v8612_v30 = vpop.f32.mrb[156].mxu1  ;;  %9884 = vmatprep.subr.bf16.mxu0 %v12800_v25 }
 0xbb7   : > { %v8755_v13 = vadd.f32 %v8723_v4, %v15896_v28  ;;  %v8731_v16 = vmul.f32 0.044715, %v8699_v29  ;;  %v15921_v5 = vadd.f32 %v8612_v30, %v7756_v20  ;;  %v8614_v19 = vpop.f32.mrb[157].mxu1  ;;  %v12810_v29 = vld [vmem:[%s14090_s22 + $0x3e0] ss:$8 sps:$4 sm:$0xff]  }
 0xbb8   : > { %v8756_v11 = vadd.f32 %v8724_v46, %v15898_v45  ;;  %v8732_v34 = vmul.f32 0.044715, %v8700_v21  ;;  %v15924_v42 = vadd.f32 %v8614_v19, %v7760_v49  ;;  %v8616_v31 = vpop.f32.mrb[158].mxu1  ;;  %v12815_v21 = vld [vmem:[%s14090_s22 + $0x3f4] ss:$8 sps:$4 sm:$0xff]   ;;  %v8635_v19 = vmul.f32 0.5, %v15902_v44 }
 0xbb9   : > { %v8787_v22 = vmul.f32 0.7978846, %v8755_v13  ;;  %v8763_v6 = vadd.f32 %v8731_v16, %v15902_v44  ;;  %v8675_v32 = vmul.f32 %v15921_v5, %v15921_v5  ;;  %v15929_v17 = vadd.f32 %v8616_v31, %v7756_v20  ;;  %v8618_v7 = vpop.f32.mrb[159].mxu1  ;;  %9885 = vmatpush1.bf16.msra.mxu0 %v12798_v50  ;;  %v12804_v20 = vld [vmem:[%s14090_s22 + $0x3c0] ss:$8 sps:$4 sm:$0xff]  }
 0xbba   : > { %v8788_v14 = vmul.f32 0.7978846, %v8756_v11  ;;  %v8764_v12 = vadd.f32 %v8732_v34, %v15907_v2  ;;  %v8676_v33 = vmul.f32 %v15924_v42, %v15924_v42  ;;  %v15935_v27 = vadd.f32 %v8618_v7, %v7760_v49  ;;  %9886 = vmatprep.subr.bf16.mxu0 %v12803_v8  ;;  %v12813_v34 = vld [vmem:[%s14090_s22 + $0x3f0] ss:$8 sps:$4 sm:$0xff]   ;;  %s9934_s22 = scalar_lea.sflag [#allocation4], %s14049_s20 }
 0xbbb   : > { %13008 = vtanh.f32 %v8787_v22  ;;  %v8795_v59 = vmul.f32 0.7978846, %v8763_v6  ;;  %v8707_v63 = vmul.f32 %v8675_v32, %v15921_v5  ;;  %v8683_v40 = vmul.f32 %v15929_v17, %v15929_v17 }
 0xbbc   : > { %13010 = vtanh.f32 %v8788_v14  ;;  %v8796_v10 = vmul.f32 0.7978846, %v8764_v12  ;;  %v8708_v57 = vmul.f32 %v8676_v33, %v15924_v42  ;;  %v8684_v61 = vmul.f32 %v15935_v27, %v15935_v27 }
 0xbbd   : > { %13012 = vtanh.f32 %v8795_v59  ;;  %v8739_v3 = vmul.f32 0.044715, %v8707_v63  ;;  %v8715_v38 = vmul.f32 %v8683_v40, %v15929_v17  ;;  %9887 = vmatpush1.bf16.msra.mxu0 %v12801_v55  ;;  %v8627_v16 = vmul.f32 0.5, %v15896_v28 }
 0xbbe   : > { %13014 = vtanh.f32 %v8796_v10  ;;  %v8740_v49 = vmul.f32 0.044715, %v8708_v57  ;;  %v8716_v52 = vmul.f32 %v8684_v61, %v15935_v27  ;;  %9888 = vmatprep.subr.bf16.mxu0 %v12806_v60  ;;  %v8628_v31 = vmul.f32 0.5, %v15898_v45 }
 0xbbf   : > { %v8771_v58 = vadd.f32 %v8739_v3, %v15921_v5  ;;  %v8747_v43 = vmul.f32 0.044715, %v8715_v38  ;;  %v8636_v22 = vmul.f32 0.5, %v15907_v2  ;;  %v8643_v45 = vmul.f32 0.5, %v15921_v5 }
 0xbc0   : > { %v8772_v26 = vadd.f32 %v8740_v49, %v15924_v42  ;;  %v8748_v51 = vmul.f32 0.044715, %v8716_v52  ;;  %v8651_v2 = vmul.f32 0.5, %v15929_v17  ;;  %v8644_v57 = vmul.f32 0.5, %v15924_v42 }
 0xbc1   : > { %v8803_v62 = vmul.f32 0.7978846, %v8771_v58  ;;  %v8779_v18 = vadd.f32 %v8747_v43, %v15929_v17  ;;  %9889 = vmatpush1.bf16.msra.mxu0 %v12804_v20  ;;  %v8652_v61 = vmul.f32 0.5, %v15935_v27 }
 0xbc2   : > { %v8804_v25 = vmul.f32 0.7978846, %v8772_v26  ;;  %v8780_v54 = vadd.f32 %v8748_v51, %v15935_v27  ;;  %9890 = vmatprep.subr.bf16.mxu0 %v12809_v39  ;;  %v9053_v27 = vld [vmem:[%s16199_s17] sm:$0x3] }
 0xbc3   : > { %13016 = vtanh.f32 %v8803_v62  ;;  %v8811_v23 = vmul.f32 0.7978846, %v8779_v18 }
 0xbc4   : > { %13018 = vtanh.f32 %v8804_v25  ;;  %v8812_v1 = vmul.f32 0.7978846, %v8780_v54  ;;  %v9062_v25 = vrot.slane %v9053_v27, %v14223_v37 }
 0xbc5   : > { %v13009_v4 = vpop.eup %13008  ;;  %13020 = vtanh.f32 %v8811_v23  ;;  %9891 = vmatpush1.bf16.msra.mxu0 %v12807_v15  ;;  %v9058_v15 = vrot.slane %v9053_v27, %v14220_v36 }
 0xbc6   : > { %v13011_v50 = vpop.eup %13010  ;;  %v8851_v46 = vadd.f32 1.0, %v13009_v4  ;;  %13022 = vtanh.f32 %v8812_v1  ;;  %9892 = vmatprep.subr.bf16.mxu0 %v12812_v9 }
 0xbc7   : > { %v13013_v30 = vpop.eup %13012  ;;  %v8852_v8 = vadd.f32 1.0, %v13011_v50 }
 0xbc8   : > { %v13015_v13 = vpop.eup %13014  ;;  %v8859_v11 = vadd.f32 1.0, %v13013_v30  ;;  %v8883_v32 = vmul.f32 %v8851_v46, %v8627_v16 }
 0xbc9   : > { %9893 = vmatpush1.bf16.msra.mxu0 %v12810_v29  ;;  %v8860_v6 = vadd.f32 1.0, %v13015_v13  ;;  %v8884_v55 = vmul.f32 %v8852_v8, %v8628_v31 }
 0xbca   : > { %v8891_v7 = vmul.f32 %v8859_v11, %v8635_v19  ;;  %9894 = vmatprep.subr.bf16.mxu0 %v12815_v21 }
 0xbcb   : > { %v8892_v14 = vmul.f32 %v8860_v6, %v8636_v22 }
 0xbcc   : > { %v8915_v12 = vpack.c.bf16 %v8891_v7, %v8883_v32 }
 0xbcd   : > { %v13017_v33 = vpop.eup %13016  ;;  %9895 = vmatpush1.bf16.msra.mxu0 %v12813_v34  ;;  %v8916_v60 = vpack.c.bf16 %v8892_v14, %v8884_v55 }
 0xbce   : > { %v13019_v28 = vpop.eup %13018  ;;  %v8867_v59 = vadd.f32 1.0, %v13017_v33 }
 0xbcf   : > { %v13021_v44 = vpop.eup %13020  ;;  %9896 = vmatprep.mubr.bf16.mxu0 %v8916_v60  ;;  %v8868_v63 = vadd.f32 1.0, %v13019_v28 }
 0xbd0   : > { %v13023_v40 = vpop.eup %13022  ;;  %9897 = vmatmul.mubr.bf16.vlgmr.msra.gmra.mrb[136].mxu0 %v8915_v12  ;;  %v8875_v10 = vadd.f32 1.0, %v13021_v44  ;;  %v8899_v38 = vmul.f32 %v8867_v59, %v8643_v45 }
 0xbd1   : > { %v8876_v3 = vadd.f32 1.0, %v13023_v40  ;;  %v8900_v49 = vmul.f32 %v8868_v63, %v8644_v57 }
 0xbd2   : > { %v8907_v20 = vmul.f32 %v8875_v10, %v8651_v2 }
 0xbd3   : > { %v8908_v52 = vmul.f32 %v8876_v3, %v8652_v61 }
 0xbd4   : > { %v8923_v39 = vpack.c.bf16 %v8907_v20, %v8899_v38 }
 0xbd5   : > { %v8924_v58 = vpack.c.bf16 %v8908_v52, %v8900_v49 }
 0xbd7   : > { %9906 = vmatprep.mubr.bf16.mxu0 %v8924_v58 }
 0xbd8   : > { %9907 = vmatmul.mubr.bf16.gmra.mrb[140].mxu0 %v8923_v39 }
 0xbee   : > { %v9739_v43 = vpop.f32.mrb[160].mxu1 }
 0xbef   : > { %v9741_v26 = vpop.f32.mrb[161].mxu1  ;;  %v9740_v54 = vadd.f32 %v9739_v43, %v9058_v15 }
 0xbf0   : > { %v9743_v5 = vpop.f32.mrb[162].mxu1  ;;  %v9742_v9 = vadd.f32 %v9741_v26, %v9062_v25 }
 0xbf1   : > { %v9745_v51 = vpop.f32.mrb[163].mxu1  ;;  %v9744_v1 = vadd.f32 %v9743_v5, %v9058_v15 }
 0xbf2   : > { %v9746_v50 = vadd.f32 %v9745_v51, %v9062_v25 }
 0xbf6   : > { %v9749_v17 = vpop.f32.mrb[164].mxu1 }
 0xbf7   : > { %v9751_v62 = vpop.f32.mrb[165].mxu1  ;;  %v9750_v11 = vadd.f32 %v9749_v17, %v9058_v15 }
 0xbf8   : > { %v9753_v18 = vpop.f32.mrb[166].mxu1  ;;  %v9752_v34 = vadd.f32 %v9751_v62, %v9062_v25 }
 0xbf9   : > { %v9755_v42 = vpop.f32.mrb[167].mxu1 }
 0xca3   : > { %v9898_v23 = vpop.f32.mrb[136].mxu0 }
 0xca4   : > { %v11934_v4 = vadd.f32 %v9898_v23, %v9740_v54  ;;  %v9900_v29 = vpop.f32.mrb[137].mxu0 }
 0xca5   : > { %v11936_v46 = vadd.f32 %v9900_v29, %v9742_v9  ;;  %v9902_v21 = vpop.f32.mrb[138].mxu0 }
 0xca6   : > { %v9917_v30 = vadd.f32 %v11934_v4, %v15370_v53  ;;  %v11938_v8 = vadd.f32 %v9902_v21, %v9744_v1  ;;  %v9904_v13 = vpop.f32.mrb[139].mxu0  ;;  %v9754_v53 = vadd.f32 %v9753_v18, %v9058_v15 }
 0xca7   : > { %v9918_v36 = vadd.f32 %v11936_v46, %v15373_v41  ;;  %v11940_v16 = vadd.f32 %v9904_v13, %v9746_v50  ;;  %v9756_v41 = vadd.f32 %v9755_v42, %v9062_v25 }
 0xca8   : > { %9925 = vst [vmem:[%s14121_s15] sm:$0xff] %v9917_v30  ;;  %v9919_v37 = vadd.f32 %v11938_v8, %v15376_v24 }
 0xca9   : > { %9926 = vst [vmem:[%s14121_s15 + $0x8] sm:$0xff] %v9918_v36  ;;  %v9920_v19 = vadd.f32 %v11940_v16, %v15378_v56 }
 0xcaa   : > { %9927 = vst [vmem:[%s14121_s15 + $0x10] sm:$0xff] %v9919_v37 }
 0xcab   : > { %9928 = vst [vmem:[%s14121_s15 + $0x18] sm:$0xff] %v9920_v19  ;;  %v9908_v31 = vpop.f32.mrb[140].mxu0 }
 0xcac   : > { %v11942_v22 = vadd.f32 %v9908_v31, %v9750_v11  ;;  %v9910_v6 = vpop.f32.mrb[141].mxu0 }
 0xcad   : > { %v11944_v32 = vadd.f32 %v9910_v6, %v9752_v34  ;;  %v9912_v7 = vpop.f32.mrb[142].mxu0 }
 0xcae   : > { %v9921_v24 = vadd.f32 %v11942_v22, %v15386_v47  ;;  %v11946_v56 = vadd.f32 %v9912_v7, %v9754_v53  ;;  %v9914_v55 = vpop.f32.mrb[143].mxu0 }
 0xcaf   : > { %v9922_v14 = vadd.f32 %v11944_v32, %v15389_v0  ;;  %v11948_v12 = vadd.f32 %v9914_v55, %v9756_v41 }
 0xcb0   : > { %9929 = vst [vmem:[%s14121_s15 + $0x20] sm:$0xff] %v9921_v24  ;;  %v9923_v33 = vadd.f32 %v11946_v56, %v15392_v48 }
 0xcb1   : > { %9930 = vst [vmem:[%s14121_s15 + $0x28] sm:$0xff] %v9922_v14  ;;  %v9924_v47 = vadd.f32 %v11948_v12, %v15394_v35 }
 0xcb2   : > { %9931 = vst [vmem:[%s14121_s15 + $0x30] sm:$0xff] %v9923_v33 }
 0xcb3   : > { %9932 = vst [vmem:[%s14121_s15 + $0x38] sm:$0xff] %v9924_v47 }
 0xcb4   : > { %13345 = shalt.err (!%p13342_p3)
}
 0xcb5   : > { %s13346_s15 = scalar_lea.hbm %s15986_s13, 1024  ;;  %s13350_s3 = scalar_lea.hbm %s16201_s28, 2048 }
 0xcb6   : > { %p13347_p6 = scmp.ne.s32.totalorder %s15986_s13, %s13346_s15  ;;  %p13351_p1 = scmp.lt.u32.totalorder %s15986_s13, %s16201_s28 }
 0xcb7   : > { %p13352_p9 = scmp.lt.u32.totalorder %s13350_s3, %s13346_s15  ;;  %p13354_p0 = scmp.lt.u32.totalorder %s13346_s15, %s15986_s13 }
 0xcb8   : > { %p13348_p11 = pnand %p13347_p6, %p16202_p8 }
 0xcb9   : > { %p13353_p4 = por %p13352_p9, %p13351_p1 }
 0xcba   : > { %p13349_p7 = pneg %p13348_p11 }
 0xcbb   : > { %p13355_p2 = por %p13354_p0, %p13353_p4 }
 0xcbd   : > { %p13356_p12 = pnand %p13355_p2, %p13349_p7 }
 0xcbf   : > { %13359 = shalt.err (!%p13356_p12)
}
 0xcc0   : > { %s13493_s0 = smov 256   ;;  %s13494_s21 = smov 16  }
 0xcc1   : > { %12057 = dma.vmem_to_hbm [thread:$0]  (%p16202_p8), %s15988_s24, 1024, %s15986_s13, %s9934_s22, %s13493_s0, %s13493_s0, %s13494_s21  }
 0xcc2 PF: > { %p12095_p10 = scmp.ge.s32.totalorder %s13474_s23, 2  ;;  %s9962_s8 = sand.u32 1, %s13446_s16  }
 0xcc3   : > { %p16203_p13 = scmp.ne.s32.totalorder %s16148_s11, 0  ;;  %s9963_s18 = scalar_lea.sflag [#allocation4], %s9962_s8 }
 0xcc5   : > { %p12091_p5 = pnand %p12095_p10, %p16203_p13 }
 0xcc7   : > { %13429 = dma.done.wait (!%p12091_p5), %s9963_s18, 1024  }
 0xcc8   : > { %13431 = vsyncadd (!%p12091_p5), %s9963_s18, 4294966272  ;;  %s45_s23 = sadd.s32 1, %s13474_s23   ;;  %s16204_s1 = sld [smem:[#allocation27_spill]] }
 0xcc9   : > { %p42_p3 = scmp.ge.s32.totalorder %s45_s23, 18   ;;  %s16205_s15 = sld [smem:[#allocation37_spill]] }
 0xcca   : > { %s16206_s16 = sld [smem:[#allocation28_spill]]  ;;  %s16207_s17 = sld [smem:[#allocation29_spill]] }
 0xccb   : > { %s16208_s18 = sld [smem:[#allocation38_spill]]  ;;  %s16209_s19 = sld [smem:[#allocation32_spill]] }
 0xccc   : > { %s16210_s20 = sld [smem:[#allocation33_spill]]  ;;  %s16211_s21 = sld [smem:[#allocation35_spill]] }
 0xccd   : > { %s16212_s22 = sld [smem:[#allocation36_spill]]  ;;  %s16213_s29 = smov %s13438_s30 }
 0xcce   : > { %s16214_s30 = smov %s16204_s1  ;;  %44 = sbr.rel (!%p42_p3) target bundleno = 35 (0x23), region = 246 }
 0xcd5   :  { %9968 = vsyncpa [#allocation3], 1 }
 0xcd6   :  { %9970 = vsyncpa [#allocation3 + $0x1], 1 }
 0xcd7   :  { %9971 = vsyncpa [#allocation6], 1 }
 0xcd8   :  { %9973 = vsyncpa [#allocation6 + $0x1], 1 }
 0xcd9   :  { %9974 = vsyncpa [#allocation9], 1 }
 0xcda   :  { %9976 = vsyncpa [#allocation9 + $0x1], 1 }
 0xcdb   :  { %9977 = vsyncpa [#allocation12], 1 }
 0xcdc   :  { %9979 = vsyncpa [#allocation12 + $0x1], 1 }
 0xcdd   :  { %9980 = vsyncpa [#allocation15], 1 }
 0xcde   :  { %9982 = vsyncpa [#allocation15 + $0x1], 1 }
 0xcdf   :  { %9983 = vsyncpa [#allocation18], 1 }
 0xce0   :  { %9985 = vsyncpa [#allocation18 + $0x1], 1 }
 0xce1   :  { %9986 = vsyncpa [#allocation4], 1 }
 0xce2   :  { %9988 = vsyncpa [#allocation4 + $0x1], 1 }

</bundles_post_ra>
